<compile_context>
chip_gen: v7x
topology: tpu7x:2x2x1
jax: 0.10.0
libtpu: 0.0.40
codegen_flags: <defaults>
</compile_context>

<pallas_src>
import numpy as np
import jax
import jax.numpy as jnp
from jax import lax
from jax.experimental import pallas as pl
from jax.experimental.pallas import tpu as pltpu

EPS = 1e-5                        # PyTorch BatchNorm2d default eps
LANE = 128                        # TPU lane width -> padded channel count
_VMEM_BUDGET = 48 * 1024 * 1024   # safe on v5e/v6e (128 MiB) and v7x (64 MiB)


# ------------------------------ small helpers -------------------------------

def _round_up(x, m):
    return (x + m - 1) // m * m


def _pad_last(a, target):
    pad = target - a.shape[-1]
    if pad == 0:
        return a
    widths = [(0, 0)] * (a.ndim - 1) + [(0, pad)]
    return jnp.pad(a, widths)


def _pad_2d(a, rows, cols):
    return jnp.pad(a, ((0, rows - a.shape[0]), (0, cols - a.shape[1])))


def _fold_bn(gamma, beta, mean, var, conv_bias=None):
    scale = gamma / jnp.sqrt(var + EPS)
    shift = beta - mean * scale
    if conv_bias is not None:
        shift = shift + conv_bias * scale
    return scale, shift


def _conv3x3_taps(w_oihw, k_pad, n_pad):
    """OIHW [Cout,Cin,3,3] -> [9, k_pad, n_pad] bf16 (tap-major: ky, kx)."""
    co, ci = w_oihw.shape[0], w_oihw.shape[1]
    w = jnp.transpose(w_oihw, (2, 3, 1, 0)).reshape(9, ci, co)   # [9, Cin, Cout]
    w = jnp.pad(w, ((0, 0), (0, k_pad - ci), (0, n_pad - co)))
    return w.astype(jnp.bfloat16)


def pack_params(p):
    """Fold BN into scale/shift, pack per-tap conv weights, pad channels to a
    lane-dense width.  Done once at parameter-load time (hoisted out of the
    per-call path per the perf review)."""
    Cout, Cin = p['W1'].shape[0], p['W1'].shape[1]
    Cp = _round_up(max(Cout, LANE), LANE)
    Cr = p['fc1'].shape[0]
    Crp = _round_up(max(Cr, LANE), LANE)
    identity = (Cin == Cout)
    kx_pad = Cp if identity else _round_up(Cin, 8)   # lhs/K width for conv1 & 1x1

    s1, sh1 = _fold_bn(p['bn1_g'], p['bn1_b'], p['bn1_m'], p['bn1_v'], p['b1'])
    s2, sh2 = _fold_bn(p['bn2_g'], p['bn2_b'], p['bn2_m'], p['bn2_v'], p['b2'])

    pk = {
        'w1':   _conv3x3_taps(p['W1'], kx_pad, Cp),
        's1':   _pad_last(s1.reshape(1, Cout), Cp),
        'b1':   _pad_last(sh1.reshape(1, Cout), Cp),
        'w2':   _conv3x3_taps(p['W2'], Cp, Cp),
        's2':   _pad_last(s2.reshape(1, Cout), Cp),
        'b2':   _pad_last(sh2.reshape(1, Cout), Cp),
        'fc1t': _pad_2d(p['fc1'].T, Cp, Crp).astype(jnp.float32),
        'fc2t': _pad_2d(p['fc2'].T, Crp, Cp).astype(jnp.float32),
    }
    if not identity:
        sc, shc = _fold_bn(p['bnc_g'], p['bnc_b'], p['bnc_m'], p['bnc_v'])
        pk['wc'] = _pad_2d(p['Wc'][:, :, 0, 0].T, kx_pad, Cp).astype(jnp.bfloat16)
        pk['sc'] = _pad_last(sc.reshape(1, Cout), Cp)
        pk['bc'] = _pad_last(shc.reshape(1, Cout), Cp)
    return pk


# --------------------------- fused forward (Pallas) --------------------------

def double_conv_forward(x_nchw, pk, *, out_ch):
    """Pallas implementation of `double_conv.forward`.  x_nchw: [B,Cin,H,W]."""
    B, Cin, H, W = x_nchw.shape
    identity = 'wc' not in pk                 # Cin == Cout -> plain skip add
    Cp = pk['w1'].shape[2]                    # lane-dense padded channel count
    Cx = pk['w1'].shape[1]                    # padded input-channel width
    Crp = pk['fc1t'].shape[1]

    Hp2, Wp2 = H + 2, W + 2
    Sp = Hp2 * Wp2                            # pixels of the zero-padded image
    Sp_c = _round_up(Sp, 16)                  # compute rows (sublane friendly)
    max_shift = Wp2 + 1                       # max |(ky-1)*Wp2 + (kx-1)|
    M_ext = _round_up(max_shift, 16)          # zero margin for shifted slices
    Sp_ext = Sp_c + 2 * M_ext
    taps = [(ky - 1) * Wp2 + (kx - 1) for ky in range(3) for kx in range(3)]
    inv_hw = 1.0 / float(H * W)

    # host: NCHW -> flattened zero-padded channel-last slab with zero margins.
    x_nhwc = jnp.transpose(x_nchw, (0, 2, 3, 1)).astype(jnp.float32)
    x_nhwc = _pad_last(x_nhwc, Cx)
    x_ext = jnp.pad(x_nhwc, ((0, 0), (1, 1), (1, 1), (0, 0))).reshape(B, Sp, Cx)
    x_ext = jnp.pad(x_ext, ((0, 0), (M_ext, Sp_ext - Sp - M_ext), (0, 0)))

    # interior mask (1 on real pixels, 0 on pad border / tail rows); numpy so
    # it is baked in as a compile-time constant.
    rows = np.arange(Sp_c)
    rr, cc = rows // Wp2, rows % Wp2
    interior = (rows < Sp) & (rr >= 1) & (rr <= H) & (cc >= 1) & (cc <= W)
    mask = jnp.asarray(interior.astype(np.float32).reshape(Sp_c, 1))

    def kernel(*refs):
        if identity:
            (x_r, m_r, w1_r, s1_r, b1_r, w2_r, s2_r, b2_r, f1_r, f2_r,
             o_r, h1_r, acc_r) = refs
            wc_r = sc_r = bc_r = None
        else:
            (x_r, m_r, w1_r, s1_r, b1_r, w2_r, s2_r, b2_r, f1_r, f2_r,
             wc_r, sc_r, bc_r, o_r, h1_r, acc_r) = refs

        mask_v = m_r[...]                                       # (Sp_c, 1) f32

        # ---- conv1: in-kernel im2col -> 9 shifted matmuls, f32 accumulate ----
        acc_r[...] = jnp.zeros_like(acc_r)
        for t, d in enumerate(taps):
            src = x_r[0, M_ext + d:M_ext + d + Sp_c, :].astype(jnp.bfloat16)
            acc_r[...] += jnp.dot(src, w1_r[t],
                                  preferred_element_type=jnp.float32)
        h1 = jnp.maximum(acc_r[...] * s1_r[...] + b1_r[...], 0.0) * mask_v

        # stage h1 (zero-extended) in VMEM; it never round-trips through HBM.
        h1_r[...] = jnp.zeros_like(h1_r)
        h1_r[M_ext:M_ext + Sp_c, :] = h1

        # ---- conv2: 9 shifted matmuls, K = Cp ----
        acc_r[...] = jnp.zeros_like(acc_r)
        for t, d in enumerate(taps):
            src = h1_r[M_ext + d:M_ext + d + Sp_c, :].astype(jnp.bfloat16)
            acc_r[...] += jnp.dot(src, w2_r[t],
                                  preferred_element_type=jnp.float32)
        h2 = jnp.maximum(acc_r[...] * s2_r[...] + b2_r[...], 0.0) * mask_v

        # ---- SE squeeze + gate (whole image is resident -> exact mean) ----
        pooled = jnp.sum(h2, axis=0, keepdims=True) * inv_hw    # (1, Cp)
        tfc = jnp.maximum(
            jnp.dot(pooled, f1_r[...], preferred_element_type=jnp.float32), 0.0)
        z = jax.nn.sigmoid(
            jnp.dot(tfc, f2_r[...], preferred_element_type=jnp.float32))

        # ---- residual (identity skip or 1x1 conv + folded BN) + excite ----
        xs = x_r[0, M_ext:M_ext + Sp_c, :]
        if identity:
            res = xs
        else:
            res = jnp.dot(xs.astype(jnp.bfloat16), wc_r[...],
                          preferred_element_type=jnp.float32)
            res = res * sc_r[...] + bc_r[...]
        o_r[0] = h2 * z + res

    const2 = lambda b: (0, 0)
    const3 = lambda b: (0, 0, 0)
    in_specs = [
        pl.BlockSpec((1, Sp_ext, Cx), lambda b: (b, 0, 0)),
        pl.BlockSpec((Sp_c, 1), const2),
        pl.BlockSpec(pk['w1'].shape, const3),
        pl.BlockSpec((1, Cp), const2),
        pl.BlockSpec((1, Cp), const2),
        pl.BlockSpec(pk['w2'].shape, const3),
        pl.BlockSpec((1, Cp), const2),
        pl.BlockSpec((1, Cp), const2),
        pl.BlockSpec((Cp, Crp), const2),
        pl.BlockSpec((Crp, Cp), const2),
    ]
    args = [x_ext, mask, pk['w1'], pk['s1'], pk['b1'],
            pk['w2'], pk['s2'], pk['b2'], pk['fc1t'], pk['fc2t']]
    if not identity:
        in_specs += [pl.BlockSpec(pk['wc'].shape, const2),
                     pl.BlockSpec((1, Cp), const2),
                     pl.BlockSpec((1, Cp), const2)]
        args += [pk['wc'], pk['sc'], pk['bc']]

    out = pl.pallas_call(
        kernel,
        out_shape=jax.ShapeDtypeStruct((B, Sp_c, Cp), jnp.float32),
        grid=(B,),
        in_specs=in_specs,
        out_specs=pl.BlockSpec((1, Sp_c, Cp), lambda b: (b, 0, 0)),
        scratch_shapes=[pltpu.VMEM((Sp_ext, Cp), jnp.float32),   # zero-ext h1
                        pltpu.VMEM((Sp_c, Cp), jnp.float32)],    # f32 accum
        compiler_params=pltpu.CompilerParams(
            dimension_semantics=("parallel",),
            vmem_limit_bytes=_VMEM_BUDGET),
    )(*args)

    out = out[:, :Sp, :].reshape(B, Hp2, Wp2, Cp)[:, 1:H + 1, 1:W + 1, :out_ch]
    return jnp.transpose(out, (0, 3, 1, 2))                     # -> NCHW


# ------------------------- pure-JAX reference (NCHW) ------------------------

def reference_forward(x, p):
    def conv3(z, Wt, b):
        y = lax.conv_general_dilated(z, Wt, (1, 1), ((1, 1), (1, 1)),
                                     dimension_numbers=('NCHW', 'OIHW', 'NCHW'))
        return y + b[None, :, None, None]

    def bn(z, g, bta, m, v):
        return ((z - m[None, :, None, None]) /
                jnp.sqrt(v[None, :, None, None] + EPS) *
                g[None, :, None, None] + bta[None, :, None, None])

    h = jax.nn.relu(bn(conv3(x, p['W1'], p['b1']),
                       p['bn1_g'], p['bn1_b'], p['bn1_m'], p['bn1_v']))
    h = jax.nn.relu(bn(conv3(h, p['W2'], p['b2']),
                       p['bn2_g'], p['bn2_b'], p['bn2_m'], p['bn2_v']))
    y = jnp.mean(h, axis=(2, 3))
    t = jax.nn.relu(y @ p['fc1'].T)
    z = jax.nn.sigmoid(t @ p['fc2'].T)
    hse = h * z[:, :, None, None]
    if x.shape[1] != hse.shape[1]:
        res = lax.conv_general_dilated(x, p['Wc'], (1, 1), ((0, 0), (0, 0)),
                                       dimension_numbers=('NCHW', 'OIHW', 'NCHW'))
        res = bn(res, p['bnc_g'], p['bnc_b'], p['bnc_m'], p['bnc_v'])
    else:
        res = x
    return hse + res


# ----------------------------------- main -----------------------------------

if __name__ == "__main__":
    key = jax.random.PRNGKey(0)
    B, Cin, H, W = 2, 4, 16, 16
    Cout = 32                     # out_ch; reduction=16 -> Cr = 2
    Cr = Cout // 16
    ks = jax.random.split(key, 20)

    f32 = jnp.float32
    p = {
        'W1':    jax.random.normal(ks[0], (Cout, Cin, 3, 3), f32) / np.sqrt(9 * Cin),
        'b1':    0.1 * jax.random.normal(ks[1], (Cout,), f32),
        'bn1_g': 1.0 + 0.1 * jax.random.normal(ks[2], (Cout,), f32),
        'bn1_b': 0.1 * jax.random.normal(ks[3], (Cout,), f32),
        'bn1_m': 0.1 * jax.random.normal(ks[4], (Cout,), f32),
        'bn1_v': 0.5 + jax.random.uniform(ks[5], (Cout,), f32),
        'W2':    jax.random.normal(ks[6], (Cout, Cout, 3, 3), f32) / np.sqrt(9 * Cout),
        'b2':    0.1 * jax.random.normal(ks[7], (Cout,), f32),
        'bn2_g': 1.0 + 0.1 * jax.random.normal(ks[8], (Cout,), f32),
        'bn2_b': 0.1 * jax.random.normal(ks[9], (Cout,), f32),
        'bn2_m': 0.1 * jax.random.normal(ks[10], (Cout,), f32),
        'bn2_v': 0.5 + jax.random.uniform(ks[11], (Cout,), f32),
        'fc1':   jax.random.normal(ks[12], (Cr, Cout), f32) / np.sqrt(Cout),
        'fc2':   jax.random.normal(ks[13], (Cout, Cr), f32) / np.sqrt(Cr),
        'Wc':    jax.random.normal(ks[14], (Cout, Cin, 1, 1), f32) / np.sqrt(Cin),
        'bnc_g': 1.0 + 0.1 * jax.random.normal(ks[15], (Cout,), f32),
        'bnc_b': 0.1 * jax.random.normal(ks[16], (Cout,), f32),
        'bnc_m': 0.1 * jax.random.normal(ks[17], (Cout,), f32),
        'bnc_v': 0.5 + jax.random.uniform(ks[18], (Cout,), f32),
    }
    x = jax.random.normal(ks[19], (B, Cin, H, W), f32)

    pk = pack_params(p)                          # one-time weight packing
    fwd = jax.jit(double_conv_forward, static_argnames=("out_ch",))
    out = jax.block_until_ready(fwd(x, pk, out_ch=Cout))

    assert out.shape == (B, Cout, H, W), out.shape

    ref = reference_forward(x, p)
    denom = jnp.maximum(jnp.abs(ref), 1.0)
    max_rel = float(jnp.max(jnp.abs(out - ref) / denom))
    # bf16 MXU inputs (f32 accumulate, f32 epilogue) -> expect O(1e-2) worst case
    if max_rel < 5e-2:
        print("KERNEL_OK")
    else:
        print(f"MISMATCH max_per_elem_rel_err={max_rel}")
</pallas_src>

<mosaic_0001>
module attributes {stable_mosaic.version = 11 : i64} {
  func.func @kernel(%arg0: i32, %arg1: memref<1x400x8xf32, #tpu.memory_space<vmem>>, %arg2: memref<336x1xf32, #tpu.memory_space<vmem>>, %arg3: memref<9x8x128xbf16, #tpu.memory_space<vmem>>, %arg4: memref<1x128xf32, #tpu.memory_space<vmem>>, %arg5: memref<1x128xf32, #tpu.memory_space<vmem>>, %arg6: memref<9x128x128xbf16, #tpu.memory_space<vmem>>, %arg7: memref<1x128xf32, #tpu.memory_space<vmem>>, %arg8: memref<1x128xf32, #tpu.memory_space<vmem>>, %arg9: memref<128x128xf32, #tpu.memory_space<vmem>>, %arg10: memref<128x128xf32, #tpu.memory_space<vmem>>, %arg11: memref<8x128xbf16, #tpu.memory_space<vmem>>, %arg12: memref<1x128xf32, #tpu.memory_space<vmem>>, %arg13: memref<1x128xf32, #tpu.memory_space<vmem>>, %arg14: memref<1x336x128xf32, #tpu.memory_space<vmem>>, %arg15: memref<400x128xf32, #tpu.memory_space<vmem>>, %arg16: memref<336x128xf32, #tpu.memory_space<vmem>>) attributes {dimension_semantics = [#tpu.dimension_semantics<parallel>], iteration_bounds = array<i64: 2>, scalar_prefetch = 0 : i64, scratch_operands = 2 : i64, tpu.core_type = #tpu.core_type<tc>, window_params = [{transform_indices = @transform_0, window_bounds = array<i64: 1, 400, 8>}, {pipeline_mode = #tpu.pipeline_mode<synchronous>, transform_indices = @transform_1, window_bounds = array<i64: 336, 1>}, {pipeline_mode = #tpu.pipeline_mode<synchronous>, transform_indices = @transform_2, window_bounds = array<i64: 9, 8, 128>}, {pipeline_mode = #tpu.pipeline_mode<synchronous>, transform_indices = @transform_3, window_bounds = array<i64: 1, 128>}, {pipeline_mode = #tpu.pipeline_mode<synchronous>, transform_indices = @transform_4, window_bounds = array<i64: 1, 128>}, {pipeline_mode = #tpu.pipeline_mode<synchronous>, transform_indices = @transform_5, window_bounds = array<i64: 9, 128, 128>}, {pipeline_mode = #tpu.pipeline_mode<synchronous>, transform_indices = @transform_6, window_bounds = array<i64: 1, 128>}, {pipeline_mode = #tpu.pipeline_mode<synchronous>, transform_indices = @transform_7, window_bounds = array<i64: 1, 128>}, {pipeline_mode = #tpu.pipeline_mode<synchronous>, transform_indices = @transform_8, window_bounds = array<i64: 128, 128>}, {pipeline_mode = #tpu.pipeline_mode<synchronous>, transform_indices = @transform_9, window_bounds = array<i64: 128, 128>}, {pipeline_mode = #tpu.pipeline_mode<synchronous>, transform_indices = @transform_10, window_bounds = array<i64: 8, 128>}, {pipeline_mode = #tpu.pipeline_mode<synchronous>, transform_indices = @transform_11, window_bounds = array<i64: 1, 128>}, {pipeline_mode = #tpu.pipeline_mode<synchronous>, transform_indices = @transform_12, window_bounds = array<i64: 1, 128>}, {transform_indices = @transform_13, window_bounds = array<i64: 1, 336, 128>}]} {
    %c0 = arith.constant 0 : index
    %c0_0 = arith.constant 0 : index
    %0 = vector.load %arg2[%c0, %c0_0] : memref<336x1xf32, #tpu.memory_space<vmem>>, vector<336x1xf32>
    %cst = arith.constant 0.000000e+00 : f32
    %1 = vector.broadcast %cst : f32 to vector<336x128xf32>
    %c0_1 = arith.constant 0 : index
    %c0_2 = arith.constant 0 : index
    %2 = vector.load %arg16[%c0_1, %c0_2] : memref<336x128xf32, #tpu.memory_space<vmem>>, vector<336x128xf32>
    tpu.vector_store %arg16[%c0_1, %c0_2], %1 {strides = array<i32>} : memref<336x128xf32, #tpu.memory_space<vmem>>, vector<336x128xf32>,
    %c0_3 = arith.constant 0 : index
    %c13 = arith.constant 13 : index
    %c0_4 = arith.constant 0 : index
    %3 = vector.load %arg1[%c0_3, %c13, %c0_4] : memref<1x400x8xf32, #tpu.memory_space<vmem>>, vector<1x336x8xf32>
    %4 = vector.shape_cast %3 : vector<1x336x8xf32> to vector<336x8xf32>
    %5 = arith.truncf %4 : vector<336x8xf32> to vector<336x8xbf16>
    %c0_5 = arith.constant 0 : index
    %c0_6 = arith.constant 0 : index
    %6 = vector.load %arg16[%c0_5, %c0_6] : memref<336x128xf32, #tpu.memory_space<vmem>>, vector<336x128xf32>
    %c0_7 = arith.constant 0 : index
    %c0_8 = arith.constant 0 : index
    %c0_9 = arith.constant 0 : index
    %7 = vector.load %arg3[%c0_7, %c0_8, %c0_9] : memref<9x8x128xbf16, #tpu.memory_space<vmem>>, vector<1x8x128xbf16>
    %8 = vector.shape_cast %7 : vector<1x8x128xbf16> to vector<8x128xbf16>
    %cst_10 = arith.constant dense<0.000000e+00> : vector<336x128xf32>
    %9 = tpu.matmul %5, %8, %cst_10 {dimension_numbers = #tpu.dot_dimension_numbers<[1], [0], [0], [1], [0, 0, 1, 1], [], []>} : vector<336x8xbf16>, vector<8x128xbf16>, vector<336x128xf32> -> vector<336x128xf32>
    %10 = arith.addf %6, %9 : vector<336x128xf32>
    %c0_11 = arith.constant 0 : index
    %c0_12 = arith.constant 0 : index
    %11 = vector.load %arg16[%c0_11, %c0_12] : memref<336x128xf32, #tpu.memory_space<vmem>>, vector<336x128xf32>
    tpu.vector_store %arg16[%c0_11, %c0_12], %10 {strides = array<i32>} : memref<336x128xf32, #tpu.memory_space<vmem>>, vector<336x128xf32>,
    %c0_13 = arith.constant 0 : index
    %c14 = arith.constant 14 : index
    %c0_14 = arith.constant 0 : index
    %12 = vector.load %arg1[%c0_13, %c14, %c0_14] : memref<1x400x8xf32, #tpu.memory_space<vmem>>, vector<1x336x8xf32>
    %13 = vector.shape_cast %12 : vector<1x336x8xf32> to vector<336x8xf32>
    %14 = arith.truncf %13 : vector<336x8xf32> to vector<336x8xbf16>
    %c0_15 = arith.constant 0 : index
    %c0_16 = arith.constant 0 : index
    %15 = vector.load %arg16[%c0_15, %c0_16] : memref<336x128xf32, #tpu.memory_space<vmem>>, vector<336x128xf32>
    %c1 = arith.constant 1 : index
    %c0_17 = arith.constant 0 : index
    %c0_18 = arith.constant 0 : index
    %16 = vector.load %arg3[%c1, %c0_17, %c0_18] : memref<9x8x128xbf16, #tpu.memory_space<vmem>>, vector<1x8x128xbf16>
    %17 = vector.shape_cast %16 : vector<1x8x128xbf16> to vector<8x128xbf16>
    %cst_19 = arith.constant dense<0.000000e+00> : vector<336x128xf32>
    %18 = tpu.matmul %14, %17, %cst_19 {dimension_numbers = #tpu.dot_dimension_numbers<[1], [0], [0], [1], [0, 0, 1, 1], [], []>} : vector<336x8xbf16>, vector<8x128xbf16>, vector<336x128xf32> -> vector<336x128xf32>
    %19 = arith.addf %15, %18 : vector<336x128xf32>
    %c0_20 = arith.constant 0 : index
    %c0_21 = arith.constant 0 : index
    %20 = vector.load %arg16[%c0_20, %c0_21] : memref<336x128xf32, #tpu.memory_space<vmem>>, vector<336x128xf32>
    tpu.vector_store %arg16[%c0_20, %c0_21], %19 {strides = array<i32>} : memref<336x128xf32, #tpu.memory_space<vmem>>, vector<336x128xf32>,
    %c0_22 = arith.constant 0 : index
    %c15 = arith.constant 15 : index
    %c0_23 = arith.constant 0 : index
    %21 = vector.load %arg1[%c0_22, %c15, %c0_23] : memref<1x400x8xf32, #tpu.memory_space<vmem>>, vector<1x336x8xf32>
    %22 = vector.shape_cast %21 : vector<1x336x8xf32> to vector<336x8xf32>
    %23 = arith.truncf %22 : vector<336x8xf32> to vector<336x8xbf16>
    %c0_24 = arith.constant 0 : index
    %c0_25 = arith.constant 0 : index
    %24 = vector.load %arg16[%c0_24, %c0_25] : memref<336x128xf32, #tpu.memory_space<vmem>>, vector<336x128xf32>
    %c2 = arith.constant 2 : index
    %c0_26 = arith.constant 0 : index
    %c0_27 = arith.constant 0 : index
    %25 = vector.load %arg3[%c2, %c0_26, %c0_27] : memref<9x8x128xbf16, #tpu.memory_space<vmem>>, vector<1x8x128xbf16>
    %26 = vector.shape_cast %25 : vector<1x8x128xbf16> to vector<8x128xbf16>
    %cst_28 = arith.constant dense<0.000000e+00> : vector<336x128xf32>
    %27 = tpu.matmul %23, %26, %cst_28 {dimension_numbers = #tpu.dot_dimension_numbers<[1], [0], [0], [1], [0, 0, 1, 1], [], []>} : vector<336x8xbf16>, vector<8x128xbf16>, vector<336x128xf32> -> vector<336x128xf32>
    %28 = arith.addf %24, %27 : vector<336x128xf32>
    %c0_29 = arith.constant 0 : index
    %c0_30 = arith.constant 0 : index
    %29 = vector.load %arg16[%c0_29, %c0_30] : memref<336x128xf32, #tpu.memory_space<vmem>>, vector<336x128xf32>
    tpu.vector_store %arg16[%c0_29, %c0_30], %28 {strides = array<i32>} : memref<336x128xf32, #tpu.memory_space<vmem>>, vector<336x128xf32>,
    %c0_31 = arith.constant 0 : index
    %c31 = arith.constant 31 : index
    %c0_32 = arith.constant 0 : index
    %30 = vector.load %arg1[%c0_31, %c31, %c0_32] : memref<1x400x8xf32, #tpu.memory_space<vmem>>, vector<1x336x8xf32>
    %31 = vector.shape_cast %30 : vector<1x336x8xf32> to vector<336x8xf32>
    %32 = arith.truncf %31 : vector<336x8xf32> to vector<336x8xbf16>
    %c0_33 = arith.constant 0 : index
    %c0_34 = arith.constant 0 : index
    %33 = vector.load %arg16[%c0_33, %c0_34] : memref<336x128xf32, #tpu.memory_space<vmem>>, vector<336x128xf32>
    %c3 = arith.constant 3 : index
    %c0_35 = arith.constant 0 : index
    %c0_36 = arith.constant 0 : index
    %34 = vector.load %arg3[%c3, %c0_35, %c0_36] : memref<9x8x128xbf16, #tpu.memory_space<vmem>>, vector<1x8x128xbf16>
    %35 = vector.shape_cast %34 : vector<1x8x128xbf16> to vector<8x128xbf16>
    %cst_37 = arith.constant dense<0.000000e+00> : vector<336x128xf32>
    %36 = tpu.matmul %32, %35, %cst_37 {dimension_numbers = #tpu.dot_dimension_numbers<[1], [0], [0], [1], [0, 0, 1, 1], [], []>} : vector<336x8xbf16>, vector<8x128xbf16>, vector<336x128xf32> -> vector<336x128xf32>
    %37 = arith.addf %33, %36 : vector<336x128xf32>
    %c0_38 = arith.constant 0 : index
    %c0_39 = arith.constant 0 : index
    %38 = vector.load %arg16[%c0_38, %c0_39] : memref<336x128xf32, #tpu.memory_space<vmem>>, vector<336x128xf32>
    tpu.vector_store %arg16[%c0_38, %c0_39], %37 {strides = array<i32>} : memref<336x128xf32, #tpu.memory_space<vmem>>, vector<336x128xf32>,
    %c0_40 = arith.constant 0 : index
    %c32 = arith.constant 32 : index
    %c0_41 = arith.constant 0 : index
    %39 = vector.load %arg1[%c0_40, %c32, %c0_41] : memref<1x400x8xf32, #tpu.memory_space<vmem>>, vector<1x336x8xf32>
    %40 = vector.shape_cast %39 : vector<1x336x8xf32> to vector<336x8xf32>
    %41 = arith.truncf %40 : vector<336x8xf32> to vector<336x8xbf16>
    %c0_42 = arith.constant 0 : index
    %c0_43 = arith.constant 0 : index
    %42 = vector.load %arg16[%c0_42, %c0_43] : memref<336x128xf32, #tpu.memory_space<vmem>>, vector<336x128xf32>
    %c4 = arith.constant 4 : index
    %c0_44 = arith.constant 0 : index
    %c0_45 = arith.constant 0 : index
    %43 = vector.load %arg3[%c4, %c0_44, %c0_45] : memref<9x8x128xbf16, #tpu.memory_space<vmem>>, vector<1x8x128xbf16>
    %44 = vector.shape_cast %43 : vector<1x8x128xbf16> to vector<8x128xbf16>
    %cst_46 = arith.constant dense<0.000000e+00> : vector<336x128xf32>
    %45 = tpu.matmul %41, %44, %cst_46 {dimension_numbers = #tpu.dot_dimension_numbers<[1], [0], [0], [1], [0, 0, 1, 1], [], []>} : vector<336x8xbf16>, vector<8x128xbf16>, vector<336x128xf32> -> vector<336x128xf32>
    %46 = arith.addf %42, %45 : vector<336x128xf32>
    %c0_47 = arith.constant 0 : index
    %c0_48 = arith.constant 0 : index
    %47 = vector.load %arg16[%c0_47, %c0_48] : memref<336x128xf32, #tpu.memory_space<vmem>>, vector<336x128xf32>
    tpu.vector_store %arg16[%c0_47, %c0_48], %46 {strides = array<i32>} : memref<336x128xf32, #tpu.memory_space<vmem>>, vector<336x128xf32>,
    %c0_49 = arith.constant 0 : index
    %c33 = arith.constant 33 : index
    %c0_50 = arith.constant 0 : index
    %48 = vector.load %arg1[%c0_49, %c33, %c0_50] : memref<1x400x8xf32, #tpu.memory_space<vmem>>, vector<1x336x8xf32>
    %49 = vector.shape_cast %48 : vector<1x336x8xf32> to vector<336x8xf32>
    %50 = arith.truncf %49 : vector<336x8xf32> to vector<336x8xbf16>
    %c0_51 = arith.constant 0 : index
    %c0_52 = arith.constant 0 : index
    %51 = vector.load %arg16[%c0_51, %c0_52] : memref<336x128xf32, #tpu.memory_space<vmem>>, vector<336x128xf32>
    %c5 = arith.constant 5 : index
    %c0_53 = arith.constant 0 : index
    %c0_54 = arith.constant 0 : index
    %52 = vector.load %arg3[%c5, %c0_53, %c0_54] : memref<9x8x128xbf16, #tpu.memory_space<vmem>>, vector<1x8x128xbf16>
    %53 = vector.shape_cast %52 : vector<1x8x128xbf16> to vector<8x128xbf16>
    %cst_55 = arith.constant dense<0.000000e+00> : vector<336x128xf32>
    %54 = tpu.matmul %50, %53, %cst_55 {dimension_numbers = #tpu.dot_dimension_numbers<[1], [0], [0], [1], [0, 0, 1, 1], [], []>} : vector<336x8xbf16>, vector<8x128xbf16>, vector<336x128xf32> -> vector<336x128xf32>
    %55 = arith.addf %51, %54 : vector<336x128xf32>
    %c0_56 = arith.constant 0 : index
    %c0_57 = arith.constant 0 : index
    %56 = vector.load %arg16[%c0_56, %c0_57] : memref<336x128xf32, #tpu.memory_space<vmem>>, vector<336x128xf32>
    tpu.vector_store %arg16[%c0_56, %c0_57], %55 {strides = array<i32>} : memref<336x128xf32, #tpu.memory_space<vmem>>, vector<336x128xf32>,
    %c0_58 = arith.constant 0 : index
    %c49 = arith.constant 49 : index
    %c0_59 = arith.constant 0 : index
    %57 = vector.load %arg1[%c0_58, %c49, %c0_59] : memref<1x400x8xf32, #tpu.memory_space<vmem>>, vector<1x336x8xf32>
    %58 = vector.shape_cast %57 : vector<1x336x8xf32> to vector<336x8xf32>
    %59 = arith.truncf %58 : vector<336x8xf32> to vector<336x8xbf16>
    %c0_60 = arith.constant 0 : index
    %c0_61 = arith.constant 0 : index
    %60 = vector.load %arg16[%c0_60, %c0_61] : memref<336x128xf32, #tpu.memory_space<vmem>>, vector<336x128xf32>
    %c6 = arith.constant 6 : index
    %c0_62 = arith.constant 0 : index
    %c0_63 = arith.constant 0 : index
    %61 = vector.load %arg3[%c6, %c0_62, %c0_63] : memref<9x8x128xbf16, #tpu.memory_space<vmem>>, vector<1x8x128xbf16>
    %62 = vector.shape_cast %61 : vector<1x8x128xbf16> to vector<8x128xbf16>
    %cst_64 = arith.constant dense<0.000000e+00> : vector<336x128xf32>
    %63 = tpu.matmul %59, %62, %cst_64 {dimension_numbers = #tpu.dot_dimension_numbers<[1], [0], [0], [1], [0, 0, 1, 1], [], []>} : vector<336x8xbf16>, vector<8x128xbf16>, vector<336x128xf32> -> vector<336x128xf32>
    %64 = arith.addf %60, %63 : vector<336x128xf32>
    %c0_65 = arith.constant 0 : index
    %c0_66 = arith.constant 0 : index
    %65 = vector.load %arg16[%c0_65, %c0_66] : memref<336x128xf32, #tpu.memory_space<vmem>>, vector<336x128xf32>
    tpu.vector_store %arg16[%c0_65, %c0_66], %64 {strides = array<i32>} : memref<336x128xf32, #tpu.memory_space<vmem>>, vector<336x128xf32>,
    %c0_67 = arith.constant 0 : index
    %c50 = arith.constant 50 : index
    %c0_68 = arith.constant 0 : index
    %66 = vector.load %arg1[%c0_67, %c50, %c0_68] : memref<1x400x8xf32, #tpu.memory_space<vmem>>, vector<1x336x8xf32>
    %67 = vector.shape_cast %66 : vector<1x336x8xf32> to vector<336x8xf32>
    %68 = arith.truncf %67 : vector<336x8xf32> to vector<336x8xbf16>
    %c0_69 = arith.constant 0 : index
    %c0_70 = arith.constant 0 : index
    %69 = vector.load %arg16[%c0_69, %c0_70] : memref<336x128xf32, #tpu.memory_space<vmem>>, vector<336x128xf32>
    %c7 = arith.constant 7 : index
    %c0_71 = arith.constant 0 : index
    %c0_72 = arith.constant 0 : index
    %70 = vector.load %arg3[%c7, %c0_71, %c0_72] : memref<9x8x128xbf16, #tpu.memory_space<vmem>>, vector<1x8x128xbf16>
    %71 = vector.shape_cast %70 : vector<1x8x128xbf16> to vector<8x128xbf16>
    %cst_73 = arith.constant dense<0.000000e+00> : vector<336x128xf32>
    %72 = tpu.matmul %68, %71, %cst_73 {dimension_numbers = #tpu.dot_dimension_numbers<[1], [0], [0], [1], [0, 0, 1, 1], [], []>} : vector<336x8xbf16>, vector<8x128xbf16>, vector<336x128xf32> -> vector<336x128xf32>
    %73 = arith.addf %69, %72 : vector<336x128xf32>
    %c0_74 = arith.constant 0 : index
    %c0_75 = arith.constant 0 : index
    %74 = vector.load %arg16[%c0_74, %c0_75] : memref<336x128xf32, #tpu.memory_space<vmem>>, vector<336x128xf32>
    tpu.vector_store %arg16[%c0_74, %c0_75], %73 {strides = array<i32>} : memref<336x128xf32, #tpu.memory_space<vmem>>, vector<336x128xf32>,
    %c0_76 = arith.constant 0 : index
    %c51 = arith.constant 51 : index
    %c0_77 = arith.constant 0 : index
    %75 = vector.load %arg1[%c0_76, %c51, %c0_77] : memref<1x400x8xf32, #tpu.memory_space<vmem>>, vector<1x336x8xf32>
    %76 = vector.shape_cast %75 : vector<1x336x8xf32> to vector<336x8xf32>
    %77 = arith.truncf %76 : vector<336x8xf32> to vector<336x8xbf16>
    %c0_78 = arith.constant 0 : index
    %c0_79 = arith.constant 0 : index
    %78 = vector.load %arg16[%c0_78, %c0_79] : memref<336x128xf32, #tpu.memory_space<vmem>>, vector<336x128xf32>
    %c8 = arith.constant 8 : index
    %c0_80 = arith.constant 0 : index
    %c0_81 = arith.constant 0 : index
    %79 = vector.load %arg3[%c8, %c0_80, %c0_81] : memref<9x8x128xbf16, #tpu.memory_space<vmem>>, vector<1x8x128xbf16>
    %80 = vector.shape_cast %79 : vector<1x8x128xbf16> to vector<8x128xbf16>
    %cst_82 = arith.constant dense<0.000000e+00> : vector<336x128xf32>
    %81 = tpu.matmul %77, %80, %cst_82 {dimension_numbers = #tpu.dot_dimension_numbers<[1], [0], [0], [1], [0, 0, 1, 1], [], []>} : vector<336x8xbf16>, vector<8x128xbf16>, vector<336x128xf32> -> vector<336x128xf32>
    %82 = arith.addf %78, %81 : vector<336x128xf32>
    %c0_83 = arith.constant 0 : index
    %c0_84 = arith.constant 0 : index
    %83 = vector.load %arg16[%c0_83, %c0_84] : memref<336x128xf32, #tpu.memory_space<vmem>>, vector<336x128xf32>
    tpu.vector_store %arg16[%c0_83, %c0_84], %82 {strides = array<i32>} : memref<336x128xf32, #tpu.memory_space<vmem>>, vector<336x128xf32>,
    %c0_85 = arith.constant 0 : index
    %c0_86 = arith.constant 0 : index
    %84 = vector.load %arg16[%c0_85, %c0_86] : memref<336x128xf32, #tpu.memory_space<vmem>>, vector<336x128xf32>
    %c0_87 = arith.constant 0 : index
    %c0_88 = arith.constant 0 : index
    %85 = vector.load %arg4[%c0_87, %c0_88] : memref<1x128xf32, #tpu.memory_space<vmem>>, vector<1x128xf32>
    %86 = vector.broadcast %85 : vector<1x128xf32> to vector<336x128xf32>
    %87 = arith.mulf %84, %86 : vector<336x128xf32>
    %c0_89 = arith.constant 0 : index
    %c0_90 = arith.constant 0 : index
    %88 = vector.load %arg5[%c0_89, %c0_90] : memref<1x128xf32, #tpu.memory_space<vmem>>, vector<1x128xf32>
    %89 = vector.broadcast %88 : vector<1x128xf32> to vector<336x128xf32>
    %90 = arith.addf %87, %89 : vector<336x128xf32>
    %cst_91 = arith.constant 0.000000e+00 : f32
    %91 = vector.broadcast %cst_91 : f32 to vector<336x128xf32>
    %92 = arith.maximumf %90, %91 : vector<336x128xf32>
    %93 = vector.broadcast %0 : vector<336x1xf32> to vector<336x128xf32>
    %94 = arith.mulf %92, %93 : vector<336x128xf32>
    %cst_92 = arith.constant 0.000000e+00 : f32
    %95 = vector.broadcast %cst_92 : f32 to vector<400x128xf32>
    %c0_93 = arith.constant 0 : index
    %c0_94 = arith.constant 0 : index
    %96 = vector.load %arg15[%c0_93, %c0_94] : memref<400x128xf32, #tpu.memory_space<vmem>>, vector<400x128xf32>
    tpu.vector_store %arg15[%c0_93, %c0_94], %95 {strides = array<i32>} : memref<400x128xf32, #tpu.memory_space<vmem>>, vector<400x128xf32>,
    %c32_95 = arith.constant 32 : index
    %c0_96 = arith.constant 0 : index
    %97 = vector.load %arg15[%c32_95, %c0_96] : memref<400x128xf32, #tpu.memory_space<vmem>>, vector<336x128xf32>
    tpu.vector_store %arg15[%c32_95, %c0_96], %94 {strides = array<i32>} : memref<400x128xf32, #tpu.memory_space<vmem>>, vector<336x128xf32>,
    %cst_97 = arith.constant 0.000000e+00 : f32
    %98 = vector.broadcast %cst_97 : f32 to vector<336x128xf32>
    %c0_98 = arith.constant 0 : index
    %c0_99 = arith.constant 0 : index
    %99 = vector.load %arg16[%c0_98, %c0_99] : memref<336x128xf32, #tpu.memory_space<vmem>>, vector<336x128xf32>
    tpu.vector_store %arg16[%c0_98, %c0_99], %98 {strides = array<i32>} : memref<336x128xf32, #tpu.memory_space<vmem>>, vector<336x128xf32>,
    %c13_100 = arith.constant 13 : index
    %c0_101 = arith.constant 0 : index
    %100 = vector.load %arg15[%c13_100, %c0_101] : memref<400x128xf32, #tpu.memory_space<vmem>>, vector<336x128xf32>
    %101 = arith.truncf %100 : vector<336x128xf32> to vector<336x128xbf16>
    %c0_102 = arith.constant 0 : index
    %c0_103 = arith.constant 0 : index
    %102 = vector.load %arg16[%c0_102, %c0_103] : memref<336x128xf32, #tpu.memory_space<vmem>>, vector<336x128xf32>
    %c0_104 = arith.constant 0 : index
    %c0_105 = arith.constant 0 : index
    %c0_106 = arith.constant 0 : index
    %103 = vector.load %arg6[%c0_104, %c0_105, %c0_106] : memref<9x128x128xbf16, #tpu.memory_space<vmem>>, vector<1x128x128xbf16>
    %104 = vector.shape_cast %103 : vector<1x128x128xbf16> to vector<128x128xbf16>
    %cst_107 = arith.constant dense<0.000000e+00> : vector<336x128xf32>
    %105 = tpu.matmul %101, %104, %cst_107 {dimension_numbers = #tpu.dot_dimension_numbers<[1], [0], [0], [1], [0, 0, 1, 1], [], []>} : vector<336x128xbf16>, vector<128x128xbf16>, vector<336x128xf32> -> vector<336x128xf32>
    %106 = arith.addf %102, %105 : vector<336x128xf32>
    %c0_108 = arith.constant 0 : index
    %c0_109 = arith.constant 0 : index
    %107 = vector.load %arg16[%c0_108, %c0_109] : memref<336x128xf32, #tpu.memory_space<vmem>>, vector<336x128xf32>
    tpu.vector_store %arg16[%c0_108, %c0_109], %106 {strides = array<i32>} : memref<336x128xf32, #tpu.memory_space<vmem>>, vector<336x128xf32>,
    %c14_110 = arith.constant 14 : index
    %c0_111 = arith.constant 0 : index
    %108 = vector.load %arg15[%c14_110, %c0_111] : memref<400x128xf32, #tpu.memory_space<vmem>>, vector<336x128xf32>
    %109 = arith.truncf %108 : vector<336x128xf32> to vector<336x128xbf16>
    %c0_112 = arith.constant 0 : index
    %c0_113 = arith.constant 0 : index
    %110 = vector.load %arg16[%c0_112, %c0_113] : memref<336x128xf32, #tpu.memory_space<vmem>>, vector<336x128xf32>
    %c1_114 = arith.constant 1 : index
    %c0_115 = arith.constant 0 : index
    %c0_116 = arith.constant 0 : index
    %111 = vector.load %arg6[%c1_114, %c0_115, %c0_116] : memref<9x128x128xbf16, #tpu.memory_space<vmem>>, vector<1x128x128xbf16>
    %112 = vector.shape_cast %111 : vector<1x128x128xbf16> to vector<128x128xbf16>
    %cst_117 = arith.constant dense<0.000000e+00> : vector<336x128xf32>
    %113 = tpu.matmul %109, %112, %cst_117 {dimension_numbers = #tpu.dot_dimension_numbers<[1], [0], [0], [1], [0, 0, 1, 1], [], []>} : vector<336x128xbf16>, vector<128x128xbf16>, vector<336x128xf32> -> vector<336x128xf32>
    %114 = arith.addf %110, %113 : vector<336x128xf32>
    %c0_118 = arith.constant 0 : index
    %c0_119 = arith.constant 0 : index
    %115 = vector.load %arg16[%c0_118, %c0_119] : memref<336x128xf32, #tpu.memory_space<vmem>>, vector<336x128xf32>
    tpu.vector_store %arg16[%c0_118, %c0_119], %114 {strides = array<i32>} : memref<336x128xf32, #tpu.memory_space<vmem>>, vector<336x128xf32>,
    %c15_120 = arith.constant 15 : index
    %c0_121 = arith.constant 0 : index
    %116 = vector.load %arg15[%c15_120, %c0_121] : memref<400x128xf32, #tpu.memory_space<vmem>>, vector<336x128xf32>
    %117 = arith.truncf %116 : vector<336x128xf32> to vector<336x128xbf16>
    %c0_122 = arith.constant 0 : index
    %c0_123 = arith.constant 0 : index
    %118 = vector.load %arg16[%c0_122, %c0_123] : memref<336x128xf32, #tpu.memory_space<vmem>>, vector<336x128xf32>
    %c2_124 = arith.constant 2 : index
    %c0_125 = arith.constant 0 : index
    %c0_126 = arith.constant 0 : index
    %119 = vector.load %arg6[%c2_124, %c0_125, %c0_126] : memref<9x128x128xbf16, #tpu.memory_space<vmem>>, vector<1x128x128xbf16>
    %120 = vector.shape_cast %119 : vector<1x128x128xbf16> to vector<128x128xbf16>
    %cst_127 = arith.constant dense<0.000000e+00> : vector<336x128xf32>
    %121 = tpu.matmul %117, %120, %cst_127 {dimension_numbers = #tpu.dot_dimension_numbers<[1], [0], [0], [1], [0, 0, 1, 1], [], []>} : vector<336x128xbf16>, vector<128x128xbf16>, vector<336x128xf32> -> vector<336x128xf32>
    %122 = arith.addf %118, %121 : vector<336x128xf32>
    %c0_128 = arith.constant 0 : index
    %c0_129 = arith.constant 0 : index
    %123 = vector.load %arg16[%c0_128, %c0_129] : memref<336x128xf32, #tpu.memory_space<vmem>>, vector<336x128xf32>
    tpu.vector_store %arg16[%c0_128, %c0_129], %122 {strides = array<i32>} : memref<336x128xf32, #tpu.memory_space<vmem>>, vector<336x128xf32>,
    %c31_130 = arith.constant 31 : index
    %c0_131 = arith.constant 0 : index
    %124 = vector.load %arg15[%c31_130, %c0_131] : memref<400x128xf32, #tpu.memory_space<vmem>>, vector<336x128xf32>
    %125 = arith.truncf %124 : vector<336x128xf32> to vector<336x128xbf16>
    %c0_132 = arith.constant 0 : index
    %c0_133 = arith.constant 0 : index
    %126 = vector.load %arg16[%c0_132, %c0_133] : memref<336x128xf32, #tpu.memory_space<vmem>>, vector<336x128xf32>
    %c3_134 = arith.constant 3 : index
    %c0_135 = arith.constant 0 : index
    %c0_136 = arith.constant 0 : index
    %127 = vector.load %arg6[%c3_134, %c0_135, %c0_136] : memref<9x128x128xbf16, #tpu.memory_space<vmem>>, vector<1x128x128xbf16>
    %128 = vector.shape_cast %127 : vector<1x128x128xbf16> to vector<128x128xbf16>
    %cst_137 = arith.constant dense<0.000000e+00> : vector<336x128xf32>
    %129 = tpu.matmul %125, %128, %cst_137 {dimension_numbers = #tpu.dot_dimension_numbers<[1], [0], [0], [1], [0, 0, 1, 1], [], []>} : vector<336x128xbf16>, vector<128x128xbf16>, vector<336x128xf32> -> vector<336x128xf32>
    %130 = arith.addf %126, %129 : vector<336x128xf32>
    %c0_138 = arith.constant 0 : index
    %c0_139 = arith.constant 0 : index
    %131 = vector.load %arg16[%c0_138, %c0_139] : memref<336x128xf32, #tpu.memory_space<vmem>>, vector<336x128xf32>
    tpu.vector_store %arg16[%c0_138, %c0_139], %130 {strides = array<i32>} : memref<336x128xf32, #tpu.memory_space<vmem>>, vector<336x128xf32>,
    %c32_140 = arith.constant 32 : index
    %c0_141 = arith.constant 0 : index
    %132 = vector.load %arg15[%c32_140, %c0_141] : memref<400x128xf32, #tpu.memory_space<vmem>>, vector<336x128xf32>
    %133 = arith.truncf %132 : vector<336x128xf32> to vector<336x128xbf16>
    %c0_142 = arith.constant 0 : index
    %c0_143 = arith.constant 0 : index
    %134 = vector.load %arg16[%c0_142, %c0_143] : memref<336x128xf32, #tpu.memory_space<vmem>>, vector<336x128xf32>
    %c4_144 = arith.constant 4 : index
    %c0_145 = arith.constant 0 : index
    %c0_146 = arith.constant 0 : index
    %135 = vector.load %arg6[%c4_144, %c0_145, %c0_146] : memref<9x128x128xbf16, #tpu.memory_space<vmem>>, vector<1x128x128xbf16>
    %136 = vector.shape_cast %135 : vector<1x128x128xbf16> to vector<128x128xbf16>
    %cst_147 = arith.constant dense<0.000000e+00> : vector<336x128xf32>
    %137 = tpu.matmul %133, %136, %cst_147 {dimension_numbers = #tpu.dot_dimension_numbers<[1], [0], [0], [1], [0, 0, 1, 1], [], []>} : vector<336x128xbf16>, vector<128x128xbf16>, vector<336x128xf32> -> vector<336x128xf32>
    %138 = arith.addf %134, %137 : vector<336x128xf32>
    %c0_148 = arith.constant 0 : index
    %c0_149 = arith.constant 0 : index
    %139 = vector.load %arg16[%c0_148, %c0_149] : memref<336x128xf32, #tpu.memory_space<vmem>>, vector<336x128xf32>
    tpu.vector_store %arg16[%c0_148, %c0_149], %138 {strides = array<i32>} : memref<336x128xf32, #tpu.memory_space<vmem>>, vector<336x128xf32>,
    %c33_150 = arith.constant 33 : index
    %c0_151 = arith.constant 0 : index
    %140 = vector.load %arg15[%c33_150, %c0_151] : memref<400x128xf32, #tpu.memory_space<vmem>>, vector<336x128xf32>
    %141 = arith.truncf %140 : vector<336x128xf32> to vector<336x128xbf16>
    %c0_152 = arith.constant 0 : index
    %c0_153 = arith.constant 0 : index
    %142 = vector.load %arg16[%c0_152, %c0_153] : memref<336x128xf32, #tpu.memory_space<vmem>>, vector<336x128xf32>
    %c5_154 = arith.constant 5 : index
    %c0_155 = arith.constant 0 : index
    %c0_156 = arith.constant 0 : index
    %143 = vector.load %arg6[%c5_154, %c0_155, %c0_156] : memref<9x128x128xbf16, #tpu.memory_space<vmem>>, vector<1x128x128xbf16>
    %144 = vector.shape_cast %143 : vector<1x128x128xbf16> to vector<128x128xbf16>
    %cst_157 = arith.constant dense<0.000000e+00> : vector<336x128xf32>
    %145 = tpu.matmul %141, %144, %cst_157 {dimension_numbers = #tpu.dot_dimension_numbers<[1], [0], [0], [1], [0, 0, 1, 1], [], []>} : vector<336x128xbf16>, vector<128x128xbf16>, vector<336x128xf32> -> vector<336x128xf32>
    %146 = arith.addf %142, %145 : vector<336x128xf32>
    %c0_158 = arith.constant 0 : index
    %c0_159 = arith.constant 0 : index
    %147 = vector.load %arg16[%c0_158, %c0_159] : memref<336x128xf32, #tpu.memory_space<vmem>>, vector<336x128xf32>
    tpu.vector_store %arg16[%c0_158, %c0_159], %146 {strides = array<i32>} : memref<336x128xf32, #tpu.memory_space<vmem>>, vector<336x128xf32>,
    %c49_160 = arith.constant 49 : index
    %c0_161 = arith.constant 0 : index
    %148 = vector.load %arg15[%c49_160, %c0_161] : memref<400x128xf32, #tpu.memory_space<vmem>>, vector<336x128xf32>
    %149 = arith.truncf %148 : vector<336x128xf32> to vector<336x128xbf16>
    %c0_162 = arith.constant 0 : index
    %c0_163 = arith.constant 0 : index
    %150 = vector.load %arg16[%c0_162, %c0_163] : memref<336x128xf32, #tpu.memory_space<vmem>>, vector<336x128xf32>
    %c6_164 = arith.constant 6 : index
    %c0_165 = arith.constant 0 : index
    %c0_166 = arith.constant 0 : index
    %151 = vector.load %arg6[%c6_164, %c0_165, %c0_166] : memref<9x128x128xbf16, #tpu.memory_space<vmem>>, vector<1x128x128xbf16>
    %152 = vector.shape_cast %151 : vector<1x128x128xbf16> to vector<128x128xbf16>
    %cst_167 = arith.constant dense<0.000000e+00> : vector<336x128xf32>
    %153 = tpu.matmul %149, %152, %cst_167 {dimension_numbers = #tpu.dot_dimension_numbers<[1], [0], [0], [1], [0, 0, 1, 1], [], []>} : vector<336x128xbf16>, vector<128x128xbf16>, vector<336x128xf32> -> vector<336x128xf32>
    %154 = arith.addf %150, %153 : vector<336x128xf32>
    %c0_168 = arith.constant 0 : index
    %c0_169 = arith.constant 0 : index
    %155 = vector.load %arg16[%c0_168, %c0_169] : memref<336x128xf32, #tpu.memory_space<vmem>>, vector<336x128xf32>
    tpu.vector_store %arg16[%c0_168, %c0_169], %154 {strides = array<i32>} : memref<336x128xf32, #tpu.memory_space<vmem>>, vector<336x128xf32>,
    %c50_170 = arith.constant 50 : index
    %c0_171 = arith.constant 0 : index
    %156 = vector.load %arg15[%c50_170, %c0_171] : memref<400x128xf32, #tpu.memory_space<vmem>>, vector<336x128xf32>
    %157 = arith.truncf %156 : vector<336x128xf32> to vector<336x128xbf16>
    %c0_172 = arith.constant 0 : index
    %c0_173 = arith.constant 0 : index
    %158 = vector.load %arg16[%c0_172, %c0_173] : memref<336x128xf32, #tpu.memory_space<vmem>>, vector<336x128xf32>
    %c7_174 = arith.constant 7 : index
    %c0_175 = arith.constant 0 : index
    %c0_176 = arith.constant 0 : index
    %159 = vector.load %arg6[%c7_174, %c0_175, %c0_176] : memref<9x128x128xbf16, #tpu.memory_space<vmem>>, vector<1x128x128xbf16>
    %160 = vector.shape_cast %159 : vector<1x128x128xbf16> to vector<128x128xbf16>
    %cst_177 = arith.constant dense<0.000000e+00> : vector<336x128xf32>
    %161 = tpu.matmul %157, %160, %cst_177 {dimension_numbers = #tpu.dot_dimension_numbers<[1], [0], [0], [1], [0, 0, 1, 1], [], []>} : vector<336x128xbf16>, vector<128x128xbf16>, vector<336x128xf32> -> vector<336x128xf32>
    %162 = arith.addf %158, %161 : vector<336x128xf32>
    %c0_178 = arith.constant 0 : index
    %c0_179 = arith.constant 0 : index
    %163 = vector.load %arg16[%c0_178, %c0_179] : memref<336x128xf32, #tpu.memory_space<vmem>>, vector<336x128xf32>
    tpu.vector_store %arg16[%c0_178, %c0_179], %162 {strides = array<i32>} : memref<336x128xf32, #tpu.memory_space<vmem>>, vector<336x128xf32>,
    %c51_180 = arith.constant 51 : index
    %c0_181 = arith.constant 0 : index
    %164 = vector.load %arg15[%c51_180, %c0_181] : memref<400x128xf32, #tpu.memory_space<vmem>>, vector<336x128xf32>
    %165 = arith.truncf %164 : vector<336x128xf32> to vector<336x128xbf16>
    %c0_182 = arith.constant 0 : index
    %c0_183 = arith.constant 0 : index
    %166 = vector.load %arg16[%c0_182, %c0_183] : memref<336x128xf32, #tpu.memory_space<vmem>>, vector<336x128xf32>
    %c8_184 = arith.constant 8 : index
    %c0_185 = arith.constant 0 : index
    %c0_186 = arith.constant 0 : index
    %167 = vector.load %arg6[%c8_184, %c0_185, %c0_186] : memref<9x128x128xbf16, #tpu.memory_space<vmem>>, vector<1x128x128xbf16>
    %168 = vector.shape_cast %167 : vector<1x128x128xbf16> to vector<128x128xbf16>
    %cst_187 = arith.constant dense<0.000000e+00> : vector<336x128xf32>
    %169 = tpu.matmul %165, %168, %cst_187 {dimension_numbers = #tpu.dot_dimension_numbers<[1], [0], [0], [1], [0, 0, 1, 1], [], []>} : vector<336x128xbf16>, vector<128x128xbf16>, vector<336x128xf32> -> vector<336x128xf32>
    %170 = arith.addf %166, %169 : vector<336x128xf32>
    %c0_188 = arith.constant 0 : index
    %c0_189 = arith.constant 0 : index
    %171 = vector.load %arg16[%c0_188, %c0_189] : memref<336x128xf32, #tpu.memory_space<vmem>>, vector<336x128xf32>
    tpu.vector_store %arg16[%c0_188, %c0_189], %170 {strides = array<i32>} : memref<336x128xf32, #tpu.memory_space<vmem>>, vector<336x128xf32>,
    %c0_190 = arith.constant 0 : index
    %c0_191 = arith.constant 0 : index
    %172 = vector.load %arg16[%c0_190, %c0_191] : memref<336x128xf32, #tpu.memory_space<vmem>>, vector<336x128xf32>
    %c0_192 = arith.constant 0 : index
    %c0_193 = arith.constant 0 : index
    %173 = vector.load %arg7[%c0_192, %c0_193] : memref<1x128xf32, #tpu.memory_space<vmem>>, vector<1x128xf32>
    %174 = vector.broadcast %173 : vector<1x128xf32> to vector<336x128xf32>
    %175 = arith.mulf %172, %174 : vector<336x128xf32>
    %c0_194 = arith.constant 0 : index
    %c0_195 = arith.constant 0 : index
    %176 = vector.load %arg8[%c0_194, %c0_195] : memref<1x128xf32, #tpu.memory_space<vmem>>, vector<1x128xf32>
    %177 = vector.broadcast %176 : vector<1x128xf32> to vector<336x128xf32>
    %178 = arith.addf %175, %177 : vector<336x128xf32>
    %cst_196 = arith.constant 0.000000e+00 : f32
    %179 = vector.broadcast %cst_196 : f32 to vector<336x128xf32>
    %180 = arith.maximumf %178, %179 : vector<336x128xf32>
    %181 = vector.broadcast %0 : vector<336x1xf32> to vector<336x128xf32>
    %182 = arith.mulf %180, %181 : vector<336x128xf32>
    %cst_197 = arith.constant dense<0.000000e+00> : vector<128xf32>
    %183 = vector.multi_reduction <add>, %182, %cst_197 [0] : vector<336x128xf32> to vector<128xf32>
    %184 = vector.shape_cast %183 : vector<128xf32> to vector<1x128xf32>
    %cst_198 = arith.constant 3.906250e-03 : f32
    %185 = vector.broadcast %cst_198 : f32 to vector<1x128xf32>
    %186 = arith.mulf %184, %185 : vector<1x128xf32>
    %c0_199 = arith.constant 0 : index
    %c0_200 = arith.constant 0 : index
    %187 = vector.load %arg9[%c0_199, %c0_200] : memref<128x128xf32, #tpu.memory_space<vmem>>, vector<128x128xf32>
    %cst_201 = arith.constant dense<0.000000e+00> : vector<1x128xf32>
    %188 = tpu.matmul %186, %187, %cst_201 {dimension_numbers = #tpu.dot_dimension_numbers<[1], [0], [0], [1], [0, 0, 1, 1], [], []>} : vector<1x128xf32>, vector<128x128xf32>, vector<1x128xf32> -> vector<1x128xf32>
    %cst_202 = arith.constant 0.000000e+00 : f32
    %189 = vector.broadcast %cst_202 : f32 to vector<1x128xf32>
    %190 = arith.maximumf %188, %189 : vector<1x128xf32>
    %c0_203 = arith.constant 0 : index
    %c0_204 = arith.constant 0 : index
    %191 = vector.load %arg10[%c0_203, %c0_204] : memref<128x128xf32, #tpu.memory_space<vmem>>, vector<128x128xf32>
    %cst_205 = arith.constant dense<0.000000e+00> : vector<1x128xf32>
    %192 = tpu.matmul %190, %191, %cst_205 {dimension_numbers = #tpu.dot_dimension_numbers<[1], [0], [0], [1], [0, 0, 1, 1], [], []>} : vector<1x128xf32>, vector<128x128xf32>, vector<1x128xf32> -> vector<1x128xf32>
    %193 = arith.negf %192 : vector<1x128xf32>
    %194 = math.exp %193 : vector<1x128xf32>
    %cst_206 = arith.constant 1.000000e+00 : f32
    %195 = vector.broadcast %cst_206 : f32 to vector<1x128xf32>
    %196 = arith.addf %195, %194 : vector<1x128xf32>
    %197 = arith.divf %195, %196 : vector<1x128xf32>
    %c0_207 = arith.constant 0 : index
    %c32_208 = arith.constant 32 : index
    %c0_209 = arith.constant 0 : index
    %198 = vector.load %arg1[%c0_207, %c32_208, %c0_209] : memref<1x400x8xf32, #tpu.memory_space<vmem>>, vector<1x336x8xf32>
    %199 = vector.shape_cast %198 : vector<1x336x8xf32> to vector<336x8xf32>
    %200 = arith.truncf %199 : vector<336x8xf32> to vector<336x8xbf16>
    %c0_210 = arith.constant 0 : index
    %c0_211 = arith.constant 0 : index
    %201 = vector.load %arg11[%c0_210, %c0_211] : memref<8x128xbf16, #tpu.memory_space<vmem>>, vector<8x128xbf16>
    %cst_212 = arith.constant dense<0.000000e+00> : vector<336x128xf32>
    %202 = tpu.matmul %200, %201, %cst_212 {dimension_numbers = #tpu.dot_dimension_numbers<[1], [0], [0], [1], [0, 0, 1, 1], [], []>} : vector<336x8xbf16>, vector<8x128xbf16>, vector<336x128xf32> -> vector<336x128xf32>
    %c0_213 = arith.constant 0 : index
    %c0_214 = arith.constant 0 : index
    %203 = vector.load %arg12[%c0_213, %c0_214] : memref<1x128xf32, #tpu.memory_space<vmem>>, vector<1x128xf32>
    %204 = vector.broadcast %203 : vector<1x128xf32> to vector<336x128xf32>
    %205 = arith.mulf %202, %204 : vector<336x128xf32>
    %c0_215 = arith.constant 0 : index
    %c0_216 = arith.constant 0 : index
    %206 = vector.load %arg13[%c0_215, %c0_216] : memref<1x128xf32, #tpu.memory_space<vmem>>, vector<1x128xf32>
    %207 = vector.broadcast %206 : vector<1x128xf32> to vector<336x128xf32>
    %208 = arith.addf %205, %207 : vector<336x128xf32>
    %209 = vector.broadcast %197 : vector<1x128xf32> to vector<336x128xf32>
    %210 = arith.mulf %182, %209 : vector<336x128xf32>
    %211 = arith.addf %210, %208 : vector<336x128xf32>
    %c0_217 = arith.constant 0 : index
    %c0_218 = arith.constant 0 : index
    %c0_219 = arith.constant 0 : index
    %212 = vector.load %arg14[%c0_217, %c0_218, %c0_219] : memref<1x336x128xf32, #tpu.memory_space<vmem>>, vector<1x336x128xf32>
    %213 = vector.shape_cast %212 : vector<1x336x128xf32> to vector<336x128xf32>
    %214 = vector.shape_cast %211 : vector<336x128xf32> to vector<1x336x128xf32>
    tpu.vector_store %arg14[%c0_217, %c0_218, %c0_219], %214 {strides = array<i32>} : memref<1x336x128xf32, #tpu.memory_space<vmem>>, vector<1x336x128xf32>,
    return
  }
  func.func @transform_0(%arg0: i32) -> (i32, i32, i32) {
    %c0_i32 = arith.constant 0 : i32
    %c0_i32_0 = arith.constant 0 : i32
    %c0_i32_1 = arith.constant 0 : i32
    return %arg0, %c0_i32, %c0_i32_0 : i32, i32, i32
  }
  func.func @transform_1(%arg0: i32) -> (i32, i32) {
    %c0_i32 = arith.constant 0 : i32
    %c0_i32_0 = arith.constant 0 : i32
    %c0_i32_1 = arith.constant 0 : i32
    return %c0_i32, %c0_i32_0 : i32, i32
  }
  func.func @transform_2(%arg0: i32) -> (i32, i32, i32) {
    %c0_i32 = arith.constant 0 : i32
    %c0_i32_0 = arith.constant 0 : i32
    %c0_i32_1 = arith.constant 0 : i32
    %c0_i32_2 = arith.constant 0 : i32
    return %c0_i32, %c0_i32_0, %c0_i32_1 : i32, i32, i32
  }
  func.func @transform_3(%arg0: i32) -> (i32, i32) {
    %c0_i32 = arith.constant 0 : i32
    %c0_i32_0 = arith.constant 0 : i32
    %c0_i32_1 = arith.constant 0 : i32
    return %c0_i32, %c0_i32_0 : i32, i32
  }
  func.func @transform_4(%arg0: i32) -> (i32, i32) {
    %c0_i32 = arith.constant 0 : i32
    %c0_i32_0 = arith.constant 0 : i32
    %c0_i32_1 = arith.constant 0 : i32
    return %c0_i32, %c0_i32_0 : i32, i32
  }
  func.func @transform_5(%arg0: i32) -> (i32, i32, i32) {
    %c0_i32 = arith.constant 0 : i32
    %c0_i32_0 = arith.constant 0 : i32
    %c0_i32_1 = arith.constant 0 : i32
    %c0_i32_2 = arith.constant 0 : i32
    return %c0_i32, %c0_i32_0, %c0_i32_1 : i32, i32, i32
  }
  func.func @transform_6(%arg0: i32) -> (i32, i32) {
    %c0_i32 = arith.constant 0 : i32
    %c0_i32_0 = arith.constant 0 : i32
    %c0_i32_1 = arith.constant 0 : i32
    return %c0_i32, %c0_i32_0 : i32, i32
  }
  func.func @transform_7(%arg0: i32) -> (i32, i32) {
    %c0_i32 = arith.constant 0 : i32
    %c0_i32_0 = arith.constant 0 : i32
    %c0_i32_1 = arith.constant 0 : i32
    return %c0_i32, %c0_i32_0 : i32, i32
  }
  func.func @transform_8(%arg0: i32) -> (i32, i32) {
    %c0_i32 = arith.constant 0 : i32
    %c0_i32_0 = arith.constant 0 : i32
    %c0_i32_1 = arith.constant 0 : i32
    return %c0_i32, %c0_i32_0 : i32, i32
  }
  func.func @transform_9(%arg0: i32) -> (i32, i32) {
    %c0_i32 = arith.constant 0 : i32
    %c0_i32_0 = arith.constant 0 : i32
    %c0_i32_1 = arith.constant 0 : i32
    return %c0_i32, %c0_i32_0 : i32, i32
  }
  func.func @transform_10(%arg0: i32) -> (i32, i32) {
    %c0_i32 = arith.constant 0 : i32
    %c0_i32_0 = arith.constant 0 : i32
    %c0_i32_1 = arith.constant 0 : i32
    return %c0_i32, %c0_i32_0 : i32, i32
  }
  func.func @transform_11(%arg0: i32) -> (i32, i32) {
    %c0_i32 = arith.constant 0 : i32
    %c0_i32_0 = arith.constant 0 : i32
    %c0_i32_1 = arith.constant 0 : i32
    return %c0_i32, %c0_i32_0 : i32, i32
  }
  func.func @transform_12(%arg0: i32) -> (i32, i32) {
    %c0_i32 = arith.constant 0 : i32
    %c0_i32_0 = arith.constant 0 : i32
    %c0_i32_1 = arith.constant 0 : i32
    return %c0_i32, %c0_i32_0 : i32, i32
  }
  func.func @transform_13(%arg0: i32) -> (i32, i32, i32) {
    %c0_i32 = arith.constant 0 : i32
    %c0_i32_0 = arith.constant 0 : i32
    %c0_i32_1 = arith.constant 0 : i32
    return %arg0, %c0_i32, %c0_i32_0 : i32, i32, i32
  }
}

</mosaic_0001>

<bundles_post_ra>
// kernel: double_conv_forward.1
= control target key start
LH: loop header
LB: loop body
LE: loop exit
PB: predicated region body
PF: predicated region fallthrough
CT: control target
= control target key end

     0   :  { %s14708_s25 = smov 0   ;;  %s17988_s0 = inlined_call_operand.vmem [shape: f32[2,400,8], index: 0, kind: input, shape index: {}]   ;;  %s17989_s1 = inlined_call_operand.vmem [shape: f32[336,1], index: 1, kind: input, shape index: {}]   ;;  %s17990_s2 = inlined_call_operand.vmem [shape: bf16[9,8,128], index: 2, kind: input, shape index: {}]   ;;  %s17991_s3 = inlined_call_operand.vmem [shape: f32[1,128], index: 3, kind: input, shape index: {}]   ;;  %s17992_s4 = inlined_call_operand.vmem [shape: f32[1,128], index: 4, kind: input, shape index: {}]   ;;  %s17993_s5 = inlined_call_operand.vmem [shape: bf16[9,128,128], index: 5, kind: input, shape index: {}]   ;;  %s17994_s6 = inlined_call_operand.vmem [shape: f32[1,128], index: 6, kind: input, shape index: {}]   ;;  %s17995_s7 = inlined_call_operand.vmem [shape: f32[1,128], index: 7, kind: input, shape index: {}]   ;;  %s17996_s8 = inlined_call_operand.vmem [shape: f32[128,128], index: 8, kind: input, shape index: {}]   ;;  %s17997_s9 = inlined_call_operand.vmem [shape: f32[128,128], index: 9, kind: input, shape index: {}]   ;;  %s17998_s10 = inlined_call_operand.vmem [shape: bf16[8,128], index: 10, kind: input, shape index: {}]   ;;  %s17999_s11 = inlined_call_operand.vmem [shape: f32[1,128], index: 11, kind: input, shape index: {}]   ;;  %s18000_s12 = inlined_call_operand.vmem [shape: f32[1,128], index: 12, kind: input, shape index: {}]   ;;  %s18001_s13 = inlined_call_operand.vmem [shape: f32[2,336,128], index: 13, kind: output, shape index: {}]  }
   0x1 LB: > { %s10376_s26 = sadd.s32 4294967295, %s14632_s25   ;;  %p10380_p0 = scmp.ge.s32.totalorder %s14632_s25, 1  ;;  %s14632_s25 = sphi %s14708_s25, %s23_s25  }
   0x2   : > { %p387_p1 = scmp.lt.s32.totalorder %s14632_s25, 3 }
   0x4   : > { %p388_p2 = pnand %p10380_p0, %p387_p1 }
   0x6   : > { %391 = sbr.rel (%p388_p2) target bundleno = 3741 (0xe9d), region = 72 }
   0xd   : > { %v631_v0 = vld [vmem:[%s17990_s2] sm:$0xf]  ;;  %vm696_vm0 = vcmask 1043456   ;;  %p14719_p3 = scmp.lt.s32.totalorder %s10376_s26, 1  ;;  %v14634_v1 = vmov 0.0   ;;  %vm14635_vm1 = vmmov 0  }
   0xe   : > { %11325 = vmatprep.subr.bf16.mxu0 %v14634_v1  ;;  %5083 = vst [vmem:[#allocation2] sm:$0xff] %v14634_v1  ;;  %5084 = vst [vmem:[#allocation2 + $0x8] sm:$0xff] %v14634_v1  ;;  %v698_v2 = vsel %vm696_vm0, %v631_v0, 0  ;;  %11327 = vmatprep.mubr.msk.bf16.mxu0 %vm14635_vm1, %v14634_v1  ;;  %v10404_v3 = vld [vmem:[%s17990_s2 + $0x4] sm:$0xf]  ;;  %vm632_vm2 = vcmask 64512  }
   0xf   : > { %5085 = vst [vmem:[#allocation2 + $0x10] sm:$0xff] %v14634_v1  ;;  %5086 = vst [vmem:[#allocation2 + $0x18] sm:$0xff] %v14634_v1  ;;  %11326 = vmatpush3.bf16.msra.mxu0 %v698_v2  ;;  %s18160_s26 = smov (!%p14719_p3, %s10376_s26), 1  ;;  %13203 = vmatprep.subr.bf16.mxu1 %v14634_v1  ;;  %v1156_v7 = vsel %vm696_vm0, %v10404_v3, 0  ;;  %v10426_v40 = vld [vmem:[%s17990_s2 + $0x8] sm:$0xf] }
  0x10   : > { %5129 = vst [vmem:[#allocation2 + $0x170] sm:$0xff] %v14634_v1  ;;  %5130 = vst [vmem:[#allocation2 + $0x178] sm:$0xff] %v14634_v1  ;;  %11411 = vmatprep.subr.bf16.mxu0 %v14634_v1  ;;  %13204 = vmatpush3.bf16.msra.mxu1 %v698_v2  ;;  %s14529_s15 = smul.u32 400, %s18160_s26  ;;  %v1614_v42 = vsel %vm696_vm0, %v10426_v40, 0 }
  0x11   : > { %5131 = vst [vmem:[#allocation2 + $0x180] sm:$0xff] %v14634_v1  ;;  %11371 = vmatprep.mubr.msk.bf16.mxu1 %vm14635_vm1, %v14634_v1  ;;  %12099 = vmatprep.subr.bf16.mxu1 %v14634_v1 }
  0x12   : > { %s14750_s18 = scalar_lea.vmem %s17988_s0, %s14529_s15  ;;  %s14530_s15 = smul.u32 336, %s18160_s26 }
  0x13   : > { %v526_v4 = vld [vmem:[%s14750_s18 + $0xd] sm:$0xff]  ;;  %v527_v5 = vld [vmem:[%s14750_s18 + $0x15] sm:$0xff]  ;;  %v528_v8 = vld [vmem:[%s14750_s18 + $0x1d] sm:$0xff] }
  0x14   : > { %v568_v6 = vpack.c.bf16 %v527_v5, %v526_v4  ;;  %v529_v9 = vld [vmem:[%s14750_s18 + $0x25] sm:$0xff]  ;;  %v530_v11 = vld [vmem:[%s14750_s18 + $0x2d] sm:$0xff]  ;;  %v531_v12 = vld [vmem:[%s14750_s18 + $0x35] sm:$0xff]  ;;  %s17872_s17 = scalar_lea.vmem %s18001_s13, %s14530_s15 }
  0x15   : > { %v569_v10 = vpack.c.bf16 %v529_v9, %v528_v8  ;;  %v570_v13 = vpack.c.bf16 %v531_v12, %v530_v11  ;;  %v532_v14 = vld [vmem:[%s14750_s18 + $0x3d] sm:$0xff]  ;;  %v533_v15 = vld [vmem:[%s14750_s18 + $0x45] sm:$0xff]  ;;  %v534_v17 = vld [vmem:[%s14750_s18 + $0x4d] sm:$0xff] }
  0x16   : > { %11328 = vmatmul.mubr.msk.bf16.vlgmr.msra.gmra.mrb[0].mxu0 %vm632_vm2, %v568_v6  ;;  %v571_v16 = vpack.c.bf16 %v533_v15, %v532_v14  ;;  %v535_v18 = vld [vmem:[%s14750_s18 + $0x55] sm:$0xff]  ;;  %v536_v20 = vld [vmem:[%s14750_s18 + $0x5d] sm:$0xff]  ;;  %v537_v21 = vld [vmem:[%s14750_s18 + $0x65] sm:$0xff] }
  0x17   : > { %11412 = vmatpush3.bf16.msra.mxu0 %v1156_v7  ;;  %11331 = vmatprep.mubr.msk.bf16.mxu0 %vm14635_vm1, %v14634_v1  ;;  %v572_v19 = vpack.c.bf16 %v535_v18, %v534_v17  ;;  %v573_v22 = vpack.c.bf16 %v537_v21, %v536_v20  ;;  %v538_v23 = vld [vmem:[%s14750_s18 + $0x6d] sm:$0xff]  ;;  %v539_v24 = vld [vmem:[%s14750_s18 + $0x75] sm:$0xff]  ;;  %v540_v26 = vld [vmem:[%s14750_s18 + $0x7d] sm:$0xff] }
  0x18   : > { %11497 = vmatprep.subr.bf16.mxu0 %v14634_v1  ;;  %v574_v25 = vpack.c.bf16 %v539_v24, %v538_v23  ;;  %v541_v27 = vld [vmem:[%s14750_s18 + $0x85] sm:$0xff]  ;;  %v542_v29 = vld [vmem:[%s14750_s18 + $0x8d] sm:$0xff]  ;;  %v543_v30 = vld [vmem:[%s14750_s18 + $0x95] sm:$0xff] }
  0x19   : > { %v575_v28 = vpack.c.bf16 %v541_v27, %v540_v26  ;;  %v576_v31 = vpack.c.bf16 %v543_v30, %v542_v29  ;;  %v544_v32 = vld [vmem:[%s14750_s18 + $0x9d] sm:$0xff]  ;;  %v545_v33 = vld [vmem:[%s14750_s18 + $0xa5] sm:$0xff]  ;;  %v546_v35 = vld [vmem:[%s14750_s18 + $0xad] sm:$0xff] }
  0x1a   : > { %v577_v34 = vpack.c.bf16 %v545_v33, %v544_v32  ;;  %v547_v36 = vld [vmem:[%s14750_s18 + $0xb5] sm:$0xff]  ;;  %v987_v43 = vld [vmem:[%s14750_s18 + $0x1e] sm:$0xff]  ;;  %v988_v44 = vld [vmem:[%s14750_s18 + $0x26] sm:$0xff] }
  0x1b   : > { %v578_v37 = vpack.c.bf16 %v547_v36, %v546_v35  ;;  %v985_v38 = vld [vmem:[%s14750_s18 + $0xe] sm:$0xff]  ;;  %v986_v39 = vld [vmem:[%s14750_s18 + $0x16] sm:$0xff]  ;;  %v1028_v45 = vpack.c.bf16 %v988_v44, %v987_v43  ;;  %v991_v49 = vld [vmem:[%s14750_s18 + $0x3e] sm:$0xff] }
  0x1c   : > { %v1027_v41 = vpack.c.bf16 %v986_v39, %v985_v38  ;;  %v989_v46 = vld [vmem:[%s14750_s18 + $0x2e] sm:$0xff]  ;;  %v990_v47 = vld [vmem:[%s14750_s18 + $0x36] sm:$0xff]  ;;  %v992_v50 = vld [vmem:[%s14750_s18 + $0x46] sm:$0xff] }
  0x1d   : > { %v1029_v48 = vpack.c.bf16 %v990_v47, %v989_v46  ;;  %v1030_v51 = vpack.c.bf16 %v992_v50, %v991_v49  ;;  %v993_v52 = vld [vmem:[%s14750_s18 + $0x4e] sm:$0xff]  ;;  %v994_v53 = vld [vmem:[%s14750_s18 + $0x56] sm:$0xff]  ;;  %v995_v55 = vld [vmem:[%s14750_s18 + $0x5e] sm:$0xff] }
  0x1e   : > { %11332 = vmatmul.mubr.msk.bf16.gmra.mrb[4].mxu0 %vm632_vm2, %v569_v10  ;;  %v1031_v54 = vpack.c.bf16 %v994_v53, %v993_v52  ;;  %v996_v56 = vld [vmem:[%s14750_s18 + $0x66] sm:$0xff]  ;;  %v997_v58 = vld [vmem:[%s14750_s18 + $0x6e] sm:$0xff]  ;;  %v998_v59 = vld [vmem:[%s14750_s18 + $0x76] sm:$0xff] }
  0x1f   : > { %11335 = vmatprep.mubr.msk.bf16.mxu0 %vm14635_vm1, %v14634_v1  ;;  %v1032_v57 = vpack.c.bf16 %v996_v56, %v995_v55  ;;  %v1033_v60 = vpack.c.bf16 %v998_v59, %v997_v58  ;;  %v999_v61 = vld [vmem:[%s14750_s18 + $0x7e] sm:$0xff]  ;;  %v1000_v62 = vld [vmem:[%s14750_s18 + $0x86] sm:$0xff]  ;;  %v1001_v0 = vld [vmem:[%s14750_s18 + $0x8e] sm:$0xff] }
  0x20   : > { %v1034_v63 = vpack.c.bf16 %v1000_v62, %v999_v61  ;;  %v1002_v2 = vld [vmem:[%s14750_s18 + $0x96] sm:$0xff]  ;;  %v1003_v4 = vld [vmem:[%s14750_s18 + $0x9e] sm:$0xff]  ;;  %v1004_v5 = vld [vmem:[%s14750_s18 + $0xa6] sm:$0xff] }
  0x21   : > { %v1035_v3 = vpack.c.bf16 %v1002_v2, %v1001_v0  ;;  %v1036_v6 = vpack.c.bf16 %v1004_v5, %v1003_v4  ;;  %v1005_v7 = vld [vmem:[%s14750_s18 + $0xae] sm:$0xff]  ;;  %v1006_v8 = vld [vmem:[%s14750_s18 + $0xb6] sm:$0xff]  ;;  %v1007_v10 = vld [vmem:[%s14750_s18 + $0xbe] sm:$0xff] }
  0x22   : > { %v1037_v9 = vpack.c.bf16 %v1006_v8, %v1005_v7  ;;  %v1008_v11 = vld [vmem:[%s14750_s18 + $0xc6] sm:$0xff]  ;;  %v1010_v14 = vld [vmem:[%s14750_s18 + $0xd6] sm:$0xff] }
  0x23   : > { %v1038_v12 = vpack.c.bf16 %v1008_v11, %v1007_v10  ;;  %v1012_v17 = vld [vmem:[%s14750_s18 + $0xe6] sm:$0xff]  ;;  %v1014_v20 = vld [vmem:[%s14750_s18 + $0xf6] sm:$0xff] }
  0x24   : > { %v1016_v23 = vld [vmem:[%s14750_s18 + $0x106] sm:$0xff]  ;;  %v1018_v26 = vld [vmem:[%s14750_s18 + $0x116] sm:$0xff] }
  0x25   : > { %v1020_v29 = vld [vmem:[%s14750_s18 + $0x126] sm:$0xff]  ;;  %v1022_v32 = vld [vmem:[%s14750_s18 + $0x136] sm:$0xff] }
  0x26   : > { %11336 = vmatmul.mubr.msk.bf16.gmra.mrb[8].mxu0 %vm632_vm2, %v570_v13  ;;  %v1009_v13 = vld [vmem:[%s14750_s18 + $0xce] sm:$0xff]  ;;  %v1024_v35 = vld [vmem:[%s14750_s18 + $0x146] sm:$0xff]  ;;  %v1026_v38 = vld [vmem:[%s14750_s18 + $0x156] sm:$0xff] }
  0x27   : > { %11339 = vmatprep.mubr.msk.bf16.mxu0 %vm14635_vm1, %v14634_v1  ;;  %v1039_v15 = vpack.c.bf16 %v1010_v14, %v1009_v13  ;;  %v1443_v40 = vld [vmem:[%s14750_s18 + $0xf] sm:$0xff]  ;;  %v1446_v46 = vld [vmem:[%s14750_s18 + $0x27] sm:$0xff]  ;;  %v1448_v49 = vld [vmem:[%s14750_s18 + $0x37] sm:$0xff] }
  0x28   : > { %v1450_v52 = vld [vmem:[%s14750_s18 + $0x47] sm:$0xff]  ;;  %v1452_v55 = vld [vmem:[%s14750_s18 + $0x57] sm:$0xff] }
  0x29   : > { %v1454_v58 = vld [vmem:[%s14750_s18 + $0x67] sm:$0xff]  ;;  %v1456_v61 = vld [vmem:[%s14750_s18 + $0x77] sm:$0xff] }
  0x2a   : > { %v1458_v0 = vld [vmem:[%s14750_s18 + $0x87] sm:$0xff]  ;;  %v1460_v4 = vld [vmem:[%s14750_s18 + $0x97] sm:$0xff] }
  0x2b   : > { %v1462_v7 = vld [vmem:[%s14750_s18 + $0xa7] sm:$0xff]  ;;  %v1464_v10 = vld [vmem:[%s14750_s18 + $0xb7] sm:$0xff] }
  0x2c   : > { %v1466_v13 = vld [vmem:[%s14750_s18 + $0xc7] sm:$0xff] }
  0x2e   : > { %11340 = vmatmul.mubr.msk.bf16.gmra.mrb[12].mxu0 %vm632_vm2, %v571_v16  ;;  %v1011_v16 = vld [vmem:[%s14750_s18 + $0xde] sm:$0xff] }
  0x2f   : > { %11343 = vmatprep.mubr.msk.bf16.mxu0 %vm14635_vm1, %v14634_v1  ;;  %v1040_v18 = vpack.c.bf16 %v1012_v17, %v1011_v16  ;;  %v1468_v16 = vld [vmem:[%s14750_s18 + $0xd7] sm:$0xff] }
  0x36   : > { %11344 = vmatmul.mubr.msk.bf16.gmra.mrb[16].mxu0 %vm632_vm2, %v572_v19  ;;  %v1013_v19 = vld [vmem:[%s14750_s18 + $0xee] sm:$0xff] }
  0x37   : > { %11347 = vmatprep.mubr.msk.bf16.mxu0 %vm14635_vm1, %v14634_v1  ;;  %v1041_v21 = vpack.c.bf16 %v1014_v20, %v1013_v19  ;;  %v1470_v19 = vld [vmem:[%s14750_s18 + $0xe7] sm:$0xff] }
  0x3e   : > { %11348 = vmatmul.mubr.msk.bf16.gmra.mrb[20].mxu0 %vm632_vm2, %v573_v22  ;;  %v1015_v22 = vld [vmem:[%s14750_s18 + $0xfe] sm:$0xff] }
  0x3f   : > { %11351 = vmatprep.mubr.msk.bf16.mxu0 %vm14635_vm1, %v14634_v1  ;;  %v1042_v24 = vpack.c.bf16 %v1016_v23, %v1015_v22  ;;  %v1472_v22 = vld [vmem:[%s14750_s18 + $0xf7] sm:$0xff] }
  0x46   : > { %11352 = vmatmul.mubr.msk.bf16.gmra.mrb[24].mxu0 %vm632_vm2, %v574_v25  ;;  %v1017_v25 = vld [vmem:[%s14750_s18 + $0x10e] sm:$0xff] }
  0x47   : > { %11355 = vmatprep.mubr.msk.bf16.mxu0 %vm14635_vm1, %v14634_v1  ;;  %v1043_v27 = vpack.c.bf16 %v1018_v26, %v1017_v25  ;;  %v1474_v25 = vld [vmem:[%s14750_s18 + $0x107] sm:$0xff] }
  0x4e   : > { %11356 = vmatmul.mubr.msk.bf16.gmra.mrb[28].mxu0 %vm632_vm2, %v575_v28  ;;  %v1019_v28 = vld [vmem:[%s14750_s18 + $0x11e] sm:$0xff] }
  0x4f   : > { %11359 = vmatprep.mubr.msk.bf16.mxu0 %vm14635_vm1, %v14634_v1  ;;  %v1044_v30 = vpack.c.bf16 %v1020_v29, %v1019_v28  ;;  %v1476_v28 = vld [vmem:[%s14750_s18 + $0x117] sm:$0xff] }
  0x56   : > { %11360 = vmatmul.mubr.msk.bf16.gmra.mrb[32].mxu0 %vm632_vm2, %v576_v31  ;;  %v1021_v31 = vld [vmem:[%s14750_s18 + $0x12e] sm:$0xff] }
  0x57   : > { %11363 = vmatprep.mubr.msk.bf16.mxu0 %vm14635_vm1, %v14634_v1  ;;  %v1045_v33 = vpack.c.bf16 %v1022_v32, %v1021_v31  ;;  %v1478_v31 = vld [vmem:[%s14750_s18 + $0x127] sm:$0xff] }
  0x5e   : > { %11364 = vmatmul.mubr.msk.bf16.gmra.mrb[36].mxu0 %vm632_vm2, %v577_v34  ;;  %v1023_v34 = vld [vmem:[%s14750_s18 + $0x13e] sm:$0xff] }
  0x5f   : > { %11367 = vmatprep.mubr.msk.bf16.mxu0 %vm14635_vm1, %v14634_v1  ;;  %v1046_v36 = vpack.c.bf16 %v1024_v35, %v1023_v34  ;;  %v1480_v34 = vld [vmem:[%s14750_s18 + $0x137] sm:$0xff] }
  0x66   : > { %11368 = vmatmul.mubr.msk.bf16.gmra.mrb[40].mxu0 %vm632_vm2, %v578_v37  ;;  %v1025_v37 = vld [vmem:[%s14750_s18 + $0x14e] sm:$0xff] }
  0x67   : > { %11413 = vmatprep.mubr.msk.bf16.mxu0 %vm14635_vm1, %v14634_v1  ;;  %v1047_v39 = vpack.c.bf16 %v1026_v38, %v1025_v37  ;;  %v1482_v37 = vld [vmem:[%s14750_s18 + $0x147] sm:$0xff] }
  0x6e   : > { %11414 = vmatmul.mubr.msk.bf16.vlgmr.msra.gmra.mrb[0].mxu0 %vm632_vm2, %v1027_v41  ;;  %v1444_v41 = vld [vmem:[%s14750_s18 + $0x17] sm:$0xff] }
  0x6f   : > { %11498 = vmatpush3.bf16.msra.mxu0 %v1614_v42  ;;  %11417 = vmatprep.mubr.msk.bf16.mxu0 %vm14635_vm1, %v14634_v1  ;;  %v10448_v42 = vld [vmem:[%s17990_s2 + $0xc] sm:$0xf]  ;;  %v1485_v43 = vpack.c.bf16 %v1444_v41, %v1443_v40  ;;  %v1484_v40 = vld [vmem:[%s14750_s18 + $0x157] sm:$0xff] }
  0x70   : > { %11583 = vmatprep.subr.bf16.mxu0 %v14634_v1  ;;  %v2072_v44 = vsel %vm696_vm0, %v10448_v42, 0  ;;  %v10470_v42 = vld [vmem:[%s17990_s2 + $0x10] sm:$0xf] }
  0x76   : > { %11418 = vmatmul.mubr.msk.bf16.gmra.mrb[4].mxu0 %vm632_vm2, %v1028_v45  ;;  %v1445_v45 = vld [vmem:[%s14750_s18 + $0x1f] sm:$0xff] }
  0x77   : > { %11421 = vmatprep.mubr.msk.bf16.mxu0 %vm14635_vm1, %v14634_v1  ;;  %v14931_v47 = vpack.c.bf16 %v1446_v46, %v1445_v45  ;;  %v1942_v45 = vld [vmem:[%s14750_s18 + $0x167] sm:$0xff] }
  0x7e   : > { %11422 = vmatmul.mubr.msk.bf16.gmra.mrb[8].mxu0 %vm632_vm2, %v1029_v48  ;;  %v1447_v48 = vld [vmem:[%s14750_s18 + $0x2f] sm:$0xff] }
  0x7f   : > { %11425 = vmatprep.mubr.msk.bf16.mxu0 %vm14635_vm1, %v14634_v1  ;;  %v14939_v50 = vpack.c.bf16 %v1448_v49, %v1447_v48  ;;  %v2360_v48 = vld [vmem:[%s14750_s18 + $0x28] sm:$0xff]  ;;  %v10492_v49 = vld [vmem:[%s17990_s2 + $0x14] sm:$0xf] }
  0x86   : > { %11426 = vmatmul.mubr.msk.bf16.gmra.mrb[12].mxu0 %vm632_vm2, %v1030_v51  ;;  %v1449_v51 = vld [vmem:[%s14750_s18 + $0x3f] sm:$0xff] }
  0x87   : > { %11429 = vmatprep.mubr.msk.bf16.mxu0 %vm14635_vm1, %v14634_v1  ;;  %v14947_v53 = vpack.c.bf16 %v1450_v52, %v1449_v51  ;;  %v2988_v51 = vsel %vm696_vm0, %v10492_v49, 0  ;;  %v2361_v52 = vld [vmem:[%s14750_s18 + $0x30] sm:$0xff]  ;;  %v2817_v49 = vld [vmem:[%s14750_s18 + $0x21] sm:$0xff] }
  0x8e   : > { %11430 = vmatmul.mubr.msk.bf16.gmra.mrb[16].mxu0 %vm632_vm2, %v1031_v54  ;;  %v1451_v54 = vld [vmem:[%s14750_s18 + $0x4f] sm:$0xff] }
  0x8f   : > { %11433 = vmatprep.mubr.msk.bf16.mxu0 %vm14635_vm1, %v14634_v1  ;;  %v14955_v56 = vpack.c.bf16 %v1452_v55, %v1451_v54  ;;  %v2363_v55 = vld [vmem:[%s14750_s18 + $0x40] sm:$0xff] }
  0x96   : > { %11434 = vmatmul.mubr.msk.bf16.gmra.mrb[20].mxu0 %vm632_vm2, %v1032_v57  ;;  %v1453_v57 = vld [vmem:[%s14750_s18 + $0x5f] sm:$0xff] }
  0x97   : > { %11437 = vmatprep.mubr.msk.bf16.mxu0 %vm14635_vm1, %v14634_v1  ;;  %v14963_v59 = vpack.c.bf16 %v1454_v58, %v1453_v57  ;;  %v2365_v58 = vld [vmem:[%s14750_s18 + $0x50] sm:$0xff] }
  0x9e   : > { %11438 = vmatmul.mubr.msk.bf16.gmra.mrb[24].mxu0 %vm632_vm2, %v1033_v60  ;;  %v1455_v60 = vld [vmem:[%s14750_s18 + $0x6f] sm:$0xff] }
  0x9f   : > { %11441 = vmatprep.mubr.msk.bf16.mxu0 %vm14635_vm1, %v14634_v1  ;;  %v14971_v62 = vpack.c.bf16 %v1456_v61, %v1455_v60  ;;  %v15178_v61 = vld [vmem:[#allocation2] sm:$0xff] }
  0xa6   : > { %11442 = vmatmul.mubr.msk.bf16.gmra.mrb[28].mxu0 %vm632_vm2, %v1034_v63  ;;  %v1457_v63 = vld [vmem:[%s14750_s18 + $0x7f] sm:$0xff] }
  0xa7   : > { %11445 = vmatprep.mubr.msk.bf16.mxu0 %vm14635_vm1, %v14634_v1  ;;  %v14979_v2 = vpack.c.bf16 %v1458_v0, %v1457_v63  ;;  %v2368_v63 = vld [vmem:[%s14750_s18 + $0x68] sm:$0xff] }
  0xae   : > { %11446 = vmatmul.mubr.msk.bf16.gmra.mrb[32].mxu0 %vm632_vm2, %v1035_v3  ;;  %v1459_v3 = vld [vmem:[%s14750_s18 + $0x8f] sm:$0xff] }
  0xaf   : > { %11449 = vmatprep.mubr.msk.bf16.mxu0 %vm14635_vm1, %v14634_v1  ;;  %v14987_v5 = vpack.c.bf16 %v1460_v4, %v1459_v3  ;;  %v2371_v4 = vld [vmem:[%s14750_s18 + $0x80] sm:$0xff] }
  0xb6   : > { %11450 = vmatmul.mubr.msk.bf16.gmra.mrb[36].mxu0 %vm632_vm2, %v1036_v6  ;;  %v1461_v6 = vld [vmem:[%s14750_s18 + $0x9f] sm:$0xff] }
  0xb7   : > { %11453 = vmatprep.mubr.msk.bf16.mxu0 %vm14635_vm1, %v14634_v1  ;;  %v14995_v8 = vpack.c.bf16 %v1462_v7, %v1461_v6  ;;  %v2373_v7 = vld [vmem:[%s14750_s18 + $0x90] sm:$0xff] }
  0xbe   : > { %11454 = vmatmul.mubr.msk.bf16.gmra.mrb[40].mxu0 %vm632_vm2, %v1037_v9  ;;  %v1463_v9 = vld [vmem:[%s14750_s18 + $0xaf] sm:$0xff] }
  0xbf   : > { %11457 = vmatprep.mubr.msk.bf16.mxu0 %vm14635_vm1, %v14634_v1  ;;  %v15003_v11 = vpack.c.bf16 %v1464_v10, %v1463_v9  ;;  %v2375_v10 = vld [vmem:[%s14750_s18 + $0xa0] sm:$0xff] }
  0xc6   : > { %11458 = vmatmul.mubr.msk.bf16.gmra.mrb[44].mxu0 %vm632_vm2, %v1038_v12  ;;  %v1465_v12 = vld [vmem:[%s14750_s18 + $0xbf] sm:$0xff] }
  0xc7   : > { %11461 = vmatprep.mubr.msk.bf16.mxu0 %vm14635_vm1, %v14634_v1  ;;  %v15011_v14 = vpack.c.bf16 %v1466_v13, %v1465_v12  ;;  %v2377_v13 = vld [vmem:[%s14750_s18 + $0xb0] sm:$0xff] }
  0xce   : > { %11462 = vmatmul.mubr.msk.bf16.gmra.mrb[48].mxu0 %vm632_vm2, %v1039_v15  ;;  %v1467_v15 = vld [vmem:[%s14750_s18 + $0xcf] sm:$0xff] }
  0xcf   : > { %11465 = vmatprep.mubr.msk.bf16.mxu0 %vm14635_vm1, %v14634_v1  ;;  %v15019_v17 = vpack.c.bf16 %v1468_v16, %v1467_v15  ;;  %v2379_v16 = vld [vmem:[%s14750_s18 + $0xc0] sm:$0xff] }
  0xd6   : > { %11466 = vmatmul.mubr.msk.bf16.gmra.mrb[52].mxu0 %vm632_vm2, %v1040_v18  ;;  %v1469_v18 = vld [vmem:[%s14750_s18 + $0xdf] sm:$0xff] }
  0xd7   : > { %11469 = vmatprep.mubr.msk.bf16.mxu0 %vm14635_vm1, %v14634_v1  ;;  %v15027_v20 = vpack.c.bf16 %v1470_v19, %v1469_v18  ;;  %v2381_v19 = vld [vmem:[%s14750_s18 + $0xd0] sm:$0xff] }
  0xde   : > { %11470 = vmatmul.mubr.msk.bf16.gmra.mrb[56].mxu0 %vm632_vm2, %v1041_v21  ;;  %v1471_v21 = vld [vmem:[%s14750_s18 + $0xef] sm:$0xff] }
  0xdf   : > { %11473 = vmatprep.mubr.msk.bf16.mxu0 %vm14635_vm1, %v14634_v1  ;;  %v15035_v23 = vpack.c.bf16 %v1472_v22, %v1471_v21  ;;  %v2383_v22 = vld [vmem:[%s14750_s18 + $0xe0] sm:$0xff] }
  0xe6   : > { %11474 = vmatmul.mubr.msk.bf16.gmra.mrb[60].mxu0 %vm632_vm2, %v1042_v24  ;;  %v1473_v24 = vld [vmem:[%s14750_s18 + $0xff] sm:$0xff] }
  0xe7   : > { %11477 = vmatprep.mubr.msk.bf16.mxu0 %vm14635_vm1, %v14634_v1  ;;  %v1500_v26 = vpack.c.bf16 %v1474_v25, %v1473_v24  ;;  %v2385_v25 = vld [vmem:[%s14750_s18 + $0xf0] sm:$0xff] }
  0xee   : > { %11478 = vmatmul.mubr.msk.bf16.gmra.mrb[64].mxu0 %vm632_vm2, %v1043_v27  ;;  %v1475_v27 = vld [vmem:[%s14750_s18 + $0x10f] sm:$0xff] }
  0xef   : > { %11481 = vmatprep.mubr.msk.bf16.mxu0 %vm14635_vm1, %v14634_v1  ;;  %v1501_v29 = vpack.c.bf16 %v1476_v28, %v1475_v27  ;;  %v2387_v28 = vld [vmem:[%s14750_s18 + $0x100] sm:$0xff] }
  0xf6   : > { %11482 = vmatmul.mubr.msk.bf16.gmra.mrb[68].mxu0 %vm632_vm2, %v1044_v30  ;;  %v1477_v30 = vld [vmem:[%s14750_s18 + $0x11f] sm:$0xff] }
  0xf7   : > { %11485 = vmatprep.mubr.msk.bf16.mxu0 %vm14635_vm1, %v14634_v1  ;;  %v1502_v32 = vpack.c.bf16 %v1478_v31, %v1477_v30  ;;  %v2389_v31 = vld [vmem:[%s14750_s18 + $0x110] sm:$0xff] }
  0xfe   : > { %11486 = vmatmul.mubr.msk.bf16.gmra.mrb[72].mxu0 %vm632_vm2, %v1045_v33  ;;  %v1479_v33 = vld [vmem:[%s14750_s18 + $0x12f] sm:$0xff] }
  0xff   : > { %11489 = vmatprep.mubr.msk.bf16.mxu0 %vm14635_vm1, %v14634_v1  ;;  %v1503_v35 = vpack.c.bf16 %v1480_v34, %v1479_v33  ;;  %v2391_v34 = vld [vmem:[%s14750_s18 + $0x120] sm:$0xff] }
 0x106   : > { %11490 = vmatmul.mubr.msk.bf16.gmra.mrb[76].mxu0 %vm632_vm2, %v1046_v36  ;;  %v1481_v36 = vld [vmem:[%s14750_s18 + $0x13f] sm:$0xff] }
 0x107   : > { %11493 = vmatprep.mubr.msk.bf16.mxu0 %vm14635_vm1, %v14634_v1  ;;  %v1504_v38 = vpack.c.bf16 %v1482_v37, %v1481_v36  ;;  %v2393_v37 = vld [vmem:[%s14750_s18 + $0x130] sm:$0xff] }
 0x10e   : > { %11494 = vmatmul.mubr.msk.bf16.gmra.mrb[80].mxu0 %vm632_vm2, %v1047_v39  ;;  %v1483_v39 = vld [vmem:[%s14750_s18 + $0x14f] sm:$0xff] }
 0x10f   : > { %11499 = vmatprep.mubr.msk.bf16.mxu0 %vm14635_vm1, %v14634_v1  ;;  %v1505_v41 = vpack.c.bf16 %v1484_v40, %v1483_v39  ;;  %v2395_v40 = vld [vmem:[%s14750_s18 + $0x140] sm:$0xff] }
 0x116   : > { %11500 = vmatmul.mubr.msk.bf16.vlgmr.msra.gmra.mrb[0].mxu0 %vm632_vm2, %v1485_v43  ;;  %v2530_v43 = vsel %vm696_vm0, %v10470_v42, 0 }
 0x117   : > { %11584 = vmatpush3.bf16.msra.mxu0 %v2072_v44  ;;  %11503 = vmatprep.mubr.msk.bf16.mxu0 %vm14635_vm1, %v14634_v1  ;;  %v1941_v44 = vld [vmem:[%s14750_s18 + $0x15f] sm:$0xff] }
 0x118   : > { %11669 = vmatprep.subr.bf16.mxu0 %v14634_v1  ;;  %v1963_v46 = vpack.c.bf16 %v1942_v45, %v1941_v44  ;;  %v2398_v44 = vld [vmem:[%s14750_s18 + $0x158] sm:$0xff] }
 0x11e   : > { %11504 = vmatmul.mubr.msk.bf16.gmra.mrb[4].mxu0 %vm632_vm2, %v14931_v47 }
 0x11f   : > { %11507 = vmatprep.mubr.msk.bf16.mxu0 %vm14635_vm1, %v14634_v1 }
 0x126   : > { %11508 = vmatmul.mubr.msk.bf16.gmra.mrb[8].mxu0 %vm632_vm2, %v14939_v50 }
 0x127   : > { %11511 = vmatprep.mubr.msk.bf16.mxu0 %vm14635_vm1, %v14634_v1 }
 0x12e   : > { %11512 = vmatmul.mubr.msk.bf16.gmra.mrb[12].mxu0 %vm632_vm2, %v14947_v53 }
 0x12f   : > { %11515 = vmatprep.mubr.msk.bf16.mxu0 %vm14635_vm1, %v14634_v1 }
 0x136   : > { %11516 = vmatmul.mubr.msk.bf16.gmra.mrb[16].mxu0 %vm632_vm2, %v14955_v56 }
 0x137   : > { %11519 = vmatprep.mubr.msk.bf16.mxu0 %vm14635_vm1, %v14634_v1 }
 0x13e   : > { %11520 = vmatmul.mubr.msk.bf16.gmra.mrb[20].mxu0 %vm632_vm2, %v14963_v59 }
 0x13f   : > { %11523 = vmatprep.mubr.msk.bf16.mxu0 %vm14635_vm1, %v14634_v1 }
 0x146   : > { %11524 = vmatmul.mubr.msk.bf16.gmra.mrb[24].mxu0 %vm632_vm2, %v14971_v62 }
 0x147   : > { %11527 = vmatprep.mubr.msk.bf16.mxu0 %vm14635_vm1, %v14634_v1 }
 0x14e   : > { %11528 = vmatmul.mubr.msk.bf16.gmra.mrb[28].mxu0 %vm632_vm2, %v14979_v2 }
 0x14f   : > { %11531 = vmatprep.mubr.msk.bf16.mxu0 %vm14635_vm1, %v14634_v1 }
 0x156   : > { %11532 = vmatmul.mubr.msk.bf16.gmra.mrb[32].mxu0 %vm632_vm2, %v14987_v5 }
 0x157   : > { %11535 = vmatprep.mubr.msk.bf16.mxu0 %vm14635_vm1, %v14634_v1 }
 0x15e   : > { %11536 = vmatmul.mubr.msk.bf16.gmra.mrb[36].mxu0 %vm632_vm2, %v14995_v8 }
 0x15f   : > { %11539 = vmatprep.mubr.msk.bf16.mxu0 %vm14635_vm1, %v14634_v1 }
 0x166   : > { %11540 = vmatmul.mubr.msk.bf16.gmra.mrb[40].mxu0 %vm632_vm2, %v15003_v11 }
 0x167   : > { %11543 = vmatprep.mubr.msk.bf16.mxu0 %vm14635_vm1, %v14634_v1 }
 0x16e   : > { %11544 = vmatmul.mubr.msk.bf16.gmra.mrb[44].mxu0 %vm632_vm2, %v15011_v14 }
 0x16f   : > { %11547 = vmatprep.mubr.msk.bf16.mxu0 %vm14635_vm1, %v14634_v1 }
 0x176   : > { %11548 = vmatmul.mubr.msk.bf16.gmra.mrb[48].mxu0 %vm632_vm2, %v15019_v17 }
 0x177   : > { %11551 = vmatprep.mubr.msk.bf16.mxu0 %vm14635_vm1, %v14634_v1 }
 0x17e   : > { %11552 = vmatmul.mubr.msk.bf16.gmra.mrb[52].mxu0 %vm632_vm2, %v15027_v20 }
 0x17f   : > { %11555 = vmatprep.mubr.msk.bf16.mxu0 %vm14635_vm1, %v14634_v1 }
 0x186   : > { %11556 = vmatmul.mubr.msk.bf16.gmra.mrb[56].mxu0 %vm632_vm2, %v15035_v23 }
 0x187   : > { %11559 = vmatprep.mubr.msk.bf16.mxu0 %vm14635_vm1, %v14634_v1 }
 0x18e   : > { %11560 = vmatmul.mubr.msk.bf16.gmra.mrb[60].mxu0 %vm632_vm2, %v1500_v26 }
 0x18f   : > { %11563 = vmatprep.mubr.msk.bf16.mxu0 %vm14635_vm1, %v14634_v1 }
 0x196   : > { %11564 = vmatmul.mubr.msk.bf16.gmra.mrb[64].mxu0 %vm632_vm2, %v1501_v29 }
 0x197   : > { %11567 = vmatprep.mubr.msk.bf16.mxu0 %vm14635_vm1, %v14634_v1 }
 0x19e   : > { %11568 = vmatmul.mubr.msk.bf16.gmra.mrb[68].mxu0 %vm632_vm2, %v1502_v32 }
 0x19f   : > { %11571 = vmatprep.mubr.msk.bf16.mxu0 %vm14635_vm1, %v14634_v1 }
 0x1a6   : > { %11572 = vmatmul.mubr.msk.bf16.gmra.mrb[72].mxu0 %vm632_vm2, %v1503_v35 }
 0x1a7   : > { %11575 = vmatprep.mubr.msk.bf16.mxu0 %vm14635_vm1, %v14634_v1 }
 0x1ae   : > { %11576 = vmatmul.mubr.msk.bf16.gmra.mrb[76].mxu0 %vm632_vm2, %v1504_v38 }
 0x1af   : > { %11579 = vmatprep.mubr.msk.bf16.mxu0 %vm14635_vm1, %v14634_v1 }
 0x1b6   : > { %11580 = vmatmul.mubr.msk.bf16.gmra.mrb[80].mxu0 %vm632_vm2, %v1505_v41 }
 0x1b7   : > { %11585 = vmatprep.mubr.msk.bf16.mxu0 %vm14635_vm1, %v14634_v1 }
 0x1be   : > { %11586 = vmatmul.mubr.msk.bf16.vlgmr.msra.gmra.mrb[0].mxu0 %vm632_vm2, %v14931_v47  ;;  %v2359_v47 = vld [vmem:[%s14750_s18 + $0x20] sm:$0xff] }
 0x1bf   : > { %11670 = vmatpush3.bf16.msra.mxu0 %v2530_v43  ;;  %11589 = vmatprep.mubr.msk.bf16.mxu0 %vm14635_vm1, %v14634_v1  ;;  %v2397_v43 = vld [vmem:[%s14750_s18 + $0x150] sm:$0xff] }
 0x1c0   : > { %11755 = vmatprep.subr.bf16.mxu0 %v14634_v1  ;;  %v2420_v45 = vpack.c.bf16 %v2398_v44, %v2397_v43  ;;  %v2854_v43 = vld [vmem:[%s14750_s18 + $0x149] sm:$0xff] }
 0x1c6   : > { %11590 = vmatmul.mubr.msk.bf16.gmra.mrb[4].mxu0 %vm632_vm2, %v14939_v50  ;;  %v2401_v50 = vpack.c.bf16 %v2360_v48, %v2359_v47  ;;  %v2400_v47 = vld [vmem:[%s14750_s18 + $0x168] sm:$0xff] }
 0x1c7   : > { %11593 = vmatprep.mubr.msk.bf16.mxu0 %vm14635_vm1, %v14634_v1 }
 0x1ce   : > { %11594 = vmatmul.mubr.msk.bf16.gmra.mrb[8].mxu0 %vm632_vm2, %v14947_v53  ;;  %v2362_v53 = vld [vmem:[%s14750_s18 + $0x38] sm:$0xff] }
 0x1cf   : > { %11597 = vmatprep.mubr.msk.bf16.mxu0 %vm14635_vm1, %v14634_v1  ;;  %v2402_v54 = vpack.c.bf16 %v2362_v53, %v2361_v52 }
 0x1d6   : > { %11598 = vmatmul.mubr.msk.bf16.gmra.mrb[12].mxu0 %vm632_vm2, %v14955_v56  ;;  %v2364_v56 = vld [vmem:[%s14750_s18 + $0x48] sm:$0xff] }
 0x1d7   : > { %11601 = vmatprep.mubr.msk.bf16.mxu0 %vm14635_vm1, %v14634_v1  ;;  %v2403_v57 = vpack.c.bf16 %v2364_v56, %v2363_v55  ;;  %v2820_v55 = vld [vmem:[%s14750_s18 + $0x39] sm:$0xff] }
 0x1de   : > { %11602 = vmatmul.mubr.msk.bf16.gmra.mrb[16].mxu0 %vm632_vm2, %v14963_v59  ;;  %v2366_v59 = vld [vmem:[%s14750_s18 + $0x58] sm:$0xff] }
 0x1df   : > { %11605 = vmatprep.mubr.msk.bf16.mxu0 %vm14635_vm1, %v14634_v1  ;;  %v2404_v60 = vpack.c.bf16 %v2366_v59, %v2365_v58  ;;  %v2822_v58 = vld [vmem:[%s14750_s18 + $0x49] sm:$0xff] }
 0x1e6   : > { %11606 = vmatmul.mubr.msk.bf16.gmra.mrb[20].mxu0 %vm632_vm2, %v14971_v62  ;;  %v2367_v62 = vld [vmem:[%s14750_s18 + $0x60] sm:$0xff] }
 0x1e7   : > { %11609 = vmatprep.mubr.msk.bf16.mxu0 %vm14635_vm1, %v14634_v1  ;;  %v2405_v0 = vpack.c.bf16 %v2368_v63, %v2367_v62  ;;  %v2824_v62 = vld [vmem:[%s14750_s18 + $0x59] sm:$0xff] }
 0x1ee   : > { %11610 = vmatmul.mubr.msk.bf16.gmra.mrb[24].mxu0 %vm632_vm2, %v14979_v2  ;;  %v2370_v2 = vld [vmem:[%s14750_s18 + $0x78] sm:$0xff] }
 0x1ef   : > { %11613 = vmatprep.mubr.msk.bf16.mxu0 %vm14635_vm1, %v14634_v1 }
 0x1f6   : > { %11614 = vmatmul.mubr.msk.bf16.gmra.mrb[28].mxu0 %vm632_vm2, %v14987_v5  ;;  %v2372_v5 = vld [vmem:[%s14750_s18 + $0x88] sm:$0xff] }
 0x1f7   : > { %11617 = vmatprep.mubr.msk.bf16.mxu0 %vm14635_vm1, %v14634_v1  ;;  %v2407_v6 = vpack.c.bf16 %v2372_v5, %v2371_v4  ;;  %v2828_v4 = vld [vmem:[%s14750_s18 + $0x79] sm:$0xff] }
 0x1fe   : > { %11618 = vmatmul.mubr.msk.bf16.gmra.mrb[32].mxu0 %vm632_vm2, %v14995_v8  ;;  %v2374_v8 = vld [vmem:[%s14750_s18 + $0x98] sm:$0xff] }
 0x1ff   : > { %11621 = vmatprep.mubr.msk.bf16.mxu0 %vm14635_vm1, %v14634_v1  ;;  %v2408_v9 = vpack.c.bf16 %v2374_v8, %v2373_v7  ;;  %v2830_v7 = vld [vmem:[%s14750_s18 + $0x89] sm:$0xff] }
 0x206   : > { %11622 = vmatmul.mubr.msk.bf16.gmra.mrb[36].mxu0 %vm632_vm2, %v15003_v11  ;;  %v2376_v11 = vld [vmem:[%s14750_s18 + $0xa8] sm:$0xff] }
 0x207   : > { %11625 = vmatprep.mubr.msk.bf16.mxu0 %vm14635_vm1, %v14634_v1  ;;  %v2409_v12 = vpack.c.bf16 %v2376_v11, %v2375_v10  ;;  %v2832_v10 = vld [vmem:[%s14750_s18 + $0x99] sm:$0xff] }
 0x20e   : > { %11626 = vmatmul.mubr.msk.bf16.gmra.mrb[40].mxu0 %vm632_vm2, %v15011_v14  ;;  %v2378_v14 = vld [vmem:[%s14750_s18 + $0xb8] sm:$0xff] }
 0x20f   : > { %11629 = vmatprep.mubr.msk.bf16.mxu0 %vm14635_vm1, %v14634_v1  ;;  %v2410_v15 = vpack.c.bf16 %v2378_v14, %v2377_v13  ;;  %v2834_v13 = vld [vmem:[%s14750_s18 + $0xa9] sm:$0xff] }
 0x216   : > { %11630 = vmatmul.mubr.msk.bf16.gmra.mrb[44].mxu0 %vm632_vm2, %v15019_v17  ;;  %v2380_v17 = vld [vmem:[%s14750_s18 + $0xc8] sm:$0xff] }
 0x217   : > { %11633 = vmatprep.mubr.msk.bf16.mxu0 %vm14635_vm1, %v14634_v1  ;;  %v2411_v18 = vpack.c.bf16 %v2380_v17, %v2379_v16  ;;  %v2836_v16 = vld [vmem:[%s14750_s18 + $0xb9] sm:$0xff] }
 0x21e   : > { %11634 = vmatmul.mubr.msk.bf16.gmra.mrb[48].mxu0 %vm632_vm2, %v15027_v20  ;;  %v2382_v20 = vld [vmem:[%s14750_s18 + $0xd8] sm:$0xff] }
 0x21f   : > { %11637 = vmatprep.mubr.msk.bf16.mxu0 %vm14635_vm1, %v14634_v1  ;;  %v2412_v21 = vpack.c.bf16 %v2382_v20, %v2381_v19  ;;  %v2838_v19 = vld [vmem:[%s14750_s18 + $0xc9] sm:$0xff] }
 0x226   : > { %11638 = vmatmul.mubr.msk.bf16.gmra.mrb[52].mxu0 %vm632_vm2, %v15035_v23  ;;  %v2384_v23 = vld [vmem:[%s14750_s18 + $0xe8] sm:$0xff] }
 0x227   : > { %11641 = vmatprep.mubr.msk.bf16.mxu0 %vm14635_vm1, %v14634_v1  ;;  %v2413_v24 = vpack.c.bf16 %v2384_v23, %v2383_v22  ;;  %v2840_v22 = vld [vmem:[%s14750_s18 + $0xd9] sm:$0xff] }
 0x22e   : > { %11642 = vmatmul.mubr.msk.bf16.gmra.mrb[56].mxu0 %vm632_vm2, %v1500_v26  ;;  %v2386_v26 = vld [vmem:[%s14750_s18 + $0xf8] sm:$0xff] }
 0x22f   : > { %11645 = vmatprep.mubr.msk.bf16.mxu0 %vm14635_vm1, %v14634_v1  ;;  %v2414_v27 = vpack.c.bf16 %v2386_v26, %v2385_v25  ;;  %v2842_v25 = vld [vmem:[%s14750_s18 + $0xe9] sm:$0xff] }
 0x236   : > { %11646 = vmatmul.mubr.msk.bf16.gmra.mrb[60].mxu0 %vm632_vm2, %v1501_v29  ;;  %v2388_v29 = vld [vmem:[%s14750_s18 + $0x108] sm:$0xff] }
 0x237   : > { %11649 = vmatprep.mubr.msk.bf16.mxu0 %vm14635_vm1, %v14634_v1  ;;  %v2415_v30 = vpack.c.bf16 %v2388_v29, %v2387_v28  ;;  %v2844_v28 = vld [vmem:[%s14750_s18 + $0xf9] sm:$0xff] }
 0x23e   : > { %11650 = vmatmul.mubr.msk.bf16.gmra.mrb[64].mxu0 %vm632_vm2, %v1502_v32  ;;  %v2390_v32 = vld [vmem:[%s14750_s18 + $0x118] sm:$0xff] }
 0x23f   : > { %11653 = vmatprep.mubr.msk.bf16.mxu0 %vm14635_vm1, %v14634_v1  ;;  %v2416_v33 = vpack.c.bf16 %v2390_v32, %v2389_v31  ;;  %v2846_v31 = vld [vmem:[%s14750_s18 + $0x109] sm:$0xff] }
 0x246   : > { %11654 = vmatmul.mubr.msk.bf16.gmra.mrb[68].mxu0 %vm632_vm2, %v1503_v35  ;;  %v2392_v35 = vld [vmem:[%s14750_s18 + $0x128] sm:$0xff] }
 0x247   : > { %11657 = vmatprep.mubr.msk.bf16.mxu0 %vm14635_vm1, %v14634_v1  ;;  %v2417_v36 = vpack.c.bf16 %v2392_v35, %v2391_v34  ;;  %v2848_v34 = vld [vmem:[%s14750_s18 + $0x119] sm:$0xff] }
 0x24e   : > { %11658 = vmatmul.mubr.msk.bf16.gmra.mrb[72].mxu0 %vm632_vm2, %v1504_v38  ;;  %v2394_v38 = vld [vmem:[%s14750_s18 + $0x138] sm:$0xff] }
 0x24f   : > { %11661 = vmatprep.mubr.msk.bf16.mxu0 %vm14635_vm1, %v14634_v1  ;;  %v2418_v39 = vpack.c.bf16 %v2394_v38, %v2393_v37  ;;  %v2850_v37 = vld [vmem:[%s14750_s18 + $0x129] sm:$0xff] }
 0x256   : > { %11662 = vmatmul.mubr.msk.bf16.gmra.mrb[76].mxu0 %vm632_vm2, %v1505_v41  ;;  %v2396_v41 = vld [vmem:[%s14750_s18 + $0x148] sm:$0xff] }
 0x257   : > { %11665 = vmatprep.mubr.msk.bf16.mxu0 %vm14635_vm1, %v14634_v1  ;;  %v2419_v42 = vpack.c.bf16 %v2396_v41, %v2395_v40  ;;  %v2852_v40 = vld [vmem:[%s14750_s18 + $0x139] sm:$0xff] }
 0x25e   : > { %11666 = vmatmul.mubr.msk.bf16.gmra.mrb[80].mxu0 %vm632_vm2, %v1963_v46  ;;  %v2399_v46 = vld [vmem:[%s14750_s18 + $0x160] sm:$0xff] }
 0x25f   : > { %11671 = vmatprep.mubr.msk.bf16.mxu0 %vm14635_vm1, %v14634_v1  ;;  %v2421_v48 = vpack.c.bf16 %v2400_v47, %v2399_v46  ;;  %v2856_v46 = vld [vmem:[%s14750_s18 + $0x159] sm:$0xff] }
 0x266   : > { %11672 = vmatmul.mubr.msk.bf16.vlgmr.msra.gmra.mrb[0].mxu0 %vm632_vm2, %v2401_v50  ;;  %v2818_v50 = vld [vmem:[%s14750_s18 + $0x29] sm:$0xff] }
 0x267   : > { %11756 = vmatpush3.bf16.msra.mxu0 %v2988_v51  ;;  %11675 = vmatprep.mubr.msk.bf16.mxu0 %vm14635_vm1, %v14634_v1  ;;  %v10514_v51 = vld [vmem:[%s17990_s2 + $0x18] sm:$0xf]  ;;  %v2859_v52 = vpack.c.bf16 %v2818_v50, %v2817_v49  ;;  %v2858_v49 = vld [vmem:[%s14750_s18 + $0x169] sm:$0xff] }
 0x268   : > { %11841 = vmatprep.subr.bf16.mxu0 %v14634_v1  ;;  %v3446_v53 = vsel %vm696_vm0, %v10514_v51, 0  ;;  %v10536_v51 = vld [vmem:[%s17990_s2 + $0x1c] sm:$0xf] }
 0x26e   : > { %11676 = vmatmul.mubr.msk.bf16.gmra.mrb[4].mxu0 %vm632_vm2, %v2402_v54  ;;  %v2819_v54 = vld [vmem:[%s14750_s18 + $0x31] sm:$0xff] }
 0x26f   : > { %11679 = vmatprep.mubr.msk.bf16.mxu0 %vm14635_vm1, %v14634_v1  ;;  %v15279_v56 = vpack.c.bf16 %v2820_v55, %v2819_v54  ;;  %v3316_v54 = vld [vmem:[%s14750_s18 + $0x179] sm:$0xff] }
 0x276   : > { %11680 = vmatmul.mubr.msk.bf16.gmra.mrb[8].mxu0 %vm632_vm2, %v2403_v57  ;;  %v2821_v57 = vld [vmem:[%s14750_s18 + $0x41] sm:$0xff] }
 0x277   : > { %11683 = vmatprep.mubr.msk.bf16.mxu0 %vm14635_vm1, %v14634_v1  ;;  %v2369_v1 = vld [vmem:[%s14750_s18 + $0x70] sm:$0xff]  ;;  %v15287_v59 = vpack.c.bf16 %v2822_v58, %v2821_v57  ;;  %v3734_v57 = vld [vmem:[%s14750_s18 + $0x3a] sm:$0xff] }
 0x278   : > { %v2406_v3 = vpack.c.bf16 %v2370_v2, %v2369_v1  ;;  %v2826_v1 = vld [vmem:[%s14750_s18 + $0x69] sm:$0xff]  ;;  %v10558_v58 = vld [vmem:[%s17990_s2 + $0x20] sm:$0xf] }
 0x27e   : > { %11684 = vmatmul.mubr.msk.bf16.gmra.mrb[12].mxu0 %vm632_vm2, %v2404_v60  ;;  %v2823_v60 = vld [vmem:[%s14750_s18 + $0x51] sm:$0xff] }
 0x27f   : > { %11687 = vmatprep.mubr.msk.bf16.mxu0 %vm14635_vm1, %v15178_v61  ;;  %v15295_v63 = vpack.c.bf16 %v2824_v62, %v2823_v60  ;;  %v4362_v60 = vsel %vm696_vm0, %v10558_v58, 0  ;;  %v3735_v62 = vld [vmem:[%s14750_s18 + $0x42] sm:$0xff] }
 0x280   : > { %v466_v58 = vld [vmem:[%s17989_s1 + $0xc0] sm:$0xff] }
 0x286   : > { %11688 = vmatmul.mubr.msk.bf16.gmra.mrb[16].mxu0 %vm632_vm2, %v2405_v0  ;;  %v2825_v0 = vld [vmem:[%s14750_s18 + $0x61] sm:$0xff] }
 0x287   : > { %11691 = vmatprep.mubr.msk.bf16.mxu0 %vm14635_vm1, %v15178_v61  ;;  %v15303_v2 = vpack.c.bf16 %v2826_v1, %v2825_v0  ;;  %v3737_v1 = vld [vmem:[%s14750_s18 + $0x52] sm:$0xff] }
 0x28e   : > { %11692 = vmatmul.mubr.msk.bf16.gmra.mrb[20].mxu0 %vm632_vm2, %v2406_v3  ;;  %v2827_v3 = vld [vmem:[%s14750_s18 + $0x71] sm:$0xff] }
 0x28f   : > { %11695 = vmatprep.mubr.msk.bf16.mxu0 %vm14635_vm1, %v15178_v61  ;;  %v15311_v5 = vpack.c.bf16 %v2828_v4, %v2827_v3  ;;  %v3739_v4 = vld [vmem:[%s14750_s18 + $0x62] sm:$0xff] }
 0x296   : > { %11696 = vmatmul.mubr.msk.bf16.gmra.mrb[24].mxu0 %vm632_vm2, %v2407_v6  ;;  %v2829_v6 = vld [vmem:[%s14750_s18 + $0x81] sm:$0xff] }
 0x297   : > { %11699 = vmatprep.mubr.msk.bf16.mxu0 %vm14635_vm1, %v15178_v61  ;;  %v15319_v8 = vpack.c.bf16 %v2830_v7, %v2829_v6  ;;  %v3741_v7 = vld [vmem:[%s14750_s18 + $0x72] sm:$0xff] }
 0x29e   : > { %11700 = vmatmul.mubr.msk.bf16.gmra.mrb[28].mxu0 %vm632_vm2, %v2408_v9  ;;  %v2831_v9 = vld [vmem:[%s14750_s18 + $0x91] sm:$0xff] }
 0x29f   : > { %11703 = vmatprep.mubr.msk.bf16.mxu0 %vm14635_vm1, %v15178_v61  ;;  %v15327_v11 = vpack.c.bf16 %v2832_v10, %v2831_v9  ;;  %v3743_v10 = vld [vmem:[%s14750_s18 + $0x82] sm:$0xff] }
 0x2a6   : > { %11704 = vmatmul.mubr.msk.bf16.gmra.mrb[32].mxu0 %vm632_vm2, %v2409_v12  ;;  %v2833_v12 = vld [vmem:[%s14750_s18 + $0xa1] sm:$0xff] }
 0x2a7   : > { %11707 = vmatprep.mubr.msk.bf16.mxu0 %vm14635_vm1, %v15178_v61  ;;  %v15335_v14 = vpack.c.bf16 %v2834_v13, %v2833_v12  ;;  %v3745_v13 = vld [vmem:[%s14750_s18 + $0x92] sm:$0xff] }
 0x2ae   : > { %11708 = vmatmul.mubr.msk.bf16.gmra.mrb[36].mxu0 %vm632_vm2, %v2410_v15  ;;  %v2835_v15 = vld [vmem:[%s14750_s18 + $0xb1] sm:$0xff] }
 0x2af   : > { %11711 = vmatprep.mubr.msk.bf16.mxu0 %vm14635_vm1, %v15178_v61  ;;  %v15343_v17 = vpack.c.bf16 %v2836_v16, %v2835_v15  ;;  %v442_v16 = vld [vmem:[%s17989_s1] sm:$0xff] }
 0x2b6   : > { %11712 = vmatmul.mubr.msk.bf16.gmra.mrb[40].mxu0 %vm632_vm2, %v2411_v18  ;;  %v2837_v18 = vld [vmem:[%s14750_s18 + $0xc1] sm:$0xff] }
 0x2b7   : > { %11715 = vmatprep.mubr.msk.bf16.mxu0 %vm14635_vm1, %v15178_v61  ;;  %v15351_v20 = vpack.c.bf16 %v2838_v19, %v2837_v18  ;;  %v3748_v18 = vld [vmem:[%s14750_s18 + $0xaa] sm:$0xff]  ;;  %v14636_v19 = vmov 0  }
 0x2b8   : > { %14543 = vset.pattern.permute.xlu0 %v14636_v19  ;;  %14544 = vset.pattern.permute.xlu1 %v14636_v19  ;;  %v3766_v19 = vld [vmem:[%s14750_s18 + $0x13a] sm:$0xff] }
 0x2b9   : > { %4833 = vperm.xlu0 %14543, %v442_v16   ;;  %v478_v16 = vld [vmem:[%s17989_s1 + $0x120] sm:$0xff] }
 0x2be   : > { %11716 = vmatmul.mubr.msk.bf16.gmra.mrb[44].mxu0 %vm632_vm2, %v2412_v21  ;;  %v2839_v21 = vld [vmem:[%s14750_s18 + $0xd1] sm:$0xff] }
 0x2bf   : > { %11719 = vmatprep.mubr.msk.bf16.mxu0 %vm14635_vm1, %v15178_v61  ;;  %v15359_v23 = vpack.c.bf16 %v2840_v22, %v2839_v21  ;;  %v444_v22 = vld [vmem:[%s17989_s1 + $0x10] sm:$0xff] }
 0x2c0   : > { %4843 = vperm.xlu1 %14544, %v444_v22   ;;  %v477_v22 = vld [vmem:[%s17989_s1 + $0x118] sm:$0xff] }
 0x2c6   : > { %11720 = vmatmul.mubr.msk.bf16.gmra.mrb[48].mxu0 %vm632_vm2, %v2413_v24  ;;  %v2841_v24 = vld [vmem:[%s14750_s18 + $0xe1] sm:$0xff] }
 0x2c7   : > { %11723 = vmatprep.mubr.msk.bf16.mxu0 %vm14635_vm1, %v15178_v61  ;;  %v15367_v26 = vpack.c.bf16 %v2842_v25, %v2841_v24  ;;  %v3749_v24 = vld [vmem:[%s14750_s18 + $0xb2] sm:$0xff]  ;;  %v3750_v25 = vld [vmem:[%s14750_s18 + $0xba] sm:$0xff] }
 0x2ce   : > { %11724 = vmatmul.mubr.msk.bf16.gmra.mrb[52].mxu0 %vm632_vm2, %v2414_v27  ;;  %v2843_v27 = vld [vmem:[%s14750_s18 + $0xf1] sm:$0xff] }
 0x2cf   : > { %11727 = vmatprep.mubr.msk.bf16.mxu0 %vm14635_vm1, %v15178_v61  ;;  %v15375_v29 = vpack.c.bf16 %v2844_v28, %v2843_v27  ;;  %v448_v27 = vld [vmem:[%s17989_s1 + $0x30] sm:$0xff]  ;;  %v3783_v28 = vpack.c.bf16 %v3750_v25, %v3749_v24  ;;  %v479_v25 = vld [vmem:[%s17989_s1 + $0x128] sm:$0xff] }
 0x2d6   : > { %11728 = vmatmul.mubr.msk.bf16.gmra.mrb[56].mxu0 %vm632_vm2, %v2415_v30  ;;  %v2845_v30 = vld [vmem:[%s14750_s18 + $0x101] sm:$0xff] }
 0x2d7   : > { %11731 = vmatprep.mubr.msk.bf16.mxu0 %vm14635_vm1, %v15178_v61  ;;  %v15383_v32 = vpack.c.bf16 %v2846_v31, %v2845_v30  ;;  %v450_v30 = vld [vmem:[%s17989_s1 + $0x40] sm:$0xff] }
 0x2d8   : > { %v3751_v31 = vld [vmem:[%s14750_s18 + $0xc2] sm:$0xff] }
 0x2de   : > { %11732 = vmatmul.mubr.msk.bf16.gmra.mrb[60].mxu0 %vm632_vm2, %v2416_v33  ;;  %v2847_v33 = vld [vmem:[%s14750_s18 + $0x111] sm:$0xff] }
 0x2df   : > { %11735 = vmatprep.mubr.msk.bf16.mxu0 %vm14635_vm1, %v15178_v61  ;;  %v2874_v35 = vpack.c.bf16 %v2848_v34, %v2847_v33  ;;  %v449_v33 = vld [vmem:[%s17989_s1 + $0x38] sm:$0xff]  ;;  %v452_v34 = vld [vmem:[%s17989_s1 + $0x50] sm:$0xff] }
 0x2e6   : > { %11736 = vmatmul.mubr.msk.bf16.gmra.mrb[64].mxu0 %vm632_vm2, %v2417_v36  ;;  %v2849_v36 = vld [vmem:[%s14750_s18 + $0x121] sm:$0xff] }
 0x2e7   : > { %11739 = vmatprep.mubr.msk.bf16.mxu0 %vm14635_vm1, %v15178_v61  ;;  %v2875_v38 = vpack.c.bf16 %v2850_v37, %v2849_v36  ;;  %v451_v36 = vld [vmem:[%s17989_s1 + $0x48] sm:$0xff]  ;;  %v454_v37 = vld [vmem:[%s17989_s1 + $0x60] sm:$0xff] }
 0x2ee   : > { %11740 = vmatmul.mubr.msk.bf16.gmra.mrb[68].mxu0 %vm632_vm2, %v2418_v39  ;;  %v2851_v39 = vld [vmem:[%s14750_s18 + $0x131] sm:$0xff] }
 0x2ef   : > { %11743 = vmatprep.mubr.msk.bf16.mxu0 %vm14635_vm1, %v15178_v61  ;;  %v2876_v41 = vpack.c.bf16 %v2852_v40, %v2851_v39  ;;  %v3754_v39 = vld [vmem:[%s14750_s18 + $0xda] sm:$0xff] }
 0x2f0   : > { %v453_v40 = vld [vmem:[%s17989_s1 + $0x58] sm:$0xff] }
 0x2f6   : > { %11744 = vmatmul.mubr.msk.bf16.gmra.mrb[72].mxu0 %vm632_vm2, %v2419_v42  ;;  %v2853_v42 = vld [vmem:[%s14750_s18 + $0x141] sm:$0xff] }
 0x2f7   : > { %11747 = vmatprep.mubr.msk.bf16.mxu0 %vm14635_vm1, %v15178_v61  ;;  %v2877_v44 = vpack.c.bf16 %v2854_v43, %v2853_v42  ;;  %v455_v43 = vld [vmem:[%s17989_s1 + $0x68] sm:$0xff] }
 0x2fe   : > { %11748 = vmatmul.mubr.msk.bf16.gmra.mrb[76].mxu0 %vm632_vm2, %v2420_v45  ;;  %v2855_v45 = vld [vmem:[%s14750_s18 + $0x151] sm:$0xff] }
 0x2ff   : > { %11751 = vmatprep.mubr.msk.bf16.mxu0 %vm14635_vm1, %v15178_v61  ;;  %v2878_v47 = vpack.c.bf16 %v2856_v46, %v2855_v45  ;;  %v3755_v45 = vld [vmem:[%s14750_s18 + $0xe2] sm:$0xff]  ;;  %v3756_v46 = vld [vmem:[%s14750_s18 + $0xea] sm:$0xff] }
 0x306   : > { %11752 = vmatmul.mubr.msk.bf16.gmra.mrb[80].mxu0 %vm632_vm2, %v2421_v48  ;;  %v2857_v48 = vld [vmem:[%s14750_s18 + $0x161] sm:$0xff] }
 0x307   : > { %11757 = vmatprep.mubr.msk.bf16.mxu0 %vm14635_vm1, %v15178_v61  ;;  %v2879_v50 = vpack.c.bf16 %v2858_v49, %v2857_v48  ;;  %v460_v48 = vld [vmem:[%s17989_s1 + $0x90] sm:$0xff]  ;;  %v3786_v49 = vpack.c.bf16 %v3756_v46, %v3755_v45 }
 0x30e   : > { %11758 = vmatmul.mubr.msk.bf16.vlgmr.msra.gmra.mrb[0].mxu0 %vm632_vm2, %v2859_v52  ;;  %v3904_v52 = vsel %vm696_vm0, %v10536_v51, 0  ;;  %v462_v51 = vld [vmem:[%s17989_s1 + $0xa0] sm:$0xff] }
 0x30f   : > { %11842 = vmatpush3.bf16.msra.mxu0 %v3446_v53  ;;  %11761 = vmatprep.mubr.msk.bf16.mxu0 %vm14635_vm1, %v15178_v61  ;;  %v3315_v53 = vld [vmem:[%s14750_s18 + $0x171] sm:$0xff] }
 0x310   : > { %11927 = vmatprep.subr.bf16.mxu0 %v15178_v61  ;;  %v3337_v55 = vpack.c.bf16 %v3316_v54, %v3315_v53  ;;  %v3758_v53 = vld [vmem:[%s14750_s18 + $0xfa] sm:$0xff] }
 0x311   : > { %v461_v54 = vld [vmem:[%s17989_s1 + $0x98] sm:$0xff] }
 0x316   : > { %11762 = vmatmul.mubr.msk.bf16.gmra.mrb[4].mxu0 %vm632_vm2, %v15279_v56 }
 0x317   : > { %11765 = vmatprep.mubr.msk.bf16.mxu0 %vm14635_vm1, %v15178_v61 }
 0x31e   : > { %11766 = vmatmul.mubr.msk.bf16.gmra.mrb[8].mxu0 %vm632_vm2, %v15287_v59 }
 0x31f   : > { %11769 = vmatprep.mubr.msk.bf16.mxu0 %vm14635_vm1, %v15178_v61 }
 0x326   : > { %11770 = vmatmul.mubr.msk.bf16.gmra.mrb[12].mxu0 %vm632_vm2, %v15295_v63 }
 0x327   : > { %11773 = vmatprep.mubr.msk.bf16.mxu0 %vm14635_vm1, %v15178_v61 }
 0x32e   : > { %11774 = vmatmul.mubr.msk.bf16.gmra.mrb[16].mxu0 %vm632_vm2, %v15303_v2 }
 0x32f   : > { %11777 = vmatprep.mubr.msk.bf16.mxu0 %vm14635_vm1, %v15178_v61 }
 0x336   : > { %11778 = vmatmul.mubr.msk.bf16.gmra.mrb[20].mxu0 %vm632_vm2, %v15311_v5 }
 0x337   : > { %11781 = vmatprep.mubr.msk.bf16.mxu0 %vm14635_vm1, %v15178_v61 }
 0x33e   : > { %11782 = vmatmul.mubr.msk.bf16.gmra.mrb[24].mxu0 %vm632_vm2, %v15319_v8 }
 0x33f   : > { %11785 = vmatprep.mubr.msk.bf16.mxu0 %vm14635_vm1, %v15178_v61 }
 0x346   : > { %11786 = vmatmul.mubr.msk.bf16.gmra.mrb[28].mxu0 %vm632_vm2, %v15327_v11 }
 0x347   : > { %11789 = vmatprep.mubr.msk.bf16.mxu0 %vm14635_vm1, %v15178_v61 }
 0x34e   : > { %11790 = vmatmul.mubr.msk.bf16.gmra.mrb[32].mxu0 %vm632_vm2, %v15335_v14 }
 0x34f   : > { %11793 = vmatprep.mubr.msk.bf16.mxu0 %vm14635_vm1, %v15178_v61 }
 0x356   : > { %11794 = vmatmul.mubr.msk.bf16.gmra.mrb[36].mxu0 %vm632_vm2, %v15343_v17 }
 0x357   : > { %11797 = vmatprep.mubr.msk.bf16.mxu0 %vm14635_vm1, %v15178_v61 }
 0x35e   : > { %11798 = vmatmul.mubr.msk.bf16.gmra.mrb[40].mxu0 %vm632_vm2, %v15351_v20 }
 0x35f   : > { %11801 = vmatprep.mubr.msk.bf16.mxu0 %vm14635_vm1, %v15178_v61 }
 0x366   : > { %11802 = vmatmul.mubr.msk.bf16.gmra.mrb[44].mxu0 %vm632_vm2, %v15359_v23 }
 0x367   : > { %11805 = vmatprep.mubr.msk.bf16.mxu0 %vm14635_vm1, %v15178_v61 }
 0x36e   : > { %11806 = vmatmul.mubr.msk.bf16.gmra.mrb[48].mxu0 %vm632_vm2, %v15367_v26 }
 0x36f   : > { %11809 = vmatprep.mubr.msk.bf16.mxu0 %vm14635_vm1, %v15178_v61 }
 0x376   : > { %11810 = vmatmul.mubr.msk.bf16.gmra.mrb[52].mxu0 %vm632_vm2, %v15375_v29 }
 0x377   : > { %11813 = vmatprep.mubr.msk.bf16.mxu0 %vm14635_vm1, %v15178_v61 }
 0x37e   : > { %11814 = vmatmul.mubr.msk.bf16.gmra.mrb[56].mxu0 %vm632_vm2, %v15383_v32 }
 0x37f   : > { %11817 = vmatprep.mubr.msk.bf16.mxu0 %vm14635_vm1, %v15178_v61 }
 0x386   : > { %11818 = vmatmul.mubr.msk.bf16.gmra.mrb[60].mxu0 %vm632_vm2, %v2874_v35 }
 0x387   : > { %11821 = vmatprep.mubr.msk.bf16.mxu0 %vm14635_vm1, %v15178_v61 }
 0x38e   : > { %11822 = vmatmul.mubr.msk.bf16.gmra.mrb[64].mxu0 %vm632_vm2, %v2875_v38 }
 0x38f   : > { %11825 = vmatprep.mubr.msk.bf16.mxu0 %vm14635_vm1, %v15178_v61 }
 0x396   : > { %11826 = vmatmul.mubr.msk.bf16.gmra.mrb[68].mxu0 %vm632_vm2, %v2876_v41 }
 0x397   : > { %11829 = vmatprep.mubr.msk.bf16.mxu0 %vm14635_vm1, %v15178_v61 }
 0x39e   : > { %11830 = vmatmul.mubr.msk.bf16.gmra.mrb[72].mxu0 %vm632_vm2, %v2877_v44 }
 0x39f   : > { %11833 = vmatprep.mubr.msk.bf16.mxu0 %vm14635_vm1, %v15178_v61 }
 0x3a6   : > { %11834 = vmatmul.mubr.msk.bf16.gmra.mrb[76].mxu0 %vm632_vm2, %v2878_v47 }
 0x3a7   : > { %11837 = vmatprep.mubr.msk.bf16.mxu0 %vm14635_vm1, %v15178_v61 }
 0x3ae   : > { %11838 = vmatmul.mubr.msk.bf16.gmra.mrb[80].mxu0 %vm632_vm2, %v2879_v50 }
 0x3af   : > { %11843 = vmatprep.mubr.msk.bf16.mxu0 %vm14635_vm1, %v15178_v61 }
 0x3b6   : > { %11844 = vmatmul.mubr.msk.bf16.vlgmr.msra.gmra.mrb[0].mxu0 %vm632_vm2, %v15279_v56  ;;  %v3733_v56 = vld [vmem:[%s14750_s18 + $0x32] sm:$0xff] }
 0x3b7   : > { %11928 = vmatpush3.bf16.msra.mxu0 %v3904_v52  ;;  %11847 = vmatprep.mubr.msk.bf16.mxu0 %vm14635_vm1, %v15178_v61  ;;  %v3757_v52 = vld [vmem:[%s14750_s18 + $0xf2] sm:$0xff] }
 0x3b8   : > { %12013 = vmatprep.subr.bf16.mxu0 %v15178_v61 }
 0x3be   : > { %11848 = vmatmul.mubr.msk.bf16.gmra.mrb[4].mxu0 %vm632_vm2, %v15287_v59  ;;  %v3775_v59 = vpack.c.bf16 %v3734_v57, %v3733_v56  ;;  %v3787_v56 = vpack.c.bf16 %v3758_v53, %v3757_v52  ;;  %v463_v57 = vld [vmem:[%s17989_s1 + $0xa8] sm:$0xff] }
 0x3bf   : > { %11851 = vmatprep.mubr.msk.bf16.mxu0 %vm14635_vm1, %v15178_v61  ;;  %v558_v53 = vld [vmem:[%s14750_s18 + $0x10d] sm:$0xff] }
 0x3c6   : > { %11852 = vmatmul.mubr.msk.bf16.gmra.mrb[8].mxu0 %vm632_vm2, %v15295_v63  ;;  %v3736_v63 = vld [vmem:[%s14750_s18 + $0x4a] sm:$0xff] }
 0x3c7   : > { %11855 = vmatprep.mubr.msk.bf16.mxu0 %vm14635_vm1, %v15178_v61  ;;  %v3776_v0 = vpack.c.bf16 %v3736_v63, %v3735_v62  ;;  %v465_v62 = vld [vmem:[%s17989_s1 + $0xb8] sm:$0xff]  ;;  %v468_v63 = vld [vmem:[%s17989_s1 + $0xd0] sm:$0xff] }
 0x3ce   : > { %11856 = vmatmul.mubr.msk.bf16.gmra.mrb[12].mxu0 %vm632_vm2, %v15303_v2  ;;  %v3738_v2 = vld [vmem:[%s14750_s18 + $0x5a] sm:$0xff] }
 0x3cf   : > { %11859 = vmatprep.mubr.msk.bf16.mxu0 %vm14635_vm1, %v15178_v61  ;;  %v3777_v3 = vpack.c.bf16 %v3738_v2, %v3737_v1  ;;  %v467_v1 = vld [vmem:[%s17989_s1 + $0xc8] sm:$0xff]  ;;  %v470_v2 = vld [vmem:[%s17989_s1 + $0xe0] sm:$0xff] }
 0x3d6   : > { %11860 = vmatmul.mubr.msk.bf16.gmra.mrb[16].mxu0 %vm632_vm2, %v15311_v5  ;;  %v3740_v5 = vld [vmem:[%s14750_s18 + $0x6a] sm:$0xff] }
 0x3d7   : > { %11863 = vmatprep.mubr.msk.bf16.mxu0 %vm14635_vm1, %v15178_v61  ;;  %v3778_v6 = vpack.c.bf16 %v3740_v5, %v3739_v4  ;;  %v3762_v4 = vld [vmem:[%s14750_s18 + $0x11a] sm:$0xff] }
 0x3d8   : > { %v469_v5 = vld [vmem:[%s17989_s1 + $0xd8] sm:$0xff] }
 0x3de   : > { %11864 = vmatmul.mubr.msk.bf16.gmra.mrb[20].mxu0 %vm632_vm2, %v15319_v8  ;;  %v3742_v8 = vld [vmem:[%s14750_s18 + $0x7a] sm:$0xff] }
 0x3df   : > { %11867 = vmatprep.mubr.msk.bf16.mxu0 %vm14635_vm1, %v15178_v61  ;;  %v3779_v9 = vpack.c.bf16 %v3742_v8, %v3741_v7  ;;  %v471_v8 = vld [vmem:[%s17989_s1 + $0xe8] sm:$0xff] }
 0x3e6   : > { %11868 = vmatmul.mubr.msk.bf16.gmra.mrb[24].mxu0 %vm632_vm2, %v15327_v11  ;;  %v3744_v11 = vld [vmem:[%s14750_s18 + $0x8a] sm:$0xff] }
 0x3e7   : > { %11871 = vmatprep.mubr.msk.bf16.mxu0 %vm14635_vm1, %v15178_v61  ;;  %v3780_v12 = vpack.c.bf16 %v3744_v11, %v3743_v10  ;;  %v3763_v10 = vld [vmem:[%s14750_s18 + $0x122] sm:$0xff]  ;;  %v3764_v11 = vld [vmem:[%s14750_s18 + $0x12a] sm:$0xff] }
 0x3ee   : > { %11872 = vmatmul.mubr.msk.bf16.gmra.mrb[28].mxu0 %vm632_vm2, %v15335_v14  ;;  %v3746_v14 = vld [vmem:[%s14750_s18 + $0x9a] sm:$0xff] }
 0x3ef   : > { %11875 = vmatprep.mubr.msk.bf16.mxu0 %vm14635_vm1, %v15178_v61  ;;  %v3781_v15 = vpack.c.bf16 %v3746_v14, %v3745_v13  ;;  %v476_v13 = vld [vmem:[%s17989_s1 + $0x110] sm:$0xff]  ;;  %v3790_v14 = vpack.c.bf16 %v3764_v11, %v3763_v10  ;;  %v565_v10 = vld [vmem:[%s14750_s18 + $0x145] sm:$0xff] }
 0x3f0   : > { %v4197_v11 = vld [vmem:[%s14750_s18 + $0x63] sm:$0xff] }
 0x3f6   : > { %11876 = vmatmul.mubr.msk.bf16.gmra.mrb[32].mxu0 %vm632_vm2, %v15343_v17  ;;  %v3747_v17 = vld [vmem:[%s14750_s18 + $0xa2] sm:$0xff] }
 0x3f7   : > { %11879 = vmatprep.mubr.msk.bf16.mxu0 %vm14635_vm1, %v15178_v61  ;;  %v3782_v21 = vpack.c.bf16 %v3748_v18, %v3747_v17  ;;  %v548_v17 = vld [vmem:[%s14750_s18 + $0xbd] sm:$0xff]  ;;  %v3765_v18 = vld [vmem:[%s14750_s18 + $0x132] sm:$0xff] }
 0x3f8   : > { %v3791_v24 = vpack.c.bf16 %v3766_v19, %v3765_v18  ;;  %v566_v18 = vld [vmem:[%s14750_s18 + $0x14d] sm:$0xff]  ;;  %v567_v19 = vld [vmem:[%s14750_s18 + $0x155] sm:$0xff] }
 0x3fe   : > { %11880 = vmatmul.mubr.msk.bf16.gmra.mrb[36].mxu0 %vm632_vm2, %v15351_v20  ;;  %v443_v20 = vld [vmem:[%s17989_s1 + $0x8] sm:$0xff] }
 0x3ff   : > { %11883 = vmatprep.mubr.msk.bf16.mxu0 %vm14635_vm1, %v15178_v61  ;;  %4838 = vperm.xlu0 %14543, %v443_v20   ;;  %v549_v20 = vld [vmem:[%s14750_s18 + $0xc5] sm:$0xff] }
 0x406   : > { %11884 = vmatmul.mubr.msk.bf16.gmra.mrb[40].mxu0 %vm632_vm2, %v15359_v23  ;;  %v446_v23 = vld [vmem:[%s17989_s1 + $0x20] sm:$0xff] }
 0x407   : > { %11887 = vmatprep.mubr.msk.bf16.mxu0 %vm14635_vm1, %v15178_v61  ;;  %4853 = vperm.xlu0 %14543, %v446_v23   ;;  %v480_v23 = vld [vmem:[%s17989_s1 + $0x130] sm:$0xff] }
 0x40b   : > { %4863 = vperm.xlu0 %14543, %v448_v27   ;;  %v550_v27 = vld [vmem:[%s14750_s18 + $0xcd] sm:$0xff] }
 0x40e   : > { %11888 = vmatmul.mubr.msk.bf16.gmra.mrb[44].mxu0 %vm632_vm2, %v15367_v26  ;;  %v445_v26 = vld [vmem:[%s17989_s1 + $0x18] sm:$0xff] }
 0x40f   : > { %11891 = vmatprep.mubr.msk.bf16.mxu0 %vm14635_vm1, %v15178_v61  ;;  %4848 = vperm.xlu1 %14544, %v445_v26   ;;  %v482_v26 = vld [vmem:[%s17989_s1 + $0x140] sm:$0xff] }
 0x410   : > { %4873 = vperm.xlu0 %14543, %v450_v30   ;;  %v551_v30 = vld [vmem:[%s14750_s18 + $0xd5] sm:$0xff] }
 0x414   : > { %4883 = vperm.xlu0 %14543, %v452_v34   ;;  %v483_v34 = vld [vmem:[%s17989_s1 + $0x148] sm:$0xff] }
 0x416   : > { %11892 = vmatmul.mubr.msk.bf16.gmra.mrb[48].mxu0 %vm632_vm2, %v15375_v29  ;;  %v447_v29 = vld [vmem:[%s17989_s1 + $0x28] sm:$0xff] }
 0x417   : > { %11895 = vmatprep.mubr.msk.bf16.mxu0 %vm14635_vm1, %v15178_v61  ;;  %4858 = vperm.xlu1 %14544, %v447_v29   ;;  %v3768_v29 = vld [vmem:[%s14750_s18 + $0x14a] sm:$0xff] }
 0x418   : > { %4893 = vperm.xlu0 %14543, %v454_v37   ;;  %v3769_v37 = vld [vmem:[%s14750_s18 + $0x152] sm:$0xff] }
 0x41b   : > { %4868 = vperm.xlu1 %14544, %v449_v33  }
 0x41e   : > { %11896 = vmatmul.mubr.msk.bf16.gmra.mrb[52].mxu0 %vm632_vm2, %v15383_v32  ;;  %v3752_v32 = vld [vmem:[%s14750_s18 + $0xca] sm:$0xff] }
 0x41f   : > { %11899 = vmatprep.mubr.msk.bf16.mxu0 %vm14635_vm1, %v15178_v61  ;;  %4878 = vperm.xlu1 %14544, %v451_v36   ;;  %v553_v36 = vld [vmem:[%s14750_s18 + $0xe5] sm:$0xff] }
 0x423   : > { %4888 = vperm.xlu1 %14544, %v453_v40  }
 0x426   : > { %11900 = vmatmul.mubr.msk.bf16.gmra.mrb[56].mxu0 %vm632_vm2, %v2874_v35  ;;  %v3784_v35 = vpack.c.bf16 %v3752_v32, %v3751_v31  ;;  %v580_v31 = vpack.c.bf16 %v551_v30, %v550_v27  ;;  %v481_v32 = vld [vmem:[%s17989_s1 + $0x138] sm:$0xff]  ;;  %v14549_v27 = vld [vmem:[%s17993_s5 + $0x20] sm:$0xff]   ;;  %v14550_v30 = vld [vmem:[%s17993_s5 + $0x28] sm:$0xff]  }
 0x427   : > { %11903 = vmatprep.mubr.msk.bf16.mxu0 %vm14635_vm1, %v15178_v61  ;;  %4898 = vperm.xlu1 %14544, %v455_v43   ;;  %v3771_v43 = vld [vmem:[%s14750_s18 + $0x162] sm:$0xff] }
 0x42e   : > { %11904 = vmatmul.mubr.msk.bf16.gmra.mrb[60].mxu0 %vm632_vm2, %v2875_v38  ;;  %v3753_v38 = vld [vmem:[%s14750_s18 + $0xd2] sm:$0xff] }
 0x42f   : > { %11907 = vmatprep.mubr.msk.bf16.mxu0 %vm14635_vm1, %v15178_v61  ;;  %v3785_v42 = vpack.c.bf16 %v3754_v39, %v3753_v38  ;;  %v3770_v38 = vld [vmem:[%s14750_s18 + $0x15a] sm:$0xff] }
 0x430   : > { %v3793_v40 = vpack.c.bf16 %v3770_v38, %v3769_v37  ;;  %v4208_v37 = vld [vmem:[%s14750_s18 + $0xbb] sm:$0xff] }
 0x436   : > { %11908 = vmatmul.mubr.msk.bf16.gmra.mrb[64].mxu0 %vm632_vm2, %v2876_v41  ;;  %v456_v41 = vld [vmem:[%s17989_s1 + $0x70] sm:$0xff] }
 0x437   : > { %11911 = vmatprep.mubr.msk.bf16.mxu0 %vm14635_vm1, %v15178_v61  ;;  %4903 = vperm.xlu0 %14543, %v456_v41   ;;  %v554_v41 = vld [vmem:[%s14750_s18 + $0xed] sm:$0xff] }
 0x43e   : > { %11912 = vmatmul.mubr.msk.bf16.gmra.mrb[68].mxu0 %vm632_vm2, %v2877_v44  ;;  %v458_v44 = vld [vmem:[%s17989_s1 + $0x80] sm:$0xff] }
 0x43f   : > { %11915 = vmatprep.mubr.msk.bf16.mxu0 %vm14635_vm1, %v15178_v61  ;;  %4913 = vperm.xlu0 %14543, %v458_v44   ;;  %v3772_v44 = vld [vmem:[%s14750_s18 + $0x16a] sm:$0xff] }
 0x440   : > { %v3794_v46 = vpack.c.bf16 %v3772_v44, %v3771_v43  ;;  %v4212_v43 = vld [vmem:[%s14750_s18 + $0xdb] sm:$0xff] }
 0x443   : > { %4923 = vperm.xlu0 %14543, %v460_v48   ;;  %v557_v48 = vld [vmem:[%s14750_s18 + $0x105] sm:$0xff] }
 0x446   : > { %11916 = vmatmul.mubr.msk.bf16.gmra.mrb[72].mxu0 %vm632_vm2, %v2878_v47  ;;  %v457_v47 = vld [vmem:[%s17989_s1 + $0x78] sm:$0xff] }
 0x447   : > { %11919 = vmatprep.mubr.msk.bf16.mxu0 %vm14635_vm1, %v15178_v61  ;;  %4908 = vperm.xlu1 %14544, %v457_v47   ;;  %v556_v47 = vld [vmem:[%s14750_s18 + $0xfd] sm:$0xff] }
 0x448   : > { %4933 = vperm.xlu0 %14543, %v462_v51   ;;  %v583_v51 = vpack.c.bf16 %v557_v48, %v556_v47  ;;  %v4215_v48 = vld [vmem:[%s14750_s18 + $0xf3] sm:$0xff] }
 0x44e   : > { %11920 = vmatmul.mubr.msk.bf16.gmra.mrb[76].mxu0 %vm632_vm2, %v2879_v50  ;;  %v459_v50 = vld [vmem:[%s17989_s1 + $0x88] sm:$0xff] }
 0x44f   : > { %11923 = vmatprep.mubr.msk.bf16.mxu0 %vm14635_vm1, %v15178_v61  ;;  %4918 = vperm.xlu1 %14544, %v459_v50   ;;  %v3774_v50 = vld [vmem:[%s14750_s18 + $0x17a] sm:$0xff] }
 0x453   : > { %4928 = vperm.xlu1 %14544, %v461_v54   ;;  %v559_v54 = vld [vmem:[%s14750_s18 + $0x115] sm:$0xff] }
 0x456   : > { %11924 = vmatmul.mubr.msk.bf16.gmra.mrb[80].mxu0 %vm632_vm2, %v3337_v55  ;;  %v464_v55 = vld [vmem:[%s17989_s1 + $0xb0] sm:$0xff] }
 0x457   : > { %11929 = vmatprep.mubr.msk.bf16.mxu0 %vm14635_vm1, %v15178_v61  ;;  %4943 = vperm.xlu0 %14543, %v464_v55   ;;  %v4191_v55 = vld [vmem:[%s14750_s18 + $0x33] sm:$0xff] }
 0x458   : > { %4938 = vperm.xlu1 %14544, %v463_v57   ;;  %v584_v57 = vpack.c.bf16 %v559_v54, %v558_v53  ;;  %v5218_v53 = vld [vmem:[#allocation2 + $0x15] sm:$0xff] }
 0x45b   : > { %4953 = vperm.xlu0 %14543, %v466_v58  }
 0x45c   : > { %4948 = vperm.xlu1 %14544, %v465_v62   ;;  %v4193_v62 = vld [vmem:[%s14750_s18 + $0x43] sm:$0xff] }
 0x45e   : > { %11930 = vmatmul.mubr.msk.bf16.vlgmr.msra.gmra.mrb[0].mxu0 %vm632_vm2, %v3775_v59  ;;  %v3759_v59 = vld [vmem:[%s14750_s18 + $0x102] sm:$0xff] }
 0x45f   : > { %12014 = vmatpush3.bf16.msra.mxu0 %v4362_v60  ;;  %11933 = vmatprep.mubr.msk.bf16.mxu0 %vm14635_vm1, %v15178_v61  ;;  %v3760_v60 = vld [vmem:[%s14750_s18 + $0x10a] sm:$0xff] }
 0x460   : > { %4963 = vperm.xlu0 %14543, %v468_v63   ;;  %4958 = vperm.xlu1 %14544, %v467_v1   ;;  %v4194_v63 = vld [vmem:[%s14750_s18 + $0x4b] sm:$0xff] }
 0x461   : > { %v4234_v1 = vpack.c.bf16 %v4194_v63, %v4193_v62  ;;  %v4221_v63 = vld [vmem:[%s14750_s18 + $0x123] sm:$0xff] }
 0x464   : > { %4973 = vperm.xlu0 %14543, %v470_v2   ;;  %4968 = vperm.xlu1 %14544, %v469_v5   ;;  %v562_v2 = vld [vmem:[%s14750_s18 + $0x12d] sm:$0xff]  ;;  %v4196_v5 = vld [vmem:[%s14750_s18 + $0x5b] sm:$0xff] }
 0x466   : > { %11934 = vmatmul.mubr.msk.bf16.gmra.mrb[4].mxu0 %vm632_vm2, %v3776_v0  ;;  %v3788_v0 = vpack.c.bf16 %v3760_v60, %v3759_v59  ;;  %v560_v59 = vld [vmem:[%s14750_s18 + $0x11d] sm:$0xff]  ;;  %v561_v60 = vld [vmem:[%s14750_s18 + $0x125] sm:$0xff] }
 0x467   : > { %11937 = vmatprep.mubr.msk.bf16.mxu0 %vm14635_vm1, %v15178_v61 }
 0x468   : > { %4978 = vperm.xlu1 %14544, %v471_v8   ;;  %v14545_v8 = vld [vmem:[%s17993_s5] sm:$0xff]  }
 0x46e   : > { %11938 = vmatmul.mubr.msk.bf16.gmra.mrb[8].mxu0 %vm632_vm2, %v3777_v3  ;;  %v3761_v3 = vld [vmem:[%s14750_s18 + $0x112] sm:$0xff] }
 0x46f   : > { %11941 = vmatprep.mubr.msk.bf16.mxu0 %vm14635_vm1, %v15178_v61  ;;  %v3789_v7 = vpack.c.bf16 %v3762_v4, %v3761_v3  ;;  %v563_v3 = vld [vmem:[%s14750_s18 + $0x135] sm:$0xff] }
 0x470   : > { %v4195_v4 = vld [vmem:[%s14750_s18 + $0x53] sm:$0xff] }
 0x476   : > { %11942 = vmatmul.mubr.msk.bf16.gmra.mrb[12].mxu0 %vm632_vm2, %v3778_v6  ;;  %v472_v6 = vld [vmem:[%s17989_s1 + $0xf0] sm:$0xff] }
 0x477   : > { %11945 = vmatprep.mubr.msk.bf16.mxu0 %vm14635_vm1, %v15178_v61  ;;  %4983 = vperm.xlu0 %14543, %v472_v6   ;;  %v586_v6 = vpack.c.bf16 %v563_v3, %v562_v2  ;;  %v4223_v2 = vld [vmem:[%s14750_s18 + $0x133] sm:$0xff]  ;;  %v4224_v3 = vld [vmem:[%s14750_s18 + $0x13b] sm:$0xff] }
 0x47e   : > { %11946 = vmatmul.mubr.msk.bf16.gmra.mrb[16].mxu0 %vm632_vm2, %v3779_v9  ;;  %v474_v9 = vld [vmem:[%s17989_s1 + $0x100] sm:$0xff] }
 0x47f   : > { %11949 = vmatprep.mubr.msk.bf16.mxu0 %vm14635_vm1, %v15178_v61  ;;  %4993 = vperm.xlu0 %14543, %v474_v9   ;;  %v564_v9 = vld [vmem:[%s14750_s18 + $0x13d] sm:$0xff] }
 0x483   : > { %5003 = vperm.xlu0 %14543, %v476_v13   ;;  %v587_v13 = vpack.c.bf16 %v565_v10, %v564_v9  ;;  %v4227_v9 = vld [vmem:[%s14750_s18 + $0x153] sm:$0xff]  ;;  %v4228_v10 = vld [vmem:[%s14750_s18 + $0x15b] sm:$0xff] }
 0x486   : > { %11950 = vmatmul.mubr.msk.bf16.gmra.mrb[20].mxu0 %vm632_vm2, %v3780_v12  ;;  %v473_v12 = vld [vmem:[%s17989_s1 + $0xf8] sm:$0xff] }
 0x487   : > { %11953 = vmatprep.mubr.msk.bf16.mxu0 %vm14635_vm1, %v15178_v61  ;;  %4988 = vperm.xlu1 %14544, %v473_v12   ;;  %v4198_v12 = vld [vmem:[%s14750_s18 + $0x6b] sm:$0xff] }
 0x488   : > { %5013 = vperm.xlu0 %14543, %v478_v16   ;;  %v14546_v16 = vld [vmem:[%s17993_s5 + $0x8] sm:$0xff]  }
 0x48c   : > { %5023 = vperm.xlu0 %14543, %v480_v23   ;;  %v4201_v23 = vld [vmem:[%s14750_s18 + $0x83] sm:$0xff] }
 0x48e   : > { %11954 = vmatmul.mubr.msk.bf16.gmra.mrb[24].mxu0 %vm632_vm2, %v3781_v15  ;;  %v475_v15 = vld [vmem:[%s17989_s1 + $0x108] sm:$0xff] }
 0x48f   : > { %11957 = vmatprep.mubr.msk.bf16.mxu0 %vm14635_vm1, %v15178_v61  ;;  %4998 = vperm.xlu1 %14544, %v475_v15   ;;  %v4199_v15 = vld [vmem:[%s14750_s18 + $0x73] sm:$0xff] }
 0x490   : > { %5033 = vperm.xlu0 %14543, %v482_v26  }
 0x493   : > { %5008 = vperm.xlu1 %14544, %v477_v22  }
 0x496   : > { %11958 = vmatmul.mubr.msk.bf16.gmra.mrb[28].mxu0 %vm632_vm2, %v3782_v21  ;;  %v579_v21 = vpack.c.bf16 %v549_v20, %v548_v17  ;;  %v4200_v17 = vld [vmem:[%s14750_s18 + $0x7b] sm:$0xff]  ;;  %v588_v20 = vpack.c.bf16 %v567_v19, %v566_v18 }
 0x497   : > { %11961 = vmatprep.mubr.msk.bf16.mxu0 %vm14635_vm1, %v15178_v61  ;;  %5018 = vperm.xlu1 %14544, %v479_v25   ;;  %v4237_v22 = vpack.c.bf16 %v4200_v17, %v4199_v15  ;;  %v14548_v25 = vld [vmem:[%s17993_s5 + $0x18] sm:$0xff]   ;;  %v14555_v15 = vld [vmem:[%s17993_s5 + $0x50] sm:$0xff]  }
 0x498   : > { %11372 = vmatmul.mubr.msk.bf16.vlgmr.msra.gmra.mrb[0].mxu1 %vm632_vm2, %v579_v21  ;;  %v15814_v21 = vld [vmem:[#allocation2] sm:$0xff]  ;;  %v14556_v19 = vld [vmem:[%s17993_s5 + $0x58] sm:$0xff]  }
 0x499   : > { %11375 = vmatprep.mubr.msk.bf16.mxu1 %vm14635_vm1, %v15178_v61  ;;  %12100 = vmatpush3.bf16.msra.mxu1 %v14545_v8  ;;  %v4232_v17 = vld [vmem:[%s14750_s18 + $0x17b] sm:$0xff] }
 0x49a   : > { %12101 = vmatprep.subr.bf16.mxu1 %v15178_v61 }
 0x49b   : > { %5028 = vperm.xlu1 %14544, %v481_v32   ;;  %v14551_v32 = vld [vmem:[%s17993_s5 + $0x30] sm:$0xff]  }
 0x49d   : > { %12102 = vmatpush3.bf16.msra.mxu1 %v14546_v16  ;;  %v4231_v16 = vld [vmem:[%s14750_s18 + $0x173] sm:$0xff] }
 0x49e   : > { %11962 = vmatmul.mubr.msk.bf16.gmra.mrb[32].mxu0 %vm632_vm2, %v3783_v28  ;;  %v3767_v28 = vld [vmem:[%s14750_s18 + $0x142] sm:$0xff]  ;;  %12103 = vmatprep.subr.bf16.mxu1 %v15814_v21  ;;  %v4253_v18 = vpack.c.bf16 %v4232_v17, %v4231_v16 }
 0x49f   : > { %11965 = vmatprep.mubr.msk.bf16.mxu0 %vm14635_vm1, %v15178_v61  ;;  %v3792_v33 = vpack.c.bf16 %v3768_v29, %v3767_v28  ;;  %5038 = vperm.xlu1 %14544, %v483_v34   ;;  %v4203_v28 = vld [vmem:[%s14750_s18 + $0x93] sm:$0xff]  ;;  %v4204_v29 = vld [vmem:[%s14750_s18 + $0x9b] sm:$0xff]  ;;  %v4206_v34 = vld [vmem:[%s14750_s18 + $0xab] sm:$0xff] }
 0x4a0   : > { %11376 = vmatmul.mubr.msk.bf16.gmra.mrb[4].mxu1 %vm632_vm2, %v580_v31  ;;  %v4239_v31 = vpack.c.bf16 %v4204_v29, %v4203_v28 }
 0x4a1   : > { %11379 = vmatprep.mubr.msk.bf16.mxu1 %vm14635_vm1, %v15178_v61 }
 0x4a6   : > { %11966 = vmatmul.mubr.msk.bf16.gmra.mrb[36].mxu0 %vm632_vm2, %v3784_v35  ;;  %v552_v35 = vld [vmem:[%s14750_s18 + $0xdd] sm:$0xff] }
 0x4a7   : > { %11969 = vmatprep.mubr.msk.bf16.mxu0 %vm14635_vm1, %v15178_v61  ;;  %v581_v39 = vpack.c.bf16 %v553_v36, %v552_v35  ;;  %v4207_v36 = vld [vmem:[%s14750_s18 + $0xb3] sm:$0xff] }
 0x4a8   : > { %v4241_v38 = vpack.c.bf16 %v4208_v37, %v4207_v36 }
 0x4a9   : > { %11380 = vmatmul.mubr.msk.bf16.gmra.mrb[8].mxu1 %vm632_vm2, %v581_v39  ;;  %v4209_v39 = vld [vmem:[%s14750_s18 + $0xc3] sm:$0xff] }
 0x4aa   : > { %11383 = vmatprep.mubr.msk.bf16.mxu1 %vm14635_vm1, %v15178_v61 }
 0x4ae   : > { %11970 = vmatmul.mubr.msk.bf16.gmra.mrb[40].mxu0 %vm632_vm2, %v3785_v42  ;;  %v555_v42 = vld [vmem:[%s14750_s18 + $0xf5] sm:$0xff] }
 0x4af   : > { %11973 = vmatprep.mubr.msk.bf16.mxu0 %vm14635_vm1, %v15178_v61  ;;  %v582_v45 = vpack.c.bf16 %v555_v42, %v554_v41  ;;  %v4211_v42 = vld [vmem:[%s14750_s18 + $0xd3] sm:$0xff] }
 0x4b0   : > { %v4243_v44 = vpack.c.bf16 %v4212_v43, %v4211_v42  ;;  %v15974_v42 = vld [vmem:[%s17991_s3] ss:$0 sm:$0xff] }
 0x4b1   : > { %11384 = vmatmul.mubr.msk.bf16.gmra.mrb[12].mxu1 %vm632_vm2, %v582_v45  ;;  %v4213_v45 = vld [vmem:[%s14750_s18 + $0xe3] sm:$0xff] }
 0x4b2   : > { %11387 = vmatprep.mubr.msk.bf16.mxu1 %vm14635_vm1, %v15178_v61 }
 0x4b6   : > { %11974 = vmatmul.mubr.msk.bf16.gmra.mrb[44].mxu0 %vm632_vm2, %v3786_v49  ;;  %v3773_v49 = vld [vmem:[%s14750_s18 + $0x172] sm:$0xff] }
 0x4b7   : > { %11977 = vmatprep.mubr.msk.bf16.mxu0 %vm14635_vm1, %v15178_v61  ;;  %v3795_v52 = vpack.c.bf16 %v3774_v50, %v3773_v49  ;;  %v4216_v49 = vld [vmem:[%s14750_s18 + $0xfb] sm:$0xff] }
 0x4b8   : > { %v14552_v50 = vld [vmem:[%s17993_s5 + $0x38] sm:$0xff]  }
 0x4b9   : > { %11388 = vmatmul.mubr.msk.bf16.gmra.mrb[16].mxu1 %vm632_vm2, %v583_v51  ;;  %v4245_v51 = vpack.c.bf16 %v4216_v49, %v4215_v48  ;;  %v15983_v48 = vpop.permute.xlu0 %4833 }
 0x4ba   : > { %11391 = vmatprep.mubr.msk.bf16.mxu1 %vm14635_vm1, %v15178_v61 }
 0x4be   : > { %11978 = vmatmul.mubr.msk.bf16.gmra.mrb[48].mxu0 %vm632_vm2, %v3787_v56  ;;  %v4192_v56 = vld [vmem:[%s14750_s18 + $0x3b] sm:$0xff] }
 0x4bf   : > { %11981 = vmatprep.mubr.msk.bf16.mxu0 %vm14635_vm1, %v15178_v61  ;;  %v4233_v58 = vpack.c.bf16 %v4192_v56, %v4191_v55  ;;  %v4217_v55 = vld [vmem:[%s14750_s18 + $0x103] sm:$0xff]  ;;  %v4218_v56 = vld [vmem:[%s14750_s18 + $0x10b] sm:$0xff] }
 0x4c1   : > { %11392 = vmatmul.mubr.msk.bf16.gmra.mrb[20].mxu1 %vm632_vm2, %v584_v57  ;;  %v4246_v57 = vpack.c.bf16 %v4218_v56, %v4217_v55  ;;  %v14558_v55 = vld [vmem:[%s17993_s5 + $0x68] sm:$0xff]  }
 0x4c2   : > { %11395 = vmatprep.mubr.msk.bf16.mxu1 %vm14635_vm1, %v15178_v61 }
 0x4c6   : > { %11982 = vmatmul.mubr.msk.bf16.gmra.mrb[52].mxu0 %vm632_vm2, %v3788_v0  ;;  %v585_v0 = vpack.c.bf16 %v561_v60, %v560_v59  ;;  %v4219_v59 = vld [vmem:[%s14750_s18 + $0x113] sm:$0xff]  ;;  %v4220_v60 = vld [vmem:[%s14750_s18 + $0x11b] sm:$0xff] }
 0x4c7   : > { %11985 = vmatprep.mubr.msk.bf16.mxu0 %vm14635_vm1, %v15178_v61  ;;  %v4247_v62 = vpack.c.bf16 %v4220_v60, %v4219_v59  ;;  %v15995_v60 = vpop.permute.xlu0 %4838 }
 0x4c9   : > { %11396 = vmatmul.mubr.msk.bf16.gmra.mrb[24].mxu1 %vm632_vm2, %v585_v0  ;;  %v4222_v0 = vld [vmem:[%s14750_s18 + $0x12b] sm:$0xff] }
 0x4ca   : > { %11399 = vmatprep.mubr.msk.bf16.mxu1 %vm14635_vm1, %v15178_v61 }
 0x4ce   : > { %11986 = vmatmul.mubr.msk.bf16.gmra.mrb[56].mxu0 %vm632_vm2, %v3789_v7  ;;  %v4235_v7 = vpack.c.bf16 %v4196_v5, %v4195_v4  ;;  %v4249_v4 = vpack.c.bf16 %v4224_v3, %v4223_v2  ;;  %v14554_v5 = vld [vmem:[%s17993_s5 + $0x48] sm:$0xff]   ;;  %v16000_v3 = vpop.permute.xlu1 %4843 }
 0x4cf   : > { %11989 = vmatprep.mubr.msk.bf16.mxu0 %vm14635_vm1, %v15178_v61 }
 0x4d1   : > { %11400 = vmatmul.mubr.msk.bf16.gmra.mrb[28].mxu1 %vm632_vm2, %v586_v6  ;;  %v4225_v6 = vld [vmem:[%s14750_s18 + $0x143] sm:$0xff] }
 0x4d2   : > { %11403 = vmatprep.mubr.msk.bf16.mxu1 %vm14635_vm1, %v15178_v61 }
 0x4d6   : > { %11990 = vmatmul.mubr.msk.bf16.gmra.mrb[60].mxu0 %vm632_vm2, %v3790_v14  ;;  %v4236_v14 = vpack.c.bf16 %v4198_v12, %v4197_v11  ;;  %v4251_v11 = vpack.c.bf16 %v4228_v10, %v4227_v9  ;;  %v4229_v12 = vld [vmem:[%s14750_s18 + $0x163] sm:$0xff] }
 0x4d7   : > { %11993 = vmatprep.mubr.msk.bf16.mxu0 %vm14635_vm1, %v15178_v61 }
 0x4d9   : > { %11404 = vmatmul.mubr.msk.bf16.gmra.mrb[32].mxu1 %vm632_vm2, %v587_v13  ;;  %v4230_v13 = vld [vmem:[%s14750_s18 + $0x16b] sm:$0xff] }
 0x4da   : > { %11407 = vmatprep.mubr.msk.bf16.mxu1 %vm14635_vm1, %v15178_v61 }
 0x4de   : > { %11994 = vmatmul.mubr.msk.bf16.gmra.mrb[64].mxu0 %vm632_vm2, %v3791_v24  ;;  %v4202_v24 = vld [vmem:[%s14750_s18 + $0x8b] sm:$0xff] }
 0x4df   : > { %11997 = vmatprep.mubr.msk.bf16.mxu0 %vm14635_vm1, %v15178_v61  ;;  %v4238_v26 = vpack.c.bf16 %v4202_v24, %v4201_v23 }
 0x4e1   : > { %11408 = vmatmul.mubr.msk.bf16.gmra.mrb[36].mxu1 %vm632_vm2, %v588_v20 }
 0x4e2   : > { %12115 = vmatprep.mubr.msk.bf16.mxu1 %vm14635_vm1, %v15814_v21 }
 0x4e6   : > { %11998 = vmatmul.mubr.msk.bf16.gmra.mrb[68].mxu0 %vm632_vm2, %v3792_v33  ;;  %v4205_v33 = vld [vmem:[%s14750_s18 + $0xa3] sm:$0xff] }
 0x4e7   : > { %12001 = vmatprep.mubr.msk.bf16.mxu0 %vm14635_vm1, %v15178_v61  ;;  %v4240_v35 = vpack.c.bf16 %v4206_v34, %v4205_v33 }
 0x4ee   : > { %12002 = vmatmul.mubr.msk.bf16.gmra.mrb[72].mxu0 %vm632_vm2, %v3793_v40  ;;  %v4210_v40 = vld [vmem:[%s14750_s18 + $0xcb] sm:$0xff] }
 0x4ef   : > { %12005 = vmatprep.mubr.msk.bf16.mxu0 %vm14635_vm1, %v15178_v61  ;;  %v4242_v41 = vpack.c.bf16 %v4210_v40, %v4209_v39 }
 0x4f6   : > { %12006 = vmatmul.mubr.msk.bf16.gmra.mrb[76].mxu0 %vm632_vm2, %v3794_v46  ;;  %v4214_v46 = vld [vmem:[%s14750_s18 + $0xeb] sm:$0xff] }
 0x4f7   : > { %12009 = vmatprep.mubr.msk.bf16.mxu0 %vm14635_vm1, %v15178_v61  ;;  %v4244_v47 = vpack.c.bf16 %v4214_v46, %v4213_v45  ;;  %v15981_v46 = vld [vmem:[%s17992_s4] ss:$0 sm:$0xff] }
 0x4fe   : > { %12010 = vmatmul.mubr.msk.bf16.gmra.mrb[80].mxu0 %vm632_vm2, %v3795_v52  ;;  %v5217_v52 = vld [vmem:[#allocation2 + $0xd] sm:$0xff] }
 0x4ff   : > { %12015 = vmatprep.mubr.msk.bf16.mxu0 %vm14635_vm1, %v15178_v61  ;;  %v5259_v54 = vpack.c.bf16 %v5218_v53, %v5217_v52 }
 0x506   : > { %12016 = vmatmul.mubr.msk.bf16.vlgmr.msra.gmra.mrb[0].mxu0 %vm632_vm2, %v4233_v58  ;;  %v14553_v58 = vld [vmem:[%s17993_s5 + $0x40] sm:$0xff]  }
 0x507   : > { %12019 = vmatprep.mubr.msk.bf16.mxu0 %vm14635_vm1, %v15178_v61 }
 0x50e   : > { %12020 = vmatmul.mubr.msk.bf16.gmra.mrb[4].mxu0 %vm632_vm2, %v4234_v1  ;;  %v4248_v1 = vpack.c.bf16 %v4222_v0, %v4221_v63 }
 0x50f   : > { %12023 = vmatprep.mubr.msk.bf16.mxu0 %vm14635_vm1, %v15178_v61 }
 0x516   : > { %12024 = vmatmul.mubr.msk.bf16.gmra.mrb[8].mxu0 %vm632_vm2, %v4235_v7  ;;  %v4226_v7 = vld [vmem:[%s14750_s18 + $0x14b] sm:$0xff] }
 0x517   : > { %12027 = vmatprep.mubr.msk.bf16.mxu0 %vm14635_vm1, %v15178_v61  ;;  %v4250_v8 = vpack.c.bf16 %v4226_v7, %v4225_v6 }
 0x51e   : > { %12028 = vmatmul.mubr.msk.bf16.gmra.mrb[12].mxu0 %vm632_vm2, %v4236_v14  ;;  %v4252_v14 = vpack.c.bf16 %v4230_v13, %v4229_v12 }
 0x51f   : > { %12031 = vmatprep.mubr.msk.bf16.mxu0 %vm14635_vm1, %v15178_v61  ;;  %v14547_v61 = vld [vmem:[%s17993_s5 + $0x10] sm:$0xff]  }
 0x520   : > { %12104 = vmatpush3.bf16.msra.mxu1 %v14547_v61 }
 0x521   : > { %12105 = vmatprep.subr.bf16.mxu1 %v15814_v21 }
 0x524   : > { %12106 = vmatpush3.bf16.msra.mxu1 %v14548_v25 }
 0x525   : > { %12107 = vmatprep.subr.bf16.mxu1 %v15814_v21 }
 0x526   : > { %12032 = vmatmul.mubr.msk.bf16.gmra.mrb[16].mxu0 %vm632_vm2, %v4237_v22 }
 0x527   : > { %12035 = vmatprep.mubr.msk.bf16.mxu0 %vm14635_vm1, %v15814_v21 }
 0x528   : > { %12108 = vmatpush3.bf16.msra.mxu1 %v14549_v27 }
 0x529   : > { %12109 = vmatprep.subr.bf16.mxu1 %v15814_v21 }
 0x52c   : > { %12110 = vmatpush3.bf16.msra.mxu1 %v14550_v30 }
 0x52d   : > { %12111 = vmatprep.subr.bf16.mxu1 %v15814_v21 }
 0x52e   : > { %12036 = vmatmul.mubr.msk.bf16.gmra.mrb[20].mxu0 %vm632_vm2, %v4238_v26 }
 0x52f   : > { %12039 = vmatprep.mubr.msk.bf16.mxu0 %vm14635_vm1, %v15814_v21 }
 0x530   : > { %12112 = vmatpush3.bf16.msra.mxu1 %v14551_v32  ;;  %v14557_v32 = vld [vmem:[%s17993_s5 + $0x60] sm:$0xff]  }
 0x531   : > { %12113 = vmatprep.subr.bf16.mxu1 %v15814_v21 }
 0x534   : > { %12114 = vmatpush3.bf16.msra.mxu1 %v14552_v50 }
 0x535   : > { %12199 = vmatprep.subr.bf16.mxu1 %v15814_v21 }
 0x536   : > { %12040 = vmatmul.mubr.msk.bf16.gmra.mrb[24].mxu0 %vm632_vm2, %v4239_v31 }
 0x537   : > { %12043 = vmatprep.mubr.msk.bf16.mxu0 %vm14635_vm1, %v15814_v21  ;;  %12116 = vmatmul.mubr.bf16.vlgmr.msra.gmra.mrb[40].mxu1 %v5259_v54 }
 0x538   : > { %12119 = vmatprep.mubr.msk.bf16.mxu1 %vm14635_vm1, %v15814_v21  ;;  %12200 = vmatpush3.bf16.msra.mxu1 %v14553_v58 }
 0x539   : > { %12201 = vmatprep.subr.bf16.mxu1 %v15814_v21 }
 0x53c   : > { %12202 = vmatpush3.bf16.msra.mxu1 %v14554_v5 }
 0x53d   : > { %12203 = vmatprep.subr.bf16.mxu1 %v15814_v21 }
 0x53e   : > { %12044 = vmatmul.mubr.msk.bf16.gmra.mrb[28].mxu0 %vm632_vm2, %v4240_v35 }
 0x53f   : > { %12047 = vmatprep.mubr.msk.bf16.mxu0 %vm14635_vm1, %v15814_v21 }
 0x540   : > { %12204 = vmatpush3.bf16.msra.mxu1 %v14555_v15  ;;  %v16009_v15 = vpop.permute.xlu1 %4848 }
 0x541   : > { %12205 = vmatprep.subr.bf16.mxu1 %v15814_v21 }
 0x544   : > { %12206 = vmatpush3.bf16.msra.mxu1 %v14556_v19 }
 0x545   : > { %12207 = vmatprep.subr.bf16.mxu1 %v15814_v21 }
 0x546   : > { %12048 = vmatmul.mubr.msk.bf16.gmra.mrb[32].mxu0 %vm632_vm2, %v4241_v38 }
 0x547   : > { %12051 = vmatprep.mubr.msk.bf16.mxu0 %vm14635_vm1, %v15814_v21 }
 0x548   : > { %12208 = vmatpush3.bf16.msra.mxu1 %v14557_v32 }
 0x549   : > { %12209 = vmatprep.subr.bf16.mxu1 %v15814_v21 }
 0x54c   : > { %12210 = vmatpush3.bf16.msra.mxu1 %v14558_v55 }
 0x54d   : > { %12211 = vmatprep.subr.bf16.mxu1 %v15814_v21 }
 0x54e   : > { %12052 = vmatmul.mubr.msk.bf16.gmra.mrb[36].mxu0 %vm632_vm2, %v4242_v41 }
 0x54f   : > { %12055 = vmatprep.mubr.msk.bf16.mxu0 %vm14635_vm1, %v15814_v21 }
 0x556   : > { %12056 = vmatmul.mubr.msk.bf16.gmra.mrb[40].mxu0 %vm632_vm2, %v4243_v44 }
 0x557   : > { %12059 = vmatprep.mubr.msk.bf16.mxu0 %vm14635_vm1, %v15814_v21 }
 0x55e   : > { %12060 = vmatmul.mubr.msk.bf16.gmra.mrb[44].mxu0 %vm632_vm2, %v4244_v47 }
 0x55f   : > { %12063 = vmatprep.mubr.msk.bf16.mxu0 %vm14635_vm1, %v15814_v21 }
 0x566   : > { %12064 = vmatmul.mubr.msk.bf16.gmra.mrb[48].mxu0 %vm632_vm2, %v4245_v51 }
 0x567   : > { %12067 = vmatprep.mubr.msk.bf16.mxu0 %vm14635_vm1, %v15814_v21 }
 0x56b   : > { %v15944_v20 = vpop.f32.mrb[0].mxu1 }
 0x56c   : > { %v11373_v22 = vpop.f32.mrb[1].mxu1 }
 0x56d   : > { %v15947_v61 = vpop.f32.mrb[2].mxu1 }
 0x56e   : > { %12068 = vmatmul.mubr.msk.bf16.gmra.mrb[52].mxu0 %vm632_vm2, %v4246_v57  ;;  %v11374_v23 = vpop.f32.mrb[3].mxu1 }
 0x56f   : > { %12071 = vmatprep.mubr.msk.bf16.mxu0 %vm14635_vm1, %v15814_v21 }
 0x573   : > { %v15949_v24 = vpop.f32.mrb[4].mxu1 }
 0x574   : > { %v11377_v25 = vpop.f32.mrb[5].mxu1 }
 0x575   : > { %v15951_v26 = vpop.f32.mrb[6].mxu1 }
 0x576   : > { %12072 = vmatmul.mubr.msk.bf16.gmra.mrb[56].mxu0 %vm632_vm2, %v4247_v62  ;;  %v11378_v27 = vpop.f32.mrb[7].mxu1 }
 0x577   : > { %12075 = vmatprep.mubr.msk.bf16.mxu0 %vm14635_vm1, %v15814_v21 }
 0x57c   : > { %v15953_v28 = vpop.f32.mrb[8].mxu1 }
 0x57d   : > { %v11381_v29 = vpop.f32.mrb[9].mxu1 }
 0x57e   : > { %12076 = vmatmul.mubr.msk.bf16.gmra.mrb[60].mxu0 %vm632_vm2, %v4248_v1  ;;  %v15955_v30 = vpop.f32.mrb[10].mxu1 }
 0x57f   : > { %12079 = vmatprep.mubr.msk.bf16.mxu0 %vm14635_vm1, %v15814_v21  ;;  %v11382_v31 = vpop.f32.mrb[11].mxu1 }
 0x584   : > { %v15960_v33 = vpop.f32.mrb[12].mxu1 }
 0x585   : > { %v11385_v34 = vpop.f32.mrb[13].mxu1 }
 0x586   : > { %12080 = vmatmul.mubr.msk.bf16.gmra.mrb[64].mxu0 %vm632_vm2, %v4249_v4  ;;  %v15962_v35 = vpop.f32.mrb[14].mxu1 }
 0x587   : > { %12083 = vmatprep.mubr.msk.bf16.mxu0 %vm14635_vm1, %v15814_v21  ;;  %v11386_v36 = vpop.f32.mrb[15].mxu1 }
 0x58c   : > { %v15965_v37 = vpop.f32.mrb[16].mxu1 }
 0x58d   : > { %v11389_v38 = vpop.f32.mrb[17].mxu1 }
 0x58e   : > { %12084 = vmatmul.mubr.msk.bf16.gmra.mrb[68].mxu0 %vm632_vm2, %v4250_v8  ;;  %v15967_v39 = vpop.f32.mrb[18].mxu1 }
 0x58f   : > { %12087 = vmatprep.mubr.msk.bf16.mxu0 %vm14635_vm1, %v15814_v21  ;;  %v11390_v40 = vpop.f32.mrb[19].mxu1 }
 0x594   : > { %v15969_v41 = vpop.f32.mrb[20].mxu1 }
 0x595   : > { %v11393_v43 = vpop.f32.mrb[21].mxu1 }
 0x596   : > { %12088 = vmatmul.mubr.msk.bf16.gmra.mrb[72].mxu0 %vm632_vm2, %v4251_v11  ;;  %v15976_v44 = vpop.f32.mrb[22].mxu1 }
 0x597   : > { %12091 = vmatprep.mubr.msk.bf16.mxu0 %vm14635_vm1, %v15814_v21  ;;  %v11394_v47 = vpop.f32.mrb[23].mxu1 }
 0x598   : > { %v14559_v47 = vld [vmem:[%s17993_s5 + $0x70] sm:$0xff]  }
 0x599   : > { %12212 = vmatpush3.bf16.msra.mxu1 %v14559_v47 }
 0x59a   : > { %12213 = vmatprep.subr.bf16.mxu1 %v15814_v21 }
 0x59c   : > { %v15992_v58 = vpop.f32.mrb[24].mxu1 }
 0x59d   : > { %v11397_v59 = vpop.f32.mrb[25].mxu1 }
 0x59e   : > { %12092 = vmatmul.mubr.msk.bf16.gmra.mrb[76].mxu0 %vm632_vm2, %v4252_v14  ;;  %v15998_v0 = vpop.f32.mrb[26].mxu1 }
 0x59f   : > { %12095 = vmatprep.mubr.msk.bf16.mxu0 %vm14635_vm1, %v15814_v21  ;;  %v11398_v2 = vpop.f32.mrb[27].mxu1 }
 0x5a4   : > { %v16007_v13 = vpop.f32.mrb[28].mxu1 }
 0x5a5   : > { %v11401_v14 = vpop.f32.mrb[29].mxu1 }
 0x5a6   : > { %12096 = vmatmul.mubr.msk.bf16.gmra.mrb[80].mxu0 %vm632_vm2, %v4253_v18  ;;  %v16012_v18 = vpop.f32.mrb[30].mxu1 }
 0x5a7   : > { %13031 = vmatprep.mubr.msk.f32.mxu0 %vm14635_vm1, %v15814_v21  ;;  %v11402_v22 = vpop.f32.mrb[31].mxu1 }
 0x5d9   : > { %v4398_v45 = vpop.f32.mrb[0].mxu0 }
 0x5da   : > { %v4698_v49 = vmul.f32 %v15974_v42, %v4398_v45  ;;  %v12017_v50 = vpop.f32.mrb[1].mxu0 }
 0x5db   : > { %v4401_v51 = vpop.f32.mrb[2].mxu0  ;;  %v16024_v50 = vpop.permute.xlu0 %4853 }
 0x5dc   : > { %v4747_v52 = vadd.f32 %v15981_v46, %v4698_v49  ;;  %v4699_v53 = vmul.f32 %v15974_v42, %v4401_v51  ;;  %v12018_v54 = vpop.f32.mrb[3].mxu0  ;;  %v16022_v49 = vpop.f32.mrb[32].mxu1 }
 0x5dd   : > { %v11405_v51 = vpop.f32.mrb[33].mxu1 }
 0x5de   : > { %v4789_v56 = vmax.f32 %v4747_v52, 0.0  ;;  %v4748_v57 = vadd.f32 %v15981_v46, %v4699_v53  ;;  %v16028_v52 = vpop.permute.xlu1 %4858  ;;  %v16031_v55 = vpop.f32.mrb[34].mxu1 }
 0x5e0   : > { %v5041_v62 = vmul.f32 %v15983_v48, %v4789_v56  ;;  %v4790_v63 = vmax.f32 %v4748_v57, 0.0  ;;  %v11406_v57 = vpop.f32.mrb[35].mxu1 }
 0x5e1   : > { %v4406_v1 = vpop.f32.mrb[4].mxu0 }
 0x5e2   : > { %5133 = vst [vmem:[#allocation2 + $0x20] sm:$0xff] %v5041_v62  ;;  %v5042_v4 = vmul.f32 %v15995_v60, %v4790_v63  ;;  %v4700_v5 = vmul.f32 %v15974_v42, %v4406_v1  ;;  %v12021_v6 = vpop.f32.mrb[5].mxu0 }
 0x5e3   : > { %v4409_v7 = vpop.f32.mrb[6].mxu0 }
 0x5e4   : > { %5134 = vst [vmem:[#allocation2 + $0x28] sm:$0xff] %v5042_v4  ;;  %v4749_v8 = vadd.f32 %v15981_v46, %v4700_v5  ;;  %v4701_v9 = vmul.f32 %v15974_v42, %v4409_v7  ;;  %v12022_v10 = vpop.f32.mrb[7].mxu0 }
 0x5e6   : > { %v4791_v11 = vmax.f32 %v4749_v8, 0.0  ;;  %v4750_v12 = vadd.f32 %v15981_v46, %v4701_v9 }
 0x5e8   : > { %v5043_v16 = vmul.f32 %v16000_v3, %v4791_v11  ;;  %v4792_v17 = vmax.f32 %v4750_v12, 0.0  ;;  %v16039_v11 = vpop.permute.xlu0 %4863  ;;  %v16043_v12 = vpop.permute.xlu1 %4868 }
 0x5e9   : > { %v4414_v19 = vpop.f32.mrb[8].mxu0  ;;  %v5219_v31 = vld [vmem:[#allocation2 + $0x1d] sm:$0xff] }
 0x5ea   : > { %5135 = vst [vmem:[#allocation2 + $0x30] sm:$0xff] %v5043_v16  ;;  %v5044_v23 = vmul.f32 %v16009_v15, %v4792_v17  ;;  %v4702_v25 = vmul.f32 %v15974_v42, %v4414_v19  ;;  %v12025_v27 = vpop.f32.mrb[9].mxu0  ;;  %v16046_v19 = vpop.f32.mrb[36].mxu1 }
 0x5eb   : > { %v4417_v29 = vpop.f32.mrb[10].mxu0  ;;  %v5220_v32 = vld [vmem:[#allocation2 + $0x25] sm:$0xff]  ;;  %v11409_v27 = vpop.f32.mrb[37].mxu1 }
 0x5ec   : > { %5136 = vst [vmem:[#allocation2 + $0x38] sm:$0xff] %v5044_v23  ;;  %v4751_v34 = vadd.f32 %v15981_v46, %v4702_v25  ;;  %v4703_v36 = vmul.f32 %v15974_v42, %v4417_v29  ;;  %v12026_v38 = vpop.f32.mrb[11].mxu0  ;;  %v5260_v40 = vpack.c.bf16 %v5220_v32, %v5219_v31  ;;  %v16060_v57 = vpop.permute.xlu1 %4878 }
 0x5ee   : > { %v4793_v43 = vmax.f32 %v4751_v34, 0.0  ;;  %v4752_v45 = vadd.f32 %v15981_v46, %v4703_v36  ;;  %12120 = vmatmul.mubr.bf16.gmra.mrb[44].mxu1 %v5260_v40  ;;  %v16050_v34 = vpop.f32.mrb[38].mxu1 }
 0x5ef   : > { %12123 = vmatprep.mubr.msk.bf16.mxu1 %vm14635_vm1, %v15814_v21 }
 0x5f0   : > { %v5045_v53 = vmul.f32 %v16024_v50, %v4793_v43  ;;  %v4794_v54 = vmax.f32 %v4752_v45, 0.0  ;;  %v11410_v45 = vpop.f32.mrb[39].mxu1 }
 0x5f1   : > { %v4422_v56 = vpop.f32.mrb[12].mxu0  ;;  %v5221_v2 = vld [vmem:[#allocation2 + $0x2d] sm:$0xff] }
 0x5f2   : > { %5137 = vst [vmem:[#allocation2 + $0x40] sm:$0xff] %v5045_v53  ;;  %v5046_v59 = vmul.f32 %v16028_v52, %v4794_v54  ;;  %v4704_v62 = vmul.f32 %v15974_v42, %v4422_v56  ;;  %v12029_v63 = vpop.f32.mrb[13].mxu0  ;;  %v16055_v53 = vpop.permute.xlu0 %4873 }
 0x5f3   : > { %v4425_v1 = vpop.f32.mrb[14].mxu0  ;;  %v5222_v4 = vld [vmem:[#allocation2 + $0x35] sm:$0xff] }
 0x5f4   : > { %5138 = vst [vmem:[#allocation2 + $0x48] sm:$0xff] %v5046_v59  ;;  %v4753_v5 = vadd.f32 %v15981_v46, %v4704_v62  ;;  %v4705_v6 = vmul.f32 %v15974_v42, %v4425_v1  ;;  %v12030_v7 = vpop.f32.mrb[15].mxu0  ;;  %v5261_v8 = vpack.c.bf16 %v5222_v4, %v5221_v2 }
 0x5f6   : > { %v4795_v9 = vmax.f32 %v4753_v5, 0.0  ;;  %v4754_v10 = vadd.f32 %v15981_v46, %v4705_v6  ;;  %12124 = vmatmul.mubr.bf16.gmra.mrb[48].mxu1 %v5261_v8 }
 0x5f7   : > { %12127 = vmatprep.mubr.msk.bf16.mxu1 %vm14635_vm1, %v15814_v21 }
 0x5f8   : > { %v5047_v14 = vmul.f32 %v16039_v11, %v4795_v9  ;;  %v4796_v16 = vmax.f32 %v4754_v10, 0.0 }
 0x5f9   : > { %v4430_v17 = vpop.f32.mrb[16].mxu0  ;;  %v5223_v31 = vld [vmem:[#allocation2 + $0x3d] sm:$0xff] }
 0x5fa   : > { %5139 = vst [vmem:[#allocation2 + $0x50] sm:$0xff] %v5047_v14  ;;  %v5048_v22 = vmul.f32 %v16043_v12, %v4796_v16  ;;  %v4706_v23 = vmul.f32 %v15974_v42, %v4430_v17  ;;  %v12033_v25 = vpop.f32.mrb[17].mxu0  ;;  %v14560_v16 = vld [vmem:[%s17993_s5 + $0x78] sm:$0xff]   ;;  %v16070_v17 = vpop.permute.xlu0 %4883 }
 0x5fb   : > { %v4433_v29 = vpop.f32.mrb[18].mxu0  ;;  %v5224_v32 = vld [vmem:[#allocation2 + $0x45] sm:$0xff]  ;;  %12214 = vmatpush3.bf16.msra.mxu1 %v14560_v16  ;;  %v16075_v25 = vpop.permute.xlu1 %4888 }
 0x5fc   : > { %5140 = vst [vmem:[#allocation2 + $0x58] sm:$0xff] %v5048_v22  ;;  %v4755_v36 = vadd.f32 %v15981_v46, %v4706_v23  ;;  %v4707_v38 = vmul.f32 %v15974_v42, %v4433_v29  ;;  %v12034_v40 = vpop.f32.mrb[19].mxu0  ;;  %v5262_v43 = vpack.c.bf16 %v5224_v32, %v5223_v31  ;;  %12299 = vmatprep.subr.bf16.mxu1 %v15814_v21 }
 0x5fe   : > { %v4797_v47 = vmax.f32 %v4755_v36, 0.0  ;;  %v4756_v51 = vadd.f32 %v15981_v46, %v4707_v38  ;;  %12128 = vmatmul.mubr.bf16.gmra.mrb[52].mxu1 %v5262_v43 }
 0x5ff   : > { %12131 = vmatprep.mubr.msk.bf16.mxu1 %vm14635_vm1, %v15814_v21 }
 0x600   : > { %v5049_v54 = vmul.f32 %v16055_v53, %v4797_v47  ;;  %v4798_v56 = vmax.f32 %v4756_v51, 0.0 }
 0x601   : > { %v4438_v59 = vpop.f32.mrb[20].mxu0  ;;  %v5225_v4 = vld [vmem:[#allocation2 + $0x4d] sm:$0xff] }
 0x602   : > { %5141 = vst [vmem:[#allocation2 + $0x60] sm:$0xff] %v5049_v54  ;;  %v5050_v62 = vmul.f32 %v16060_v57, %v4798_v56  ;;  %v4708_v63 = vmul.f32 %v15974_v42, %v4438_v59  ;;  %v12037_v1 = vpop.f32.mrb[21].mxu0  ;;  %v16083_v59 = vpop.permute.xlu0 %4893 }
 0x603   : > { %v4441_v2 = vpop.f32.mrb[22].mxu0  ;;  %v5226_v5 = vld [vmem:[#allocation2 + $0x55] sm:$0xff]  ;;  %v16088_v1 = vpop.permute.xlu1 %4898 }
 0x604   : > { %5142 = vst [vmem:[#allocation2 + $0x68] sm:$0xff] %v5050_v62  ;;  %v4757_v6 = vadd.f32 %v15981_v46, %v4708_v63  ;;  %v4709_v7 = vmul.f32 %v15974_v42, %v4441_v2  ;;  %v12038_v8 = vpop.f32.mrb[23].mxu0  ;;  %v5263_v9 = vpack.c.bf16 %v5226_v5, %v5225_v4 }
 0x606   : > { %v4799_v10 = vmax.f32 %v4757_v6, 0.0  ;;  %v4758_v14 = vadd.f32 %v15981_v46, %v4709_v7  ;;  %12132 = vmatmul.mubr.bf16.gmra.mrb[56].mxu1 %v5263_v9 }
 0x607   : > { %12135 = vmatprep.mubr.msk.bf16.mxu1 %vm14635_vm1, %v15814_v21 }
 0x608   : > { %v5051_v22 = vmul.f32 %v16070_v17, %v4799_v10  ;;  %v4800_v23 = vmax.f32 %v4758_v14, 0.0 }
 0x609   : > { %v4446_v27 = vpop.f32.mrb[24].mxu0  ;;  %v5227_v38 = vld [vmem:[#allocation2 + $0x5d] sm:$0xff] }
 0x60a   : > { %5143 = vst [vmem:[#allocation2 + $0x70] sm:$0xff] %v5051_v22  ;;  %v5052_v29 = vmul.f32 %v16075_v25, %v4800_v23  ;;  %v4710_v31 = vmul.f32 %v15974_v42, %v4446_v27  ;;  %v12041_v32 = vpop.f32.mrb[25].mxu0 }
 0x60b   : > { %v4449_v36 = vpop.f32.mrb[26].mxu0  ;;  %v5228_v40 = vld [vmem:[#allocation2 + $0x65] sm:$0xff] }
 0x60c   : > { %5144 = vst [vmem:[#allocation2 + $0x78] sm:$0xff] %v5052_v29  ;;  %v4759_v43 = vadd.f32 %v15981_v46, %v4710_v31  ;;  %v4711_v45 = vmul.f32 %v15974_v42, %v4449_v36  ;;  %v12042_v47 = vpop.f32.mrb[27].mxu0  ;;  %v5264_v51 = vpack.c.bf16 %v5228_v40, %v5227_v38  ;;  %v16095_v29 = vpop.permute.xlu0 %4903 }
 0x60d   : > { %v16100_v36 = vpop.permute.xlu1 %4908 }
 0x60e   : > { %v4801_v54 = vmax.f32 %v4759_v43, 0.0  ;;  %v4760_v56 = vadd.f32 %v15981_v46, %v4711_v45  ;;  %12136 = vmatmul.mubr.bf16.gmra.mrb[60].mxu1 %v5264_v51 }
 0x60f   : > { %12139 = vmatprep.mubr.msk.bf16.mxu1 %vm14635_vm1, %v15814_v21 }
 0x610   : > { %v5053_v62 = vmul.f32 %v16083_v59, %v4801_v54  ;;  %v4802_v63 = vmax.f32 %v4760_v56, 0.0 }
 0x611   : > { %v4454_v2 = vpop.f32.mrb[28].mxu0  ;;  %v5229_v8 = vld [vmem:[#allocation2 + $0x6d] sm:$0xff] }
 0x612   : > { %5145 = vst [vmem:[#allocation2 + $0x80] sm:$0xff] %v5053_v62  ;;  %v5054_v4 = vmul.f32 %v16088_v1, %v4802_v63  ;;  %v4712_v5 = vmul.f32 %v15974_v42, %v4454_v2  ;;  %v12045_v6 = vpop.f32.mrb[29].mxu0 }
 0x613   : > { %v4457_v7 = vpop.f32.mrb[30].mxu0  ;;  %v5230_v9 = vld [vmem:[#allocation2 + $0x75] sm:$0xff]  ;;  %v16107_v6 = vpop.permute.xlu0 %4913 }
 0x614   : > { %5146 = vst [vmem:[#allocation2 + $0x88] sm:$0xff] %v5054_v4  ;;  %v4761_v10 = vadd.f32 %v15981_v46, %v4712_v5  ;;  %v4713_v14 = vmul.f32 %v15974_v42, %v4457_v7  ;;  %v12046_v16 = vpop.f32.mrb[31].mxu0  ;;  %v5265_v22 = vpack.c.bf16 %v5230_v9, %v5229_v8  ;;  %v16112_v9 = vpop.permute.xlu1 %4918 }
 0x616   : > { %v4803_v23 = vmax.f32 %v4761_v10, 0.0  ;;  %v4762_v27 = vadd.f32 %v15981_v46, %v4713_v14  ;;  %12140 = vmatmul.mubr.bf16.gmra.mrb[64].mxu1 %v5265_v22 }
 0x617   : > { %12143 = vmatprep.mubr.msk.bf16.mxu1 %vm14635_vm1, %v15814_v21 }
 0x618   : > { %v5055_v31 = vmul.f32 %v16095_v29, %v4803_v23  ;;  %v4804_v32 = vmax.f32 %v4762_v27, 0.0 }
 0x619   : > { %v4462_v38 = vpop.f32.mrb[32].mxu0  ;;  %v5231_v51 = vld [vmem:[#allocation2 + $0x7d] sm:$0xff] }
 0x61a   : > { %5147 = vst [vmem:[#allocation2 + $0x90] sm:$0xff] %v5055_v31  ;;  %v5056_v40 = vmul.f32 %v16100_v36, %v4804_v32  ;;  %v4714_v43 = vmul.f32 %v15974_v42, %v4462_v38  ;;  %v12049_v45 = vpop.f32.mrb[33].mxu0 }
 0x61b   : > { %v4465_v47 = vpop.f32.mrb[34].mxu0  ;;  %v5232_v54 = vld [vmem:[#allocation2 + $0x85] sm:$0xff] }
 0x61c   : > { %5148 = vst [vmem:[#allocation2 + $0x98] sm:$0xff] %v5056_v40  ;;  %v4763_v56 = vadd.f32 %v15981_v46, %v4714_v43  ;;  %v4715_v62 = vmul.f32 %v15974_v42, %v4465_v47  ;;  %v12050_v63 = vpop.f32.mrb[35].mxu0  ;;  %v5266_v2 = vpack.c.bf16 %v5232_v54, %v5231_v51  ;;  %v16119_v51 = vpop.permute.xlu0 %4923 }
 0x61e   : > { %v4805_v4 = vmax.f32 %v4763_v56, 0.0  ;;  %v4764_v5 = vadd.f32 %v15981_v46, %v4715_v62  ;;  %12144 = vmatmul.mubr.bf16.gmra.mrb[68].mxu1 %v5266_v2  ;;  %v16124_v62 = vpop.permute.xlu1 %4928 }
 0x61f   : > { %12147 = vmatprep.mubr.msk.bf16.mxu1 %vm14635_vm1, %v15814_v21 }
 0x620   : > { %v5057_v7 = vmul.f32 %v16107_v6, %v4805_v4  ;;  %v4806_v8 = vmax.f32 %v4764_v5, 0.0 }
 0x621   : > { %v4470_v10 = vpop.f32.mrb[36].mxu0  ;;  %v5233_v27 = vld [vmem:[#allocation2 + $0x8d] sm:$0xff] }
 0x622   : > { %5149 = vst [vmem:[#allocation2 + $0xa0] sm:$0xff] %v5057_v7  ;;  %v5058_v14 = vmul.f32 %v16112_v9, %v4806_v8  ;;  %v4716_v16 = vmul.f32 %v15974_v42, %v4470_v10  ;;  %v12053_v22 = vpop.f32.mrb[37].mxu0 }
 0x623   : > { %v4473_v23 = vpop.f32.mrb[38].mxu0  ;;  %v5234_v31 = vld [vmem:[#allocation2 + $0x95] sm:$0xff] }
 0x624   : > { %5150 = vst [vmem:[#allocation2 + $0xa8] sm:$0xff] %v5058_v14  ;;  %v4765_v32 = vadd.f32 %v15981_v46, %v4716_v16  ;;  %v4717_v38 = vmul.f32 %v15974_v42, %v4473_v23  ;;  %v12054_v40 = vpop.f32.mrb[39].mxu0  ;;  %v5267_v43 = vpack.c.bf16 %v5234_v31, %v5233_v27 }
 0x626   : > { %v4807_v45 = vmax.f32 %v4765_v32, 0.0  ;;  %v4766_v47 = vadd.f32 %v15981_v46, %v4717_v38  ;;  %12148 = vmatmul.mubr.bf16.gmra.mrb[72].mxu1 %v5267_v43  ;;  %v16131_v32 = vpop.permute.xlu0 %4933  ;;  %v16136_v43 = vpop.permute.xlu1 %4938 }
 0x627   : > { %12151 = vmatprep.mubr.msk.bf16.mxu1 %vm14635_vm1, %v15814_v21 }
 0x628   : > { %v5059_v54 = vmul.f32 %v16119_v51, %v4807_v45  ;;  %v4808_v56 = vmax.f32 %v4766_v47, 0.0 }
 0x629   : > { %v4478_v63 = vpop.f32.mrb[40].mxu0  ;;  %v5235_v8 = vld [vmem:[#allocation2 + $0x9d] sm:$0xff] }
 0x62a   : > { %5151 = vst [vmem:[#allocation2 + $0xb0] sm:$0xff] %v5059_v54  ;;  %v5060_v2 = vmul.f32 %v16124_v62, %v4808_v56  ;;  %v4718_v4 = vmul.f32 %v15974_v42, %v4478_v63  ;;  %v12057_v5 = vpop.f32.mrb[41].mxu0 }
 0x62b   : > { %v4481_v7 = vpop.f32.mrb[42].mxu0  ;;  %v5236_v10 = vld [vmem:[#allocation2 + $0xa5] sm:$0xff] }
 0x62c   : > { %5152 = vst [vmem:[#allocation2 + $0xb8] sm:$0xff] %v5060_v2  ;;  %v4767_v14 = vadd.f32 %v15981_v46, %v4718_v4  ;;  %v4719_v16 = vmul.f32 %v15974_v42, %v4481_v7  ;;  %v12058_v22 = vpop.f32.mrb[43].mxu0  ;;  %v5268_v23 = vpack.c.bf16 %v5236_v10, %v5235_v8 }
 0x62e   : > { %v4809_v27 = vmax.f32 %v4767_v14, 0.0  ;;  %v4768_v31 = vadd.f32 %v15981_v46, %v4719_v16  ;;  %12152 = vmatmul.mubr.bf16.gmra.mrb[76].mxu1 %v5268_v23  ;;  %v16147_v23 = vpop.permute.xlu0 %4943 }
 0x62f   : > { %12155 = vmatprep.mubr.msk.bf16.mxu1 %vm14635_vm1, %v15814_v21 }
 0x630   : > { %v5061_v38 = vmul.f32 %v16131_v32, %v4809_v27  ;;  %v4810_v40 = vmax.f32 %v4768_v31, 0.0 }
 0x631   : > { %v4486_v45 = vpop.f32.mrb[44].mxu0  ;;  %v5237_v2 = vld [vmem:[#allocation2 + $0xad] sm:$0xff] }
 0x632   : > { %5153 = vst [vmem:[#allocation2 + $0xc0] sm:$0xff] %v5061_v38  ;;  %v5062_v47 = vmul.f32 %v16136_v43, %v4810_v40  ;;  %v13205_v54 = vadd.f32 %v4486_v45, %v15944_v20  ;;  %v12061_v56 = vpop.f32.mrb[45].mxu0  ;;  %v16151_v45 = vpop.permute.xlu1 %4948 }
 0x633   : > { %v4489_v63 = vpop.f32.mrb[46].mxu0  ;;  %v5238_v4 = vld [vmem:[#allocation2 + $0xb5] sm:$0xff] }
 0x634   : > { %5154 = vst [vmem:[#allocation2 + $0xc8] sm:$0xff] %v5062_v47  ;;  %v4720_v5 = vmul.f32 %v13205_v54, %v15974_v42  ;;  %v13206_v7 = vadd.f32 %v4489_v63, %v15947_v61  ;;  %v12062_v8 = vpop.f32.mrb[47].mxu0  ;;  %v5269_v10 = vpack.c.bf16 %v5238_v4, %v5237_v2 }
 0x636   : > { %v4769_v14 = vadd.f32 %v15981_v46, %v4720_v5  ;;  %v4721_v16 = vmul.f32 %v13206_v7, %v15974_v42  ;;  %12156 = vmatmul.mubr.bf16.gmra.mrb[80].mxu1 %v5269_v10 }
 0x637   : > { %12159 = vmatprep.mubr.msk.bf16.mxu1 %vm14635_vm1, %v15814_v21 }
 0x638   : > { %v4811_v20 = vmax.f32 %v4769_v14, 0.0  ;;  %v4770_v22 = vadd.f32 %v15981_v46, %v4721_v16  ;;  %v16161_v16 = vpop.permute.xlu0 %4953 }
 0x639   : > { %v4494_v27 = vpop.f32.mrb[48].mxu0  ;;  %v5239_v54 = vld [vmem:[#allocation2 + $0xbd] sm:$0xff] }
 0x63a   : > { %v5063_v31 = vmul.f32 %v16147_v23, %v4811_v20  ;;  %v4812_v38 = vmax.f32 %v4770_v22, 0.0  ;;  %v13207_v61 = vadd.f32 %v4494_v27, %v15949_v24  ;;  %v12065_v40 = vpop.f32.mrb[49].mxu0 }
 0x63b   : > { %v4497_v47 = vpop.f32.mrb[50].mxu0  ;;  %v5240_v56 = vld [vmem:[#allocation2 + $0xc5] sm:$0xff] }
 0x63c   : > { %5155 = vst [vmem:[#allocation2 + $0xd0] sm:$0xff] %v5063_v31  ;;  %v5064_v63 = vmul.f32 %v16151_v45, %v4812_v38  ;;  %v4722_v2 = vmul.f32 %v13207_v61, %v15974_v42  ;;  %v13208_v4 = vadd.f32 %v4497_v47, %v15951_v26  ;;  %v12066_v5 = vpop.f32.mrb[51].mxu0  ;;  %v5270_v7 = vpack.c.bf16 %v5240_v56, %v5239_v54  ;;  %v16165_v38 = vpop.permute.xlu1 %4958 }
 0x63e   : > { %5156 = vst [vmem:[#allocation2 + $0xd8] sm:$0xff] %v5064_v63  ;;  %v4771_v8 = vadd.f32 %v15981_v46, %v4722_v2  ;;  %v4723_v24 = vmul.f32 %v13208_v4, %v15974_v42  ;;  %12160 = vmatmul.mubr.bf16.gmra.mrb[84].mxu1 %v5270_v7 }
 0x63f   : > { %12163 = vmatprep.mubr.msk.bf16.mxu1 %vm14635_vm1, %v15814_v21 }
 0x640   : > { %v4813_v10 = vmax.f32 %v4771_v8, 0.0  ;;  %v4772_v14 = vadd.f32 %v15981_v46, %v4723_v24  ;;  %v16173_v24 = vpop.permute.xlu0 %4963 }
 0x641   : > { %v4502_v20 = vpop.f32.mrb[52].mxu0 }
 0x642   : > { %v5065_v22 = vmul.f32 %v16161_v16, %v4813_v10  ;;  %v4814_v26 = vmax.f32 %v4772_v14, 0.0  ;;  %v13209_v27 = vadd.f32 %v4502_v20, %v15953_v28  ;;  %v12069_v31 = vpop.f32.mrb[53].mxu0 }
 0x643   : > { %v4505_v61 = vpop.f32.mrb[54].mxu0  ;;  %v5241_v63 = vld [vmem:[#allocation2 + $0xcd] sm:$0xff] }
 0x644   : > { %5157 = vst [vmem:[#allocation2 + $0xe0] sm:$0xff] %v5065_v22  ;;  %v5066_v40 = vmul.f32 %v16165_v38, %v4814_v26  ;;  %v4724_v47 = vmul.f32 %v13209_v27, %v15974_v42  ;;  %v13210_v54 = vadd.f32 %v4505_v61, %v15955_v30  ;;  %v12070_v56 = vpop.f32.mrb[55].mxu0  ;;  %v16179_v26 = vpop.permute.xlu1 %4968 }
 0x645   : > { %v5242_v2 = vld [vmem:[#allocation2 + $0xd5] sm:$0xff] }
 0x646   : > { %5158 = vst [vmem:[#allocation2 + $0xe8] sm:$0xff] %v5066_v40  ;;  %v4773_v4 = vadd.f32 %v15981_v46, %v4724_v47  ;;  %v4725_v5 = vmul.f32 %v13210_v54, %v15974_v42  ;;  %v5271_v28 = vpack.c.bf16 %v5242_v2, %v5241_v63 }
 0x648   : > { %v4815_v7 = vmax.f32 %v4773_v4, 0.0  ;;  %v4774_v8 = vadd.f32 %v15981_v46, %v4725_v5  ;;  %12164 = vmatmul.mubr.bf16.gmra.mrb[88].mxu1 %v5271_v28  ;;  %v16187_v28 = vpop.permute.xlu0 %4973 }
 0x649   : > { %v4510_v10 = vpop.f32.mrb[56].mxu0  ;;  %12167 = vmatprep.mubr.msk.bf16.mxu1 %vm14635_vm1, %v15814_v21 }
 0x64a   : > { %v5067_v30 = vmul.f32 %v16173_v24, %v4815_v7  ;;  %v4816_v14 = vmax.f32 %v4774_v8, 0.0  ;;  %v13211_v20 = vadd.f32 %v4510_v10, %v15960_v33  ;;  %v12073_v22 = vpop.f32.mrb[57].mxu0 }
 0x64b   : > { %v4513_v27 = vpop.f32.mrb[58].mxu0  ;;  %v5243_v54 = vld [vmem:[#allocation2 + $0xdd] sm:$0xff] }
 0x64c   : > { %5159 = vst [vmem:[#allocation2 + $0xf0] sm:$0xff] %v5067_v30  ;;  %v5068_v31 = vmul.f32 %v16179_v26, %v4816_v14  ;;  %v4726_v61 = vmul.f32 %v13211_v20, %v15974_v42  ;;  %v13212_v40 = vadd.f32 %v4513_v27, %v15962_v35  ;;  %v12074_v47 = vpop.f32.mrb[59].mxu0  ;;  %v16193_v14 = vpop.permute.xlu1 %4978 }
 0x64d   : > { %v5244_v56 = vld [vmem:[#allocation2 + $0xe5] sm:$0xff] }
 0x64e   : > { %5160 = vst [vmem:[#allocation2 + $0xf8] sm:$0xff] %v5068_v31  ;;  %v4775_v63 = vadd.f32 %v15981_v46, %v4726_v61  ;;  %v4727_v2 = vmul.f32 %v13212_v40, %v15974_v42  ;;  %v5272_v33 = vpack.c.bf16 %v5244_v56, %v5243_v54 }
 0x650   : > { %v4817_v4 = vmax.f32 %v4775_v63, 0.0  ;;  %v4776_v5 = vadd.f32 %v15981_v46, %v4727_v2  ;;  %12168 = vmatmul.mubr.bf16.gmra.mrb[92].mxu1 %v5272_v33  ;;  %v16201_v33 = vpop.permute.xlu0 %4983 }
 0x651   : > { %v4518_v7 = vpop.f32.mrb[60].mxu0  ;;  %12171 = vmatprep.mubr.msk.bf16.mxu1 %vm14635_vm1, %v15814_v21 }
 0x652   : > { %v5069_v35 = vmul.f32 %v16187_v28, %v4817_v4  ;;  %v4818_v8 = vmax.f32 %v4776_v5, 0.0  ;;  %v13213_v10 = vadd.f32 %v4518_v7, %v15965_v37  ;;  %v12077_v30 = vpop.f32.mrb[61].mxu0 }
 0x653   : > { %v4521_v20 = vpop.f32.mrb[62].mxu0  ;;  %v5245_v40 = vld [vmem:[#allocation2 + $0xed] sm:$0xff] }
 0x654   : > { %5161 = vst [vmem:[#allocation2 + $0x100] sm:$0xff] %v5069_v35  ;;  %v5070_v22 = vmul.f32 %v16193_v14, %v4818_v8  ;;  %v4728_v27 = vmul.f32 %v13213_v10, %v15974_v42  ;;  %v13214_v31 = vadd.f32 %v4521_v20, %v15967_v39  ;;  %v12078_v61 = vpop.f32.mrb[63].mxu0  ;;  %v16207_v8 = vpop.permute.xlu1 %4988 }
 0x655   : > { %v5246_v47 = vld [vmem:[#allocation2 + $0xf5] sm:$0xff] }
 0x656   : > { %5162 = vst [vmem:[#allocation2 + $0x108] sm:$0xff] %v5070_v22  ;;  %v4777_v54 = vadd.f32 %v15981_v46, %v4728_v27  ;;  %v4729_v56 = vmul.f32 %v13214_v31, %v15974_v42  ;;  %v5273_v37 = vpack.c.bf16 %v5246_v47, %v5245_v40 }
 0x658   : > { %v4819_v63 = vmax.f32 %v4777_v54, 0.0  ;;  %v4778_v2 = vadd.f32 %v15981_v46, %v4729_v56  ;;  %12172 = vmatmul.mubr.bf16.gmra.mrb[96].mxu1 %v5273_v37  ;;  %v16215_v56 = vpop.permute.xlu0 %4993 }
 0x659   : > { %v4526_v4 = vpop.f32.mrb[64].mxu0  ;;  %12175 = vmatprep.mubr.msk.bf16.mxu1 %vm14635_vm1, %v15814_v21 }
 0x65a   : > { %v5071_v39 = vmul.f32 %v16201_v33, %v4819_v63  ;;  %v4820_v5 = vmax.f32 %v4778_v2, 0.0  ;;  %v13215_v7 = vadd.f32 %v4526_v4, %v15969_v41  ;;  %v12081_v35 = vpop.f32.mrb[65].mxu0  ;;  %v16217_v63 = vld [vmem:[#allocation2] sm:$0xff] }
 0x65b   : > { %v4529_v10 = vpop.f32.mrb[66].mxu0  ;;  %v5247_v31 = vld [vmem:[#allocation2 + $0xfd] sm:$0xff] }
 0x65c   : > { %5163 = vst [vmem:[#allocation2 + $0x110] sm:$0xff] %v5071_v39  ;;  %v5072_v30 = vmul.f32 %v16207_v8, %v4820_v5  ;;  %v4730_v20 = vmul.f32 %v13215_v7, %v15974_v42  ;;  %v13216_v22 = vadd.f32 %v4529_v10, %v15976_v44  ;;  %v12082_v27 = vpop.f32.mrb[67].mxu0  ;;  %v16223_v5 = vpop.permute.xlu1 %4998 }
 0x65d   : > { %v5248_v61 = vld [vmem:[#allocation2 + $0x105] sm:$0xff] }
 0x65e   : > { %5164 = vst [vmem:[#allocation2 + $0x118] sm:$0xff] %v5072_v30  ;;  %v4779_v21 = vadd.f32 %v15981_v46, %v4730_v20  ;;  %v4731_v40 = vmul.f32 %v13216_v22, %v15974_v42  ;;  %v5274_v41 = vpack.c.bf16 %v5248_v61, %v5247_v31 }
 0x660   : > { %v4821_v47 = vmax.f32 %v4779_v21, 0.0  ;;  %v4780_v54 = vadd.f32 %v15981_v46, %v4731_v40  ;;  %12176 = vmatmul.mubr.bf16.gmra.mrb[100].mxu1 %v5274_v41  ;;  %v16231_v41 = vpop.permute.xlu0 %5003 }
 0x661   : > { %v4534_v37 = vpop.f32.mrb[68].mxu0  ;;  %12179 = vmatprep.mubr.msk.bf16.mxu1 %vm14635_vm1, %v16217_v63 }
 0x662   : > { %v5073_v44 = vmul.f32 %v16215_v56, %v4821_v47  ;;  %v4822_v2 = vmax.f32 %v4780_v54, 0.0  ;;  %v13217_v4 = vadd.f32 %v4534_v37, %v15992_v58  ;;  %v12085_v39 = vpop.f32.mrb[69].mxu0 }
 0x663   : > { %v4537_v7 = vpop.f32.mrb[70].mxu0  ;;  %v5249_v22 = vld [vmem:[#allocation2 + $0x10d] sm:$0xff] }
 0x664   : > { %5165 = vst [vmem:[#allocation2 + $0x120] sm:$0xff] %v5073_v44  ;;  %v5074_v35 = vmul.f32 %v16223_v5, %v4822_v2  ;;  %v4732_v10 = vmul.f32 %v13217_v4, %v15974_v42  ;;  %v13218_v30 = vadd.f32 %v4537_v7, %v15998_v0  ;;  %v12086_v20 = vpop.f32.mrb[71].mxu0  ;;  %v16237_v2 = vpop.permute.xlu1 %5008 }
 0x665   : > { %v5250_v27 = vld [vmem:[#allocation2 + $0x115] sm:$0xff] }
 0x666   : > { %5166 = vst [vmem:[#allocation2 + $0x128] sm:$0xff] %v5074_v35  ;;  %v4781_v31 = vadd.f32 %v15981_v46, %v4732_v10  ;;  %v4733_v61 = vmul.f32 %v13218_v30, %v15974_v42  ;;  %v5275_v58 = vpack.c.bf16 %v5250_v27, %v5249_v22 }
 0x668   : > { %v4823_v21 = vmax.f32 %v4781_v31, 0.0  ;;  %v4782_v40 = vadd.f32 %v15981_v46, %v4733_v61  ;;  %12180 = vmatmul.mubr.bf16.gmra.mrb[104].mxu1 %v5275_v58  ;;  %v16245_v58 = vpop.permute.xlu0 %5013 }
 0x669   : > { %v4542_v47 = vpop.f32.mrb[72].mxu0  ;;  %12183 = vmatprep.mubr.msk.bf16.mxu1 %vm14635_vm1, %v16217_v63 }
 0x66a   : > { %v5075_v0 = vmul.f32 %v16231_v41, %v4823_v21  ;;  %v4824_v54 = vmax.f32 %v4782_v40, 0.0  ;;  %v13219_v37 = vadd.f32 %v4542_v47, %v16007_v13  ;;  %v12089_v44 = vpop.f32.mrb[73].mxu0 }
 0x66b   : > { %v4545_v4 = vpop.f32.mrb[74].mxu0  ;;  %v5251_v30 = vld [vmem:[#allocation2 + $0x11d] sm:$0xff] }
 0x66c   : > { %5167 = vst [vmem:[#allocation2 + $0x130] sm:$0xff] %v5075_v0  ;;  %v5076_v39 = vmul.f32 %v16237_v2, %v4824_v54  ;;  %v4734_v7 = vmul.f32 %v13219_v37, %v15974_v42  ;;  %v13220_v35 = vadd.f32 %v4545_v4, %v16012_v18  ;;  %v12090_v10 = vpop.f32.mrb[75].mxu0  ;;  %v16251_v54 = vpop.permute.xlu1 %5018 }
 0x66d   : > { %v5252_v20 = vld [vmem:[#allocation2 + $0x125] sm:$0xff]  ;;  %18040 = vst [vmem:[#allocation4_spill] sm:$0xff] %v16251_v54 }
 0x66e   : > { %5168 = vst [vmem:[#allocation2 + $0x138] sm:$0xff] %v5076_v39  ;;  %v4783_v22 = vadd.f32 %v15981_v46, %v4734_v7  ;;  %v4735_v27 = vmul.f32 %v13220_v35, %v15974_v42  ;;  %v5276_v13 = vpack.c.bf16 %v5252_v20, %v5251_v30 }
 0x670   : > { %v4825_v31 = vmax.f32 %v4783_v22, 0.0  ;;  %v4784_v61 = vadd.f32 %v15981_v46, %v4735_v27  ;;  %12184 = vmatmul.mubr.bf16.gmra.mrb[108].mxu1 %v5276_v13  ;;  %v16259_v13 = vpop.permute.xlu0 %5023 }
 0x671   : > { %v4550_v21 = vpop.f32.mrb[76].mxu0  ;;  %12187 = vmatprep.mubr.msk.bf16.mxu1 %vm14635_vm1, %v16217_v63  ;;  %18041 = vst [vmem:[#allocation5_spill] sm:$0xff] %v16259_v13 }
 0x672   : > { %v5077_v18 = vmul.f32 %v16245_v58, %v4825_v31  ;;  %v4826_v40 = vmax.f32 %v4784_v61, 0.0  ;;  %v13221_v47 = vadd.f32 %v4550_v21, %v16022_v49  ;;  %v12093_v0 = vpop.f32.mrb[77].mxu0 }
 0x673   : > { %v4553_v37 = vpop.f32.mrb[78].mxu0  ;;  %v5253_v35 = vld [vmem:[#allocation2 + $0x12d] sm:$0xff] }
 0x674   : > { %5169 = vst [vmem:[#allocation2 + $0x140] sm:$0xff] %v5077_v18  ;;  %v5078_v44 = vmul.f32 %v16251_v54, %v4826_v40  ;;  %v4736_v4 = vmul.f32 %v13221_v47, %v15974_v42  ;;  %v13222_v39 = vadd.f32 %v4553_v37, %v16031_v55  ;;  %v12094_v7 = vpop.f32.mrb[79].mxu0  ;;  %v16265_v40 = vpop.permute.xlu1 %5028 }
 0x675   : > { %v5254_v10 = vld [vmem:[#allocation2 + $0x135] sm:$0xff]  ;;  %18042 = vst [vmem:[#allocation6_spill] sm:$0xff] %v16265_v40 }
 0x676   : > { %5170 = vst [vmem:[#allocation2 + $0x148] sm:$0xff] %v5078_v44  ;;  %v4785_v30 = vadd.f32 %v15981_v46, %v4736_v4  ;;  %v4737_v20 = vmul.f32 %v13222_v39, %v15974_v42  ;;  %v5277_v49 = vpack.c.bf16 %v5254_v10, %v5253_v35 }
 0x678   : > { %v4827_v22 = vmax.f32 %v4785_v30, 0.0  ;;  %v4786_v27 = vadd.f32 %v15981_v46, %v4737_v20  ;;  %12188 = vmatmul.mubr.bf16.gmra.mrb[112].mxu1 %v5277_v49  ;;  %v16273_v49 = vpop.permute.xlu0 %5033 }
 0x679   : > { %v4558_v31 = vpop.f32.mrb[80].mxu0  ;;  %12191 = vmatprep.mubr.msk.bf16.mxu1 %vm14635_vm1, %v16217_v63  ;;  %18043 = vst [vmem:[#allocation7_spill] sm:$0xff] %v16273_v49 }
 0x67a   : > { %v5079_v55 = vmul.f32 %v16259_v13, %v4827_v22  ;;  %v4828_v61 = vmax.f32 %v4786_v27, 0.0  ;;  %v13223_v21 = vadd.f32 %v4558_v31, %v16046_v19  ;;  %v12097_v18 = vpop.f32.mrb[81].mxu0  ;;  %v16278_v27 = vpop.permute.xlu1 %5038 }
 0x67b   : > { %v4561_v47 = vpop.f32.mrb[82].mxu0  ;;  %v5255_v39 = vld [vmem:[#allocation2 + $0x13d] sm:$0xff]  ;;  %18044 = vst [vmem:[#allocation8_spill] sm:$0xff] %v16278_v27 }
 0x67c   : > { %5171 = vst [vmem:[#allocation2 + $0x150] sm:$0xff] %v5079_v55  ;;  %v5080_v0 = vmul.f32 %v16265_v40, %v4828_v61  ;;  %v4738_v37 = vmul.f32 %v13223_v21, %v15974_v42  ;;  %v13224_v44 = vadd.f32 %v4561_v47, %v16050_v34  ;;  %v12098_v4 = vpop.f32.mrb[83].mxu0  ;;  %v5672_v21 = vld [vmem:[#allocation2 + $0x16] sm:$0xff]  ;;  %v14561_v47 = vld [vmem:[%s17993_s5 + $0x80] sm:$0xff]  }
 0x67d   : > { %v5256_v7 = vld [vmem:[#allocation2 + $0x145] sm:$0xff]  ;;  %v14563_v4 = vld [vmem:[%s17993_s5 + $0x90] sm:$0xff]  }
 0x67e   : > { %5172 = vst [vmem:[#allocation2 + $0x158] sm:$0xff] %v5080_v0  ;;  %v4787_v35 = vadd.f32 %v15981_v46, %v4738_v37  ;;  %v4739_v10 = vmul.f32 %v13224_v44, %v15974_v42  ;;  %v5278_v19 = vpack.c.bf16 %v5256_v7, %v5255_v39  ;;  %v14562_v0 = vld [vmem:[%s17993_s5 + $0x88] sm:$0xff]   ;;  %v5673_v44 = vld [vmem:[#allocation2 + $0x1e] sm:$0xff] }
 0x67f   : > { %v5674_v37 = vld [vmem:[#allocation2 + $0x26] sm:$0xff]  ;;  %v14564_v7 = vld [vmem:[%s17993_s5 + $0x98] sm:$0xff]  }
 0x680   : > { %v4829_v30 = vmax.f32 %v4787_v35, 0.0  ;;  %v4788_v20 = vadd.f32 %v15981_v46, %v4739_v10  ;;  %12192 = vmatmul.mubr.bf16.gmra.mrb[116].mxu1 %v5278_v19  ;;  %v5671_v46 = vld [vmem:[#allocation2 + $0xe] sm:$0xff]  ;;  %v5714_v39 = vpack.c.bf16 %v5674_v37, %v5673_v44  ;;  %v5676_v35 = vld [vmem:[#allocation2 + $0x36] sm:$0xff]  ;;  %v14565_v19 = vld [vmem:[%s17993_s5 + $0xa0] sm:$0xff]  }
 0x681   : > { %12195 = vmatprep.mubr.msk.bf16.mxu1 %vm14635_vm1, %v16217_v63  ;;  %v5713_v18 = vpack.c.bf16 %v5672_v21, %v5671_v46  ;;  %v5675_v10 = vld [vmem:[#allocation2 + $0x2e] sm:$0xff]  ;;  %v5684_v37 = vld [vmem:[#allocation2 + $0x76] sm:$0xff] }
 0x682   : > { %v5081_v34 = vmul.f32 %v16273_v49, %v4829_v30  ;;  %v4830_v22 = vmax.f32 %v4788_v20, 0.0  ;;  %v5715_v30 = vpack.c.bf16 %v5676_v35, %v5675_v10  ;;  %v14566_v20 = vld [vmem:[%s17993_s5 + $0xa8] sm:$0xff]   ;;  %v5688_v10 = vld [vmem:[#allocation2 + $0x96] sm:$0xff] }
 0x683   : > { %v5257_v55 = vld [vmem:[#allocation2 + $0x14d] sm:$0xff] }
 0x684   : > { %5173 = vst [vmem:[#allocation2 + $0x160] sm:$0xff] %v5081_v34  ;;  %v5082_v31 = vmul.f32 %v16278_v27, %v4830_v22  ;;  %v5678_v34 = vld [vmem:[#allocation2 + $0x46] sm:$0xff]  ;;  %v5677_v22 = vld [vmem:[#allocation2 + $0x3e] sm:$0xff]  ;;  %v5679_v46 = vld [vmem:[#allocation2 + $0x4e] sm:$0xff] }
 0x685   : > { %v5258_v42 = vld [vmem:[#allocation2 + $0x155] sm:$0xff] }
 0x686   : > { %5174 = vst [vmem:[#allocation2 + $0x168] sm:$0xff] %v5082_v31  ;;  %v5279_v61 = vpack.c.bf16 %v5258_v42, %v5257_v55  ;;  %v14567_v31 = vld [vmem:[%s17993_s5 + $0xb0] sm:$0xff]   ;;  %v5716_v55 = vpack.c.bf16 %v5678_v34, %v5677_v22  ;;  %v14568_v42 = vld [vmem:[%s17993_s5 + $0xb8] sm:$0xff]  }
 0x687   : > { %v5683_v44 = vld [vmem:[#allocation2 + $0x6e] sm:$0xff]  ;;  %v5689_v34 = vld [vmem:[#allocation2 + $0x9e] sm:$0xff] }
 0x688   : > { %12196 = vmatmul.mubr.bf16.gmra.mrb[120].mxu1 %v5279_v61  ;;  %v5680_v61 = vld [vmem:[#allocation2 + $0x56] sm:$0xff] }
 0x689   : > { %12215 = vmatprep.mubr.msk.bf16.mxu1 %vm14635_vm1, %v16217_v63  ;;  %v5717_v21 = vpack.c.bf16 %v5680_v61, %v5679_v46  ;;  %v5694_v61 = vld [vmem:[#allocation2 + $0xc6] sm:$0xff]  ;;  %v5693_v46 = vld [vmem:[#allocation2 + $0xbe] sm:$0xff] }
 0x690   : > { %12216 = vmatmul.mubr.bf16.vlgmr.msra.gmra.mrb[40].mxu1 %v5713_v18  ;;  %v5682_v18 = vld [vmem:[#allocation2 + $0x66] sm:$0xff] }
 0x691   : > { %12300 = vmatpush3.bf16.msra.mxu1 %v14561_v47  ;;  %12219 = vmatprep.mubr.msk.bf16.mxu1 %vm14635_vm1, %v16217_v63  ;;  %v5681_v47 = vld [vmem:[#allocation2 + $0x5e] sm:$0xff] }
 0x692   : > { %12301 = vmatprep.subr.bf16.mxu1 %v16217_v63 }
 0x695   : > { %12302 = vmatpush3.bf16.msra.mxu1 %v14562_v0  ;;  %v5718_v0 = vpack.c.bf16 %v5682_v18, %v5681_v47  ;;  %v5696_v18 = vld [vmem:[#allocation2 + $0xd6] sm:$0xff]  ;;  %v5695_v47 = vld [vmem:[#allocation2 + $0xce] sm:$0xff] }
 0x696   : > { %12303 = vmatprep.subr.bf16.mxu1 %v16217_v63 }
 0x698   : > { %12220 = vmatmul.mubr.bf16.gmra.mrb[44].mxu1 %v5714_v39  ;;  %v5686_v39 = vld [vmem:[#allocation2 + $0x86] sm:$0xff] }
 0x699   : > { %12223 = vmatprep.mubr.msk.bf16.mxu1 %vm14635_vm1, %v16217_v63  ;;  %12304 = vmatpush3.bf16.msra.mxu1 %v14563_v4  ;;  %v5719_v4 = vpack.c.bf16 %v5684_v37, %v5683_v44  ;;  %v5698_v37 = vld [vmem:[#allocation2 + $0xe6] sm:$0xff]  ;;  %v5697_v44 = vld [vmem:[#allocation2 + $0xde] sm:$0xff] }
 0x69a   : > { %12305 = vmatprep.subr.bf16.mxu1 %v16217_v63 }
 0x69d   : > { %12306 = vmatpush3.bf16.msra.mxu1 %v14564_v7  ;;  %v5685_v7 = vld [vmem:[#allocation2 + $0x7e] sm:$0xff] }
 0x69e   : > { %12307 = vmatprep.subr.bf16.mxu1 %v16217_v63  ;;  %v5720_v35 = vpack.c.bf16 %v5686_v39, %v5685_v7  ;;  %v5700_v39 = vld [vmem:[#allocation2 + $0xf6] sm:$0xff]  ;;  %v5699_v7 = vld [vmem:[#allocation2 + $0xee] sm:$0xff] }
 0x6a0   : > { %12224 = vmatmul.mubr.bf16.gmra.mrb[48].mxu1 %v5715_v30 }
 0x6a1   : > { %12227 = vmatprep.mubr.msk.bf16.mxu1 %vm14635_vm1, %v16217_v63  ;;  %12308 = vmatpush3.bf16.msra.mxu1 %v14565_v19  ;;  %v5687_v19 = vld [vmem:[#allocation2 + $0x8e] sm:$0xff] }
 0x6a2   : > { %12309 = vmatprep.subr.bf16.mxu1 %v16217_v63  ;;  %v5721_v30 = vpack.c.bf16 %v5688_v10, %v5687_v19  ;;  %v5702_v10 = vld [vmem:[#allocation2 + $0x106] sm:$0xff]  ;;  %v5701_v19 = vld [vmem:[#allocation2 + $0xfe] sm:$0xff] }
 0x6a5   : > { %12310 = vmatpush3.bf16.msra.mxu1 %v14566_v20  ;;  %v5690_v20 = vld [vmem:[#allocation2 + $0xa6] sm:$0xff] }
 0x6a6   : > { %12311 = vmatprep.subr.bf16.mxu1 %v16217_v63  ;;  %v5722_v22 = vpack.c.bf16 %v5690_v20, %v5689_v34  ;;  %v5704_v20 = vld [vmem:[#allocation2 + $0x116] sm:$0xff]  ;;  %v5703_v34 = vld [vmem:[#allocation2 + $0x10e] sm:$0xff] }
 0x6a8   : > { %12228 = vmatmul.mubr.bf16.gmra.mrb[52].mxu1 %v5716_v55  ;;  %v5691_v55 = vld [vmem:[#allocation2 + $0xae] sm:$0xff] }
 0x6a9   : > { %12231 = vmatprep.mubr.msk.bf16.mxu1 %vm14635_vm1, %v16217_v63  ;;  %12312 = vmatpush3.bf16.msra.mxu1 %v14567_v31  ;;  %v5692_v31 = vld [vmem:[#allocation2 + $0xb6] sm:$0xff] }
 0x6aa   : > { %12313 = vmatprep.subr.bf16.mxu1 %v16217_v63 }
 0x6ad   : > { %12314 = vmatpush3.bf16.msra.mxu1 %v14568_v42  ;;  %v5723_v42 = vpack.c.bf16 %v5692_v31, %v5691_v55  ;;  %v5706_v31 = vld [vmem:[#allocation2 + $0x126] sm:$0xff]  ;;  %v5705_v55 = vld [vmem:[#allocation2 + $0x11e] sm:$0xff] }
 0x6ae   : > { %12399 = vmatprep.subr.bf16.mxu1 %v16217_v63 }
 0x6b0   : > { %12232 = vmatmul.mubr.bf16.gmra.mrb[56].mxu1 %v5717_v21  ;;  %v5724_v21 = vpack.c.bf16 %v5694_v61, %v5693_v46  ;;  %v5708_v61 = vld [vmem:[#allocation2 + $0x136] sm:$0xff]  ;;  %v5707_v46 = vld [vmem:[#allocation2 + $0x12e] sm:$0xff] }
 0x6b1   : > { %12235 = vmatprep.mubr.msk.bf16.mxu1 %vm14635_vm1, %v16217_v63 }
 0x6b8   : > { %12236 = vmatmul.mubr.bf16.gmra.mrb[60].mxu1 %v5718_v0  ;;  %v5725_v0 = vpack.c.bf16 %v5696_v18, %v5695_v47  ;;  %v5710_v18 = vld [vmem:[#allocation2 + $0x146] sm:$0xff]  ;;  %v5709_v47 = vld [vmem:[#allocation2 + $0x13e] sm:$0xff] }
 0x6b9   : > { %12239 = vmatprep.mubr.msk.bf16.mxu1 %vm14635_vm1, %v16217_v63 }
 0x6c0   : > { %12240 = vmatmul.mubr.bf16.gmra.mrb[64].mxu1 %v5719_v4  ;;  %v5726_v4 = vpack.c.bf16 %v5698_v37, %v5697_v44  ;;  %v5712_v37 = vld [vmem:[#allocation2 + $0x156] sm:$0xff]  ;;  %v5711_v44 = vld [vmem:[#allocation2 + $0x14e] sm:$0xff] }
 0x6c1   : > { %12243 = vmatprep.mubr.msk.bf16.mxu1 %vm14635_vm1, %v16217_v63 }
 0x6c8   : > { %12244 = vmatmul.mubr.bf16.gmra.mrb[68].mxu1 %v5720_v35  ;;  %v5727_v35 = vpack.c.bf16 %v5700_v39, %v5699_v7  ;;  %v6126_v39 = vld [vmem:[#allocation2 + $0xf] sm:$0xff]  ;;  %v6127_v7 = vld [vmem:[#allocation2 + $0x17] sm:$0xff] }
 0x6c9   : > { %12247 = vmatprep.mubr.msk.bf16.mxu1 %vm14635_vm1, %v16217_v63 }
 0x6d0   : > { %12248 = vmatmul.mubr.bf16.gmra.mrb[72].mxu1 %v5721_v30  ;;  %v5728_v30 = vpack.c.bf16 %v5702_v10, %v5701_v19  ;;  %v14569_v10 = vld [vmem:[%s17993_s5 + $0xc0] sm:$0xff]   ;;  %v14570_v19 = vld [vmem:[%s17993_s5 + $0xc8] sm:$0xff]  }
 0x6d1   : > { %12251 = vmatprep.mubr.msk.bf16.mxu1 %vm14635_vm1, %v16217_v63 }
 0x6d8   : > { %12252 = vmatmul.mubr.bf16.gmra.mrb[76].mxu1 %v5722_v22  ;;  %v5729_v22 = vpack.c.bf16 %v5704_v20, %v5703_v34  ;;  %v6128_v20 = vld [vmem:[#allocation2 + $0x1f] sm:$0xff]  ;;  %v14571_v34 = vld [vmem:[%s17993_s5 + $0xd0] sm:$0xff]  }
 0x6d9   : > { %12255 = vmatprep.mubr.msk.bf16.mxu1 %vm14635_vm1, %v16217_v63 }
 0x6e0   : > { %12256 = vmatmul.mubr.bf16.gmra.mrb[80].mxu1 %v5723_v42  ;;  %v5730_v42 = vpack.c.bf16 %v5706_v31, %v5705_v55  ;;  %v14572_v31 = vld [vmem:[%s17993_s5 + $0xd8] sm:$0xff]  }
 0x6e1   : > { %12259 = vmatprep.mubr.msk.bf16.mxu1 %vm14635_vm1, %v16217_v63  ;;  %v6131_v55 = vld [vmem:[#allocation2 + $0x37] sm:$0xff] }
 0x6e8   : > { %12260 = vmatmul.mubr.bf16.gmra.mrb[84].mxu1 %v5724_v21  ;;  %v5731_v21 = vpack.c.bf16 %v5708_v61, %v5707_v46  ;;  %v14573_v61 = vld [vmem:[%s17993_s5 + $0xe0] sm:$0xff]  }
 0x6e9   : > { %12263 = vmatprep.mubr.msk.bf16.mxu1 %vm14635_vm1, %v16217_v63 }
 0x6f0   : > { %12264 = vmatmul.mubr.bf16.gmra.mrb[88].mxu1 %v5725_v0  ;;  %v5732_v0 = vpack.c.bf16 %v5710_v18, %v5709_v47  ;;  %v6133_v18 = vld [vmem:[#allocation2 + $0x47] sm:$0xff]  ;;  %v6132_v47 = vld [vmem:[#allocation2 + $0x3f] sm:$0xff] }
 0x6f1   : > { %12267 = vmatprep.mubr.msk.bf16.mxu1 %vm14635_vm1, %v16217_v63 }
 0x6f8   : > { %12268 = vmatmul.mubr.bf16.gmra.mrb[92].mxu1 %v5726_v4  ;;  %v5733_v4 = vpack.c.bf16 %v5712_v37, %v5711_v44  ;;  %v16395_v37 = vpack.c.bf16 %v6133_v18, %v6132_v47  ;;  %v14576_v44 = vld [vmem:[%s17993_s5 + $0xf8] sm:$0xff]   ;;  %v6145_v47 = vld [vmem:[#allocation2 + $0xa7] sm:$0xff] }
 0x6f9   : > { %12271 = vmatprep.mubr.msk.bf16.mxu1 %vm14635_vm1, %v16217_v63 }
 0x700   : > { %12272 = vmatmul.mubr.bf16.gmra.mrb[96].mxu1 %v5727_v35  ;;  %v6168_v35 = vpack.c.bf16 %v6127_v7, %v6126_v39  ;;  %v6134_v39 = vld [vmem:[#allocation2 + $0x4f] sm:$0xff] }
 0x701   : > { %12275 = vmatprep.mubr.msk.bf16.mxu1 %vm14635_vm1, %v16217_v63 }
 0x708   : > { %12276 = vmatmul.mubr.bf16.gmra.mrb[100].mxu1 %v5728_v30  ;;  %v6129_v30 = vld [vmem:[#allocation2 + $0x27] sm:$0xff] }
 0x709   : > { %12279 = vmatprep.mubr.msk.bf16.mxu1 %vm14635_vm1, %v16217_v63 }
 0x710   : > { %12280 = vmatmul.mubr.bf16.gmra.mrb[104].mxu1 %v5729_v22  ;;  %v16369_v22 = vpack.c.bf16 %v6129_v30, %v6128_v20  ;;  %v6139_v30 = vld [vmem:[#allocation2 + $0x77] sm:$0xff]  ;;  %v6138_v20 = vld [vmem:[#allocation2 + $0x6f] sm:$0xff] }
 0x711   : > { %12283 = vmatprep.mubr.msk.bf16.mxu1 %vm14635_vm1, %v16217_v63 }
 0x718   : > { %12284 = vmatmul.mubr.bf16.gmra.mrb[108].mxu1 %v5730_v42  ;;  %v6130_v42 = vld [vmem:[#allocation2 + $0x2f] sm:$0xff] }
 0x719   : > { %12287 = vmatprep.mubr.msk.bf16.mxu1 %vm14635_vm1, %v16217_v63  ;;  %v16382_v46 = vpack.c.bf16 %v6131_v55, %v6130_v42  ;;  %v6140_v55 = vld [vmem:[#allocation2 + $0x7f] sm:$0xff] }
 0x720   : > { %12288 = vmatmul.mubr.bf16.gmra.mrb[112].mxu1 %v5731_v21  ;;  %v14574_v21 = vld [vmem:[%s17993_s5 + $0xe8] sm:$0xff]  }
 0x721   : > { %12291 = vmatprep.mubr.msk.bf16.mxu1 %vm14635_vm1, %v16217_v63 }
 0x728   : > { %12292 = vmatmul.mubr.bf16.gmra.mrb[116].mxu1 %v5732_v0  ;;  %v14575_v0 = vld [vmem:[%s17993_s5 + $0xf0] sm:$0xff]  }
 0x729   : > { %12295 = vmatprep.mubr.msk.bf16.mxu1 %vm14635_vm1, %v16217_v63 }
 0x730   : > { %12296 = vmatmul.mubr.bf16.gmra.mrb[120].mxu1 %v5733_v4  ;;  %v6135_v4 = vld [vmem:[#allocation2 + $0x57] sm:$0xff] }
 0x731   : > { %12315 = vmatprep.mubr.msk.bf16.mxu1 %vm14635_vm1, %v16217_v63  ;;  %v16405_v7 = vpack.c.bf16 %v6135_v4, %v6134_v39  ;;  %v6147_v4 = vld [vmem:[#allocation2 + $0xb7] sm:$0xff]  ;;  %v6146_v39 = vld [vmem:[#allocation2 + $0xaf] sm:$0xff] }
 0x738   : > { %12316 = vmatmul.mubr.bf16.vlgmr.msra.gmra.mrb[40].mxu1 %v6168_v35  ;;  %v6137_v35 = vld [vmem:[#allocation2 + $0x67] sm:$0xff] }
 0x739   : > { %12400 = vmatpush3.bf16.msra.mxu1 %v14569_v10  ;;  %12319 = vmatprep.mubr.msk.bf16.mxu1 %vm14635_vm1, %v16217_v63  ;;  %v6136_v10 = vld [vmem:[#allocation2 + $0x5f] sm:$0xff] }
 0x73a   : > { %12401 = vmatprep.subr.bf16.mxu1 %v16217_v63 }
 0x73d   : > { %12402 = vmatpush3.bf16.msra.mxu1 %v14570_v19  ;;  %v16411_v19 = vpack.c.bf16 %v6137_v35, %v6136_v10  ;;  %v16436_v35 = vpack.c.bf16 %v6147_v4, %v6146_v39  ;;  %v6149_v10 = vld [vmem:[#allocation2 + $0xc7] sm:$0xff]  ;;  %v6155_v4 = vld [vmem:[#allocation2 + $0xf7] sm:$0xff]  ;;  %v6154_v39 = vld [vmem:[#allocation2 + $0xef] sm:$0xff] }
 0x73e   : > { %12403 = vmatprep.subr.bf16.mxu1 %v16217_v63 }
 0x740   : > { %12320 = vmatmul.mubr.bf16.gmra.mrb[44].mxu1 %v16369_v22 }
 0x741   : > { %12323 = vmatprep.mubr.msk.bf16.mxu1 %vm14635_vm1, %v16217_v63  ;;  %12404 = vmatpush3.bf16.msra.mxu1 %v14571_v34  ;;  %v16416_v34 = vpack.c.bf16 %v6139_v30, %v6138_v20  ;;  %v6148_v30 = vld [vmem:[#allocation2 + $0xbf] sm:$0xff] }
 0x742   : > { %12405 = vmatprep.subr.bf16.mxu1 %v16217_v63  ;;  %v16441_v20 = vpack.c.bf16 %v6149_v10, %v6148_v30  ;;  %v16456_v10 = vpack.c.bf16 %v6155_v4, %v6154_v39  ;;  %v6157_v30 = vld [vmem:[#allocation2 + $0x107] sm:$0xff]  ;;  %v6160_v39 = vld [vmem:[#allocation2 + $0x11f] sm:$0xff] }
 0x743   : > { %v6161_v4 = vld [vmem:[#allocation2 + $0x127] sm:$0xff] }
 0x744   : > { %v16471_v49 = vpack.c.bf16 %v6161_v4, %v6160_v39  ;;  %v6167_v4 = vld [vmem:[#allocation2 + $0x157] sm:$0xff]  ;;  %v6166_v39 = vld [vmem:[#allocation2 + $0x14f] sm:$0xff] }
 0x745   : > { %12406 = vmatpush3.bf16.msra.mxu1 %v14572_v31  ;;  %v6141_v31 = vld [vmem:[#allocation2 + $0x87] sm:$0xff]  ;;  %v16486_v54 = vpack.c.bf16 %v6167_v4, %v6166_v39  ;;  %v14583_v4 = vld [vmem:[%s17993_s5 + $0x130] sm:$0xff]  }
 0x746   : > { %12407 = vmatprep.subr.bf16.mxu1 %v16217_v63  ;;  %v16421_v42 = vpack.c.bf16 %v6141_v31, %v6140_v55  ;;  %v6151_v31 = vld [vmem:[#allocation2 + $0xd7] sm:$0xff]  ;;  %v6150_v55 = vld [vmem:[#allocation2 + $0xcf] sm:$0xff] }
 0x747   : > { %v14590_v39 = vld [vmem:[%s17993_s5 + $0x168] sm:$0xff]  }
 0x748   : > { %12324 = vmatmul.mubr.bf16.gmra.mrb[48].mxu1 %v16382_v46 }
 0x749   : > { %12327 = vmatprep.mubr.msk.bf16.mxu1 %vm14635_vm1, %v16217_v63  ;;  %12408 = vmatpush3.bf16.msra.mxu1 %v14573_v61  ;;  %v6143_v61 = vld [vmem:[#allocation2 + $0x97] sm:$0xff] }
 0x74a   : > { %12409 = vmatprep.subr.bf16.mxu1 %v16217_v63 }
 0x74d   : > { %12410 = vmatpush3.bf16.msra.mxu1 %v14574_v21  ;;  %v6142_v21 = vld [vmem:[#allocation2 + $0x8f] sm:$0xff] }
 0x74e   : > { %12411 = vmatprep.subr.bf16.mxu1 %v16217_v63  ;;  %v16426_v18 = vpack.c.bf16 %v6143_v61, %v6142_v21  ;;  %v16446_v61 = vpack.c.bf16 %v6151_v31, %v6150_v55  ;;  %v6153_v21 = vld [vmem:[#allocation2 + $0xe7] sm:$0xff]  ;;  %v6156_v31 = vld [vmem:[#allocation2 + $0xff] sm:$0xff] }
 0x74f   : > { %v16461_v55 = vpack.c.bf16 %v6157_v30, %v6156_v31  ;;  %v6163_v30 = vld [vmem:[#allocation2 + $0x137] sm:$0xff]  ;;  %v6162_v31 = vld [vmem:[#allocation2 + $0x12f] sm:$0xff] }
 0x750   : > { %12328 = vmatmul.mubr.bf16.gmra.mrb[52].mxu1 %v16395_v37  ;;  %v16476_v40 = vpack.c.bf16 %v6163_v30, %v6162_v31  ;;  %v14577_v30 = vld [vmem:[%s17993_s5 + $0x100] sm:$0xff]   ;;  %v14578_v31 = vld [vmem:[%s17993_s5 + $0x108] sm:$0xff]  }
 0x751   : > { %12331 = vmatprep.mubr.msk.bf16.mxu1 %vm14635_vm1, %v16217_v63  ;;  %12412 = vmatpush3.bf16.msra.mxu1 %v14575_v0  ;;  %v6144_v0 = vld [vmem:[#allocation2 + $0x9f] sm:$0xff] }
 0x752   : > { %12413 = vmatprep.subr.bf16.mxu1 %v16217_v63 }
 0x755   : > { %12414 = vmatpush3.bf16.msra.mxu1 %v14576_v44  ;;  %v16431_v44 = vpack.c.bf16 %v6145_v47, %v6144_v0  ;;  %v6152_v47 = vld [vmem:[#allocation2 + $0xdf] sm:$0xff] }
 0x756   : > { %12499 = vmatprep.subr.bf16.mxu1 %v16217_v63  ;;  %v16451_v0 = vpack.c.bf16 %v6153_v21, %v6152_v47  ;;  %v6159_v21 = vld [vmem:[#allocation2 + $0x117] sm:$0xff]  ;;  %v6158_v47 = vld [vmem:[#allocation2 + $0x10f] sm:$0xff] }
 0x757   : > { %v16466_v27 = vpack.c.bf16 %v6159_v21, %v6158_v47  ;;  %v6165_v21 = vld [vmem:[#allocation2 + $0x147] sm:$0xff]  ;;  %v6164_v47 = vld [vmem:[#allocation2 + $0x13f] sm:$0xff] }
 0x758   : > { %12332 = vmatmul.mubr.bf16.gmra.mrb[56].mxu1 %v16405_v7  ;;  %v16481_v13 = vpack.c.bf16 %v6165_v21, %v6164_v47  ;;  %v14579_v21 = vld [vmem:[%s17993_s5 + $0x110] sm:$0xff]   ;;  %v14581_v47 = vld [vmem:[%s17993_s5 + $0x120] sm:$0xff]  }
 0x759   : > { %12335 = vmatprep.mubr.msk.bf16.mxu1 %vm14635_vm1, %v16217_v63 }
 0x760   : > { %12336 = vmatmul.mubr.bf16.gmra.mrb[60].mxu1 %v16411_v19 }
 0x761   : > { %12339 = vmatprep.mubr.msk.bf16.mxu1 %vm14635_vm1, %v16217_v63 }
 0x768   : > { %12340 = vmatmul.mubr.bf16.gmra.mrb[64].mxu1 %v16416_v34 }
 0x769   : > { %12343 = vmatprep.mubr.msk.bf16.mxu1 %vm14635_vm1, %v16217_v63 }
 0x770   : > { %12344 = vmatmul.mubr.bf16.gmra.mrb[68].mxu1 %v16421_v42 }
 0x771   : > { %12347 = vmatprep.mubr.msk.bf16.mxu1 %vm14635_vm1, %v16217_v63 }
 0x778   : > { %12348 = vmatmul.mubr.bf16.gmra.mrb[72].mxu1 %v16426_v18 }
 0x779   : > { %12351 = vmatprep.mubr.msk.bf16.mxu1 %vm14635_vm1, %v16217_v63 }
 0x780   : > { %12352 = vmatmul.mubr.bf16.gmra.mrb[76].mxu1 %v16431_v44 }
 0x781   : > { %12355 = vmatprep.mubr.msk.bf16.mxu1 %vm14635_vm1, %v16217_v63 }
 0x788   : > { %12356 = vmatmul.mubr.bf16.gmra.mrb[80].mxu1 %v16436_v35 }
 0x789   : > { %12359 = vmatprep.mubr.msk.bf16.mxu1 %vm14635_vm1, %v16217_v63 }
 0x790   : > { %12360 = vmatmul.mubr.bf16.gmra.mrb[84].mxu1 %v16441_v20 }
 0x791   : > { %12363 = vmatprep.mubr.msk.bf16.mxu1 %vm14635_vm1, %v16217_v63 }
 0x798   : > { %12364 = vmatmul.mubr.bf16.gmra.mrb[88].mxu1 %v16446_v61 }
 0x799   : > { %12367 = vmatprep.mubr.msk.bf16.mxu1 %vm14635_vm1, %v16217_v63 }
 0x7a0   : > { %12368 = vmatmul.mubr.bf16.gmra.mrb[92].mxu1 %v16451_v0 }
 0x7a1   : > { %12371 = vmatprep.mubr.msk.bf16.mxu1 %vm14635_vm1, %v16217_v63 }
 0x7a8   : > { %12372 = vmatmul.mubr.bf16.gmra.mrb[96].mxu1 %v16456_v10 }
 0x7a9   : > { %12375 = vmatprep.mubr.msk.bf16.mxu1 %vm14635_vm1, %v16217_v63 }
 0x7b0   : > { %12376 = vmatmul.mubr.bf16.gmra.mrb[100].mxu1 %v16461_v55 }
 0x7b1   : > { %12379 = vmatprep.mubr.msk.bf16.mxu1 %vm14635_vm1, %v16217_v63 }
 0x7b8   : > { %12380 = vmatmul.mubr.bf16.gmra.mrb[104].mxu1 %v16466_v27 }
 0x7b9   : > { %12383 = vmatprep.mubr.msk.bf16.mxu1 %vm14635_vm1, %v16217_v63 }
 0x7c0   : > { %12384 = vmatmul.mubr.bf16.gmra.mrb[108].mxu1 %v16471_v49 }
 0x7c1   : > { %12387 = vmatprep.mubr.msk.bf16.mxu1 %vm14635_vm1, %v16217_v63 }
 0x7c8   : > { %12388 = vmatmul.mubr.bf16.gmra.mrb[112].mxu1 %v16476_v40 }
 0x7c9   : > { %12391 = vmatprep.mubr.msk.bf16.mxu1 %vm14635_vm1, %v16217_v63 }
 0x7d0   : > { %12392 = vmatmul.mubr.bf16.gmra.mrb[116].mxu1 %v16481_v13 }
 0x7d1   : > { %12395 = vmatprep.mubr.msk.bf16.mxu1 %vm14635_vm1, %v16217_v63 }
 0x7d8   : > { %12396 = vmatmul.mubr.bf16.gmra.mrb[120].mxu1 %v16486_v54 }
 0x7d9   : > { %12415 = vmatprep.mubr.msk.bf16.mxu1 %vm14635_vm1, %v16217_v63 }
 0x7e0   : > { %12416 = vmatmul.mubr.bf16.vlgmr.msra.gmra.mrb[40].mxu1 %v16369_v22  ;;  %v14580_v22 = vld [vmem:[%s17993_s5 + $0x118] sm:$0xff]  }
 0x7e1   : > { %12500 = vmatpush3.bf16.msra.mxu1 %v14577_v30  ;;  %12419 = vmatprep.mubr.msk.bf16.mxu1 %vm14635_vm1, %v16217_v63  ;;  %v7043_v30 = vld [vmem:[#allocation2 + $0x58] sm:$0xff] }
 0x7e2   : > { %12501 = vmatprep.subr.bf16.mxu1 %v16217_v63 }
 0x7e5   : > { %12502 = vmatpush3.bf16.msra.mxu1 %v14578_v31  ;;  %v7042_v31 = vld [vmem:[#allocation2 + $0x50] sm:$0xff] }
 0x7e6   : > { %12503 = vmatprep.subr.bf16.mxu1 %v16217_v63 }
 0x7e8   : > { %12420 = vmatmul.mubr.bf16.gmra.mrb[44].mxu1 %v16382_v46  ;;  %v14582_v46 = vld [vmem:[%s17993_s5 + $0x128] sm:$0xff]  }
 0x7e9   : > { %12423 = vmatprep.mubr.msk.bf16.mxu1 %vm14635_vm1, %v16217_v63  ;;  %12504 = vmatpush3.bf16.msra.mxu1 %v14579_v21  ;;  %v14591_v21 = vld [vmem:[%s17993_s5 + $0x170] sm:$0xff]  }
 0x7ea   : > { %12505 = vmatprep.subr.bf16.mxu1 %v16217_v63 }
 0x7ed   : > { %12506 = vmatpush3.bf16.msra.mxu1 %v14580_v22  ;;  %v7081_v22 = vpack.c.bf16 %v7043_v30, %v7042_v31  ;;  %v7059_v30 = vld [vmem:[#allocation2 + $0xd8] sm:$0xff]  ;;  %v7058_v31 = vld [vmem:[#allocation2 + $0xd0] sm:$0xff] }
 0x7ee   : > { %12507 = vmatprep.subr.bf16.mxu1 %v16217_v63 }
 0x7f0   : > { %12424 = vmatmul.mubr.bf16.gmra.mrb[48].mxu1 %v16395_v37  ;;  %v14584_v37 = vld [vmem:[%s17993_s5 + $0x138] sm:$0xff]  }
 0x7f1   : > { %12427 = vmatprep.mubr.msk.bf16.mxu1 %vm14635_vm1, %v16217_v63  ;;  %12508 = vmatpush3.bf16.msra.mxu1 %v14581_v47  ;;  %v14592_v47 = vld [vmem:[%s17993_s5 + $0x178] sm:$0xff]  }
 0x7f2   : > { %12509 = vmatprep.subr.bf16.mxu1 %v16217_v63 }
 0x7f5   : > { %12510 = vmatpush3.bf16.msra.mxu1 %v14582_v46  ;;  %v7045_v46 = vld [vmem:[#allocation2 + $0x68] sm:$0xff] }
 0x7f6   : > { %12511 = vmatprep.subr.bf16.mxu1 %v16217_v63 }
 0x7f8   : > { %12428 = vmatmul.mubr.bf16.gmra.mrb[52].mxu1 %v16405_v7 }
 0x7f9   : > { %12431 = vmatprep.mubr.msk.bf16.mxu1 %vm14635_vm1, %v16217_v63  ;;  %12512 = vmatpush3.bf16.msra.mxu1 %v14583_v4  ;;  %v7044_v4 = vld [vmem:[#allocation2 + $0x60] sm:$0xff] }
 0x7fa   : > { %12513 = vmatprep.subr.bf16.mxu1 %v16217_v63 }
 0x7fd   : > { %12514 = vmatpush3.bf16.msra.mxu1 %v14584_v37  ;;  %v7082_v37 = vpack.c.bf16 %v7045_v46, %v7044_v4  ;;  %v7060_v46 = vld [vmem:[#allocation2 + $0xe0] sm:$0xff] }
 0x7fe   : > { %12599 = vmatprep.subr.bf16.mxu1 %v16217_v63 }
 0x800   : > { %12432 = vmatmul.mubr.bf16.gmra.mrb[56].mxu1 %v16411_v19  ;;  %v7036_v19 = vld [vmem:[#allocation2 + $0x20] sm:$0xff] }
 0x801   : > { %12435 = vmatprep.mubr.msk.bf16.mxu1 %vm14635_vm1, %v16217_v63 }
 0x808   : > { %12436 = vmatmul.mubr.bf16.gmra.mrb[60].mxu1 %v16416_v34 }
 0x809   : > { %12439 = vmatprep.mubr.msk.bf16.mxu1 %vm14635_vm1, %v16217_v63 }
 0x810   : > { %12440 = vmatmul.mubr.bf16.gmra.mrb[64].mxu1 %v16421_v42  ;;  %v7039_v42 = vld [vmem:[#allocation2 + $0x38] sm:$0xff] }
 0x811   : > { %12443 = vmatprep.mubr.msk.bf16.mxu1 %vm14635_vm1, %v16217_v63 }
 0x818   : > { %12444 = vmatmul.mubr.bf16.gmra.mrb[68].mxu1 %v16426_v18  ;;  %v7038_v18 = vld [vmem:[#allocation2 + $0x30] sm:$0xff] }
 0x819   : > { %12447 = vmatprep.mubr.msk.bf16.mxu1 %vm14635_vm1, %v16217_v63 }
 0x820   : > { %12448 = vmatmul.mubr.bf16.gmra.mrb[72].mxu1 %v16431_v44  ;;  %v14587_v44 = vld [vmem:[%s17993_s5 + $0x150] sm:$0xff]  }
 0x821   : > { %12451 = vmatprep.mubr.msk.bf16.mxu1 %vm14635_vm1, %v16217_v63 }
 0x828   : > { %12452 = vmatmul.mubr.bf16.gmra.mrb[76].mxu1 %v16436_v35  ;;  %v7079_v35 = vpack.c.bf16 %v7039_v42, %v7038_v18  ;;  %v7053_v18 = vld [vmem:[#allocation2 + $0xa8] sm:$0xff] }
 0x829   : > { %12455 = vmatprep.mubr.msk.bf16.mxu1 %vm14635_vm1, %v16217_v63 }
 0x830   : > { %12456 = vmatmul.mubr.bf16.gmra.mrb[80].mxu1 %v16441_v20  ;;  %v14588_v20 = vld [vmem:[%s17993_s5 + $0x158] sm:$0xff]  }
 0x831   : > { %12459 = vmatprep.mubr.msk.bf16.mxu1 %vm14635_vm1, %v16217_v63 }
 0x838   : > { %12460 = vmatmul.mubr.bf16.gmra.mrb[84].mxu1 %v16446_v61  ;;  %v7041_v61 = vld [vmem:[#allocation2 + $0x48] sm:$0xff] }
 0x839   : > { %12463 = vmatprep.mubr.msk.bf16.mxu1 %vm14635_vm1, %v16217_v63 }
 0x840   : > { %12464 = vmatmul.mubr.bf16.gmra.mrb[88].mxu1 %v16451_v0  ;;  %v7040_v0 = vld [vmem:[#allocation2 + $0x40] sm:$0xff] }
 0x841   : > { %12467 = vmatprep.mubr.msk.bf16.mxu1 %vm14635_vm1, %v16217_v63 }
 0x848   : > { %12468 = vmatmul.mubr.bf16.gmra.mrb[92].mxu1 %v16456_v10  ;;  %v14589_v10 = vld [vmem:[%s17993_s5 + $0x160] sm:$0xff]  }
 0x849   : > { %12471 = vmatprep.mubr.msk.bf16.mxu1 %vm14635_vm1, %v16217_v63 }
 0x850   : > { %12472 = vmatmul.mubr.bf16.gmra.mrb[96].mxu1 %v16461_v55  ;;  %v7080_v55 = vpack.c.bf16 %v7041_v61, %v7040_v0  ;;  %v7054_v61 = vld [vmem:[#allocation2 + $0xb0] sm:$0xff] }
 0x851   : > { %12475 = vmatprep.mubr.msk.bf16.mxu1 %vm14635_vm1, %v16217_v63 }
 0x858   : > { %12476 = vmatmul.mubr.bf16.gmra.mrb[100].mxu1 %v16466_v27  ;;  %v6622_v27 = vld [vmem:[#allocation2 + $0x167] sm:$0xff] }
 0x859   : > { %12479 = vmatprep.mubr.msk.bf16.mxu1 %vm14635_vm1, %v16217_v63 }
 0x860   : > { %12480 = vmatmul.mubr.bf16.gmra.mrb[104].mxu1 %v16471_v49  ;;  %v6621_v49 = vld [vmem:[#allocation2 + $0x15f] sm:$0xff] }
 0x861   : > { %12483 = vmatprep.mubr.msk.bf16.mxu1 %vm14635_vm1, %v16217_v63  ;;  %v6643_v7 = vpack.c.bf16 %v6622_v27, %v6621_v49  ;;  %v7047_v27 = vld [vmem:[#allocation2 + $0x78] sm:$0xff]  ;;  %v7046_v49 = vld [vmem:[#allocation2 + $0x70] sm:$0xff] }
 0x868   : > { %12484 = vmatmul.mubr.bf16.gmra.mrb[108].mxu1 %v16476_v40  ;;  %v7037_v40 = vld [vmem:[#allocation2 + $0x28] sm:$0xff] }
 0x869   : > { %12487 = vmatprep.mubr.msk.bf16.mxu1 %vm14635_vm1, %v16217_v63  ;;  %v7078_v34 = vpack.c.bf16 %v7037_v40, %v7036_v19  ;;  %v7049_v40 = vld [vmem:[#allocation2 + $0x88] sm:$0xff]  ;;  %v7048_v19 = vld [vmem:[#allocation2 + $0x80] sm:$0xff] }
 0x870   : > { %12488 = vmatmul.mubr.bf16.gmra.mrb[112].mxu1 %v16481_v13  ;;  %v14585_v13 = vld [vmem:[%s17993_s5 + $0x140] sm:$0xff]  }
 0x871   : > { %12491 = vmatprep.mubr.msk.bf16.mxu1 %vm14635_vm1, %v16217_v63 }
 0x878   : > { %12492 = vmatmul.mubr.bf16.gmra.mrb[116].mxu1 %v16486_v54  ;;  %v14586_v54 = vld [vmem:[%s17993_s5 + $0x148] sm:$0xff]  }
 0x879   : > { %12495 = vmatprep.mubr.msk.bf16.mxu1 %vm14635_vm1, %v16217_v63 }
 0x880   : > { %12496 = vmatmul.mubr.bf16.gmra.mrb[120].mxu1 %v6643_v7  ;;  %v7083_v7 = vpack.c.bf16 %v7047_v27, %v7046_v49  ;;  %v7062_v27 = vld [vmem:[#allocation2 + $0xf0] sm:$0xff] }
 0x881   : > { %12515 = vmatprep.mubr.msk.bf16.mxu1 %vm14635_vm1, %v16217_v63 }
 0x888   : > { %12516 = vmatmul.mubr.bf16.vlgmr.msra.gmra.mrb[40].mxu1 %v7078_v34  ;;  %v7051_v34 = vld [vmem:[#allocation2 + $0x98] sm:$0xff] }
 0x889   : > { %12600 = vmatpush3.bf16.msra.mxu1 %v14585_v13  ;;  %12519 = vmatprep.mubr.msk.bf16.mxu1 %vm14635_vm1, %v16217_v63  ;;  %v7084_v13 = vpack.c.bf16 %v7049_v40, %v7048_v19  ;;  %v7067_v19 = vld [vmem:[#allocation2 + $0x118] sm:$0xff] }
 0x88a   : > { %12601 = vmatprep.subr.bf16.mxu1 %v16217_v63 }
 0x88d   : > { %12602 = vmatpush3.bf16.msra.mxu1 %v14586_v54  ;;  %v7050_v54 = vld [vmem:[#allocation2 + $0x90] sm:$0xff] }
 0x88e   : > { %12603 = vmatprep.subr.bf16.mxu1 %v16217_v63  ;;  %v7085_v42 = vpack.c.bf16 %v7051_v34, %v7050_v54  ;;  %v7069_v54 = vld [vmem:[#allocation2 + $0x128] sm:$0xff] }
 0x890   : > { %12520 = vmatmul.mubr.bf16.gmra.mrb[44].mxu1 %v7079_v35 }
 0x891   : > { %12523 = vmatprep.mubr.msk.bf16.mxu1 %vm14635_vm1, %v16217_v63  ;;  %12604 = vmatpush3.bf16.msra.mxu1 %v14587_v44  ;;  %v7052_v44 = vld [vmem:[#allocation2 + $0xa0] sm:$0xff] }
 0x892   : > { %12605 = vmatprep.subr.bf16.mxu1 %v16217_v63  ;;  %v7086_v35 = vpack.c.bf16 %v7053_v18, %v7052_v44  ;;  %v7071_v44 = vld [vmem:[#allocation2 + $0x138] sm:$0xff] }
 0x895   : > { %12606 = vmatpush3.bf16.msra.mxu1 %v14588_v20  ;;  %v7055_v20 = vld [vmem:[#allocation2 + $0xb8] sm:$0xff] }
 0x896   : > { %12607 = vmatprep.subr.bf16.mxu1 %v16217_v63  ;;  %v7087_v0 = vpack.c.bf16 %v7055_v20, %v7054_v61  ;;  %v7073_v61 = vld [vmem:[#allocation2 + $0x148] sm:$0xff] }
 0x898   : > { %12524 = vmatmul.mubr.bf16.gmra.mrb[48].mxu1 %v7080_v55  ;;  %v7056_v55 = vld [vmem:[#allocation2 + $0xc0] sm:$0xff] }
 0x899   : > { %12527 = vmatprep.mubr.msk.bf16.mxu1 %vm14635_vm1, %v16217_v63  ;;  %12608 = vmatpush3.bf16.msra.mxu1 %v14589_v10  ;;  %v7057_v10 = vld [vmem:[#allocation2 + $0xc8] sm:$0xff] }
 0x89a   : > { %12609 = vmatprep.subr.bf16.mxu1 %v16217_v63 }
 0x89d   : > { %12610 = vmatpush3.bf16.msra.mxu1 %v14590_v39  ;;  %v7088_v39 = vpack.c.bf16 %v7057_v10, %v7056_v55  ;;  %v7075_v55 = vld [vmem:[#allocation2 + $0x158] sm:$0xff] }
 0x89e   : > { %12611 = vmatprep.subr.bf16.mxu1 %v16217_v63 }
 0x8a0   : > { %12528 = vmatmul.mubr.bf16.gmra.mrb[52].mxu1 %v7081_v22  ;;  %v16639_v22 = vld [vmem:[#allocation2] sm:$0xff] }
 0x8a1   : > { %12531 = vmatprep.mubr.msk.bf16.mxu1 %vm14635_vm1, %v16217_v63  ;;  %12612 = vmatpush3.bf16.msra.mxu1 %v14591_v21  ;;  %v7089_v21 = vpack.c.bf16 %v7059_v30, %v7058_v31  ;;  %v7077_v31 = vld [vmem:[#allocation2 + $0x168] sm:$0xff] }
 0x8a2   : > { %12613 = vmatprep.subr.bf16.mxu1 %v16217_v63 }
 0x8a5   : > { %12614 = vmatpush3.bf16.msra.mxu1 %v14592_v47  ;;  %v7061_v47 = vld [vmem:[#allocation2 + $0xe8] sm:$0xff] }
 0x8a6   : > { %12699 = vmatprep.subr.bf16.mxu1 %v16217_v63  ;;  %v7090_v4 = vpack.c.bf16 %v7061_v47, %v7060_v46  ;;  %v7492_v46 = vld [vmem:[#allocation2 + $0x29] sm:$0xff] }
 0x8a8   : > { %12532 = vmatmul.mubr.bf16.gmra.mrb[56].mxu1 %v7082_v37  ;;  %v7063_v37 = vld [vmem:[#allocation2 + $0xf8] sm:$0xff] }
 0x8a9   : > { %12535 = vmatprep.mubr.msk.bf16.mxu1 %vm14635_vm1, %v16217_v63  ;;  %v7091_v49 = vpack.c.bf16 %v7063_v37, %v7062_v27  ;;  %v14593_v37 = vld [vmem:[%s17993_s5 + $0x180] sm:$0xff]  }
 0x8b0   : > { %12536 = vmatmul.mubr.bf16.gmra.mrb[60].mxu1 %v7083_v7  ;;  %v7064_v7 = vld [vmem:[#allocation2 + $0x100] sm:$0xff] }
 0x8b1   : > { %12539 = vmatprep.mubr.msk.bf16.mxu1 %vm14635_vm1, %v16217_v63 }
 0x8b8   : > { %12540 = vmatmul.mubr.bf16.gmra.mrb[64].mxu1 %v7084_v13  ;;  %v7066_v13 = vld [vmem:[#allocation2 + $0x110] sm:$0xff] }
 0x8b9   : > { %12543 = vmatprep.mubr.msk.bf16.mxu1 %vm14635_vm1, %v16217_v63  ;;  %v7093_v34 = vpack.c.bf16 %v7067_v19, %v7066_v13  ;;  %v14596_v13 = vld [vmem:[%s17993_s5 + $0x198] sm:$0xff]  }
 0x8c0   : > { %12544 = vmatmul.mubr.bf16.gmra.mrb[68].mxu1 %v7085_v42  ;;  %v7068_v42 = vld [vmem:[#allocation2 + $0x120] sm:$0xff] }
 0x8c1   : > { %12547 = vmatprep.mubr.msk.bf16.mxu1 %vm14635_vm1, %v16217_v63  ;;  %v7094_v18 = vpack.c.bf16 %v7069_v54, %v7068_v42  ;;  %v7495_v54 = vld [vmem:[#allocation2 + $0x41] sm:$0xff] }
 0x8c2   : > { %v14597_v42 = vld [vmem:[%s17993_s5 + $0x1a0] sm:$0xff]  }
 0x8c8   : > { %12548 = vmatmul.mubr.bf16.gmra.mrb[72].mxu1 %v7086_v35  ;;  %v7070_v35 = vld [vmem:[#allocation2 + $0x130] sm:$0xff] }
 0x8c9   : > { %12551 = vmatprep.mubr.msk.bf16.mxu1 %vm14635_vm1, %v16217_v63  ;;  %v7095_v20 = vpack.c.bf16 %v7071_v44, %v7070_v35  ;;  %v14598_v44 = vld [vmem:[%s17993_s5 + $0x1a8] sm:$0xff]   ;;  %v7498_v35 = vld [vmem:[#allocation2 + $0x59] sm:$0xff] }
 0x8d0   : > { %12552 = vmatmul.mubr.bf16.gmra.mrb[76].mxu1 %v7087_v0  ;;  %v7072_v0 = vld [vmem:[#allocation2 + $0x140] sm:$0xff] }
 0x8d1   : > { %12555 = vmatprep.mubr.msk.bf16.mxu1 %vm14635_vm1, %v16217_v63  ;;  %v7096_v10 = vpack.c.bf16 %v7073_v61, %v7072_v0  ;;  %v14599_v61 = vld [vmem:[%s17993_s5 + $0x1b0] sm:$0xff]  }
 0x8d8   : > { %12556 = vmatmul.mubr.bf16.gmra.mrb[80].mxu1 %v7088_v39  ;;  %v7074_v39 = vld [vmem:[#allocation2 + $0x150] sm:$0xff] }
 0x8d9   : > { %12559 = vmatprep.mubr.msk.bf16.mxu1 %vm14635_vm1, %v16217_v63  ;;  %v7065_v63 = vld [vmem:[#allocation2 + $0x108] sm:$0xff]  ;;  %v7097_v30 = vpack.c.bf16 %v7075_v55, %v7074_v39 }
 0x8da   : > { %v7092_v40 = vpack.c.bf16 %v7065_v63, %v7064_v7  ;;  %v7494_v63 = vld [vmem:[#allocation2 + $0x39] sm:$0xff]  ;;  %v7493_v7 = vld [vmem:[#allocation2 + $0x31] sm:$0xff]  ;;  %v7500_v55 = vld [vmem:[#allocation2 + $0x69] sm:$0xff] }
 0x8db   : > { %v16673_v19 = vpack.c.bf16 %v7494_v63, %v7493_v7  ;;  %v7499_v39 = vld [vmem:[#allocation2 + $0x61] sm:$0xff]  ;;  %v7508_v7 = vld [vmem:[#allocation2 + $0xa9] sm:$0xff] }
 0x8e0   : > { %12560 = vmatmul.mubr.bf16.gmra.mrb[84].mxu1 %v7089_v21  ;;  %v7076_v21 = vld [vmem:[#allocation2 + $0x160] sm:$0xff] }
 0x8e1   : > { %12563 = vmatprep.mubr.msk.bf16.mxu1 %vm14635_vm1, %v16639_v22  ;;  %v7098_v47 = vpack.c.bf16 %v7077_v31, %v7076_v21  ;;  %v7502_v31 = vld [vmem:[#allocation2 + $0x79] sm:$0xff]  ;;  %v7501_v21 = vld [vmem:[#allocation2 + $0x71] sm:$0xff] }
 0x8e8   : > { %12564 = vmatmul.mubr.bf16.gmra.mrb[88].mxu1 %v7090_v4  ;;  %v7491_v4 = vld [vmem:[#allocation2 + $0x21] sm:$0xff] }
 0x8e9   : > { %12567 = vmatprep.mubr.msk.bf16.mxu1 %vm14635_vm1, %v16639_v22  ;;  %v7533_v27 = vpack.c.bf16 %v7492_v46, %v7491_v4  ;;  %v7504_v46 = vld [vmem:[#allocation2 + $0x89] sm:$0xff]  ;;  %v7503_v4 = vld [vmem:[#allocation2 + $0x81] sm:$0xff] }
 0x8f0   : > { %12568 = vmatmul.mubr.bf16.gmra.mrb[92].mxu1 %v7091_v49  ;;  %v14594_v49 = vld [vmem:[%s17993_s5 + $0x188] sm:$0xff]  }
 0x8f1   : > { %12571 = vmatprep.mubr.msk.bf16.mxu1 %vm14635_vm1, %v16639_v22 }
 0x8f8   : > { %12572 = vmatmul.mubr.bf16.gmra.mrb[96].mxu1 %v7092_v40  ;;  %v14595_v40 = vld [vmem:[%s17993_s5 + $0x190] sm:$0xff]  }
 0x8f9   : > { %12575 = vmatprep.mubr.msk.bf16.mxu1 %vm14635_vm1, %v16639_v22 }
 0x900   : > { %12576 = vmatmul.mubr.bf16.gmra.mrb[100].mxu1 %v7093_v34  ;;  %v7496_v34 = vld [vmem:[#allocation2 + $0x49] sm:$0xff] }
 0x901   : > { %12579 = vmatprep.mubr.msk.bf16.mxu1 %vm14635_vm1, %v16639_v22 }
 0x908   : > { %12580 = vmatmul.mubr.bf16.gmra.mrb[104].mxu1 %v7094_v18  ;;  %v16686_v18 = vpack.c.bf16 %v7496_v34, %v7495_v54  ;;  %v7510_v34 = vld [vmem:[#allocation2 + $0xb9] sm:$0xff]  ;;  %v7509_v54 = vld [vmem:[#allocation2 + $0xb1] sm:$0xff] }
 0x909   : > { %12583 = vmatprep.mubr.msk.bf16.mxu1 %vm14635_vm1, %v16639_v22 }
 0x910   : > { %12584 = vmatmul.mubr.bf16.gmra.mrb[108].mxu1 %v7095_v20  ;;  %v7497_v20 = vld [vmem:[#allocation2 + $0x51] sm:$0xff] }
 0x911   : > { %12587 = vmatprep.mubr.msk.bf16.mxu1 %vm14635_vm1, %v16639_v22  ;;  %v16699_v0 = vpack.c.bf16 %v7498_v35, %v7497_v20  ;;  %v7511_v35 = vld [vmem:[#allocation2 + $0xc1] sm:$0xff] }
 0x918   : > { %12588 = vmatmul.mubr.bf16.gmra.mrb[112].mxu1 %v7096_v10  ;;  %v14600_v10 = vld [vmem:[%s17993_s5 + $0x1b8] sm:$0xff]  }
 0x919   : > { %12591 = vmatprep.mubr.msk.bf16.mxu1 %vm14635_vm1, %v16639_v22 }
 0x920   : > { %12592 = vmatmul.mubr.bf16.gmra.mrb[116].mxu1 %v7097_v30  ;;  %v16709_v30 = vpack.c.bf16 %v7500_v55, %v7499_v39  ;;  %v7516_v39 = vld [vmem:[#allocation2 + $0xe9] sm:$0xff] }
 0x921   : > { %12595 = vmatprep.mubr.msk.bf16.mxu1 %vm14635_vm1, %v16639_v22 }
 0x928   : > { %12596 = vmatmul.mubr.bf16.gmra.mrb[120].mxu1 %v7098_v47  ;;  %v16715_v47 = vpack.c.bf16 %v7502_v31, %v7501_v21  ;;  %v7515_v31 = vld [vmem:[#allocation2 + $0xe1] sm:$0xff] }
 0x929   : > { %12615 = vmatprep.mubr.msk.bf16.mxu1 %vm14635_vm1, %v16639_v22  ;;  %v16750_v21 = vpack.c.bf16 %v7516_v39, %v7515_v31  ;;  %v7526_v39 = vld [vmem:[#allocation2 + $0x139] sm:$0xff]  ;;  %v7525_v31 = vld [vmem:[#allocation2 + $0x131] sm:$0xff] }
 0x930   : > { %12616 = vmatmul.mubr.bf16.vlgmr.msra.gmra.mrb[40].mxu1 %v7533_v27  ;;  %v7506_v27 = vld [vmem:[#allocation2 + $0x99] sm:$0xff] }
 0x931   : > { %12700 = vmatpush3.bf16.msra.mxu1 %v14593_v37  ;;  %12619 = vmatprep.mubr.msk.bf16.mxu1 %vm14635_vm1, %v16639_v22  ;;  %v16720_v37 = vpack.c.bf16 %v7504_v46, %v7503_v4  ;;  %v7518_v46 = vld [vmem:[#allocation2 + $0xf9] sm:$0xff]  ;;  %v7517_v4 = vld [vmem:[#allocation2 + $0xf1] sm:$0xff] }
 0x932   : > { %12701 = vmatprep.subr.bf16.mxu1 %v16639_v22 }
 0x935   : > { %12702 = vmatpush3.bf16.msra.mxu1 %v14594_v49  ;;  %v7505_v49 = vld [vmem:[#allocation2 + $0x91] sm:$0xff] }
 0x936   : > { %12703 = vmatprep.subr.bf16.mxu1 %v16639_v22  ;;  %v16725_v63 = vpack.c.bf16 %v7506_v27, %v7505_v49  ;;  %v16755_v27 = vpack.c.bf16 %v7518_v46, %v7517_v4  ;;  %v7520_v49 = vld [vmem:[#allocation2 + $0x109] sm:$0xff]  ;;  %v16775_v46 = vpack.c.bf16 %v7526_v39, %v7525_v31 }
 0x937   : > { %v7528_v4 = vld [vmem:[#allocation2 + $0x149] sm:$0xff] }
 0x938   : > { %12620 = vmatmul.mubr.bf16.gmra.mrb[44].mxu1 %v16673_v19  ;;  %v7532_v39 = vld [vmem:[#allocation2 + $0x169] sm:$0xff] }
 0x939   : > { %12623 = vmatprep.mubr.msk.bf16.mxu1 %vm14635_vm1, %v16639_v22  ;;  %12704 = vmatpush3.bf16.msra.mxu1 %v14595_v40  ;;  %v7507_v40 = vld [vmem:[#allocation2 + $0xa1] sm:$0xff] }
 0x93a   : > { %12705 = vmatprep.subr.bf16.mxu1 %v16639_v22 }
 0x93d   : > { %12706 = vmatpush3.bf16.msra.mxu1 %v14596_v13  ;;  %v16730_v13 = vpack.c.bf16 %v7508_v7, %v7507_v40  ;;  %v7519_v7 = vld [vmem:[#allocation2 + $0x101] sm:$0xff] }
 0x93e   : > { %12707 = vmatprep.subr.bf16.mxu1 %v16639_v22  ;;  %v16760_v40 = vpack.c.bf16 %v7520_v49, %v7519_v7  ;;  %v7527_v49 = vld [vmem:[#allocation2 + $0x141] sm:$0xff] }
 0x93f   : > { %v16780_v7 = vpack.c.bf16 %v7528_v4, %v7527_v49  ;;  %v14601_v4 = vld [vmem:[%s17993_s5 + $0x1c0] sm:$0xff]   ;;  %v14602_v49 = vld [vmem:[%s17993_s5 + $0x1c8] sm:$0xff]  }
 0x940   : > { %12624 = vmatmul.mubr.bf16.gmra.mrb[48].mxu1 %v16686_v18 }
 0x941   : > { %12627 = vmatprep.mubr.msk.bf16.mxu1 %vm14635_vm1, %v16639_v22  ;;  %12708 = vmatpush3.bf16.msra.mxu1 %v14597_v42  ;;  %v16735_v42 = vpack.c.bf16 %v7510_v34, %v7509_v54  ;;  %v7522_v34 = vld [vmem:[#allocation2 + $0x119] sm:$0xff]  ;;  %v7521_v54 = vld [vmem:[#allocation2 + $0x111] sm:$0xff] }
 0x942   : > { %12709 = vmatprep.subr.bf16.mxu1 %v16639_v22 }
 0x945   : > { %12710 = vmatpush3.bf16.msra.mxu1 %v14598_v44  ;;  %v7512_v44 = vld [vmem:[#allocation2 + $0xc9] sm:$0xff] }
 0x946   : > { %12711 = vmatprep.subr.bf16.mxu1 %v16639_v22  ;;  %v16740_v20 = vpack.c.bf16 %v7512_v44, %v7511_v35  ;;  %v16765_v44 = vpack.c.bf16 %v7522_v34, %v7521_v54  ;;  %v7524_v35 = vld [vmem:[#allocation2 + $0x129] sm:$0xff]  ;;  %v7530_v34 = vld [vmem:[#allocation2 + $0x159] sm:$0xff]  ;;  %v7529_v54 = vld [vmem:[#allocation2 + $0x151] sm:$0xff] }
 0x948   : > { %12628 = vmatmul.mubr.bf16.gmra.mrb[52].mxu1 %v16699_v0 }
 0x949   : > { %12631 = vmatprep.mubr.msk.bf16.mxu1 %vm14635_vm1, %v16639_v22  ;;  %12712 = vmatpush3.bf16.msra.mxu1 %v14599_v61  ;;  %v7514_v61 = vld [vmem:[#allocation2 + $0xd9] sm:$0xff] }
 0x94a   : > { %12713 = vmatprep.subr.bf16.mxu1 %v16639_v22 }
 0x94d   : > { %12714 = vmatpush3.bf16.msra.mxu1 %v14600_v10  ;;  %v7513_v10 = vld [vmem:[#allocation2 + $0xd1] sm:$0xff] }
 0x94e   : > { %12799 = vmatprep.subr.bf16.mxu1 %v16639_v22  ;;  %v16745_v55 = vpack.c.bf16 %v7514_v61, %v7513_v10  ;;  %v7523_v61 = vld [vmem:[#allocation2 + $0x121] sm:$0xff] }
 0x94f   : > { %v16770_v10 = vpack.c.bf16 %v7524_v35, %v7523_v61  ;;  %v16785_v35 = vpack.c.bf16 %v7530_v34, %v7529_v54  ;;  %v7531_v61 = vld [vmem:[#allocation2 + $0x161] sm:$0xff]  ;;  %v14603_v34 = vld [vmem:[%s17993_s5 + $0x1d0] sm:$0xff]  }
 0x950   : > { %12632 = vmatmul.mubr.bf16.gmra.mrb[56].mxu1 %v16709_v30  ;;  %v16790_v31 = vpack.c.bf16 %v7532_v39, %v7531_v61  ;;  %v14605_v54 = vld [vmem:[%s17993_s5 + $0x1e0] sm:$0xff]   ;;  %v14607_v61 = vld [vmem:[%s17993_s5 + $0x1f0] sm:$0xff]  }
 0x951   : > { %12635 = vmatprep.mubr.msk.bf16.mxu1 %vm14635_vm1, %v16639_v22 }
 0x958   : > { %12636 = vmatmul.mubr.bf16.gmra.mrb[60].mxu1 %v16715_v47 }
 0x959   : > { %12639 = vmatprep.mubr.msk.bf16.mxu1 %vm14635_vm1, %v16639_v22 }
 0x960   : > { %12640 = vmatmul.mubr.bf16.gmra.mrb[64].mxu1 %v16720_v37 }
 0x961   : > { %12643 = vmatprep.mubr.msk.bf16.mxu1 %vm14635_vm1, %v16639_v22 }
 0x968   : > { %12644 = vmatmul.mubr.bf16.gmra.mrb[68].mxu1 %v16725_v63 }
 0x969   : > { %12647 = vmatprep.mubr.msk.bf16.mxu1 %vm14635_vm1, %v16639_v22 }
 0x970   : > { %12648 = vmatmul.mubr.bf16.gmra.mrb[72].mxu1 %v16730_v13 }
 0x971   : > { %12651 = vmatprep.mubr.msk.bf16.mxu1 %vm14635_vm1, %v16639_v22 }
 0x978   : > { %12652 = vmatmul.mubr.bf16.gmra.mrb[76].mxu1 %v16735_v42 }
 0x979   : > { %12655 = vmatprep.mubr.msk.bf16.mxu1 %vm14635_vm1, %v16639_v22 }
 0x980   : > { %12656 = vmatmul.mubr.bf16.gmra.mrb[80].mxu1 %v16740_v20 }
 0x981   : > { %12659 = vmatprep.mubr.msk.bf16.mxu1 %vm14635_vm1, %v16639_v22 }
 0x988   : > { %12660 = vmatmul.mubr.bf16.gmra.mrb[84].mxu1 %v16745_v55 }
 0x989   : > { %12663 = vmatprep.mubr.msk.bf16.mxu1 %vm14635_vm1, %v16639_v22 }
 0x990   : > { %12664 = vmatmul.mubr.bf16.gmra.mrb[88].mxu1 %v16750_v21 }
 0x991   : > { %12667 = vmatprep.mubr.msk.bf16.mxu1 %vm14635_vm1, %v16639_v22 }
 0x998   : > { %12668 = vmatmul.mubr.bf16.gmra.mrb[92].mxu1 %v16755_v27 }
 0x999   : > { %12671 = vmatprep.mubr.msk.bf16.mxu1 %vm14635_vm1, %v16639_v22 }
 0x9a0   : > { %12672 = vmatmul.mubr.bf16.gmra.mrb[96].mxu1 %v16760_v40 }
 0x9a1   : > { %12675 = vmatprep.mubr.msk.bf16.mxu1 %vm14635_vm1, %v16639_v22 }
 0x9a8   : > { %12676 = vmatmul.mubr.bf16.gmra.mrb[100].mxu1 %v16765_v44 }
 0x9a9   : > { %12679 = vmatprep.mubr.msk.bf16.mxu1 %vm14635_vm1, %v16639_v22 }
 0x9b0   : > { %12680 = vmatmul.mubr.bf16.gmra.mrb[104].mxu1 %v16770_v10 }
 0x9b1   : > { %12683 = vmatprep.mubr.msk.bf16.mxu1 %vm14635_vm1, %v16639_v22 }
 0x9b8   : > { %12684 = vmatmul.mubr.bf16.gmra.mrb[108].mxu1 %v16775_v46 }
 0x9b9   : > { %12687 = vmatprep.mubr.msk.bf16.mxu1 %vm14635_vm1, %v16639_v22 }
 0x9c0   : > { %12688 = vmatmul.mubr.bf16.gmra.mrb[112].mxu1 %v16780_v7 }
 0x9c1   : > { %12691 = vmatprep.mubr.msk.bf16.mxu1 %vm14635_vm1, %v16639_v22 }
 0x9c8   : > { %12692 = vmatmul.mubr.bf16.gmra.mrb[116].mxu1 %v16785_v35 }
 0x9c9   : > { %12695 = vmatprep.mubr.msk.bf16.mxu1 %vm14635_vm1, %v16639_v22 }
 0x9d0   : > { %12696 = vmatmul.mubr.bf16.gmra.mrb[120].mxu1 %v16790_v31 }
 0x9d1   : > { %12715 = vmatprep.mubr.msk.bf16.mxu1 %vm14635_vm1, %v16639_v22 }
 0x9d8   : > { %12716 = vmatmul.mubr.bf16.vlgmr.msra.gmra.mrb[40].mxu1 %v16673_v19  ;;  %v14604_v19 = vld [vmem:[%s17993_s5 + $0x1d8] sm:$0xff]  }
 0x9d9   : > { %12800 = vmatpush3.bf16.msra.mxu1 %v14601_v4  ;;  %12719 = vmatprep.mubr.msk.bf16.mxu1 %vm14635_vm1, %v16639_v22  ;;  %v8408_v4 = vld [vmem:[#allocation2 + $0x6a] sm:$0xff] }
 0x9da   : > { %12801 = vmatprep.subr.bf16.mxu1 %v16639_v22 }
 0x9dd   : > { %12802 = vmatpush3.bf16.msra.mxu1 %v14602_v49  ;;  %v8407_v49 = vld [vmem:[#allocation2 + $0x62] sm:$0xff] }
 0x9de   : > { %12803 = vmatprep.subr.bf16.mxu1 %v16639_v22 }
 0x9e0   : > { %12720 = vmatmul.mubr.bf16.gmra.mrb[44].mxu1 %v16686_v18  ;;  %v14606_v18 = vld [vmem:[%s17993_s5 + $0x1e8] sm:$0xff]  }
 0x9e1   : > { %12723 = vmatprep.mubr.msk.bf16.mxu1 %vm14635_vm1, %v16639_v22  ;;  %12804 = vmatpush3.bf16.msra.mxu1 %v14603_v34  ;;  %v14615_v34 = vld [vmem:[%s17993_s5 + $0x230] sm:$0xff]  }
 0x9e2   : > { %12805 = vmatprep.subr.bf16.mxu1 %v16639_v22 }
 0x9e5   : > { %12806 = vmatpush3.bf16.msra.mxu1 %v14604_v19  ;;  %v8446_v19 = vpack.c.bf16 %v8408_v4, %v8407_v49  ;;  %v8424_v4 = vld [vmem:[#allocation2 + $0xea] sm:$0xff]  ;;  %v8423_v49 = vld [vmem:[#allocation2 + $0xe2] sm:$0xff] }
 0x9e6   : > { %12807 = vmatprep.subr.bf16.mxu1 %v16639_v22 }
 0x9e8   : > { %12724 = vmatmul.mubr.bf16.gmra.mrb[48].mxu1 %v16699_v0  ;;  %v14608_v0 = vld [vmem:[%s17993_s5 + $0x1f8] sm:$0xff]  }
 0x9e9   : > { %12727 = vmatprep.mubr.msk.bf16.mxu1 %vm14635_vm1, %v16639_v22  ;;  %12808 = vmatpush3.bf16.msra.mxu1 %v14605_v54  ;;  %v14616_v54 = vld [vmem:[%s17993_s5 + $0x238] sm:$0xff]  }
 0x9ea   : > { %12809 = vmatprep.subr.bf16.mxu1 %v16639_v22 }
 0x9ed   : > { %12810 = vmatpush3.bf16.msra.mxu1 %v14606_v18  ;;  %v8410_v18 = vld [vmem:[#allocation2 + $0x7a] sm:$0xff] }
 0x9ee   : > { %12811 = vmatprep.subr.bf16.mxu1 %v16639_v22 }
 0x9f0   : > { %12728 = vmatmul.mubr.bf16.gmra.mrb[52].mxu1 %v16709_v30  ;;  %v7986_v30 = vld [vmem:[#allocation2 + $0x171] sm:$0xff] }
 0x9f1   : > { %12731 = vmatprep.mubr.msk.bf16.mxu1 %vm14635_vm1, %v16639_v22  ;;  %12812 = vmatpush3.bf16.msra.mxu1 %v14607_v61  ;;  %v8409_v61 = vld [vmem:[#allocation2 + $0x72] sm:$0xff] }
 0x9f2   : > { %12813 = vmatprep.subr.bf16.mxu1 %v16639_v22 }
 0x9f5   : > { %12814 = vmatpush3.bf16.msra.mxu1 %v14608_v0  ;;  %v8447_v0 = vpack.c.bf16 %v8410_v18, %v8409_v61  ;;  %v8428_v61 = vld [vmem:[#allocation2 + $0x10a] sm:$0xff] }
 0x9f6   : > { %12899 = vmatprep.subr.bf16.mxu1 %v16639_v22 }
 0x9f8   : > { %12732 = vmatmul.mubr.bf16.gmra.mrb[56].mxu1 %v16715_v47  ;;  %v7987_v47 = vld [vmem:[#allocation2 + $0x179] sm:$0xff] }
 0x9f9   : > { %12735 = vmatprep.mubr.msk.bf16.mxu1 %vm14635_vm1, %v16639_v22 }
 0xa00   : > { %12736 = vmatmul.mubr.bf16.gmra.mrb[60].mxu1 %v16720_v37  ;;  %v8008_v37 = vpack.c.bf16 %v7987_v47, %v7986_v30  ;;  %v8412_v30 = vld [vmem:[#allocation2 + $0x8a] sm:$0xff]  ;;  %v8411_v47 = vld [vmem:[#allocation2 + $0x82] sm:$0xff] }
 0xa01   : > { %12739 = vmatprep.mubr.msk.bf16.mxu1 %vm14635_vm1, %v16639_v22 }
 0xa08   : > { %12740 = vmatmul.mubr.bf16.gmra.mrb[64].mxu1 %v16725_v63  ;;  %v8402_v63 = vld [vmem:[#allocation2 + $0x3a] sm:$0xff] }
 0xa09   : > { %12743 = vmatprep.mubr.msk.bf16.mxu1 %vm14635_vm1, %v16639_v22 }
 0xa10   : > { %12744 = vmatmul.mubr.bf16.gmra.mrb[68].mxu1 %v16730_v13  ;;  %v8401_v13 = vld [vmem:[#allocation2 + $0x32] sm:$0xff] }
 0xa11   : > { %12747 = vmatprep.mubr.msk.bf16.mxu1 %vm14635_vm1, %v16639_v22 }
 0xa18   : > { %12748 = vmatmul.mubr.bf16.gmra.mrb[72].mxu1 %v16735_v42  ;;  %v14609_v42 = vld [vmem:[%s17993_s5 + $0x200] sm:$0xff]  }
 0xa19   : > { %12751 = vmatprep.mubr.msk.bf16.mxu1 %vm14635_vm1, %v16639_v22 }
 0xa20   : > { %12752 = vmatmul.mubr.bf16.gmra.mrb[76].mxu1 %v16740_v20  ;;  %v8443_v20 = vpack.c.bf16 %v8402_v63, %v8401_v13  ;;  %v8414_v63 = vld [vmem:[#allocation2 + $0x9a] sm:$0xff]  ;;  %v8413_v13 = vld [vmem:[#allocation2 + $0x92] sm:$0xff] }
 0xa21   : > { %12755 = vmatprep.mubr.msk.bf16.mxu1 %vm14635_vm1, %v16639_v22 }
 0xa28   : > { %12756 = vmatmul.mubr.bf16.gmra.mrb[80].mxu1 %v16745_v55  ;;  %v14610_v55 = vld [vmem:[%s17993_s5 + $0x208] sm:$0xff]  }
 0xa29   : > { %12759 = vmatprep.mubr.msk.bf16.mxu1 %vm14635_vm1, %v16639_v22 }
 0xa30   : > { %12760 = vmatmul.mubr.bf16.gmra.mrb[84].mxu1 %v16750_v21  ;;  %v8404_v21 = vld [vmem:[#allocation2 + $0x4a] sm:$0xff] }
 0xa31   : > { %12763 = vmatprep.mubr.msk.bf16.mxu1 %vm14635_vm1, %v16639_v22 }
 0xa38   : > { %12764 = vmatmul.mubr.bf16.gmra.mrb[88].mxu1 %v16755_v27  ;;  %v8403_v27 = vld [vmem:[#allocation2 + $0x42] sm:$0xff] }
 0xa39   : > { %12767 = vmatprep.mubr.msk.bf16.mxu1 %vm14635_vm1, %v16639_v22 }
 0xa40   : > { %12768 = vmatmul.mubr.bf16.gmra.mrb[92].mxu1 %v16760_v40  ;;  %v14611_v40 = vld [vmem:[%s17993_s5 + $0x210] sm:$0xff]  }
 0xa41   : > { %12771 = vmatprep.mubr.msk.bf16.mxu1 %vm14635_vm1, %v16639_v22 }
 0xa48   : > { %12772 = vmatmul.mubr.bf16.gmra.mrb[96].mxu1 %v16765_v44  ;;  %v8444_v44 = vpack.c.bf16 %v8404_v21, %v8403_v27  ;;  %v8418_v27 = vld [vmem:[#allocation2 + $0xba] sm:$0xff] }
 0xa49   : > { %12775 = vmatprep.mubr.msk.bf16.mxu1 %vm14635_vm1, %v16639_v22 }
 0xa50   : > { %12776 = vmatmul.mubr.bf16.gmra.mrb[100].mxu1 %v16770_v10  ;;  %v14612_v10 = vld [vmem:[%s17993_s5 + $0x218] sm:$0xff]  }
 0xa51   : > { %12779 = vmatprep.mubr.msk.bf16.mxu1 %vm14635_vm1, %v16639_v22 }
 0xa58   : > { %12780 = vmatmul.mubr.bf16.gmra.mrb[104].mxu1 %v16775_v46  ;;  %v8406_v46 = vld [vmem:[#allocation2 + $0x5a] sm:$0xff] }
 0xa59   : > { %12783 = vmatprep.mubr.msk.bf16.mxu1 %vm14635_vm1, %v16639_v22 }
 0xa60   : > { %12784 = vmatmul.mubr.bf16.gmra.mrb[108].mxu1 %v16780_v7  ;;  %v8405_v7 = vld [vmem:[#allocation2 + $0x52] sm:$0xff] }
 0xa61   : > { %12787 = vmatprep.mubr.msk.bf16.mxu1 %vm14635_vm1, %v16639_v22  ;;  %v8445_v39 = vpack.c.bf16 %v8406_v46, %v8405_v7  ;;  %v8419_v46 = vld [vmem:[#allocation2 + $0xc2] sm:$0xff] }
 0xa68   : > { %12788 = vmatmul.mubr.bf16.gmra.mrb[112].mxu1 %v16785_v35  ;;  %v14613_v35 = vld [vmem:[%s17993_s5 + $0x220] sm:$0xff]  }
 0xa69   : > { %12791 = vmatprep.mubr.msk.bf16.mxu1 %vm14635_vm1, %v16639_v22 }
 0xa70   : > { %12792 = vmatmul.mubr.bf16.gmra.mrb[116].mxu1 %v16790_v31  ;;  %v14614_v31 = vld [vmem:[%s17993_s5 + $0x228] sm:$0xff]  }
 0xa71   : > { %12795 = vmatprep.mubr.msk.bf16.mxu1 %vm14635_vm1, %v16639_v22 }
 0xa78   : > { %12796 = vmatmul.mubr.bf16.gmra.mrb[120].mxu1 %v8008_v37  ;;  %v8448_v37 = vpack.c.bf16 %v8412_v30, %v8411_v47  ;;  %v8430_v47 = vld [vmem:[#allocation2 + $0x11a] sm:$0xff] }
 0xa79   : > { %12815 = vmatprep.mubr.msk.bf16.mxu1 %vm14635_vm1, %v16639_v22 }
 0xa80   : > { %12816 = vmatmul.mubr.bf16.vlgmr.msra.gmra.mrb[40].mxu1 %v8443_v20  ;;  %v8416_v20 = vld [vmem:[#allocation2 + $0xaa] sm:$0xff] }
 0xa81   : > { %12900 = vmatpush3.bf16.msra.mxu1 %v14609_v42  ;;  %12819 = vmatprep.mubr.msk.bf16.mxu1 %vm14635_vm1, %v16639_v22  ;;  %v8449_v42 = vpack.c.bf16 %v8414_v63, %v8413_v13  ;;  %v8432_v13 = vld [vmem:[#allocation2 + $0x12a] sm:$0xff] }
 0xa82   : > { %12901 = vmatprep.subr.bf16.mxu1 %v16639_v22 }
 0xa85   : > { %12902 = vmatpush3.bf16.msra.mxu1 %v14610_v55  ;;  %v8415_v55 = vld [vmem:[#allocation2 + $0xa2] sm:$0xff] }
 0xa86   : > { %12903 = vmatprep.subr.bf16.mxu1 %v16639_v22  ;;  %v8450_v21 = vpack.c.bf16 %v8416_v20, %v8415_v55  ;;  %v8434_v55 = vld [vmem:[#allocation2 + $0x13a] sm:$0xff] }
 0xa88   : > { %12820 = vmatmul.mubr.bf16.gmra.mrb[44].mxu1 %v8444_v44 }
 0xa89   : > { %12823 = vmatprep.mubr.msk.bf16.mxu1 %vm14635_vm1, %v16639_v22  ;;  %12904 = vmatpush3.bf16.msra.mxu1 %v14611_v40  ;;  %v8417_v40 = vld [vmem:[#allocation2 + $0xb2] sm:$0xff] }
 0xa8a   : > { %12905 = vmatprep.subr.bf16.mxu1 %v16639_v22  ;;  %v8451_v44 = vpack.c.bf16 %v8418_v27, %v8417_v40  ;;  %v8436_v40 = vld [vmem:[#allocation2 + $0x14a] sm:$0xff] }
 0xa8d   : > { %12906 = vmatpush3.bf16.msra.mxu1 %v14612_v10  ;;  %v8420_v10 = vld [vmem:[#allocation2 + $0xca] sm:$0xff] }
 0xa8e   : > { %12907 = vmatprep.subr.bf16.mxu1 %v16639_v22  ;;  %v8452_v7 = vpack.c.bf16 %v8420_v10, %v8419_v46  ;;  %v8438_v46 = vld [vmem:[#allocation2 + $0x15a] sm:$0xff] }
 0xa90   : > { %12824 = vmatmul.mubr.bf16.gmra.mrb[48].mxu1 %v8445_v39  ;;  %v8421_v39 = vld [vmem:[#allocation2 + $0xd2] sm:$0xff] }
 0xa91   : > { %12827 = vmatprep.mubr.msk.bf16.mxu1 %vm14635_vm1, %v16639_v22  ;;  %12908 = vmatpush3.bf16.msra.mxu1 %v14613_v35  ;;  %v8422_v35 = vld [vmem:[#allocation2 + $0xda] sm:$0xff] }
 0xa92   : > { %12909 = vmatprep.subr.bf16.mxu1 %v16639_v22 }
 0xa95   : > { %12910 = vmatpush3.bf16.msra.mxu1 %v14614_v31  ;;  %v8453_v31 = vpack.c.bf16 %v8422_v35, %v8421_v39  ;;  %v8439_v39 = vld [vmem:[#allocation2 + $0x162] sm:$0xff] }
 0xa96   : > { %12911 = vmatprep.subr.bf16.mxu1 %v16639_v22 }
 0xa98   : > { %12828 = vmatmul.mubr.bf16.gmra.mrb[52].mxu1 %v8446_v19  ;;  %v8426_v19 = vld [vmem:[#allocation2 + $0xfa] sm:$0xff] }
 0xa99   : > { %12831 = vmatprep.mubr.msk.bf16.mxu1 %vm14635_vm1, %v16639_v22  ;;  %12912 = vmatpush3.bf16.msra.mxu1 %v14615_v34  ;;  %v8454_v34 = vpack.c.bf16 %v8424_v4, %v8423_v49  ;;  %v8441_v49 = vld [vmem:[#allocation2 + $0x172] sm:$0xff] }
 0xa9a   : > { %12913 = vmatprep.subr.bf16.mxu1 %v16639_v22 }
 0xa9d   : > { %12914 = vmatpush3.bf16.msra.mxu1 %v14616_v54  ;;  %v8425_v54 = vld [vmem:[#allocation2 + $0xf2] sm:$0xff] }
 0xa9e   : > { %v8455_v18 = vpack.c.bf16 %v8426_v19, %v8425_v54  ;;  %v8857_v54 = vld [vmem:[#allocation2 + $0x3b] sm:$0xff] }
 0xaa0   : > { %12832 = vmatmul.mubr.bf16.gmra.mrb[56].mxu1 %v8447_v0  ;;  %v8427_v0 = vld [vmem:[#allocation2 + $0x102] sm:$0xff] }
 0xaa1   : > { %12835 = vmatprep.mubr.msk.bf16.mxu1 %vm14635_vm1, %v16639_v22  ;;  %v8456_v30 = vpack.c.bf16 %v8428_v61, %v8427_v0  ;;  %v8859_v0 = vld [vmem:[#allocation2 + $0x4b] sm:$0xff] }
 0xaa8   : > { %12836 = vmatmul.mubr.bf16.gmra.mrb[60].mxu1 %v8448_v37  ;;  %v8429_v37 = vld [vmem:[#allocation2 + $0x112] sm:$0xff] }
 0xaa9   : > { %12839 = vmatprep.mubr.msk.bf16.mxu1 %vm14635_vm1, %v16639_v22  ;;  %v8457_v63 = vpack.c.bf16 %v8430_v47, %v8429_v37  ;;  %v8861_v37 = vld [vmem:[#allocation2 + $0x5b] sm:$0xff] }
 0xab0   : > { %12840 = vmatmul.mubr.bf16.gmra.mrb[64].mxu1 %v8449_v42  ;;  %v8431_v42 = vld [vmem:[#allocation2 + $0x122] sm:$0xff] }
 0xab1   : > { %12843 = vmatprep.mubr.msk.bf16.mxu1 %vm14635_vm1, %v16639_v22  ;;  %v8458_v20 = vpack.c.bf16 %v8432_v13, %v8431_v42  ;;  %v8863_v42 = vld [vmem:[#allocation2 + $0x6b] sm:$0xff] }
 0xab8   : > { %12844 = vmatmul.mubr.bf16.gmra.mrb[68].mxu1 %v8450_v21  ;;  %v8433_v21 = vld [vmem:[#allocation2 + $0x132] sm:$0xff] }
 0xab9   : > { %12847 = vmatprep.mubr.msk.bf16.mxu1 %vm14635_vm1, %v16639_v22  ;;  %v8459_v27 = vpack.c.bf16 %v8434_v55, %v8433_v21  ;;  %v8865_v21 = vld [vmem:[#allocation2 + $0x7b] sm:$0xff] }
 0xac0   : > { %12848 = vmatmul.mubr.bf16.gmra.mrb[72].mxu1 %v8451_v44  ;;  %v8435_v44 = vld [vmem:[#allocation2 + $0x142] sm:$0xff] }
 0xac1   : > { %12851 = vmatprep.mubr.msk.bf16.mxu1 %vm14635_vm1, %v16639_v22  ;;  %v8460_v10 = vpack.c.bf16 %v8436_v40, %v8435_v44  ;;  %v8867_v44 = vld [vmem:[#allocation2 + $0x8b] sm:$0xff] }
 0xac8   : > { %12852 = vmatmul.mubr.bf16.gmra.mrb[76].mxu1 %v8452_v7  ;;  %v8437_v7 = vld [vmem:[#allocation2 + $0x152] sm:$0xff] }
 0xac9   : > { %12855 = vmatprep.mubr.msk.bf16.mxu1 %vm14635_vm1, %v16639_v22  ;;  %v8461_v35 = vpack.c.bf16 %v8438_v46, %v8437_v7  ;;  %v8869_v7 = vld [vmem:[#allocation2 + $0x9b] sm:$0xff] }
 0xad0   : > { %12856 = vmatmul.mubr.bf16.gmra.mrb[80].mxu1 %v8453_v31  ;;  %v8440_v31 = vld [vmem:[#allocation2 + $0x16a] sm:$0xff] }
 0xad1   : > { %12859 = vmatprep.mubr.msk.bf16.mxu1 %vm14635_vm1, %v16639_v22  ;;  %v8462_v4 = vpack.c.bf16 %v8440_v31, %v8439_v39  ;;  %v8871_v31 = vld [vmem:[#allocation2 + $0xab] sm:$0xff] }
 0xad8   : > { %12860 = vmatmul.mubr.bf16.gmra.mrb[84].mxu1 %v8454_v34  ;;  %v8442_v34 = vld [vmem:[#allocation2 + $0x17a] sm:$0xff] }
 0xad9   : > { %12863 = vmatprep.mubr.msk.bf16.mxu1 %vm14635_vm1, %v16639_v22  ;;  %v8463_v19 = vpack.c.bf16 %v8442_v34, %v8441_v49  ;;  %v8873_v34 = vld [vmem:[#allocation2 + $0xbb] sm:$0xff] }
 0xae0   : > { %12864 = vmatmul.mubr.bf16.gmra.mrb[88].mxu1 %v8455_v18  ;;  %v8856_v18 = vld [vmem:[#allocation2 + $0x33] sm:$0xff] }
 0xae1   : > { %12867 = vmatprep.mubr.msk.bf16.mxu1 %vm14635_vm1, %v16639_v22  ;;  %v8898_v61 = vpack.c.bf16 %v8857_v54, %v8856_v18  ;;  %v8875_v18 = vld [vmem:[#allocation2 + $0xcb] sm:$0xff] }
 0xae8   : > { %12868 = vmatmul.mubr.bf16.gmra.mrb[92].mxu1 %v8456_v30  ;;  %v8858_v30 = vld [vmem:[#allocation2 + $0x43] sm:$0xff] }
 0xae9   : > { %12871 = vmatprep.mubr.msk.bf16.mxu1 %vm14635_vm1, %v16639_v22  ;;  %v8899_v47 = vpack.c.bf16 %v8859_v0, %v8858_v30  ;;  %v8877_v30 = vld [vmem:[#allocation2 + $0xdb] sm:$0xff] }
 0xaf0   : > { %12872 = vmatmul.mubr.bf16.gmra.mrb[96].mxu1 %v8457_v63  ;;  %v8860_v63 = vld [vmem:[#allocation2 + $0x53] sm:$0xff] }
 0xaf1   : > { %12875 = vmatprep.mubr.msk.bf16.mxu1 %vm14635_vm1, %v16639_v22  ;;  %v8900_v13 = vpack.c.bf16 %v8861_v37, %v8860_v63  ;;  %v8879_v63 = vld [vmem:[#allocation2 + $0xeb] sm:$0xff] }
 0xaf8   : > { %12876 = vmatmul.mubr.bf16.gmra.mrb[100].mxu1 %v8458_v20  ;;  %v8862_v20 = vld [vmem:[#allocation2 + $0x63] sm:$0xff] }
 0xaf9   : > { %12879 = vmatprep.mubr.msk.bf16.mxu1 %vm14635_vm1, %v16639_v22  ;;  %v8901_v55 = vpack.c.bf16 %v8863_v42, %v8862_v20  ;;  %v8881_v20 = vld [vmem:[#allocation2 + $0xfb] sm:$0xff] }
 0xb00   : > { %12880 = vmatmul.mubr.bf16.gmra.mrb[104].mxu1 %v8459_v27  ;;  %v8864_v27 = vld [vmem:[#allocation2 + $0x73] sm:$0xff] }
 0xb01   : > { %12883 = vmatprep.mubr.msk.bf16.mxu1 %vm14635_vm1, %v16639_v22  ;;  %v8902_v40 = vpack.c.bf16 %v8865_v21, %v8864_v27  ;;  %v8883_v27 = vld [vmem:[#allocation2 + $0x10b] sm:$0xff] }
 0xb08   : > { %12884 = vmatmul.mubr.bf16.gmra.mrb[108].mxu1 %v8460_v10  ;;  %v8866_v10 = vld [vmem:[#allocation2 + $0x83] sm:$0xff] }
 0xb09   : > { %12887 = vmatprep.mubr.msk.bf16.mxu1 %vm14635_vm1, %v16639_v22  ;;  %v8903_v46 = vpack.c.bf16 %v8867_v44, %v8866_v10  ;;  %v8885_v10 = vld [vmem:[#allocation2 + $0x11b] sm:$0xff] }
 0xb10   : > { %12888 = vmatmul.mubr.bf16.gmra.mrb[112].mxu1 %v8461_v35  ;;  %v8868_v35 = vld [vmem:[#allocation2 + $0x93] sm:$0xff] }
 0xb11   : > { %12891 = vmatprep.mubr.msk.bf16.mxu1 %vm14635_vm1, %v16639_v22  ;;  %v8904_v39 = vpack.c.bf16 %v8869_v7, %v8868_v35  ;;  %v9583_v35 = vld [vmem:[%s17996_s8] sm:$0xff] }
 0xb18   : > { %12892 = vmatmul.mubr.bf16.gmra.mrb[116].mxu1 %v8462_v4  ;;  %v8870_v4 = vld [vmem:[#allocation2 + $0xa3] sm:$0xff] }
 0xb19   : > { %12895 = vmatprep.mubr.msk.bf16.mxu1 %vm14635_vm1, %v16639_v22  ;;  %v8905_v49 = vpack.c.bf16 %v8871_v31, %v8870_v4  ;;  %v18007_v31 = vmov 0.0|0.0  }
 0xb1a   : > { %13155 = vmatprep.subr.bf16.mxu0 %v18007_v31  ;;  %13179 = vmatprep.subr.bf16.mxu1 %v18007_v31 }
 0xb20   : > { %12896 = vmatmul.mubr.bf16.gmra.mrb[120].mxu1 %v8463_v19  ;;  %v8872_v19 = vld [vmem:[#allocation2 + $0xb3] sm:$0xff] }
 0xb21   : > { %12915 = vmatprep.mubr.msk.bf16.mxu1 %vm14635_vm1, %v16639_v22  ;;  %v8906_v54 = vpack.c.bf16 %v8873_v34, %v8872_v19  ;;  %v8886_v34 = vld [vmem:[#allocation2 + $0x123] sm:$0xff] }
 0xb28   : > { %12916 = vmatmul.mubr.bf16.vlgmr.msra.gmra.mrb[40].mxu1 %v8898_v61  ;;  %v8874_v61 = vld [vmem:[#allocation2 + $0xc3] sm:$0xff] }
 0xb29   : > { %12919 = vmatprep.mubr.msk.bf16.mxu1 %vm14635_vm1, %v16639_v22  ;;  %v8907_v0 = vpack.c.bf16 %v8875_v18, %v8874_v61  ;;  %v8888_v18 = vld [vmem:[#allocation2 + $0x133] sm:$0xff] }
 0xb30   : > { %12920 = vmatmul.mubr.bf16.gmra.mrb[44].mxu1 %v8899_v47  ;;  %v8876_v47 = vld [vmem:[#allocation2 + $0xd3] sm:$0xff] }
 0xb31   : > { %12923 = vmatprep.mubr.msk.bf16.mxu1 %vm14635_vm1, %v16639_v22  ;;  %v8908_v37 = vpack.c.bf16 %v8877_v30, %v8876_v47  ;;  %v9585_v30 = vld [vmem:[%s17996_s8 + $0x10] sm:$0xff]  ;;  %v9586_v47 = vld [vmem:[%s17996_s8 + $0x18] sm:$0xff] }
 0xb38   : > { %12924 = vmatmul.mubr.bf16.gmra.mrb[48].mxu1 %v8900_v13  ;;  %v8878_v13 = vld [vmem:[#allocation2 + $0xe3] sm:$0xff] }
 0xb39   : > { %12927 = vmatprep.mubr.msk.bf16.mxu1 %vm14635_vm1, %v16639_v22  ;;  %v8909_v42 = vpack.c.bf16 %v8879_v63, %v8878_v13  ;;  %v13159_v63 = vpack.c.bf16 %v9586_v47, %v9585_v30  ;;  %v9593_v47 = vld [vmem:[%s17996_s8 + $0x50] sm:$0xff] }
 0xb40   : > { %12928 = vmatmul.mubr.bf16.gmra.mrb[52].mxu1 %v8901_v55  ;;  %v8880_v55 = vld [vmem:[#allocation2 + $0xf3] sm:$0xff] }
 0xb41   : > { %12931 = vmatprep.mubr.msk.bf16.mxu1 %vm14635_vm1, %v16639_v22  ;;  %v8910_v21 = vpack.c.bf16 %v8881_v20, %v8880_v55  ;;  %v8892_v20 = vld [vmem:[#allocation2 + $0x153] sm:$0xff] }
 0xb48   : > { %12932 = vmatmul.mubr.bf16.gmra.mrb[56].mxu1 %v8902_v40  ;;  %v8882_v40 = vld [vmem:[#allocation2 + $0x103] sm:$0xff] }
 0xb49   : > { %12935 = vmatprep.mubr.msk.bf16.mxu1 %vm14635_vm1, %v16639_v22  ;;  %v8911_v44 = vpack.c.bf16 %v8883_v27, %v8882_v40  ;;  %v8895_v27 = vld [vmem:[#allocation2 + $0x16b] sm:$0xff] }
 0xb50   : > { %12936 = vmatmul.mubr.bf16.gmra.mrb[60].mxu1 %v8903_v46  ;;  %v8884_v46 = vld [vmem:[#allocation2 + $0x113] sm:$0xff] }
 0xb51   : > { %12939 = vmatprep.mubr.msk.bf16.mxu1 %vm14635_vm1, %v16639_v22  ;;  %v8912_v7 = vpack.c.bf16 %v8885_v10, %v8884_v46  ;;  %v9588_v10 = vld [vmem:[%s17996_s8 + $0x28] sm:$0xff] }
 0xb58   : > { %12940 = vmatmul.mubr.bf16.gmra.mrb[64].mxu1 %v8904_v39  ;;  %v9584_v39 = vld [vmem:[%s17996_s8 + $0x8] sm:$0xff] }
 0xb59   : > { %12943 = vmatprep.mubr.msk.bf16.mxu1 %vm14635_vm1, %v16639_v22  ;;  %v13156_v4 = vpack.c.bf16 %v9584_v39, %v9583_v35  ;;  %v8897_v35 = vld [vmem:[#allocation2 + $0x17b] sm:$0xff] }
 0xb5b   : > { %13157 = vmatpush3.bf16.msra.mxu0 %v13156_v4  ;;  %v9589_v4 = vld [vmem:[%s17996_s8 + $0x30] sm:$0xff] }
 0xb5c   : > { %13158 = vmatprep.subr.bf16.mxu0 %v18007_v31 }
 0xb5f   : > { %13160 = vmatpush3.bf16.msra.mxu0 %v13159_v63 }
 0xb60   : > { %12944 = vmatmul.mubr.bf16.gmra.mrb[68].mxu1 %v8905_v49  ;;  %v8887_v49 = vld [vmem:[#allocation2 + $0x12b] sm:$0xff]  ;;  %13161 = vmatprep.subr.bf16.mxu0 %v18007_v31 }
 0xb61   : > { %12947 = vmatprep.mubr.msk.bf16.mxu1 %vm14635_vm1, %v16639_v22  ;;  %v8913_v19 = vpack.c.bf16 %v8887_v49, %v8886_v34  ;;  %v9590_v49 = vld [vmem:[%s17996_s8 + $0x38] sm:$0xff] }
 0xb62   : > { %v13165_v34 = vpack.c.bf16 %v9590_v49, %v9589_v4 }
 0xb68   : > { %12948 = vmatmul.mubr.bf16.gmra.mrb[72].mxu1 %v8906_v54  ;;  %v8889_v54 = vld [vmem:[#allocation2 + $0x13b] sm:$0xff] }
 0xb69   : > { %12951 = vmatprep.mubr.msk.bf16.mxu1 %vm14635_vm1, %v16639_v22  ;;  %v8914_v61 = vpack.c.bf16 %v8889_v54, %v8888_v18 }
 0xb70   : > { %12952 = vmatmul.mubr.bf16.gmra.mrb[76].mxu1 %v8907_v0  ;;  %v8891_v0 = vld [vmem:[#allocation2 + $0x14b] sm:$0xff] }
 0xb71   : > { %12955 = vmatprep.mubr.msk.bf16.mxu1 %vm14635_vm1, %v16639_v22 }
 0xb78   : > { %12956 = vmatmul.mubr.bf16.gmra.mrb[80].mxu1 %v8908_v37  ;;  %v8890_v37 = vld [vmem:[#allocation2 + $0x143] sm:$0xff] }
 0xb79   : > { %12959 = vmatprep.mubr.msk.bf16.mxu1 %vm14635_vm1, %v16639_v22  ;;  %v8915_v13 = vpack.c.bf16 %v8891_v0, %v8890_v37  ;;  %v9594_v37 = vld [vmem:[%s17996_s8 + $0x58] sm:$0xff] }
 0xb7a   : > { %v13171_v63 = vpack.c.bf16 %v9594_v37, %v9593_v47 }
 0xb80   : > { %12960 = vmatmul.mubr.bf16.gmra.mrb[84].mxu1 %v8909_v42  ;;  %v8893_v42 = vld [vmem:[#allocation2 + $0x15b] sm:$0xff] }
 0xb81   : > { %12963 = vmatprep.mubr.msk.bf16.mxu1 %vm14635_vm1, %v16639_v22  ;;  %v8916_v55 = vpack.c.bf16 %v8893_v42, %v8892_v20 }
 0xb88   : > { %12964 = vmatmul.mubr.bf16.gmra.mrb[88].mxu1 %v8910_v21  ;;  %v8894_v21 = vld [vmem:[#allocation2 + $0x163] sm:$0xff] }
 0xb89   : > { %12967 = vmatprep.mubr.msk.bf16.mxu1 %vm14635_vm1, %v16639_v22  ;;  %v8917_v40 = vpack.c.bf16 %v8895_v27, %v8894_v21 }
 0xb90   : > { %12968 = vmatmul.mubr.bf16.gmra.mrb[92].mxu1 %v8911_v44  ;;  %v9587_v44 = vld [vmem:[%s17996_s8 + $0x20] sm:$0xff] }
 0xb91   : > { %12971 = vmatprep.mubr.msk.bf16.mxu1 %vm14635_vm1, %v16639_v22  ;;  %v13162_v46 = vpack.c.bf16 %v9588_v10, %v9587_v44 }
 0xb93   : > { %13163 = vmatpush3.bf16.msra.mxu0 %v13162_v46 }
 0xb94   : > { %13164 = vmatprep.subr.bf16.mxu0 %v18007_v31 }
 0xb97   : > { %13166 = vmatpush3.bf16.msra.mxu0 %v13165_v34 }
 0xb98   : > { %12972 = vmatmul.mubr.bf16.gmra.mrb[96].mxu1 %v8912_v7  ;;  %v8896_v7 = vld [vmem:[#allocation2 + $0x173] sm:$0xff]  ;;  %13167 = vmatprep.subr.bf16.mxu0 %v18007_v31 }
 0xb99   : > { %12975 = vmatprep.mubr.msk.bf16.mxu1 %vm14635_vm1, %v16639_v22  ;;  %v8918_v39 = vpack.c.bf16 %v8897_v35, %v8896_v7  ;;  %v9595_v7 = vld [vmem:[%s17996_s8 + $0x60] sm:$0xff]  ;;  %v9596_v35 = vld [vmem:[%s17996_s8 + $0x68] sm:$0xff] }
 0xb9a   : > { %v13174_v4 = vpack.c.bf16 %v9596_v35, %v9595_v7 }
 0xba0   : > { %12976 = vmatmul.mubr.bf16.gmra.mrb[100].mxu1 %v8913_v19  ;;  %v9591_v19 = vld [vmem:[%s17996_s8 + $0x40] sm:$0xff] }
 0xba1   : > { %12979 = vmatprep.mubr.msk.bf16.mxu1 %vm14635_vm1, %v16639_v22 }
 0xba8   : > { %12980 = vmatmul.mubr.bf16.gmra.mrb[104].mxu1 %v8914_v61 }
 0xba9   : > { %12983 = vmatprep.mubr.msk.bf16.mxu1 %vm14635_vm1, %v16639_v22 }
 0xbb0   : > { %12984 = vmatmul.mubr.bf16.gmra.mrb[108].mxu1 %v8915_v13 }
 0xbb1   : > { %12987 = vmatprep.mubr.msk.bf16.mxu1 %vm14635_vm1, %v16639_v22 }
 0xbb8   : > { %12988 = vmatmul.mubr.bf16.gmra.mrb[112].mxu1 %v8916_v55 }
 0xbb9   : > { %12991 = vmatprep.mubr.msk.bf16.mxu1 %vm14635_vm1, %v16639_v22 }
 0xbc0   : > { %12992 = vmatmul.mubr.bf16.gmra.mrb[116].mxu1 %v8917_v40 }
 0xbc1   : > { %12995 = vmatprep.mubr.msk.bf16.mxu1 %vm14635_vm1, %v16639_v22 }
 0xbc8   : > { %12996 = vmatmul.mubr.bf16.gmra.mrb[120].mxu1 %v8918_v39 }
 0xbc9   : > { %13066 = vmatprep.mubr.msk.f32.mxu1 %vm14635_vm1, %v16639_v22  ;;  %v9592_v22 = vld [vmem:[%s17996_s8 + $0x48] sm:$0xff] }
 0xbca   : > { %v13168_v54 = vpack.c.bf16 %v9592_v22, %v9591_v19 }
 0xbcc   : > { %13169 = vmatpush3.bf16.msra.mxu0 %v13168_v54 }
 0xbcd   : > { %13170 = vmatprep.subr.bf16.mxu0 %v18007_v31 }
 0xbd0   : > { %13172 = vmatpush3.bf16.msra.mxu0 %v13171_v63  ;;  %v17066_v63 = vld [vmem:[%s17995_s7] ss:$0 sm:$0xff] }
 0xbd1   : > { %13173 = vmatprep.subr.bf16.mxu0 %v18007_v31 }
 0xbd4   : > { %13175 = vmatpush3.bf16.msra.mxu0 %v13174_v4 }
 0xbd5   : > { %13176 = vmatprep.subr.bf16.mxu0 %v18007_v31 }
 0xbfb   : > { %v9060_v18 = vpop.f32.mrb[40].mxu1 }
 0xbfc   : > { %v12917_v61 = vpop.f32.mrb[41].mxu1 }
 0xbfd   : > { %v9063_v0 = vpop.f32.mrb[42].mxu1  ;;  %v17058_v61 = vld [vmem:[%s17994_s6] ss:$0 sm:$0xff] }
 0xbfe   : > { %v12918_v30 = vpop.f32.mrb[43].mxu1  ;;  %v9360_v47 = vmul.f32 %v17058_v61, %v9060_v18 }
 0xbff   : > { %v9361_v30 = vmul.f32 %v17058_v61, %v9063_v0 }
 0xc03   : > { %v9068_v13 = vpop.f32.mrb[44].mxu1 }
 0xc04   : > { %v12921_v42 = vpop.f32.mrb[45].mxu1  ;;  %v9362_v37 = vmul.f32 %v17058_v61, %v9068_v13 }
 0xc05   : > { %v9071_v20 = vpop.f32.mrb[46].mxu1 }
 0xc06   : > { %v12922_v55 = vpop.f32.mrb[47].mxu1  ;;  %v9411_v7 = vadd.f32 %v17066_v63, %v9362_v37  ;;  %v9363_v0 = vmul.f32 %v17058_v61, %v9071_v20 }
 0xc07   : > { %v9410_v55 = vadd.f32 %v17066_v63, %v9361_v30 }
 0xc09   : > { %v9452_v35 = vmax.f32 %v9410_v55, 0.0 }
 0xc0b   : > { %v9076_v21 = vpop.f32.mrb[48].mxu1  ;;  %v17079_v30 = vmul.f32 %v9452_v35, %v15995_v60 }
 0xc0c   : > { %v12925_v27 = vpop.f32.mrb[49].mxu1  ;;  %v9364_v13 = vmul.f32 %v17058_v61, %v9076_v21 }
 0xc0d   : > { %v9079_v40 = vpop.f32.mrb[50].mxu1 }
 0xc0e   : > { %v12926_v44 = vpop.f32.mrb[51].mxu1 }
 0xc13   : > { %v9084_v10 = vpop.f32.mrb[52].mxu1 }
 0xc14   : > { %v12929_v46 = vpop.f32.mrb[53].mxu1 }
 0xc15   : > { %v9087_v39 = vpop.f32.mrb[54].mxu1  ;;  %v9409_v46 = vadd.f32 %v17066_v63, %v9360_v47  ;;  %v9365_v47 = vmul.f32 %v17058_v61, %v9079_v40  ;;  %v9597_v40 = vld [vmem:[%s17996_s8 + $0x70] sm:$0xff] }
 0xc16   : > { %v12930_v49 = vpop.f32.mrb[55].mxu1 }
 0xc17   : > { %v9451_v4 = vmax.f32 %v9409_v46, 0.0  ;;  %v9453_v49 = vmax.f32 %v9411_v7, 0.0  ;;  %v9366_v46 = vmul.f32 %v17058_v61, %v9084_v10 }
 0xc19   : > { %v17086_v20 = vmul.f32 %v9451_v4, %v15983_v48  ;;  %v17089_v21 = vmul.f32 %v9453_v49, %v16000_v3  ;;  %v9598_v48 = vld [vmem:[%s17996_s8 + $0x78] sm:$0xff]  ;;  %v9367_v4 = vmul.f32 %v17058_v61, %v9087_v39 }
 0xc1a   : > { %v13177_v3 = vpack.c.bf16 %v9598_v48, %v9597_v40  ;;  %v9673_v40 = vld [vmem:[%s17997_s9 + $0x18] sm:$0xff] }
 0xc1b   : > { %v9092_v34 = vpop.f32.mrb[56].mxu1  ;;  %v9535_v60 = vadd.f32 %v17079_v30, %v17086_v20 }
 0xc1c   : > { %v12933_v19 = vpop.f32.mrb[57].mxu1  ;;  %13178 = vmatpush3.bf16.msra.mxu0 %v13177_v3 }
 0xc1d   : > { %v9095_v22 = vpop.f32.mrb[58].mxu1  ;;  %v9412_v19 = vadd.f32 %v17066_v63, %v9363_v0  ;;  %v9536_v35 = vadd.f32 %v9535_v60, %v17089_v21 }
 0xc1e   : > { %v12934_v54 = vpop.f32.mrb[59].mxu1 }
 0xc1f   : > { %v9454_v55 = vmax.f32 %v9412_v19, 0.0 }
 0xc21   : > { %v17103_v10 = vmul.f32 %v9454_v55, %v16009_v15 }
 0xc23   : > { %v9100_v42 = vpop.f32.mrb[60].mxu1  ;;  %18045 = vst [vmem:[#allocation9_spill] sm:$0xff] %v17103_v10  ;;  %v9537_v15 = vadd.f32 %v9536_v35, %v17103_v10 }
 0xc24   : > { %v12937_v27 = vpop.f32.mrb[61].mxu1 }
 0xc25   : > { %v17069_v44 = vpop.f32.mrb[62].mxu1  ;;  %v9413_v27 = vadd.f32 %v17066_v63, %v9364_v13  ;;  %v9415_v13 = vadd.f32 %v17066_v63, %v9366_v46  ;;  %v9416_v46 = vadd.f32 %v17066_v63, %v9367_v4 }
 0xc26   : > { %v12938_v18 = vpop.f32.mrb[63].mxu1 }
 0xc27   : > { %v9455_v0 = vmax.f32 %v9413_v27, 0.0  ;;  %v9414_v18 = vadd.f32 %v17066_v63, %v9365_v47  ;;  %v9368_v47 = vmul.f32 %v17058_v61, %v9092_v34  ;;  %v9457_v55 = vmax.f32 %v9415_v13, 0.0  ;;  %v9671_v34 = vld [vmem:[%s17997_s9 + $0x8] sm:$0xff] }
 0xc28   : > { %v9369_v13 = vmul.f32 %v17058_v61, %v9095_v22 }
 0xc29   : > { %v17108_v19 = vmul.f32 %v9455_v0, %v16024_v50  ;;  %v9456_v27 = vmax.f32 %v9414_v18, 0.0  ;;  %v9670_v50 = vld [vmem:[%s17997_s9] sm:$0xff]  ;;  %v9672_v0 = vld [vmem:[%s17997_s9 + $0x10] sm:$0xff]  ;;  %v9417_v35 = vadd.f32 %v17066_v63, %v9368_v47 }
 0xc2a   : > { %v13180_v18 = vpack.c.bf16 %v9671_v34, %v9670_v50  ;;  %v13183_v4 = vpack.c.bf16 %v9673_v40, %v9672_v0  ;;  %v9370_v50 = vmul.f32 %v17058_v61, %v9100_v42  ;;  %v18047_v34 = vmov 0.0|0.0  }
 0xc2b   : > { %v17076_v54 = vpop.f32.mrb[64].mxu1  ;;  %18046 = vst [vmem:[#allocation10_spill] sm:$0xff] %v17108_v19  ;;  %v9538_v48 = vadd.f32 %v9537_v15, %v17108_v19  ;;  %v17130_v3 = vmul.f32 %v9456_v27, %v16028_v52  ;;  %v9459_v19 = vmax.f32 %v9417_v35, 0.0  ;;  %v9418_v52 = vadd.f32 %v17066_v63, %v9369_v13  ;;  %v9674_v13 = vld [vmem:[%s17997_s9 + $0x20] sm:$0xff] }
 0xc2c   : > { %v12941_v37 = vpop.f32.mrb[65].mxu1  ;;  %13181 = vmatpush3.bf16.msra.mxu1 %v13180_v18  ;;  %v9371_v42 = vmul.f32 %v17058_v61, %v17069_v44  ;;  %v9372_v40 = vmul.f32 %v17058_v61, %v17076_v54  ;;  %v9675_v44 = vld [vmem:[%s17997_s9 + $0x28] sm:$0xff] }
 0xc2d   : > { %v17083_v31 = vpop.f32.mrb[66].mxu1  ;;  %13182 = vmatprep.subr.bf16.mxu1 %v18047_v34  ;;  %v9539_v15 = vadd.f32 %v9538_v48, %v17130_v3  ;;  %v9460_v18 = vmax.f32 %v9418_v52, 0.0 }
 0xc2e   : > { %v12942_v7 = vpop.f32.mrb[67].mxu1  ;;  %v9421_v54 = vadd.f32 %v17066_v63, %v9372_v40 }
 0xc2f   : > { %v17111_v7 = vld [vmem:[#allocation2] sm:$0xff] }
 0xc30   : > { %13069 = vmatprep.subr.bf16.mxu0 %v17111_v7  ;;  %13184 = vmatpush3.bf16.msra.mxu1 %v13183_v4 }
 0xc31   : > { %13185 = vmatprep.subr.bf16.mxu1 %v18047_v34 }
 0xc33   : > { %v9116_v49 = vpop.f32.mrb[68].mxu1 }
 0xc34   : > { %v12945_v37 = vpop.f32.mrb[69].mxu1 }
 0xc35   : > { %v9119_v60 = vpop.f32.mrb[70].mxu1  ;;  %v17135_v37 = vmul.f32 %v9457_v55, %v16039_v11  ;;  %v9419_v11 = vadd.f32 %v17066_v63, %v9370_v50  ;;  %v9373_v50 = vmul.f32 %v17058_v61, %v17083_v31 }
 0xc36   : > { %v12946_v39 = vpop.f32.mrb[71].mxu1 }
 0xc37   : > { %v9458_v39 = vmax.f32 %v9416_v46, 0.0  ;;  %v9540_v22 = vadd.f32 %v9539_v15, %v17135_v37  ;;  %v17150_v46 = vmul.f32 %v9459_v19, %v16055_v53  ;;  %v9461_v35 = vmax.f32 %v9419_v11, 0.0 }
 0xc38   : > { %v13186_v53 = vpack.c.bf16 %v9675_v44, %v9674_v13  ;;  %v9374_v11 = vmul.f32 %v17058_v61, %v9116_v49 }
 0xc39   : > { %v17143_v0 = vmul.f32 %v9458_v39, %v16043_v12  ;;  %v9420_v12 = vadd.f32 %v17066_v63, %v9371_v42  ;;  %v17164_v39 = vmul.f32 %v9460_v18, %v16060_v57  ;;  %v9422_v18 = vadd.f32 %v17066_v63, %v9373_v50 }
 0xc3a   : > { %13187 = vmatpush3.bf16.msra.mxu1 %v13186_v53 }
 0xc3b   : > { %v9124_v10 = vpop.f32.mrb[72].mxu1  ;;  %v9541_v48 = vadd.f32 %v9540_v22, %v17143_v0  ;;  %v9462_v22 = vmax.f32 %v9420_v12, 0.0  ;;  %13188 = vmatprep.subr.bf16.mxu1 %v18047_v34  ;;  %v9464_v12 = vmax.f32 %v9422_v18, 0.0 }
 0xc3c   : > { %v12949_v27 = vpop.f32.mrb[73].mxu1  ;;  %v9376_v13 = vmul.f32 %v17058_v61, %v9124_v10 }
 0xc3d   : > { %v9127_v47 = vpop.f32.mrb[74].mxu1  ;;  %v9542_v19 = vadd.f32 %v9541_v48, %v17150_v46  ;;  %v17170_v27 = vmul.f32 %v9461_v35, %v16070_v17  ;;  %v17178_v31 = vmul.f32 %v9462_v22, %v16075_v25  ;;  %v9423_v48 = vadd.f32 %v17066_v63, %v9374_v11 }
 0xc3e   : > { %v12950_v55 = vpop.f32.mrb[75].mxu1  ;;  %v9375_v17 = vmul.f32 %v17058_v61, %v9119_v60  ;;  %v17190_v22 = vmul.f32 %v9464_v12, %v16088_v1  ;;  %v9425_v60 = vadd.f32 %v17066_v63, %v9376_v13 }
 0xc3f   : > { %v9543_v57 = vadd.f32 %v9542_v19, %v17164_v39  ;;  %v9463_v55 = vmax.f32 %v9421_v54, 0.0  ;;  %v9465_v54 = vmax.f32 %v9423_v48, 0.0 }
 0xc40   : > { %v9424_v50 = vadd.f32 %v17066_v63, %v9375_v17  ;;  %v9467_v18 = vmax.f32 %v9425_v60, 0.0 }
 0xc41   : > { %v9544_v40 = vadd.f32 %v9543_v57, %v17170_v27  ;;  %v17183_v49 = vmul.f32 %v9463_v55, %v16083_v59  ;;  %v9377_v59 = vmul.f32 %v17058_v61, %v9127_v47  ;;  %v17195_v11 = vmul.f32 %v9465_v54, %v16095_v29 }
 0xc42   : > { %v9466_v10 = vmax.f32 %v9424_v50, 0.0 }
 0xc43   : > { %v9132_v4 = vpop.f32.mrb[76].mxu1  ;;  %v9545_v19 = vadd.f32 %v9544_v40, %v17178_v31  ;;  %v9426_v40 = vadd.f32 %v17066_v63, %v9377_v59 }
 0xc44   : > { %v12953_v15 = vpop.f32.mrb[77].mxu1  ;;  %v17202_v12 = vmul.f32 %v9466_v10, %v16100_v36  ;;  %v9676_v36 = vld [vmem:[%s17997_s9 + $0x30] sm:$0xff] }
 0xc45   : > { %v9135_v52 = vpop.f32.mrb[78].mxu1  ;;  %v9546_v15 = vadd.f32 %v9545_v19, %v17183_v49 }
 0xc46   : > { %v12954_v42 = vpop.f32.mrb[79].mxu1  ;;  %18048 = vst [vmem:[#allocation11_spill] sm:$0xff] %v17202_v12  ;;  %v9379_v29 = vmul.f32 %v17058_v61, %v9135_v52  ;;  %v9677_v52 = vld [vmem:[%s17997_s9 + $0x38] sm:$0xff] }
 0xc47   : > { %v9378_v42 = vmul.f32 %v17058_v61, %v9132_v4  ;;  %v9547_v55 = vadd.f32 %v9546_v15, %v17190_v22  ;;  %v17207_v4 = vmul.f32 %v9467_v18, %v16107_v6  ;;  %v13189_v60 = vpack.c.bf16 %v9677_v52, %v9676_v36 }
 0xc49   : > { %v9548_v1 = vadd.f32 %v9547_v55, %v17195_v11  ;;  %v9427_v47 = vadd.f32 %v17066_v63, %v9378_v42  ;;  %18049 = vst [vmem:[#allocation12_spill] sm:$0xff] %v17207_v4  ;;  %13190 = vmatpush3.bf16.msra.mxu1 %v13189_v60 }
 0xc4a   : > { %13191 = vmatprep.subr.bf16.mxu1 %v18047_v34 }
 0xc4b   : > { %v9140_v35 = vpop.f32.mrb[80].mxu1  ;;  %v9549_v54 = vadd.f32 %v9548_v1, %v17202_v12  ;;  %v9469_v50 = vmax.f32 %v9427_v47, 0.0 }
 0xc4c   : > { %v12957_v44 = vpop.f32.mrb[81].mxu1  ;;  %v9380_v19 = vmul.f32 %v17058_v61, %v9140_v35 }
 0xc4d   : > { %v9143_v53 = vpop.f32.mrb[82].mxu1  ;;  %v9468_v44 = vmax.f32 %v9426_v40, 0.0  ;;  %v9550_v6 = vadd.f32 %v9549_v54, %v17207_v4  ;;  %v17225_v18 = vmul.f32 %v9469_v50, %v16119_v51 }
 0xc4e   : > { %v12958_v25 = vpop.f32.mrb[83].mxu1  ;;  %v9429_v35 = vadd.f32 %v17066_v63, %v9380_v19  ;;  %v9381_v10 = vmul.f32 %v17058_v61, %v9143_v53 }
 0xc4f   : > { %v9428_v25 = vadd.f32 %v17066_v63, %v9379_v29  ;;  %v17220_v59 = vmul.f32 %v9468_v44, %v16112_v9  ;;  %18051 = vst [vmem:[#allocation14_spill] sm:$0xff] %v17225_v18 }
 0xc50   : > { %v9471_v9 = vmax.f32 %v9429_v35, 0.0  ;;  %v9430_v29 = vadd.f32 %v17066_v63, %v9381_v10 }
 0xc51   : > { %18050 = vst [vmem:[#allocation13_spill] sm:$0xff] %v17220_v59  ;;  %v9470_v40 = vmax.f32 %v9428_v25, 0.0  ;;  %v9551_v47 = vadd.f32 %v9550_v6, %v17220_v59 }
 0xc52   : > { %v9472_v54 = vmax.f32 %v9430_v29, 0.0 }
 0xc53   : > { %v9148_v57 = vpop.f32.mrb[84].mxu1  ;;  %v17233_v53 = vmul.f32 %v9470_v40, %v16124_v62 }
 0xc54   : > { %v12961_v48 = vpop.f32.mrb[85].mxu1  ;;  %v17245_v10 = vmul.f32 %v9472_v54, %v16136_v43 }
 0xc55   : > { %v9151_v17 = vpop.f32.mrb[86].mxu1  ;;  %v9382_v48 = vmul.f32 %v17058_v61, %v9148_v57  ;;  %18052 = vst [vmem:[#allocation15_spill] sm:$0xff] %v17233_v53  ;;  %v17238_v57 = vmul.f32 %v9471_v9, %v16131_v32 }
 0xc56   : > { %v12962_v13 = vpop.f32.mrb[87].mxu1  ;;  %v9383_v51 = vmul.f32 %v17058_v61, %v9151_v17  ;;  %18054 = vst [vmem:[#allocation17_spill] sm:$0xff] %v17245_v10 }
 0xc57   : > { %v9552_v13 = vadd.f32 %v9551_v47, %v17225_v18  ;;  %v9431_v44 = vadd.f32 %v17066_v63, %v9382_v48  ;;  %18053 = vst [vmem:[#allocation16_spill] sm:$0xff] %v17238_v57  ;;  %v9678_v48 = vld [vmem:[%s17997_s9 + $0x40] sm:$0xff] }
 0xc58   : > { %v9432_v6 = vadd.f32 %v17066_v63, %v9383_v51 }
 0xc59   : > { %v9553_v52 = vadd.f32 %v9552_v13, %v17233_v53  ;;  %v9473_v60 = vmax.f32 %v9431_v44, 0.0 }
 0xc5b   : > { %v9156_v15 = vpop.f32.mrb[88].mxu1  ;;  %v9554_v35 = vadd.f32 %v9553_v52, %v17238_v57 }
 0xc5c   : > { %v12965_v42 = vpop.f32.mrb[89].mxu1  ;;  %v9384_v50 = vmul.f32 %v17058_v61, %v9156_v15  ;;  %v9474_v15 = vmax.f32 %v9432_v6, 0.0 }
 0xc5d   : > { %v9159_v55 = vpop.f32.mrb[90].mxu1  ;;  %v17250_v42 = vmul.f32 %v9473_v60, %v16147_v23  ;;  %v9555_v9 = vadd.f32 %v9554_v35, %v17245_v10 }
 0xc5e   : > { %v12966_v1 = vpop.f32.mrb[91].mxu1  ;;  %v9433_v17 = vadd.f32 %v17066_v63, %v9384_v50  ;;  %v9385_v32 = vmul.f32 %v17058_v61, %v9159_v55  ;;  %v17263_v51 = vmul.f32 %v9474_v15, %v16151_v45 }
 0xc5f   : > { %18055 = vst [vmem:[#allocation18_spill] sm:$0xff] %v17250_v42  ;;  %v9679_v1 = vld [vmem:[%s17997_s9 + $0x48] sm:$0xff]  ;;  %v9556_v44 = vadd.f32 %v9555_v9, %v17250_v42 }
 0xc60   : > { %v13192_v47 = vpack.c.bf16 %v9679_v1, %v9678_v48  ;;  %v9475_v29 = vmax.f32 %v9433_v17, 0.0  ;;  %v9434_v55 = vadd.f32 %v17066_v63, %v9385_v32  ;;  %18056 = vst [vmem:[#allocation19_spill] sm:$0xff] %v17263_v51 }
 0xc61   : > { %v9557_v6 = vadd.f32 %v9556_v44, %v17263_v51 }
 0xc62   : > { %13193 = vmatpush3.bf16.msra.mxu1 %v13192_v47  ;;  %v9476_v52 = vmax.f32 %v9434_v55, 0.0 }
 0xc63   : > { %v9164_v19 = vpop.f32.mrb[92].mxu1  ;;  %13194 = vmatprep.subr.bf16.mxu1 %v18047_v34 }
 0xc64   : > { %v12969_v25 = vpop.f32.mrb[93].mxu1  ;;  %v9386_v40 = vmul.f32 %v17058_v61, %v9164_v19  ;;  %v17276_v32 = vmul.f32 %v9476_v52, %v16165_v38 }
 0xc65   : > { %v9167_v36 = vpop.f32.mrb[94].mxu1  ;;  %v17269_v25 = vmul.f32 %v9475_v29, %v16161_v16 }
 0xc66   : > { %v12970_v62 = vpop.f32.mrb[95].mxu1  ;;  %v9435_v19 = vadd.f32 %v17066_v63, %v9386_v40  ;;  %v9387_v54 = vmul.f32 %v17058_v61, %v9167_v36  ;;  %18058 = vst [vmem:[#allocation21_spill] sm:$0xff] %v17276_v32 }
 0xc67   : > { %18057 = vst [vmem:[#allocation20_spill] sm:$0xff] %v17269_v25  ;;  %v9558_v17 = vadd.f32 %v9557_v6, %v17269_v25 }
 0xc68   : > { %v9477_v62 = vmax.f32 %v9435_v19, 0.0  ;;  %v9436_v35 = vadd.f32 %v17066_v63, %v9387_v54 }
 0xc69   : > { %v9559_v9 = vadd.f32 %v9558_v17, %v17276_v32 }
 0xc6a   : > { %v17281_v48 = vmul.f32 %v9477_v62, %v16173_v24  ;;  %v9478_v1 = vmax.f32 %v9436_v35, 0.0 }
 0xc6b   : > { %v9172_v43 = vpop.f32.mrb[96].mxu1 }
 0xc6c   : > { %v12973_v23 = vpop.f32.mrb[97].mxu1  ;;  %v9388_v60 = vmul.f32 %v17058_v61, %v9172_v43  ;;  %18059 = vst [vmem:[#allocation22_spill] sm:$0xff] %v17281_v48  ;;  %v9560_v38 = vadd.f32 %v9559_v9, %v17281_v48 }
 0xc6d   : > { %v9175_v13 = vpop.f32.mrb[98].mxu1  ;;  %v17288_v23 = vmul.f32 %v9478_v1, %v16179_v26  ;;  %v9681_v1 = vld [vmem:[%s17997_s9 + $0x58] sm:$0xff] }
 0xc6e   : > { %v12974_v50 = vpop.f32.mrb[99].mxu1  ;;  %v9437_v36 = vadd.f32 %v17066_v63, %v9388_v60  ;;  %v9389_v15 = vmul.f32 %v17058_v61, %v9175_v13 }
 0xc6f   : > { %18060 = vst [vmem:[#allocation23_spill] sm:$0xff] %v17288_v23  ;;  %v9561_v6 = vadd.f32 %v9560_v38, %v17288_v23 }
 0xc70   : > { %v9479_v29 = vmax.f32 %v9437_v36, 0.0  ;;  %v9438_v55 = vadd.f32 %v17066_v63, %v9389_v15 }
 0xc72   : > { %v17293_v19 = vmul.f32 %v9479_v29, %v16187_v28  ;;  %v9480_v54 = vmax.f32 %v9438_v55, 0.0 }
 0xc73   : > { %v9180_v45 = vpop.f32.mrb[100].mxu1 }
 0xc74   : > { %v12977_v16 = vpop.f32.mrb[101].mxu1  ;;  %v9390_v43 = vmul.f32 %v17058_v61, %v9180_v45  ;;  %18061 = vst [vmem:[#allocation24_spill] sm:$0xff] %v17293_v19  ;;  %v9562_v45 = vadd.f32 %v9561_v6, %v17293_v19  ;;  %v17300_v17 = vmul.f32 %v9480_v54, %v16193_v14 }
 0xc75   : > { %v9183_v40 = vpop.f32.mrb[102].mxu1 }
 0xc76   : > { %v12978_v47 = vpop.f32.mrb[103].mxu1  ;;  %v9439_v13 = vadd.f32 %v17066_v63, %v9390_v43  ;;  %v9391_v44 = vmul.f32 %v17058_v61, %v9183_v40  ;;  %18062 = vst [vmem:[#allocation25_spill] sm:$0xff] %v17300_v17  ;;  %v9680_v40 = vld [vmem:[%s17997_s9 + $0x50] sm:$0xff]  ;;  %v9563_v14 = vadd.f32 %v9562_v45, %v17300_v17 }
 0xc77   : > { %v13195_v47 = vpack.c.bf16 %v9681_v1, %v9680_v40 }
 0xc78   : > { %v9481_v62 = vmax.f32 %v9439_v13, 0.0  ;;  %v9440_v35 = vadd.f32 %v17066_v63, %v9391_v44 }
 0xc79   : > { %13196 = vmatpush3.bf16.msra.mxu1 %v13195_v47 }
 0xc7a   : > { %v17305_v15 = vmul.f32 %v9481_v62, %v16201_v33  ;;  %v9482_v16 = vmax.f32 %v9440_v35, 0.0  ;;  %13197 = vmatprep.subr.bf16.mxu1 %v18047_v34 }
 0xc7b   : > { %v9188_v24 = vpop.f32.mrb[104].mxu1 }
 0xc7c   : > { %v9392_v50 = vmul.f32 %v17058_v61, %v9188_v24  ;;  %v12981_v52 = vpop.f32.mrb[105].mxu1  ;;  %18063 = vst [vmem:[#allocation26_spill] sm:$0xff] %v17305_v15  ;;  %v9564_v13 = vadd.f32 %v9563_v14, %v17305_v15  ;;  %v17318_v44 = vmul.f32 %v9482_v16, %v16207_v8 }
 0xc7d   : > { %v9191_v60 = vpop.f32.mrb[106].mxu1 }
 0xc7e   : > { %v12982_v26 = vpop.f32.mrb[107].mxu1  ;;  %v9441_v36 = vadd.f32 %v17066_v63, %v9392_v50  ;;  %v9393_v28 = vmul.f32 %v17058_v61, %v9191_v60  ;;  %18064 = vst [vmem:[#allocation27_spill] sm:$0xff] %v17318_v44  ;;  %v9565_v6 = vadd.f32 %v9564_v13, %v17318_v44 }
 0xc80   : > { %v9483_v9 = vmax.f32 %v9441_v36, 0.0  ;;  %v9442_v29 = vadd.f32 %v17066_v63, %v9393_v28 }
 0xc82   : > { %v17324_v52 = vmul.f32 %v9483_v9, %v16215_v56  ;;  %v9484_v60 = vmax.f32 %v9442_v29, 0.0 }
 0xc83   : > { %v9196_v43 = vpop.f32.mrb[108].mxu1 }
 0xc84   : > { %v9394_v55 = vmul.f32 %v17058_v61, %v9196_v43  ;;  %v12985_v33 = vpop.f32.mrb[109].mxu1  ;;  %18065 = vst [vmem:[#allocation28_spill] sm:$0xff] %v17324_v52  ;;  %v9566_v8 = vadd.f32 %v9565_v6, %v17324_v52  ;;  %v17330_v45 = vmul.f32 %v9484_v60, %v16223_v5 }
 0xc85   : > { %v9199_v38 = vpop.f32.mrb[110].mxu1 }
 0xc86   : > { %v9443_v24 = vadd.f32 %v17066_v63, %v9394_v55  ;;  %v9395_v54 = vmul.f32 %v17058_v61, %v9199_v38  ;;  %v12986_v50 = vpop.f32.mrb[111].mxu1  ;;  %18066 = vst [vmem:[#allocation29_spill] sm:$0xff] %v17330_v45  ;;  %v9567_v14 = vadd.f32 %v9566_v8, %v17330_v45 }
 0xc88   : > { %v9485_v62 = vmax.f32 %v9443_v24, 0.0  ;;  %v9444_v35 = vadd.f32 %v17066_v63, %v9395_v54 }
 0xc8a   : > { %v17334_v40 = vmul.f32 %v9485_v62, %v16231_v41  ;;  %v9486_v56 = vmax.f32 %v9444_v35, 0.0 }
 0xc8b   : > { %v9204_v26 = vpop.f32.mrb[112].mxu1 }
 0xc8c   : > { %v9396_v36 = vmul.f32 %v17058_v61, %v9204_v26  ;;  %v12989_v28 = vpop.f32.mrb[113].mxu1  ;;  %18067 = vst [vmem:[#allocation30_spill] sm:$0xff] %v17334_v40  ;;  %v9568_v5 = vadd.f32 %v9567_v14, %v17334_v40  ;;  %v17342_v55 = vmul.f32 %v9486_v56, %v16237_v2  ;;  %v18070_v2 = vld [vmem:[#allocation4_spill] sm:$0xff]  ;;  %v9682_v56 = vld [vmem:[%s17997_s9 + $0x60] sm:$0xff] }
 0xc8d   : > { %v9207_v16 = vpop.f32.mrb[114].mxu1 }
 0xc8e   : > { %v9445_v1 = vadd.f32 %v17066_v63, %v9396_v36  ;;  %v9397_v43 = vmul.f32 %v17058_v61, %v9207_v16  ;;  %v12990_v47 = vpop.f32.mrb[115].mxu1  ;;  %18068 = vst [vmem:[#allocation31_spill] sm:$0xff] %v17342_v55  ;;  %v9569_v50 = vadd.f32 %v9568_v5, %v17342_v55  ;;  %v18072_v36 = vld [vmem:[#allocation5_spill] sm:$0xff] }
 0xc90   : > { %v9487_v9 = vmax.f32 %v9445_v1, 0.0  ;;  %v9446_v29 = vadd.f32 %v17066_v63, %v9397_v43  ;;  %v9683_v1 = vld [vmem:[%s17997_s9 + $0x68] sm:$0xff] }
 0xc91   : > { %v13198_v47 = vpack.c.bf16 %v9683_v1, %v9682_v56  ;;  %v9685_v1 = vld [vmem:[%s17997_s9 + $0x78] sm:$0xff] }
 0xc92   : > { %v17345_v41 = vmul.f32 %v9487_v9, %v16245_v58  ;;  %v9488_v38 = vmax.f32 %v9446_v29, 0.0 }
 0xc93   : > { %v9212_v33 = vpop.f32.mrb[116].mxu1  ;;  %13199 = vmatpush3.bf16.msra.mxu1 %v13198_v47 }
 0xc94   : > { %18069 = vst [vmem:[#allocation32_spill] sm:$0xff] %v17345_v41  ;;  %v9398_v13 = vmul.f32 %v17058_v61, %v9212_v33  ;;  %v12993_v24 = vpop.f32.mrb[117].mxu1  ;;  %v9570_v35 = vadd.f32 %v9569_v50, %v17345_v41  ;;  %v17353_v26 = vmul.f32 %v9488_v38, %v18070_v2  ;;  %v18074_v38 = vld [vmem:[#allocation6_spill] sm:$0xff]  ;;  %13200 = vmatprep.subr.bf16.mxu1 %v18047_v34 }
 0xc95   : > { %v9215_v54 = vpop.f32.mrb[118].mxu1 }
 0xc96   : > { %v9447_v60 = vadd.f32 %v17066_v63, %v9398_v13  ;;  %v9399_v6 = vmul.f32 %v17058_v61, %v9215_v54  ;;  %v12994_v62 = vpop.f32.mrb[119].mxu1  ;;  %18071 = vst [vmem:[#allocation4_spill] sm:$0xff] %v17353_v26  ;;  %v9571_v14 = vadd.f32 %v9570_v35, %v17353_v26  ;;  %v18076_v35 = vld [vmem:[#allocation7_spill] sm:$0xff] }
 0xc98   : > { %v9489_v8 = vmax.f32 %v9447_v60, 0.0  ;;  %v9448_v58 = vadd.f32 %v17066_v63, %v9399_v6 }
 0xc9a   : > { %v17357_v28 = vmul.f32 %v9489_v8, %v18072_v36  ;;  %v9490_v16 = vmax.f32 %v9448_v58, 0.0  ;;  %v18078_v36 = vld [vmem:[#allocation8_spill] sm:$0xff] }
 0xc9b   : > { %v9220_v43 = vpop.f32.mrb[120].mxu1 }
 0xc9c   : > { %18073 = vst [vmem:[#allocation5_spill] sm:$0xff] %v17357_v28  ;;  %v9400_v9 = vmul.f32 %v17058_v61, %v9220_v43  ;;  %v12997_v29 = vpop.f32.mrb[121].mxu1  ;;  %v9572_v33 = vadd.f32 %v9571_v14, %v17357_v28  ;;  %v17369_v13 = vmul.f32 %v9490_v16, %v18074_v38  ;;  %v9763_v38 = vld [vmem:[%s14750_s18 + $0x28] sm:$0xff] }
 0xc9d   : > { %v9223_v5 = vpop.f32.mrb[122].mxu1  ;;  %v9825_v29 = vld [vmem:[%s17998_s10] sm:$0xf] }
 0xc9e   : > { %18075 = vst [vmem:[#allocation6_spill] sm:$0xff] %v17369_v13  ;;  %v9449_v24 = vadd.f32 %v17066_v63, %v9400_v9  ;;  %v9401_v54 = vmul.f32 %v17058_v61, %v9223_v5  ;;  %v12998_v50 = vpop.f32.mrb[123].mxu1  ;;  %v9573_v62 = vadd.f32 %v9572_v33, %v17369_v13  ;;  %v9762_v33 = vld [vmem:[%s14750_s18 + $0x20] sm:$0xff] }
 0xc9f   : > { %v9804_v50 = vpack.c.bf16 %v9763_v38, %v9762_v33  ;;  %v9776_v33 = vld [vmem:[%s14750_s18 + $0x90] sm:$0xff]  ;;  %v9777_v38 = vld [vmem:[%s14750_s18 + $0x98] sm:$0xff] }
 0xca0   : > { %v9491_v60 = vmax.f32 %v9449_v24, 0.0  ;;  %v9450_v6 = vadd.f32 %v17066_v63, %v9401_v54  ;;  %v9684_v63 = vld [vmem:[%s17997_s9 + $0x70] sm:$0xff]  ;;  %v9890_v54 = vsel %vm696_vm0, %v9825_v29, 0  ;;  %v9775_v29 = vld [vmem:[%s14750_s18 + $0x88] sm:$0xff] }
 0xca1   : > { %v13201_v43 = vpack.c.bf16 %v9685_v1, %v9684_v63  ;;  %v9771_v63 = vld [vmem:[%s14750_s18 + $0x68] sm:$0xff] }
 0xca2   : > { %v17377_v2 = vmul.f32 %v9491_v60, %v18076_v35  ;;  %v9492_v8 = vmax.f32 %v9450_v6, 0.0  ;;  %v9764_v60 = vld [vmem:[%s14750_s18 + $0x30] sm:$0xff]  ;;  %v9765_v6 = vld [vmem:[%s14750_s18 + $0x38] sm:$0xff]  ;;  %v9766_v35 = vld [vmem:[%s14750_s18 + $0x40] sm:$0xff] }
 0xca3   : > { %13202 = vmatpush3.bf16.msra.mxu1 %v13201_v43  ;;  %v9772_v43 = vld [vmem:[%s14750_s18 + $0x70] sm:$0xff] }
 0xca4   : > { %18077 = vst [vmem:[#allocation7_spill] sm:$0xff] %v17377_v2  ;;  %v9574_v58 = vadd.f32 %v9573_v62, %v17377_v2  ;;  %v17381_v16 = vmul.f32 %v9492_v8, %v18078_v36  ;;  %v9805_v62 = vpack.c.bf16 %v9765_v6, %v9764_v60  ;;  %v9767_v8 = vld [vmem:[%s14750_s18 + $0x48] sm:$0xff]  ;;  %v9768_v36 = vld [vmem:[%s14750_s18 + $0x50] sm:$0xff] }
 0xca5   : > { %v9780_v6 = vld [vmem:[%s14750_s18 + $0xb0] sm:$0xff] }
 0xca6   : > { %18079 = vst [vmem:[#allocation8_spill] sm:$0xff] %v17381_v16  ;;  %v9575_v61 = vadd.f32 %v9574_v58, %v17381_v16  ;;  %v9806_v58 = vpack.c.bf16 %v9767_v8, %v9766_v35  ;;  %v9782_v8 = vld [vmem:[%s14750_s18 + $0xc0] sm:$0xff] }
 0xca8   : > { %v9576_v56 = vrot.slane %v9575_v61, 4 }
 0xcaa   : > { %v9577_v34 = vadd.f32 %v9576_v56, %v9575_v61  ;;  %v9769_v61 = vld [vmem:[%s14750_s18 + $0x58] sm:$0xff] }
 0xcab   : > { %v9807_v56 = vpack.c.bf16 %v9769_v61, %v9768_v36  ;;  %v9784_v61 = vld [vmem:[%s14750_s18 + $0xd0] sm:$0xff] }
 0xcac   : > { %v9578_v47 = vrot.slane %v9577_v34, 2 }
 0xcae   : > { %v9579_v14 = vadd.f32 %v9578_v47, %v9577_v34  ;;  %v9770_v34 = vld [vmem:[%s14750_s18 + $0x60] sm:$0xff]  ;;  %v9773_v47 = vld [vmem:[%s14750_s18 + $0x78] sm:$0xff] }
 0xcaf   : > { %v9808_v1 = vpack.c.bf16 %v9771_v63, %v9770_v34  ;;  %v9786_v63 = vld [vmem:[%s14750_s18 + $0xe0] sm:$0xff] }
 0xcb0   : > { %v9580_v9 = vrot.slane %v9579_v14, 1 }
 0xcb2   : > { %v9581_v5 = vadd.f32 %v9580_v9, %v9579_v14  ;;  %v9809_v14 = vpack.c.bf16 %v9773_v47, %v9772_v43  ;;  %v9774_v9 = vld [vmem:[%s14750_s18 + $0x80] sm:$0xff]  ;;  %v9788_v47 = vld [vmem:[%s14750_s18 + $0xf0] sm:$0xff] }
 0xcb4   : > { %v9582_v24 = vmul.f32 0.00390625, %v9581_v5  ;;  %v9810_v5 = vpack.c.bf16 %v9775_v29, %v9774_v9  ;;  %v9790_v29 = vld [vmem:[%s14750_s18 + $0x100] sm:$0xff] }
 0xcb6   : > { %13032 = vmatmul.mubr.f32.vlgmr.msra.gmra.mrb[84].mxu0 %v9582_v24  ;;  %v9811_v24 = vpack.c.bf16 %v9777_v38, %v9776_v33  ;;  %v9792_v38 = vld [vmem:[%s14750_s18 + $0x110] sm:$0xff] }
 0xcb7   : > { %13070 = vmatpush3.bf16.msra.mxu0 %v9890_v54  ;;  %13071 = vmatprep.mubr.msk.bf16.mxu0 %vm14635_vm1, %v17111_v7  ;;  %v9778_v54 = vld [vmem:[%s14750_s18 + $0xa0] sm:$0xff] }
 0xcba   : > { %13072 = vmatmul.mubr.msk.bf16.vlgmr.msra.gmra.mrb[88].mxu0 %vm632_vm2, %v9804_v50  ;;  %v9779_v50 = vld [vmem:[%s14750_s18 + $0xa8] sm:$0xff] }
 0xcbb   : > { %13075 = vmatprep.mubr.msk.bf16.mxu0 %vm14635_vm1, %v17111_v7  ;;  %v9812_v60 = vpack.c.bf16 %v9779_v50, %v9778_v54  ;;  %v9794_v50 = vld [vmem:[%s14750_s18 + $0x120] sm:$0xff] }
 0xcc2   : > { %13076 = vmatmul.mubr.msk.bf16.gmra.mrb[92].mxu0 %vm632_vm2, %v9805_v62  ;;  %v9781_v62 = vld [vmem:[%s14750_s18 + $0xb8] sm:$0xff] }
 0xcc3   : > { %13079 = vmatprep.mubr.msk.bf16.mxu0 %vm14635_vm1, %v17111_v7  ;;  %v9813_v35 = vpack.c.bf16 %v9781_v62, %v9780_v6  ;;  %v9796_v62 = vld [vmem:[%s14750_s18 + $0x130] sm:$0xff] }
 0xcca   : > { %13080 = vmatmul.mubr.msk.bf16.gmra.mrb[96].mxu0 %vm632_vm2, %v9806_v58  ;;  %v9783_v58 = vld [vmem:[%s14750_s18 + $0xc8] sm:$0xff] }
 0xccb   : > { %13083 = vmatprep.mubr.msk.bf16.mxu0 %vm14635_vm1, %v17111_v7  ;;  %v9814_v36 = vpack.c.bf16 %v9783_v58, %v9782_v8  ;;  %v9798_v58 = vld [vmem:[%s14750_s18 + $0x140] sm:$0xff] }
 0xcd2   : > { %13084 = vmatmul.mubr.msk.bf16.gmra.mrb[100].mxu0 %vm632_vm2, %v9807_v56  ;;  %v9785_v56 = vld [vmem:[%s14750_s18 + $0xd8] sm:$0xff] }
 0xcd3   : > { %13087 = vmatprep.mubr.msk.bf16.mxu0 %vm14635_vm1, %v17111_v7  ;;  %v9815_v34 = vpack.c.bf16 %v9785_v56, %v9784_v61  ;;  %v9800_v56 = vld [vmem:[%s14750_s18 + $0x150] sm:$0xff] }
 0xcda   : > { %13088 = vmatmul.mubr.msk.bf16.gmra.mrb[104].mxu0 %vm632_vm2, %v9808_v1  ;;  %v9787_v1 = vld [vmem:[%s14750_s18 + $0xe8] sm:$0xff] }
 0xcdb   : > { %13091 = vmatprep.mubr.msk.bf16.mxu0 %vm14635_vm1, %v17111_v7  ;;  %v9816_v43 = vpack.c.bf16 %v9787_v1, %v9786_v63  ;;  %v9802_v1 = vld [vmem:[%s14750_s18 + $0x160] sm:$0xff] }
 0xce2   : > { %13092 = vmatmul.mubr.msk.bf16.gmra.mrb[108].mxu0 %vm632_vm2, %v9809_v14  ;;  %v9789_v14 = vld [vmem:[%s14750_s18 + $0xf8] sm:$0xff] }
 0xce3   : > { %13095 = vmatprep.mubr.msk.bf16.mxu0 %vm14635_vm1, %v17111_v7  ;;  %v9817_v9 = vpack.c.bf16 %v9789_v14, %v9788_v47 }
 0xcea   : > { %13096 = vmatmul.mubr.msk.bf16.gmra.mrb[112].mxu0 %vm632_vm2, %v9810_v5  ;;  %v9791_v5 = vld [vmem:[%s14750_s18 + $0x108] sm:$0xff] }
 0xceb   : > { %13099 = vmatprep.mubr.msk.bf16.mxu0 %vm14635_vm1, %v17111_v7  ;;  %v9818_v33 = vpack.c.bf16 %v9791_v5, %v9790_v29 }
 0xcf2   : > { %13100 = vmatmul.mubr.msk.bf16.gmra.mrb[116].mxu0 %vm632_vm2, %v9811_v24  ;;  %v9793_v24 = vld [vmem:[%s14750_s18 + $0x118] sm:$0xff] }
 0xcf3   : > { %13103 = vmatprep.mubr.msk.bf16.mxu0 %vm14635_vm1, %v17111_v7  ;;  %v9819_v54 = vpack.c.bf16 %v9793_v24, %v9792_v38 }
 0xcfa   : > { %13104 = vmatmul.mubr.msk.bf16.gmra.mrb[120].mxu0 %vm632_vm2, %v9812_v60  ;;  %v9795_v60 = vld [vmem:[%s14750_s18 + $0x128] sm:$0xff] }
 0xcfb   : > { %13107 = vmatprep.mubr.msk.bf16.mxu0 %vm14635_vm1, %v17111_v7  ;;  %v9820_v6 = vpack.c.bf16 %v9795_v60, %v9794_v50 }
 0xd02   : > { %13108 = vmatmul.mubr.msk.bf16.gmra.mrb[124].mxu0 %vm632_vm2, %v9813_v35  ;;  %v9797_v35 = vld [vmem:[%s14750_s18 + $0x138] sm:$0xff] }
 0xd03   : > { %13111 = vmatprep.mubr.msk.bf16.mxu0 %vm14635_vm1, %v17111_v7  ;;  %v9821_v8 = vpack.c.bf16 %v9797_v35, %v9796_v62 }
 0xd0a   : > { %13112 = vmatmul.mubr.msk.bf16.gmra.mrb[128].mxu0 %vm632_vm2, %v9814_v36  ;;  %v9799_v36 = vld [vmem:[%s14750_s18 + $0x148] sm:$0xff] }
 0xd0b   : > { %13115 = vmatprep.mubr.msk.bf16.mxu0 %vm14635_vm1, %v17111_v7  ;;  %v9822_v61 = vpack.c.bf16 %v9799_v36, %v9798_v58 }
 0xd12   : > { %13116 = vmatmul.mubr.msk.bf16.gmra.mrb[132].mxu0 %vm632_vm2, %v9815_v34  ;;  %v9801_v34 = vld [vmem:[%s14750_s18 + $0x158] sm:$0xff] }
 0xd13   : > { %13119 = vmatprep.mubr.msk.bf16.mxu0 %vm14635_vm1, %v17111_v7  ;;  %v9823_v63 = vpack.c.bf16 %v9801_v34, %v9800_v56 }
 0xd1a   : > { %13120 = vmatmul.mubr.msk.bf16.gmra.mrb[136].mxu0 %vm632_vm2, %v9816_v43  ;;  %v9803_v43 = vld [vmem:[%s14750_s18 + $0x168] sm:$0xff] }
 0xd1b   : > { %13123 = vmatprep.mubr.msk.bf16.mxu0 %vm14635_vm1, %v17111_v7  ;;  %v9824_v47 = vpack.c.bf16 %v9803_v43, %v9802_v1 }
 0xd22   : > { %13124 = vmatmul.mubr.msk.bf16.gmra.mrb[140].mxu0 %vm632_vm2, %v9817_v9 }
 0xd23   : > { %13127 = vmatprep.mubr.msk.bf16.mxu0 %vm14635_vm1, %v17111_v7 }
 0xd2a   : > { %13128 = vmatmul.mubr.msk.bf16.gmra.mrb[144].mxu0 %vm632_vm2, %v9818_v33 }
 0xd2b   : > { %13131 = vmatprep.mubr.msk.bf16.mxu0 %vm14635_vm1, %v17111_v7 }
 0xd32   : > { %13132 = vmatmul.mubr.msk.bf16.gmra.mrb[148].mxu0 %vm632_vm2, %v9819_v54 }
 0xd33   : > { %13135 = vmatprep.mubr.msk.bf16.mxu0 %vm14635_vm1, %v17111_v7 }
 0xd3a   : > { %13136 = vmatmul.mubr.msk.bf16.gmra.mrb[152].mxu0 %vm632_vm2, %v9820_v6 }
 0xd3b   : > { %13139 = vmatprep.mubr.msk.bf16.mxu0 %vm14635_vm1, %v17111_v7 }
 0xd42   : > { %13140 = vmatmul.mubr.msk.bf16.gmra.mrb[156].mxu0 %vm632_vm2, %v9821_v8 }
 0xd43   : > { %13143 = vmatprep.mubr.msk.bf16.mxu0 %vm14635_vm1, %v17111_v7 }
 0xd4a   : > { %13144 = vmatmul.mubr.msk.bf16.gmra.mrb[160].mxu0 %vm632_vm2, %v9822_v61 }
 0xd4b   : > { %13147 = vmatprep.mubr.msk.bf16.mxu0 %vm14635_vm1, %v17111_v7 }
 0xd52   : > { %13148 = vmatmul.mubr.msk.bf16.gmra.mrb[164].mxu0 %vm632_vm2, %v9823_v63 }
 0xd53   : > { %13151 = vmatprep.mubr.msk.bf16.mxu0 %vm14635_vm1, %v17111_v7 }
 0xd5a   : > { %13152 = vmatmul.mubr.msk.bf16.gmra.mrb[168].mxu0 %vm632_vm2, %v9824_v47 }
 0xd89   : > { %v9665_v14 = vpop.f32.mrb[84].mxu0 }
 0xd8a   : > { %v9669_v9 = vmax.f32 %v9665_v14, 0.0  ;;  %v13033_v29 = vpop.f32.mrb[85].mxu0 }
 0xd8c   : > { %13067 = vmatmul.mubr.f32.vlgmr.msra.gmra.mrb[124].mxu1 %v9669_v9 }
 0xd8d   : > { %v17499_v5 = vpop.f32.mrb[88].mxu0 }
 0xd8e   : > { %v13073_v33 = vpop.f32.mrb[89].mxu0 }
 0xd8f   : > { %v17501_v38 = vpop.f32.mrb[90].mxu0 }
 0xd90   : > { %v13074_v24 = vpop.f32.mrb[91].mxu0 }
 0xd95   : > { %v17503_v54 = vpop.f32.mrb[92].mxu0 }
 0xd96   : > { %v13077_v50 = vpop.f32.mrb[93].mxu0 }
 0xd97   : > { %v17505_v60 = vpop.f32.mrb[94].mxu0 }
 0xd98   : > { %v13078_v7 = vpop.f32.mrb[95].mxu0 }
 0xd9d   : > { %v17507_v6 = vpop.f32.mrb[96].mxu0 }
 0xd9e   : > { %v13081_v62 = vpop.f32.mrb[97].mxu0 }
 0xd9f   : > { %v17509_v35 = vpop.f32.mrb[98].mxu0 }
 0xda0   : > { %v13082_v8 = vpop.f32.mrb[99].mxu0 }
 0xda5   : > { %v17511_v58 = vpop.f32.mrb[100].mxu0 }
 0xda6   : > { %v13085_v36 = vpop.f32.mrb[101].mxu0 }
 0xda7   : > { %v17513_v61 = vpop.f32.mrb[102].mxu0 }
 0xda8   : > { %v13086_v56 = vpop.f32.mrb[103].mxu0 }
 0xdad   : > { %v17515_v34 = vpop.f32.mrb[104].mxu0 }
 0xdae   : > { %v13089_v63 = vpop.f32.mrb[105].mxu0 }
 0xdaf   : > { %v17517_v1 = vpop.f32.mrb[106].mxu0 }
 0xdb0   : > { %v13090_v43 = vpop.f32.mrb[107].mxu0 }
 0xdb5   : > { %v17519_v47 = vpop.f32.mrb[108].mxu0 }
 0xdb6   : > { %v13093_v14 = vpop.f32.mrb[109].mxu0 }
 0xdb7   : > { %v17521_v9 = vpop.f32.mrb[110].mxu0 }
 0xdb8   : > { %v13094_v29 = vpop.f32.mrb[111].mxu0 }
 0xdbd   : > { %v17523_v33 = vpop.f32.mrb[112].mxu0 }
 0xdbe   : > { %v13097_v24 = vpop.f32.mrb[113].mxu0 }
 0xdbf   : > { %v17525_v50 = vpop.f32.mrb[114].mxu0 }
 0xdc0   : > { %v13098_v7 = vpop.f32.mrb[115].mxu0 }
 0xdc5   : > { %v17527_v62 = vpop.f32.mrb[116].mxu0 }
 0xdc6   : > { %v13101_v8 = vpop.f32.mrb[117].mxu0 }
 0xdc7   : > { %v17529_v36 = vpop.f32.mrb[118].mxu0 }
 0xdc8   : > { %v13102_v56 = vpop.f32.mrb[119].mxu0 }
 0xdcd   : > { %v17531_v63 = vpop.f32.mrb[120].mxu0 }
 0xdce   : > { %v13105_v43 = vpop.f32.mrb[121].mxu0 }
 0xdcf   : > { %v17533_v16 = vpop.f32.mrb[122].mxu0 }
 0xdd0   : > { %v13106_v14 = vpop.f32.mrb[123].mxu0 }
 0xdd5   : > { %v17535_v2 = vpop.f32.mrb[124].mxu0 }
 0xdd6   : > { %v13109_v29 = vpop.f32.mrb[125].mxu0 }
 0xdd7   : > { %v17537_v13 = vpop.f32.mrb[126].mxu0 }
 0xdd8   : > { %v13110_v24 = vpop.f32.mrb[127].mxu0 }
 0xddd   : > { %v17539_v28 = vpop.f32.mrb[128].mxu0 }
 0xdde   : > { %v13113_v7 = vpop.f32.mrb[129].mxu0 }
 0xddf   : > { %v17541_v26 = vpop.f32.mrb[130].mxu0 }
 0xde0   : > { %v13114_v8 = vpop.f32.mrb[131].mxu0 }
 0xde5   : > { %v17543_v41 = vpop.f32.mrb[132].mxu0 }
 0xde6   : > { %v13117_v56 = vpop.f32.mrb[133].mxu0 }
 0xde7   : > { %v17545_v55 = vpop.f32.mrb[134].mxu0 }
 0xde8   : > { %v13118_v43 = vpop.f32.mrb[135].mxu0 }
 0xded   : > { %v17547_v40 = vpop.f32.mrb[136].mxu0 }
 0xdee   : > { %v13121_v14 = vpop.f32.mrb[137].mxu0 }
 0xdef   : > { %v17549_v45 = vpop.f32.mrb[138].mxu0 }
 0xdf0   : > { %v13122_v29 = vpop.f32.mrb[139].mxu0 }
 0xdf5   : > { %v17551_v52 = vpop.f32.mrb[140].mxu0 }
 0xdf6   : > { %v13125_v24 = vpop.f32.mrb[141].mxu0 }
 0xdf7   : > { %v17553_v44 = vpop.f32.mrb[142].mxu0 }
 0xdf8   : > { %v13126_v7 = vpop.f32.mrb[143].mxu0 }
 0xdfd   : > { %v17555_v15 = vpop.f32.mrb[144].mxu0 }
 0xdfe   : > { %v13129_v8 = vpop.f32.mrb[145].mxu0 }
 0xdff   : > { %v17557_v17 = vpop.f32.mrb[146].mxu0 }
 0xe00   : > { %v13130_v56 = vpop.f32.mrb[147].mxu0 }
 0xe05   : > { %v17559_v19 = vpop.f32.mrb[148].mxu0 }
 0xe06   : > { %v13133_v43 = vpop.f32.mrb[149].mxu0 }
 0xe07   : > { %v17561_v23 = vpop.f32.mrb[150].mxu0 }
 0xe08   : > { %v13134_v14 = vpop.f32.mrb[151].mxu0 }
 0xe0d   : > { %v17563_v48 = vpop.f32.mrb[152].mxu0 }
 0xe0e   : > { %v13137_v29 = vpop.f32.mrb[153].mxu0 }
 0xe0f   : > { %v17565_v32 = vpop.f32.mrb[154].mxu0 }
 0xe10   : > { %v13138_v24 = vpop.f32.mrb[155].mxu0 }
 0xe15   : > { %v17567_v25 = vpop.f32.mrb[156].mxu0 }
 0xe16   : > { %v13141_v7 = vpop.f32.mrb[157].mxu0 }
 0xe17   : > { %v17569_v51 = vpop.f32.mrb[158].mxu0 }
 0xe18   : > { %v13142_v8 = vpop.f32.mrb[159].mxu0 }
 0xe1d   : > { %v17571_v42 = vpop.f32.mrb[160].mxu0 }
 0xe1e   : > { %v13145_v56 = vpop.f32.mrb[161].mxu0 }
 0xe1f   : > { %v17573_v10 = vpop.f32.mrb[162].mxu0  ;;  %v17586_v56 = vld [vmem:[%s17999_s11] ss:$0 sm:$0xff] }
 0xe20   : > { %v13146_v43 = vpop.f32.mrb[163].mxu0 }
 0xe21   : > { %v10100_v43 = vmul.f32 %v17586_v56, %v17499_v5  ;;  %v10105_v5 = vmul.f32 %v17586_v56, %v17509_v35 }
 0xe25   : > { %v17575_v57 = vpop.f32.mrb[164].mxu0 }
 0xe26   : > { %v13149_v14 = vpop.f32.mrb[165].mxu0 }
 0xe27   : > { %v17577_v53 = vpop.f32.mrb[166].mxu0  ;;  %v17593_v14 = vld [vmem:[%s18000_s12] ss:$0 sm:$0xff] }
 0xe28   : > { %v13150_v29 = vpop.f32.mrb[167].mxu0  ;;  %18080 = vst [vmem:[#allocation33_spill] sm:$0xff] %v17593_v14  ;;  %v17618_v35 = vadd.f32 %v17593_v14, %v10100_v43 }
 0xe29   : > { %v10101_v29 = vmul.f32 %v17586_v56, %v17501_v38  ;;  %v10108_v38 = vmul.f32 %v17586_v56, %v17515_v34 }
 0xe2d   : > { %v17579_v18 = vpop.f32.mrb[168].mxu0 }
 0xe2e   : > { %v13153_v24 = vpop.f32.mrb[169].mxu0 }
 0xe2f   : > { %v17581_v59 = vpop.f32.mrb[170].mxu0  ;;  %v10104_v24 = vmul.f32 %v17586_v56, %v17507_v6  ;;  %v10111_v6 = vmul.f32 %v17586_v56, %v17521_v9 }
 0xe30   : > { %v13154_v7 = vpop.f32.mrb[171].mxu0 }
 0xe31   : > { %v10106_v7 = vmul.f32 %v17586_v56, %v17511_v58  ;;  %v17621_v58 = vadd.f32 %v17593_v14, %v10101_v29  ;;  %v17642_v29 = vadd.f32 %v17593_v14, %v10108_v38  ;;  %v10114_v38 = vmul.f32 %v17586_v56, %v17527_v62 }
 0xe32   : > { %v10121_v62 = vmul.f32 %v17586_v56, %v17541_v26 }
 0xe33   : > { %v17636_v9 = vadd.f32 %v17593_v14, %v10106_v7  ;;  %v17688_v26 = vadd.f32 %v17593_v14, %v10114_v38 }
 0xe5f   : > { %v9752_v4 = vpop.f32.mrb[124].mxu1 }
 0xe60   : > { %v10784_v8 = vmul.f32 -1.442695, %v9752_v4  ;;  %v13068_v12 = vpop.f32.mrb[125].mxu1  ;;  %v10103_v4 = vmul.f32 %v17586_v56, %v17505_v60  ;;  %v10110_v60 = vmul.f32 %v17586_v56, %v17519_v47  ;;  %v17633_v47 = vadd.f32 %v17593_v14, %v10105_v5 }
 0xe61   : > { %v10102_v12 = vmul.f32 %v17586_v56, %v17503_v54  ;;  %v10109_v54 = vmul.f32 %v17586_v56, %v17517_v1  ;;  %v17630_v1 = vadd.f32 %v17593_v14, %v10104_v24  ;;  %v17651_v24 = vadd.f32 %v17593_v14, %v10111_v6 }
 0xe62   : > { %14617 = vpow2.f32 %v10784_v8  ;;  %v10107_v8 = vmul.f32 %v17586_v56, %v17513_v61  ;;  %v17627_v34 = vadd.f32 %v17593_v14, %v10103_v4  ;;  %v17648_v4 = vadd.f32 %v17593_v14, %v10110_v60 }
 0xe63   : > { %v17624_v61 = vadd.f32 %v17593_v14, %v10102_v12  ;;  %v17645_v12 = vadd.f32 %v17593_v14, %v10109_v54  ;;  %18082 = vst [vmem:[#allocation35_spill] sm:$0xff] %v17651_v24  ;;  %v10112_v5 = vmul.f32 %v17586_v56, %v17523_v33  ;;  %v10115_v54 = vmul.f32 %v17586_v56, %v17529_v36 }
 0xe64   : > { %v17639_v43 = vadd.f32 %v17593_v14, %v10107_v8  ;;  %18081 = vst [vmem:[#allocation34_spill] sm:$0xff] %v17648_v4  ;;  %v10113_v8 = vmul.f32 %v17586_v56, %v17525_v50  ;;  %v10116_v60 = vmul.f32 %v17586_v56, %v17531_v63  ;;  %v10117_v6 = vmul.f32 %v17586_v56, %v17533_v16 }
 0xe65   : > { %v10118_v24 = vmul.f32 %v17586_v56, %v17535_v2  ;;  %v10119_v33 = vmul.f32 %v17586_v56, %v17537_v13  ;;  %v10120_v50 = vmul.f32 %v17586_v56, %v17539_v28  ;;  %v10122_v36 = vmul.f32 %v17586_v56, %v17543_v41 }
 0xe66   : > { %v10191_v63 = vlaneseq  ;;  %v10123_v16 = vmul.f32 %v17586_v56, %v17545_v55  ;;  %v10124_v2 = vmul.f32 %v17586_v56, %v17547_v40  ;;  %v10125_v13 = vmul.f32 %v17586_v56, %v17549_v45 }
 0xe67   : > { %v17685_v28 = vadd.f32 %v17593_v14, %v10113_v8  ;;  %v17691_v41 = vadd.f32 %v17593_v14, %v10115_v54  ;;  %v17694_v55 = vadd.f32 %v17593_v14, %v10116_v60  ;;  %v17697_v40 = vadd.f32 %v17593_v14, %v10117_v6 }
 0xe68   : > { %v17700_v45 = vadd.f32 %v17593_v14, %v10118_v24  ;;  %v17709_v8 = vadd.f32 %v17593_v14, %v10121_v62  ;;  %v17712_v38 = vadd.f32 %v17593_v14, %v10122_v36  ;;  %v10192_v54 = vshrl.u32 %v10191_v63, 7 }
 0xe69   : > { %v17715_v60 = vadd.f32 %v17593_v14, %v10123_v16  ;;  %v17718_v6 = vadd.f32 %v17593_v14, %v10124_v2  ;;  %v17721_v24 = vadd.f32 %v17593_v14, %v10125_v13  ;;  %v10128_v62 = vmul.f32 %v17586_v56, %v17555_v15 }
 0xe6a   : > { %18083 = vst [vmem:[#allocation36_spill] sm:$0xff] %v17709_v8  ;;  %18084 = vst [vmem:[#allocation37_spill] sm:$0xff] %v17712_v38  ;;  %v10129_v36 = vmul.f32 %v17586_v56, %v17557_v17  ;;  %v10130_v63 = vmul.f32 %v17586_v56, %v17559_v19  ;;  %v10131_v16 = vmul.f32 %v17586_v56, %v17561_v23  ;;  %v10193_v13 = vsub.s32 0, %v10192_v54 }
 0xe6b   : > { %18085 = vst [vmem:[#allocation38_spill] sm:$0xff] %v17715_v60  ;;  %18086 = vst [vmem:[#allocation39_spill] sm:$0xff] %v17718_v6  ;;  %v10132_v2 = vmul.f32 %v17586_v56, %v17563_v48  ;;  %v10135_v15 = vmul.f32 %v17586_v56, %v17569_v51  ;;  %v10136_v17 = vmul.f32 %v17586_v56, %v17571_v42  ;;  %v18128_v6 = vld [vmem:[#allocation32_spill] sm:$0xff] }
 0xe6c   : > { %v14618_v7 = vpop.eup %14617  ;;  %18087 = vst [vmem:[#allocation40_spill] sm:$0xff] %v17721_v24  ;;  %v10137_v19 = vmul.f32 %v17586_v56, %v17573_v10  ;;  %v10138_v48 = vmul.f32 %v17586_v56, %v17575_v57  ;;  %v17760_v42 = vadd.f32 %v17593_v14, %v10128_v62  ;;  %v17763_v10 = vadd.f32 %v17593_v14, %v10129_v36  ;;  %v18125_v24 = vld [vmem:[#allocation30_spill] sm:$0xff] }
 0xe6d   : > { %v9759_v4 = vadd.f32 1.0, %v14618_v7  ;;  %v17682_v7 = vadd.f32 %v17593_v14, %v10112_v5  ;;  %v17706_v5 = vadd.f32 %v17593_v14, %v10120_v50  ;;  %v10127_v50 = vmul.f32 %v17586_v56, %v17553_v44 }
 0xe6e   : > { %v10134_v44 = vmul.f32 %v17586_v56, %v17567_v25  ;;  %v10140_v25 = vmul.f32 %v17586_v56, %v17579_v18  ;;  %18090 = vst [vmem:[#allocation43_spill] sm:$0xff] %v17760_v42  ;;  %18091 = vst [vmem:[#allocation44_spill] sm:$0xff] %v17763_v10  ;;  %v17766_v54 = vadd.f32 %v17593_v14, %v10130_v63  ;;  %v18119_v10 = vld [vmem:[#allocation24_spill] sm:$0xff]  ;;  %v18120_v42 = vld [vmem:[#allocation25_spill] sm:$0xff] }
 0xe6f   : > { %14619 = vrcp.f32 %v9759_v4  ;;  %v17703_v4 = vadd.f32 %v17593_v14, %v10119_v33  ;;  %v10126_v33 = vmul.f32 %v17586_v56, %v17551_v52  ;;  %v10133_v52 = vmul.f32 %v17586_v56, %v17565_v32 }
 0xe70   : > { %v10139_v32 = vmul.f32 %v17586_v56, %v17577_v53  ;;  %v17757_v51 = vadd.f32 %v17593_v14, %v10127_v50  ;;  %18092 = vst [vmem:[#allocation45_spill] sm:$0xff] %v17766_v54  ;;  %v17769_v57 = vadd.f32 %v17593_v14, %v10131_v16  ;;  %v17772_v53 = vadd.f32 %v17593_v14, %v10132_v2  ;;  %v18118_v54 = vld [vmem:[#allocation23_spill] sm:$0xff] }
 0xe71   : > { %v17748_v23 = vadd.f32 %v17593_v14, %v10126_v33  ;;  %v17775_v18 = vadd.f32 %v17593_v14, %v10133_v52  ;;  %v17778_v50 = vadd.f32 %v17593_v14, %v10134_v44  ;;  %v17781_v62 = vadd.f32 %v17593_v14, %v10135_v15 }
 0xe72   : > { %18089 = vst [vmem:[#allocation42_spill] sm:$0xff] %v17757_v51  ;;  %18093 = vst [vmem:[#allocation46_spill] sm:$0xff] %v17769_v57  ;;  %v17786_v63 = vadd.f32 %v17593_v14, %v10136_v17  ;;  %v17789_v16 = vadd.f32 %v17593_v14, %v10137_v19  ;;  %v17792_v2 = vadd.f32 %v17593_v14, %v10138_v48  ;;  %v18104_v48 = vld [vmem:[#allocation9_spill] sm:$0xff]  ;;  %v18117_v57 = vld [vmem:[#allocation22_spill] sm:$0xff] }
 0xe73   : > { %18088 = vst [vmem:[#allocation41_spill] sm:$0xff] %v17748_v23  ;;  %18094 = vst [vmem:[#allocation47_spill] sm:$0xff] %v17772_v53  ;;  %v17795_v52 = vadd.f32 %v17593_v14, %v10139_v32  ;;  %v17798_v44 = vadd.f32 %v17593_v14, %v10140_v25  ;;  %v17802_v15 = vmul.f32 %v17586_v56, %v17581_v59  ;;  %v18116_v53 = vld [vmem:[#allocation21_spill] sm:$0xff]  ;;  %v18121_v51 = vld [vmem:[#allocation26_spill] sm:$0xff] }
 0xe74   : > { %18095 = vst [vmem:[#allocation48_spill] sm:$0xff] %v17775_v18  ;;  %18096 = vst [vmem:[#allocation49_spill] sm:$0xff] %v17778_v50  ;;  %v18114_v50 = vld [vmem:[#allocation19_spill] sm:$0xff]  ;;  %v18115_v18 = vld [vmem:[#allocation20_spill] sm:$0xff] }
 0xe75   : > { %18097 = vst [vmem:[#allocation50_spill] sm:$0xff] %v17781_v62  ;;  %18098 = vst [vmem:[#allocation51_spill] sm:$0xff] %v17786_v63  ;;  %v18122_v23 = vld [vmem:[#allocation27_spill] sm:$0xff] }
 0xe76   : > { %18099 = vst [vmem:[#allocation52_spill] sm:$0xff] %v17789_v16  ;;  %18100 = vst [vmem:[#allocation53_spill] sm:$0xff] %v17792_v2 }
 0xe77   : > { %18101 = vst [vmem:[#allocation54_spill] sm:$0xff] %v17795_v52  ;;  %18102 = vst [vmem:[#allocation55_spill] sm:$0xff] %v17798_v44  ;;  %v18106_v44 = vld [vmem:[#allocation11_spill] sm:$0xff] }
 0xe78   : > { %18103 = vst [vmem:[#allocation56_spill] sm:$0xff] %v17802_v15 }
 0xe79   : > { %v14620_v33 = vpop.eup %14619 }
 0xe7a   : > { %v17783_v36 = vrot.slane %v14620_v33, %v10193_v13  ;;  %v18105_v33 = vld [vmem:[#allocation10_spill] sm:$0xff] }
 0xe7c   : > { %v10195_v13 = vmul.f32 %v17783_v36, %v17086_v20  ;;  %v10196_v17 = vmul.f32 %v17783_v36, %v17079_v30  ;;  %v10197_v19 = vmul.f32 %v17783_v36, %v17089_v21  ;;  %v10198_v32 = vmul.f32 %v17783_v36, %v18104_v48 }
 0xe7d   : > { %v10199_v25 = vmul.f32 %v17783_v36, %v18105_v33  ;;  %v10200_v59 = vmul.f32 %v17783_v36, %v17130_v3  ;;  %v10201_v56 = vmul.f32 %v17783_v36, %v17135_v37  ;;  %v10202_v20 = vmul.f32 %v17783_v36, %v17143_v0 }
 0xe7e   : > { %v10203_v30 = vmul.f32 %v17783_v36, %v17150_v46  ;;  %v10204_v21 = vmul.f32 %v17783_v36, %v17164_v39  ;;  %v10205_v48 = vmul.f32 %v17783_v36, %v17170_v27  ;;  %v10206_v33 = vmul.f32 %v17783_v36, %v17178_v31  ;;  %v18107_v39 = vld [vmem:[#allocation12_spill] sm:$0xff]  ;;  %v18108_v27 = vld [vmem:[#allocation13_spill] sm:$0xff]  ;;  %v18109_v31 = vld [vmem:[#allocation14_spill] sm:$0xff] }
 0xe7f   : > { %v10207_v3 = vmul.f32 %v17783_v36, %v17183_v49  ;;  %v10208_v37 = vmul.f32 %v17783_v36, %v17190_v22  ;;  %v10209_v0 = vmul.f32 %v17783_v36, %v17195_v11  ;;  %v10210_v46 = vmul.f32 %v17783_v36, %v18106_v44  ;;  %v18110_v49 = vld [vmem:[#allocation15_spill] sm:$0xff]  ;;  %v18111_v22 = vld [vmem:[#allocation16_spill] sm:$0xff]  ;;  %v18112_v11 = vld [vmem:[#allocation17_spill] sm:$0xff] }
 0xe80   : > { %v10211_v52 = vmul.f32 %v17783_v36, %v18107_v39  ;;  %v10212_v2 = vmul.f32 %v17783_v36, %v18108_v27  ;;  %v10213_v16 = vmul.f32 %v17783_v36, %v18109_v31  ;;  %v10214_v14 = vmul.f32 %v17783_v36, %v18110_v49  ;;  %v18113_v44 = vld [vmem:[#allocation18_spill] sm:$0xff] }
 0xe81   : > { %v10215_v15 = vmul.f32 %v17783_v36, %v18111_v22  ;;  %v10216_v63 = vmul.f32 %v17783_v36, %v18112_v11  ;;  %v10217_v62 = vmul.f32 %v17783_v36, %v18113_v44  ;;  %v10218_v39 = vmul.f32 %v17783_v36, %v18114_v50 }
 0xe82   : > { %v10219_v27 = vmul.f32 %v17783_v36, %v18115_v18  ;;  %v10220_v31 = vmul.f32 %v17783_v36, %v18116_v53  ;;  %v10221_v49 = vmul.f32 %v17783_v36, %v18117_v57  ;;  %v10222_v22 = vmul.f32 %v17783_v36, %v18118_v54  ;;  %v18123_v57 = vld [vmem:[#allocation28_spill] sm:$0xff]  ;;  %v18124_v53 = vld [vmem:[#allocation29_spill] sm:$0xff] }
 0xe83   : > { %v10223_v11 = vmul.f32 %v17783_v36, %v18119_v10  ;;  %v10224_v44 = vmul.f32 %v17783_v36, %v18120_v42  ;;  %v10225_v50 = vmul.f32 %v17783_v36, %v18121_v51  ;;  %v10226_v18 = vmul.f32 %v17783_v36, %v18122_v23  ;;  %v18126_v51 = vld [vmem:[#allocation31_spill] sm:$0xff] }
 0xe84   : > { %v10227_v54 = vmul.f32 %v17783_v36, %v18123_v57  ;;  %v10228_v10 = vmul.f32 %v17783_v36, %v18124_v53  ;;  %v10229_v42 = vmul.f32 %v17783_v36, %v18125_v24  ;;  %v17882_v23 = vmul.f32 %v17783_v36, %v18126_v51 }
 0xe85   : > { %v17886_v60 = vmul.f32 %v17783_v36, %v18128_v6  ;;  %v10237_v38 = vadd.f32 %v10195_v13, %v17618_v35  ;;  %v10238_v57 = vadd.f32 %v10196_v17, %v17621_v58  ;;  %v10239_v8 = vadd.f32 %v10197_v19, %v17624_v61  ;;  %v18129_v13 = vld [vmem:[#allocation34_spill] sm:$0xff]  ;;  %v18132_v17 = vld [vmem:[#allocation37_spill] sm:$0xff] }
 0xe86   : > { %18127 = vst [vmem:[#allocation9_spill] sm:$0xff] %v17882_v23  ;;  %v10240_v53 = vadd.f32 %v10198_v32, %v17627_v34  ;;  %v10241_v24 = vadd.f32 %v10199_v25, %v17630_v1  ;;  %v10242_v51 = vadd.f32 %v10200_v59, %v17633_v47  ;;  %v10243_v23 = vadd.f32 %v10201_v56, %v17636_v9  ;;  %v18130_v34 = vld [vmem:[#allocation35_spill] sm:$0xff]  ;;  %v18139_v32 = vld [vmem:[#allocation44_spill] sm:$0xff]  ;;  %v18140_v59 = vld [vmem:[#allocation45_spill] sm:$0xff] }
 0xe87   : > { %v10244_v6 = vadd.f32 %v10202_v20, %v17639_v43  ;;  %v10245_v35 = vadd.f32 %v10203_v30, %v17642_v29  ;;  %v10246_v58 = vadd.f32 %v10204_v21, %v17645_v12  ;;  %v10247_v61 = vadd.f32 %v10205_v48, %v18129_v13  ;;  %10279 = vst [vmem:[%s17872_s17] sm:$0xff] %v10237_v38  ;;  %v18131_v38 = vld [vmem:[#allocation36_spill] sm:$0xff]  ;;  %v18141_v20 = vld [vmem:[#allocation46_spill] sm:$0xff]  ;;  %v18142_v21 = vld [vmem:[#allocation47_spill] sm:$0xff] }
 0xe88   : > { %10280 = vst [vmem:[%s17872_s17 + $0x8] sm:$0xff] %v10238_v57  ;;  %10281 = vst [vmem:[%s17872_s17 + $0x10] sm:$0xff] %v10239_v8  ;;  %v10248_v1 = vadd.f32 %v10206_v33, %v18130_v34  ;;  %v10249_v47 = vadd.f32 %v10207_v3, %v17682_v7  ;;  %v10250_v9 = vadd.f32 %v10208_v37, %v17685_v28  ;;  %v18143_v33 = vld [vmem:[#allocation48_spill] sm:$0xff]  ;;  %v18144_v37 = vld [vmem:[#allocation49_spill] sm:$0xff] }
 0xe89   : > { %v10251_v43 = vadd.f32 %v10209_v0, %v17688_v26  ;;  %10282 = vst [vmem:[%s17872_s17 + $0x18] sm:$0xff] %v10240_v53  ;;  %10283 = vst [vmem:[%s17872_s17 + $0x20] sm:$0xff] %v10241_v24  ;;  %v10252_v29 = vadd.f32 %v10210_v46, %v17691_v41  ;;  %v10253_v12 = vadd.f32 %v10211_v52, %v17694_v55  ;;  %v18135_v52 = vld [vmem:[#allocation40_spill] sm:$0xff]  ;;  %v18145_v46 = vld [vmem:[#allocation50_spill] sm:$0xff] }
 0xe8a   : > { %10284 = vst [vmem:[%s17872_s17 + $0x28] sm:$0xff] %v10242_v51  ;;  %10285 = vst [vmem:[%s17872_s17 + $0x30] sm:$0xff] %v10243_v23  ;;  %v10254_v8 = vadd.f32 %v10212_v2, %v17697_v40  ;;  %v10255_v7 = vadd.f32 %v10213_v16, %v17700_v45  ;;  %v10256_v28 = vadd.f32 %v10214_v14, %v17703_v4  ;;  %v18133_v40 = vld [vmem:[#allocation38_spill] sm:$0xff]  ;;  %v18134_v16 = vld [vmem:[#allocation39_spill] sm:$0xff] }
 0xe8b   : > { %10286 = vst [vmem:[%s17872_s17 + $0x38] sm:$0xff] %v10244_v6  ;;  %10287 = vst [vmem:[%s17872_s17 + $0x40] sm:$0xff] %v10245_v35  ;;  %v10257_v26 = vadd.f32 %v10215_v15, %v17706_v5  ;;  %v10258_v41 = vadd.f32 %v10216_v63, %v18131_v38  ;;  %v10259_v55 = vadd.f32 %v10217_v62, %v18132_v17  ;;  %v18136_v4 = vld [vmem:[#allocation41_spill] sm:$0xff]  ;;  %v18137_v62 = vld [vmem:[#allocation42_spill] sm:$0xff] }
 0xe8c   : > { %10288 = vst [vmem:[%s17872_s17 + $0x48] sm:$0xff] %v10246_v58  ;;  %10289 = vst [vmem:[%s17872_s17 + $0x50] sm:$0xff] %v10247_v61  ;;  %v10260_v45 = vadd.f32 %v10218_v39, %v18133_v40  ;;  %v10261_v2 = vadd.f32 %v10219_v27, %v18134_v16  ;;  %v10262_v14 = vadd.f32 %v10220_v31, %v18135_v52  ;;  %v18138_v15 = vld [vmem:[#allocation43_spill] sm:$0xff]  ;;  %v18153_v23 = vld [vmem:[#allocation33_spill] sm:$0xff] }
 0xe8d   : > { %10290 = vst [vmem:[%s17872_s17 + $0x58] sm:$0xff] %v10248_v1  ;;  %10291 = vst [vmem:[%s17872_s17 + $0x60] sm:$0xff] %v10249_v47  ;;  %v10263_v5 = vadd.f32 %v10221_v49, %v18136_v4  ;;  %v10264_v63 = vadd.f32 %v10222_v22, %v18137_v62  ;;  %v10265_v19 = vadd.f32 %v10223_v11, %v18138_v15  ;;  %v18146_v39 = vld [vmem:[#allocation9_spill] sm:$0xff]  ;;  %v18147_v31 = vld [vmem:[#allocation51_spill] sm:$0xff] }
 0xe8e   : > { %10292 = vst [vmem:[%s17872_s17 + $0x68] sm:$0xff] %v10250_v9  ;;  %10293 = vst [vmem:[%s17872_s17 + $0x70] sm:$0xff] %v10251_v43  ;;  %v10266_v25 = vadd.f32 %v10224_v44, %v18139_v32  ;;  %v10267_v56 = vadd.f32 %v10225_v50, %v18140_v59  ;;  %v10268_v30 = vadd.f32 %v10226_v18, %v18141_v20  ;;  %v18148_v22 = vld [vmem:[#allocation4_spill] sm:$0xff]  ;;  %v18149_v44 = vld [vmem:[#allocation5_spill] sm:$0xff] }
 0xe8f   : > { %10294 = vst [vmem:[%s17872_s17 + $0x78] sm:$0xff] %v10252_v29  ;;  %10295 = vst [vmem:[%s17872_s17 + $0x80] sm:$0xff] %v10253_v12  ;;  %v10269_v48 = vadd.f32 %v10227_v54, %v18142_v21  ;;  %v10270_v3 = vadd.f32 %v10228_v10, %v18143_v33  ;;  %v10271_v0 = vadd.f32 %v10229_v42, %v18144_v37  ;;  %v18151_v54 = vld [vmem:[#allocation7_spill] sm:$0xff]  ;;  %v18152_v42 = vld [vmem:[#allocation56_spill] sm:$0xff] }
 0xe90   : > { %10296 = vst [vmem:[%s17872_s17 + $0x88] sm:$0xff] %v10254_v8  ;;  %10297 = vst [vmem:[%s17872_s17 + $0x90] sm:$0xff] %v10255_v7  ;;  %v10272_v27 = vadd.f32 %v18146_v39, %v18145_v46  ;;  %v10273_v49 = vadd.f32 %v17886_v60, %v18147_v31  ;;  %v10232_v11 = vmul.f32 %v17783_v36, %v18148_v22  ;;  %v18150_v60 = vld [vmem:[#allocation6_spill] sm:$0xff]  ;;  %v18154_v53 = vld [vmem:[#allocation8_spill] sm:$0xff] }
 0xe91   : > { %10298 = vst [vmem:[%s17872_s17 + $0x98] sm:$0xff] %v10256_v28  ;;  %10299 = vst [vmem:[%s17872_s17 + $0xa0] sm:$0xff] %v10257_v26  ;;  %v10233_v50 = vmul.f32 %v17783_v36, %v18149_v44  ;;  %v10234_v18 = vmul.f32 %v17783_v36, %v18150_v60  ;;  %v10235_v10 = vmul.f32 %v17783_v36, %v18151_v54  ;;  %v18155_v51 = vld [vmem:[#allocation52_spill] sm:$0xff]  ;;  %v18156_v35 = vld [vmem:[#allocation53_spill] sm:$0xff] }
 0xe92   : > { %10300 = vst [vmem:[%s17872_s17 + $0xa8] sm:$0xff] %v10258_v41  ;;  %10301 = vst [vmem:[%s17872_s17 + $0xb0] sm:$0xff] %v10259_v55  ;;  %v10190_v57 = vadd.f32 %v18153_v23, %v18152_v42  ;;  %v10236_v24 = vmul.f32 %v17783_v36, %v18154_v53  ;;  %v10274_v6 = vadd.f32 %v10232_v11, %v18155_v51  ;;  %v18157_v13 = vld [vmem:[#allocation54_spill] sm:$0xff]  ;;  %v18158_v34 = vld [vmem:[#allocation55_spill] sm:$0xff] }
 0xe93   : > { %10302 = vst [vmem:[%s17872_s17 + $0xb8] sm:$0xff] %v10260_v45  ;;  %10303 = vst [vmem:[%s17872_s17 + $0xc0] sm:$0xff] %v10261_v2  ;;  %v10275_v58 = vadd.f32 %v10233_v50, %v18156_v35  ;;  %v10276_v61 = vadd.f32 %v10234_v18, %v18157_v13  ;;  %v10277_v1 = vadd.f32 %v10235_v10, %v18158_v34 }
 0xe94   : > { %10304 = vst [vmem:[%s17872_s17 + $0xc8] sm:$0xff] %v10262_v14  ;;  %10305 = vst [vmem:[%s17872_s17 + $0xd0] sm:$0xff] %v10263_v5  ;;  %v10278_v47 = vadd.f32 %v10236_v24, %v10190_v57 }
 0xe95   : > { %10306 = vst [vmem:[%s17872_s17 + $0xd8] sm:$0xff] %v10264_v63  ;;  %10307 = vst [vmem:[%s17872_s17 + $0xe0] sm:$0xff] %v10265_v19 }
 0xe96   : > { %10308 = vst [vmem:[%s17872_s17 + $0xe8] sm:$0xff] %v10266_v25  ;;  %10309 = vst [vmem:[%s17872_s17 + $0xf0] sm:$0xff] %v10267_v56 }
 0xe97   : > { %10310 = vst [vmem:[%s17872_s17 + $0xf8] sm:$0xff] %v10268_v30  ;;  %10311 = vst [vmem:[%s17872_s17 + $0x100] sm:$0xff] %v10269_v48 }
 0xe98   : > { %10312 = vst [vmem:[%s17872_s17 + $0x108] sm:$0xff] %v10270_v3  ;;  %10313 = vst [vmem:[%s17872_s17 + $0x110] sm:$0xff] %v10271_v0 }
 0xe99   : > { %10314 = vst [vmem:[%s17872_s17 + $0x118] sm:$0xff] %v10272_v27  ;;  %10315 = vst [vmem:[%s17872_s17 + $0x120] sm:$0xff] %v10273_v49 }
 0xe9a   : > { %10316 = vst [vmem:[%s17872_s17 + $0x128] sm:$0xff] %v10274_v6  ;;  %10317 = vst [vmem:[%s17872_s17 + $0x130] sm:$0xff] %v10275_v58 }
 0xe9b   : > { %10318 = vst [vmem:[%s17872_s17 + $0x138] sm:$0xff] %v10276_v61  ;;  %10319 = vst [vmem:[%s17872_s17 + $0x140] sm:$0xff] %v10277_v1 }
 0xe9c   : > { %10320 = vst [vmem:[%s17872_s17 + $0x148] sm:$0xff] %v10278_v47 }
 0xe9d PF: > { %s23_s25 = sadd.s32 1, %s14632_s25  }
 0xe9e   : > { %p20_p4 = scmp.ge.s32.totalorder %s23_s25, 4  }
 0xea0   :  { %22 = sbr.rel (!%p20_p4) target bundleno = 1 (0x1), region = 118 }

</bundles_post_ra>
